<compile_context>
chip_gen: v5e
topology: v5e:2x2
jax: 0.10.0
libtpu: 0.0.40
codegen_flags: <defaults>
</compile_context>

<pallas_src>
import jax
import jax.numpy as jnp
from jax.experimental import pallas as pl
from jax.experimental.pallas import tpu as pltpu


# ----------------------------------------------------------------------------
# Fused kernel: embedding + wavefront LSTM recurrence + decoder
# ----------------------------------------------------------------------------
def _wavefront_lstm_kernel(tok_ref, h0_ref, c0_ref, m0b_ref, whx_ref,
                           pre_ref, add_ref, wdec_ref, bdec_ref,
                           logits_ref, hN_ref, cN_ref,
                           gx_sc, out_sc):
    L, Bp, H = hN_ref.shape
    TB, G = gx_sc.shape                      # G = 4 * L * H
    T = TB // Bp
    LH = L * H
    V = m0b_ref.shape[0]
    Op = wdec_ref.shape[1]

    # ---- prologue: fused embedding + layer-0 input projection (+ all biases)
    tok = tok_ref[...]                                           # (TB, 1) int32
    vocab_iota = jax.lax.broadcasted_iota(jnp.int32, (TB, V), 1)
    onehot = (vocab_iota == tok).astype(jnp.float32)             # (TB, V)
    gx_sc[...] = jnp.dot(onehot, m0b_ref[...],
                         preferred_element_type=jnp.float32)     # (TB, G)

    # sigmoid-via-tanh constants over the grouped gate layout [i|f|g|o]
    pre = pre_ref[...]          # (1, G): 0.5 on i/f/o lanes, 1.0 on g lanes
    add = add_ref[...]          # (1, G): 0.5 on i/f/o lanes, 0.0 on g lanes

    lane = jax.lax.broadcasted_iota(jnp.int32, (Bp, LH), 1)      # hoisted

    h_state = h0_ref[...]                                        # (Bp, L*H)
    c_state = c0_ref[...]

    # ---- wavefront: step s processes every live (layer l, t = s - l) cell ---
    for s in range(T + L - 1):
        t0 = min(s, T - 1)                         # layer-0 time index, clamped
        gx_s = gx_sc[t0 * Bp:(t0 + 1) * Bp, :]     # (Bp, G) static slice load

        gates = gx_s + jnp.dot(h_state, whx_ref[...],
                               preferred_element_type=jnp.float32)  # (Bp, G)

        # one EUP pass for every gate of every live layer
        act = jnp.tanh(gates * pre) * pre + add

        i_all = act[:, 0 * LH:1 * LH]
        f_all = act[:, 1 * LH:2 * LH]
        g_all = act[:, 2 * LH:3 * LH]
        o_all = act[:, 3 * LH:4 * LH]

        c_cand = f_all * c_state + i_all * g_all
        h_cand = o_all * jnp.tanh(c_cand)

        # only layers with 0 <= s - l <= T-1 commit their update
        lo = max(0, s - T + 1)
        hi = min(L - 1, s)
        if lo == 0 and hi == L - 1:
            h_state, c_state = h_cand, c_cand
        else:
            if lo == 0:
                m = lane < (hi + 1) * H
            elif hi == L - 1:
                m = lane >= lo * H
            else:
                m = jnp.logical_and(lane >= lo * H, lane < (hi + 1) * H)
            h_state = jnp.where(m, h_cand, h_state)
            c_state = jnp.where(m, c_cand, c_state)

        # top layer emitted time step t_top = s - (L - 1)
        if s >= L - 1:
            t_top = s - (L - 1)
            out_sc[t_top * Bp:(t_top + 1) * Bp, :] = \
                h_state[:, (L - 1) * H:L * H]

    # ---- decoder over the whole sequence; lane-dense (Op = 128) stores ------
    dec = (jnp.dot(out_sc[...], wdec_ref[...],
                   preferred_element_type=jnp.float32) + bdec_ref[...])
    for t in range(T):
        logits_ref[:, t * Op:(t + 1) * Op] = \
            dec[t * Bp:(t + 1) * Bp, :].astype(logits_ref.dtype)

    # ---- final hidden / cell states -----------------------------------------
    for l in range(L):
        hN_ref[l] = h_state[:, l * H:(l + 1) * H]
        cN_ref[l] = c_state[:, l * H:(l + 1) * H]


def _fused_call(tok_tm, h0_pk, c0_pk, m0b, whx, pre, add, wdec, bdec,
                *, L, Bp, H, T):
    TB = T * Bp
    LH = L * H
    G = 4 * LH
    V = m0b.shape[0]
    Op = wdec.shape[1]

    def spec(shape):
        return pl.BlockSpec(shape, lambda i: (0,) * len(shape))

    out_shapes = (
        jax.ShapeDtypeStruct((Bp, T * Op), jnp.float32),   # logits (batch-major)
        jax.ShapeDtypeStruct((L, Bp, H), jnp.float32),     # h_N
        jax.ShapeDtypeStruct((L, Bp, H), jnp.float32),     # c_N
    )
    return pl.pallas_call(
        _wavefront_lstm_kernel,
        out_shape=out_shapes,
        grid=(1,),
        in_specs=[
            spec((TB, 1)),       # tokens, time-major column (int32)
            spec((Bp, LH)),      # h0 packed
            spec((Bp, LH)),      # c0 packed
            spec((V, G)),        # emb @ W_ih_0^T  (+ bias), grouped columns
            spec((LH, G)),       # wavefront RHS  (W_hh_l + W_ih_{l+1})
            spec((1, G)),        # gate pre-scale (0.5 / 1.0)
            spec((1, G)),        # gate post-add  (0.5 / 0.0)
            spec((H, Op)),       # decoder W^T, lane-padded
            spec((1, Op)),       # decoder bias, lane-padded
        ],
        out_specs=(
            spec((Bp, T * Op)),
            spec((L, Bp, H)),
            spec((L, Bp, H)),
        ),
        scratch_shapes=[
            pltpu.VMEM((TB, G), jnp.float32),   # hoisted layer-0 gate inputs
            pltpu.VMEM((TB, H), jnp.float32),   # top-layer outputs (time-major)
        ],
        compiler_params=pltpu.CompilerParams(
            dimension_semantics=("arbitrary",)),
        # TODO(synk): if batch grows, add a leading 'parallel' grid axis over
        # batch tiles to use both v7x TensorCores; at B=2 single-core is right.
    )(tok_tm, h0_pk, c0_pk, m0b, whx, pre, add, wdec, bdec)


# ----------------------------------------------------------------------------
# One-time weight packing (all static padding / layout work lives here)
# ----------------------------------------------------------------------------
def prepare_params(raw):
    emb = raw["embedding"]                  # (V, H)
    w_ih = raw["w_ih"]                      # (L, 4H, H)  rows = [i, f, g, o]
    w_hh = raw["w_hh"]                      # (L, 4H, H)
    b_ih = raw["b_ih"]                      # (L, 4H)
    b_hh = raw["b_hh"]                      # (L, 4H)
    w_dec = raw["w_dec"]                    # (O, H)
    b_dec = raw["b_dec"]                    # (O,)

    L = w_ih.shape[0]
    H = w_ih.shape[2]
    V = emb.shape[0]
    O = w_dec.shape[0]
    LH = L * H
    G = 4 * LH

    # grouped bias: column g*LH + l*H + j  <-  (b_ih + b_hh)[l, g*H + j]
    bias = (b_ih + b_hh).reshape(L, 4, H)
    bias_g = jnp.transpose(bias, (1, 0, 2)).reshape(G)

    # wavefront RHS: rows = h_state lanes, cols = grouped gates
    whx = jnp.zeros((LH, G), jnp.float32)
    for l in range(L):
        for g in range(4):
            blk = w_hh[l][g * H:(g + 1) * H, :].T          # (k, j)
            whx = whx.at[l * H:(l + 1) * H,
                         g * LH + l * H: g * LH + (l + 1) * H].set(blk)
        if l >= 1:
            for g in range(4):
                blk = w_ih[l][g * H:(g + 1) * H, :].T
                whx = whx.at[(l - 1) * H:l * H,
                             g * LH + l * H: g * LH + (l + 1) * H].set(blk)

    # layer-0 input path: embedding folded into W_ih_0, bias folded onto rows
    m0 = jnp.zeros((V, G), jnp.float32)
    for g in range(4):
        m0 = m0.at[:, g * LH: g * LH + H].set(
            emb @ w_ih[0][g * H:(g + 1) * H, :].T)
    m0b = m0 + bias_g[None, :]

    # sigmoid-via-tanh constants (g-gate group is block 2 of [i,f,g,o])
    col = jnp.arange(G)
    is_g = jnp.logical_and(col >= 2 * LH, col < 3 * LH)
    pre = jnp.where(is_g, 1.0, 0.5)[None, :].astype(jnp.float32)
    add = jnp.where(is_g, 0.0, 0.5)[None, :].astype(jnp.float32)

    # decoder, lane-padded to a dense 128-lane store
    Op = max(128, ((O + 127) // 128) * 128)
    wdec_p = jnp.zeros((H, Op), jnp.float32).at[:, :O].set(w_dec.T)
    bdec_p = jnp.zeros((1, Op), jnp.float32).at[:, :O].set(b_dec[None, :])

    return {"m0b": m0b, "whx": whx, "pre": pre, "add": add,
            "wdec": wdec_p, "bdec": bdec_p}


# ----------------------------------------------------------------------------
# CharLSTM forward (matches the PyTorch module's forward)
# ----------------------------------------------------------------------------
def char_lstm_forward(prep, tokens, hidden, *, out_size):
    """tokens: (B, T) int32; hidden = (h0, c0) each (n_layers, B, H).

    Returns (logits (B*T, out_size), (hN, cN))."""
    h0, c0 = hidden
    L, B, H = h0.shape
    T = tokens.shape[1]
    LH = L * H
    Bp = max(8, ((B + 7) // 8) * 8)
    Op = prep["wdec"].shape[1]

    # runtime inputs: pad batch to a sublane group; tokens to a time-major column
    tok_p = jnp.zeros((Bp, T), jnp.int32).at[:B].set(tokens.astype(jnp.int32))
    tok_tm = tok_p.T.reshape(T * Bp, 1)

    def pack(x):                                # (L, B, H) -> (Bp, L*H)
        xb = jnp.transpose(x, (1, 0, 2)).reshape(B, LH).astype(jnp.float32)
        return jnp.zeros((Bp, LH), jnp.float32).at[:B].set(xb)

    logits_flat, hN_p, cN_p = _fused_call(
        tok_tm, pack(h0), pack(c0),
        prep["m0b"], prep["whx"], prep["pre"], prep["add"],
        prep["wdec"], prep["bdec"],
        L=L, Bp=Bp, H=H, T=T)

    logits = (logits_flat.reshape(Bp, T, Op)[:B, :, :out_size]
              .reshape(B * T, out_size))
    return logits, (hN_p[:, :B], cN_p[:, :B])


# ----------------------------------------------------------------------------
# Pure-JAX reference (independent formulation) for verification
# ----------------------------------------------------------------------------
def reference_forward(raw, tokens, hidden):
    h0_all, c0_all = hidden
    L, _, H = h0_all.shape
    x = jnp.take(raw["embedding"], tokens, axis=0)           # (B, T, H)
    x = jnp.transpose(x, (1, 0, 2))                          # (T, B, H)

    hs, cs = [], []
    for l in range(L):
        w_ih = raw["w_ih"][l]
        w_hh = raw["w_hh"][l]
        b = raw["b_ih"][l] + raw["b_hh"][l]

        def step(carry, x_t, w_ih=w_ih, w_hh=w_hh, b=b):
            h, c = carry
            gates = x_t @ w_ih.T + h @ w_hh.T + b
            i = jax.nn.sigmoid(gates[:, 0:H])
            f = jax.nn.sigmoid(gates[:, H:2 * H])
            g = jnp.tanh(gates[:, 2 * H:3 * H])
            o = jax.nn.sigmoid(gates[:, 3 * H:4 * H])
            c_new = f * c + i * g
            h_new = o * jnp.tanh(c_new)
            return (h_new, c_new), h_new

        (hT, cT), y = jax.lax.scan(step, (h0_all[l], c0_all[l]), x)
        x = y
        hs.append(hT)
        cs.append(cT)

    out = jnp.transpose(x, (1, 0, 2)).reshape(-1, H)
    logits = out @ raw["w_dec"].T + raw["b_dec"]
    return logits, (jnp.stack(hs), jnp.stack(cs))


# ----------------------------------------------------------------------------
# Deterministic parameter init (PyTorch nn.Embedding / nn.LSTM / nn.Linear shapes)
# ----------------------------------------------------------------------------
def init_params(key, vocab_size, hidden_size, output_size, n_layers):
    keys = jax.random.split(key, 4 * n_layers + 3)
    k = iter(keys)
    scale = 1.0 / jnp.sqrt(jnp.float32(hidden_size))

    embedding = jax.random.normal(next(k), (vocab_size, hidden_size), jnp.float32)

    w_ih, w_hh, b_ih, b_hh = [], [], [], []
    for _ in range(n_layers):
        w_ih.append(jax.random.uniform(next(k), (4 * hidden_size, hidden_size),
                                       jnp.float32, -scale, scale))
        w_hh.append(jax.random.uniform(next(k), (4 * hidden_size, hidden_size),
                                       jnp.float32, -scale, scale))
        b_ih.append(jax.random.uniform(next(k), (4 * hidden_size,),
                                       jnp.float32, -scale, scale))
        b_hh.append(jax.random.uniform(next(k), (4 * hidden_size,),
                                       jnp.float32, -scale, scale))

    w_dec = jax.random.uniform(next(k), (output_size, hidden_size),
                               jnp.float32, -scale, scale)
    b_dec = jax.random.uniform(next(k), (output_size,),
                               jnp.float32, -scale, scale)

    return {
        "embedding": embedding,
        "w_ih": jnp.stack(w_ih),      # (L, 4H, H)
        "w_hh": jnp.stack(w_hh),      # (L, 4H, H)
        "b_ih": jnp.stack(b_ih),      # (L, 4H)
        "b_hh": jnp.stack(b_hh),      # (L, 4H)
        "w_dec": w_dec,               # (O, H)
        "b_dec": b_dec,               # (O,)
    }


if __name__ == "__main__":
    VOCAB = 16          # input_size
    HIDDEN = 32         # hidden_size
    OUTPUT = 16         # output_size
    N_LAYERS = 5
    B, T = 2, 8

    key = jax.random.PRNGKey(0)
    kp, kt = jax.random.split(key)
    raw = init_params(kp, VOCAB, HIDDEN, OUTPUT, N_LAYERS)
    prep = prepare_params(raw)                     # one-time packing / padding

    tokens = jax.random.randint(kt, (B, T), 0, VOCAB, dtype=jnp.int32)
    h0 = jnp.zeros((N_LAYERS, B, HIDDEN), jnp.float32)   # init_hidden
    c0 = jnp.zeros((N_LAYERS, B, HIDDEN), jnp.float32)

    fwd = jax.jit(char_lstm_forward, static_argnames=("out_size",))
    logits, (hN, cN) = fwd(prep, tokens, (h0, c0), out_size=OUTPUT)
    jax.block_until_ready((logits, hN, cN))

    # verify against pure-JAX reference
    ref_logits, (ref_h, ref_c) = reference_forward(raw, tokens, (h0, c0))
    assert logits.shape == (B * T, OUTPUT)
    assert hN.shape == (N_LAYERS, B, HIDDEN) and cN.shape == (N_LAYERS, B, HIDDEN)
    assert jnp.allclose(logits, ref_logits, atol=2e-4, rtol=2e-4)
    assert jnp.allclose(hN, ref_h, atol=2e-4, rtol=2e-4)
    assert jnp.allclose(cN, ref_c, atol=2e-4, rtol=2e-4)

    # TODO(synk): autoregressive generate()/softmax-sampling loops are host-side
    # control flow (np.random.choice) in the PyTorch module and are not kernels.
    print("KERNEL_OK")
</pallas_src>

<mosaic_0001>
module attributes {stable_mosaic.version = 11 : i64} {
  func.func @_wavefront_lstm_kernel(%arg0: i32, %arg1: memref<64x1xi32, #tpu.memory_space<vmem>>, %arg2: memref<8x160xf32, #tpu.memory_space<vmem>>, %arg3: memref<8x160xf32, #tpu.memory_space<vmem>>, %arg4: memref<16x640xf32, #tpu.memory_space<vmem>>, %arg5: memref<160x640xf32, #tpu.memory_space<vmem>>, %arg6: memref<1x640xf32, #tpu.memory_space<vmem>>, %arg7: memref<1x640xf32, #tpu.memory_space<vmem>>, %arg8: memref<32x128xf32, #tpu.memory_space<vmem>>, %arg9: memref<1x128xf32, #tpu.memory_space<vmem>>, %arg10: memref<8x1024xf32, #tpu.memory_space<vmem>>, %arg11: memref<5x8x32xf32, #tpu.memory_space<vmem>>, %arg12: memref<5x8x32xf32, #tpu.memory_space<vmem>>, %arg13: memref<64x640xf32, #tpu.memory_space<vmem>>, %arg14: memref<64x32xf32, #tpu.memory_space<vmem>>) attributes {dimension_semantics = [#tpu.dimension_semantics<arbitrary>], iteration_bounds = array<i64: 1>, scalar_prefetch = 0 : i64, scratch_operands = 2 : i64, tpu.core_type = #tpu.core_type<tc>, window_params = [{pipeline_mode = #tpu.pipeline_mode<synchronous>, transform_indices = @transform_0, window_bounds = array<i64: 64, 1>}, {pipeline_mode = #tpu.pipeline_mode<synchronous>, transform_indices = @transform_1, window_bounds = array<i64: 8, 160>}, {pipeline_mode = #tpu.pipeline_mode<synchronous>, transform_indices = @transform_2, window_bounds = array<i64: 8, 160>}, {pipeline_mode = #tpu.pipeline_mode<synchronous>, transform_indices = @transform_3, window_bounds = array<i64: 16, 640>}, {pipeline_mode = #tpu.pipeline_mode<synchronous>, transform_indices = @transform_4, window_bounds = array<i64: 160, 640>}, {pipeline_mode = #tpu.pipeline_mode<synchronous>, transform_indices = @transform_5, window_bounds = array<i64: 1, 640>}, {pipeline_mode = #tpu.pipeline_mode<synchronous>, transform_indices = @transform_6, window_bounds = array<i64: 1, 640>}, {pipeline_mode = #tpu.pipeline_mode<synchronous>, transform_indices = @transform_7, window_bounds = array<i64: 32, 128>}, {pipeline_mode = #tpu.pipeline_mode<synchronous>, transform_indices = @transform_8, window_bounds = array<i64: 1, 128>}, {pipeline_mode = #tpu.pipeline_mode<synchronous>, transform_indices = @transform_9, window_bounds = array<i64: 8, 1024>}, {pipeline_mode = #tpu.pipeline_mode<synchronous>, transform_indices = @transform_10, window_bounds = array<i64: 5, 8, 32>}, {pipeline_mode = #tpu.pipeline_mode<synchronous>, transform_indices = @transform_11, window_bounds = array<i64: 5, 8, 32>}]} {
    %c0 = arith.constant 0 : index
    %c0_0 = arith.constant 0 : index
    %0 = vector.load %arg1[%c0, %c0_0] : memref<64x1xi32, #tpu.memory_space<vmem>>, vector<64x1xi32>
    %1 = tpu.iota {dimensions = array<i32: 1>} : vector<64x16xi32>
    %2 = vector.broadcast %0 : vector<64x1xi32> to vector<64x16xi32>
    %3 = arith.cmpi eq, %1, %2 : vector<64x16xi32>
    %4 = arith.extui %3 : vector<64x16xi1> to vector<64x16xi32>
    %5 = arith.sitofp %4 : vector<64x16xi32> to vector<64x16xf32>
    %c0_1 = arith.constant 0 : index
    %c0_2 = arith.constant 0 : index
    %6 = vector.load %arg4[%c0_1, %c0_2] : memref<16x640xf32, #tpu.memory_space<vmem>>, vector<16x640xf32>
    %cst = arith.constant dense<0.000000e+00> : vector<64x640xf32>
    %7 = tpu.matmul %5, %6, %cst {dimension_numbers = #tpu.dot_dimension_numbers<[1], [0], [0], [1], [0, 0, 1, 1], [], []>} : vector<64x16xf32>, vector<16x640xf32>, vector<64x640xf32> -> vector<64x640xf32>
    %c0_3 = arith.constant 0 : index
    %c0_4 = arith.constant 0 : index
    %8 = vector.load %arg13[%c0_3, %c0_4] : memref<64x640xf32, #tpu.memory_space<vmem>>, vector<64x640xf32>
    tpu.vector_store %arg13[%c0_3, %c0_4], %7 {strides = array<i32>} : memref<64x640xf32, #tpu.memory_space<vmem>>, vector<64x640xf32>,
    %c0_5 = arith.constant 0 : index
    %c0_6 = arith.constant 0 : index
    %9 = vector.load %arg6[%c0_5, %c0_6] : memref<1x640xf32, #tpu.memory_space<vmem>>, vector<1x640xf32>
    %c0_7 = arith.constant 0 : index
    %c0_8 = arith.constant 0 : index
    %10 = vector.load %arg7[%c0_7, %c0_8] : memref<1x640xf32, #tpu.memory_space<vmem>>, vector<1x640xf32>
    %11 = tpu.iota {dimensions = array<i32: 1>} : vector<8x160xi32>
    %c0_9 = arith.constant 0 : index
    %c0_10 = arith.constant 0 : index
    %12 = vector.load %arg2[%c0_9, %c0_10] : memref<8x160xf32, #tpu.memory_space<vmem>>, vector<8x160xf32>
    %c0_11 = arith.constant 0 : index
    %c0_12 = arith.constant 0 : index
    %13 = vector.load %arg3[%c0_11, %c0_12] : memref<8x160xf32, #tpu.memory_space<vmem>>, vector<8x160xf32>
    %c0_13 = arith.constant 0 : index
    %c0_14 = arith.constant 0 : index
    %14 = vector.load %arg13[%c0_13, %c0_14] : memref<64x640xf32, #tpu.memory_space<vmem>>, vector<8x640xf32>
    %c0_15 = arith.constant 0 : index
    %c0_16 = arith.constant 0 : index
    %15 = vector.load %arg5[%c0_15, %c0_16] : memref<160x640xf32, #tpu.memory_space<vmem>>, vector<160x640xf32>
    %cst_17 = arith.constant dense<0.000000e+00> : vector<8x640xf32>
    %16 = tpu.matmul %12, %15, %cst_17 {dimension_numbers = #tpu.dot_dimension_numbers<[1], [0], [0], [1], [0, 0, 1, 1], [], []>} : vector<8x160xf32>, vector<160x640xf32>, vector<8x640xf32> -> vector<8x640xf32>
    %17 = arith.addf %14, %16 : vector<8x640xf32>
    %18 = vector.broadcast %9 : vector<1x640xf32> to vector<8x640xf32>
    %19 = arith.mulf %17, %18 : vector<8x640xf32>
    %20 = math.tanh %19 : vector<8x640xf32>
    %21 = vector.broadcast %9 : vector<1x640xf32> to vector<8x640xf32>
    %22 = arith.mulf %20, %21 : vector<8x640xf32>
    %23 = vector.broadcast %10 : vector<1x640xf32> to vector<8x640xf32>
    %24 = arith.addf %22, %23 : vector<8x640xf32>
    %25 = vector.extract_strided_slice %24 {offsets = [0, 0], sizes = [8, 160], strides = [1, 1]} : vector<8x640xf32> to vector<8x160xf32>
    %26 = vector.extract_strided_slice %24 {offsets = [0, 160], sizes = [8, 160], strides = [1, 1]} : vector<8x640xf32> to vector<8x160xf32>
    %27 = vector.extract_strided_slice %24 {offsets = [0, 320], sizes = [8, 160], strides = [1, 1]} : vector<8x640xf32> to vector<8x160xf32>
    %28 = vector.extract_strided_slice %24 {offsets = [0, 480], sizes = [8, 160], strides = [1, 1]} : vector<8x640xf32> to vector<8x160xf32>
    %29 = arith.mulf %26, %13 : vector<8x160xf32>
    %30 = arith.mulf %25, %27 : vector<8x160xf32>
    %31 = arith.addf %29, %30 : vector<8x160xf32>
    %32 = math.tanh %31 : vector<8x160xf32>
    %33 = arith.mulf %28, %32 : vector<8x160xf32>
    %c32_i32 = arith.constant 32 : i32
    %34 = vector.broadcast %c32_i32 : i32 to vector<8x160xi32>
    %35 = arith.cmpi slt, %11, %34 : vector<8x160xi32>
    %36 = arith.select %35, %33, %12 : vector<8x160xi1>, vector<8x160xf32>
    %37 = arith.select %35, %31, %13 : vector<8x160xi1>, vector<8x160xf32>
    %c8 = arith.constant 8 : index
    %c0_18 = arith.constant 0 : index
    %38 = vector.load %arg13[%c8, %c0_18] : memref<64x640xf32, #tpu.memory_space<vmem>>, vector<8x640xf32>
    %c0_19 = arith.constant 0 : index
    %c0_20 = arith.constant 0 : index
    %39 = vector.load %arg5[%c0_19, %c0_20] : memref<160x640xf32, #tpu.memory_space<vmem>>, vector<160x640xf32>
    %cst_21 = arith.constant dense<0.000000e+00> : vector<8x640xf32>
    %40 = tpu.matmul %36, %39, %cst_21 {dimension_numbers = #tpu.dot_dimension_numbers<[1], [0], [0], [1], [0, 0, 1, 1], [], []>} : vector<8x160xf32>, vector<160x640xf32>, vector<8x640xf32> -> vector<8x640xf32>
    %41 = arith.addf %38, %40 : vector<8x640xf32>
    %42 = vector.broadcast %9 : vector<1x640xf32> to vector<8x640xf32>
    %43 = arith.mulf %41, %42 : vector<8x640xf32>
    %44 = math.tanh %43 : vector<8x640xf32>
    %45 = vector.broadcast %9 : vector<1x640xf32> to vector<8x640xf32>
    %46 = arith.mulf %44, %45 : vector<8x640xf32>
    %47 = vector.broadcast %10 : vector<1x640xf32> to vector<8x640xf32>
    %48 = arith.addf %46, %47 : vector<8x640xf32>
    %49 = vector.extract_strided_slice %48 {offsets = [0, 0], sizes = [8, 160], strides = [1, 1]} : vector<8x640xf32> to vector<8x160xf32>
    %50 = vector.extract_strided_slice %48 {offsets = [0, 160], sizes = [8, 160], strides = [1, 1]} : vector<8x640xf32> to vector<8x160xf32>
    %51 = vector.extract_strided_slice %48 {offsets = [0, 320], sizes = [8, 160], strides = [1, 1]} : vector<8x640xf32> to vector<8x160xf32>
    %52 = vector.extract_strided_slice %48 {offsets = [0, 480], sizes = [8, 160], strides = [1, 1]} : vector<8x640xf32> to vector<8x160xf32>
    %53 = arith.mulf %50, %37 : vector<8x160xf32>
    %54 = arith.mulf %49, %51 : vector<8x160xf32>
    %55 = arith.addf %53, %54 : vector<8x160xf32>
    %56 = math.tanh %55 : vector<8x160xf32>
    %57 = arith.mulf %52, %56 : vector<8x160xf32>
    %c64_i32 = arith.constant 64 : i32
    %58 = vector.broadcast %c64_i32 : i32 to vector<8x160xi32>
    %59 = arith.cmpi slt, %11, %58 : vector<8x160xi32>
    %60 = arith.select %59, %57, %36 : vector<8x160xi1>, vector<8x160xf32>
    %61 = arith.select %59, %55, %37 : vector<8x160xi1>, vector<8x160xf32>
    %c16 = arith.constant 16 : index
    %c0_22 = arith.constant 0 : index
    %62 = vector.load %arg13[%c16, %c0_22] : memref<64x640xf32, #tpu.memory_space<vmem>>, vector<8x640xf32>
    %c0_23 = arith.constant 0 : index
    %c0_24 = arith.constant 0 : index
    %63 = vector.load %arg5[%c0_23, %c0_24] : memref<160x640xf32, #tpu.memory_space<vmem>>, vector<160x640xf32>
    %cst_25 = arith.constant dense<0.000000e+00> : vector<8x640xf32>
    %64 = tpu.matmul %60, %63, %cst_25 {dimension_numbers = #tpu.dot_dimension_numbers<[1], [0], [0], [1], [0, 0, 1, 1], [], []>} : vector<8x160xf32>, vector<160x640xf32>, vector<8x640xf32> -> vector<8x640xf32>
    %65 = arith.addf %62, %64 : vector<8x640xf32>
    %66 = vector.broadcast %9 : vector<1x640xf32> to vector<8x640xf32>
    %67 = arith.mulf %65, %66 : vector<8x640xf32>
    %68 = math.tanh %67 : vector<8x640xf32>
    %69 = vector.broadcast %9 : vector<1x640xf32> to vector<8x640xf32>
    %70 = arith.mulf %68, %69 : vector<8x640xf32>
    %71 = vector.broadcast %10 : vector<1x640xf32> to vector<8x640xf32>
    %72 = arith.addf %70, %71 : vector<8x640xf32>
    %73 = vector.extract_strided_slice %72 {offsets = [0, 0], sizes = [8, 160], strides = [1, 1]} : vector<8x640xf32> to vector<8x160xf32>
    %74 = vector.extract_strided_slice %72 {offsets = [0, 160], sizes = [8, 160], strides = [1, 1]} : vector<8x640xf32> to vector<8x160xf32>
    %75 = vector.extract_strided_slice %72 {offsets = [0, 320], sizes = [8, 160], strides = [1, 1]} : vector<8x640xf32> to vector<8x160xf32>
    %76 = vector.extract_strided_slice %72 {offsets = [0, 480], sizes = [8, 160], strides = [1, 1]} : vector<8x640xf32> to vector<8x160xf32>
    %77 = arith.mulf %74, %61 : vector<8x160xf32>
    %78 = arith.mulf %73, %75 : vector<8x160xf32>
    %79 = arith.addf %77, %78 : vector<8x160xf32>
    %80 = math.tanh %79 : vector<8x160xf32>
    %81 = arith.mulf %76, %80 : vector<8x160xf32>
    %c96_i32 = arith.constant 96 : i32
    %82 = vector.broadcast %c96_i32 : i32 to vector<8x160xi32>
    %83 = arith.cmpi slt, %11, %82 : vector<8x160xi32>
    %84 = arith.select %83, %81, %60 : vector<8x160xi1>, vector<8x160xf32>
    %85 = arith.select %83, %79, %61 : vector<8x160xi1>, vector<8x160xf32>
    %c24 = arith.constant 24 : index
    %c0_26 = arith.constant 0 : index
    %86 = vector.load %arg13[%c24, %c0_26] : memref<64x640xf32, #tpu.memory_space<vmem>>, vector<8x640xf32>
    %c0_27 = arith.constant 0 : index
    %c0_28 = arith.constant 0 : index
    %87 = vector.load %arg5[%c0_27, %c0_28] : memref<160x640xf32, #tpu.memory_space<vmem>>, vector<160x640xf32>
    %cst_29 = arith.constant dense<0.000000e+00> : vector<8x640xf32>
    %88 = tpu.matmul %84, %87, %cst_29 {dimension_numbers = #tpu.dot_dimension_numbers<[1], [0], [0], [1], [0, 0, 1, 1], [], []>} : vector<8x160xf32>, vector<160x640xf32>, vector<8x640xf32> -> vector<8x640xf32>
    %89 = arith.addf %86, %88 : vector<8x640xf32>
    %90 = vector.broadcast %9 : vector<1x640xf32> to vector<8x640xf32>
    %91 = arith.mulf %89, %90 : vector<8x640xf32>
    %92 = math.tanh %91 : vector<8x640xf32>
    %93 = vector.broadcast %9 : vector<1x640xf32> to vector<8x640xf32>
    %94 = arith.mulf %92, %93 : vector<8x640xf32>
    %95 = vector.broadcast %10 : vector<1x640xf32> to vector<8x640xf32>
    %96 = arith.addf %94, %95 : vector<8x640xf32>
    %97 = vector.extract_strided_slice %96 {offsets = [0, 0], sizes = [8, 160], strides = [1, 1]} : vector<8x640xf32> to vector<8x160xf32>
    %98 = vector.extract_strided_slice %96 {offsets = [0, 160], sizes = [8, 160], strides = [1, 1]} : vector<8x640xf32> to vector<8x160xf32>
    %99 = vector.extract_strided_slice %96 {offsets = [0, 320], sizes = [8, 160], strides = [1, 1]} : vector<8x640xf32> to vector<8x160xf32>
    %100 = vector.extract_strided_slice %96 {offsets = [0, 480], sizes = [8, 160], strides = [1, 1]} : vector<8x640xf32> to vector<8x160xf32>
    %101 = arith.mulf %98, %85 : vector<8x160xf32>
    %102 = arith.mulf %97, %99 : vector<8x160xf32>
    %103 = arith.addf %101, %102 : vector<8x160xf32>
    %104 = math.tanh %103 : vector<8x160xf32>
    %105 = arith.mulf %100, %104 : vector<8x160xf32>
    %c128_i32 = arith.constant 128 : i32
    %106 = vector.broadcast %c128_i32 : i32 to vector<8x160xi32>
    %107 = arith.cmpi slt, %11, %106 : vector<8x160xi32>
    %108 = arith.select %107, %105, %84 : vector<8x160xi1>, vector<8x160xf32>
    %109 = arith.select %107, %103, %85 : vector<8x160xi1>, vector<8x160xf32>
    %c32 = arith.constant 32 : index
    %c0_30 = arith.constant 0 : index
    %110 = vector.load %arg13[%c32, %c0_30] : memref<64x640xf32, #tpu.memory_space<vmem>>, vector<8x640xf32>
    %c0_31 = arith.constant 0 : index
    %c0_32 = arith.constant 0 : index
    %111 = vector.load %arg5[%c0_31, %c0_32] : memref<160x640xf32, #tpu.memory_space<vmem>>, vector<160x640xf32>
    %cst_33 = arith.constant dense<0.000000e+00> : vector<8x640xf32>
    %112 = tpu.matmul %108, %111, %cst_33 {dimension_numbers = #tpu.dot_dimension_numbers<[1], [0], [0], [1], [0, 0, 1, 1], [], []>} : vector<8x160xf32>, vector<160x640xf32>, vector<8x640xf32> -> vector<8x640xf32>
    %113 = arith.addf %110, %112 : vector<8x640xf32>
    %114 = vector.broadcast %9 : vector<1x640xf32> to vector<8x640xf32>
    %115 = arith.mulf %113, %114 : vector<8x640xf32>
    %116 = math.tanh %115 : vector<8x640xf32>
    %117 = vector.broadcast %9 : vector<1x640xf32> to vector<8x640xf32>
    %118 = arith.mulf %116, %117 : vector<8x640xf32>
    %119 = vector.broadcast %10 : vector<1x640xf32> to vector<8x640xf32>
    %120 = arith.addf %118, %119 : vector<8x640xf32>
    %121 = vector.extract_strided_slice %120 {offsets = [0, 0], sizes = [8, 160], strides = [1, 1]} : vector<8x640xf32> to vector<8x160xf32>
    %122 = vector.extract_strided_slice %120 {offsets = [0, 160], sizes = [8, 160], strides = [1, 1]} : vector<8x640xf32> to vector<8x160xf32>
    %123 = vector.extract_strided_slice %120 {offsets = [0, 320], sizes = [8, 160], strides = [1, 1]} : vector<8x640xf32> to vector<8x160xf32>
    %124 = vector.extract_strided_slice %120 {offsets = [0, 480], sizes = [8, 160], strides = [1, 1]} : vector<8x640xf32> to vector<8x160xf32>
    %125 = arith.mulf %122, %109 : vector<8x160xf32>
    %126 = arith.mulf %121, %123 : vector<8x160xf32>
    %127 = arith.addf %125, %126 : vector<8x160xf32>
    %128 = math.tanh %127 : vector<8x160xf32>
    %129 = arith.mulf %124, %128 : vector<8x160xf32>
    %130 = vector.extract_strided_slice %129 {offsets = [0, 128], sizes = [8, 32], strides = [1, 1]} : vector<8x160xf32> to vector<8x32xf32>
    %c0_34 = arith.constant 0 : index
    %c0_35 = arith.constant 0 : index
    %131 = vector.load %arg14[%c0_34, %c0_35] : memref<64x32xf32, #tpu.memory_space<vmem>>, vector<8x32xf32>
    tpu.vector_store %arg14[%c0_34, %c0_35], %130 {strides = array<i32>} : memref<64x32xf32, #tpu.memory_space<vmem>>, vector<8x32xf32>,
    %c40 = arith.constant 40 : index
    %c0_36 = arith.constant 0 : index
    %132 = vector.load %arg13[%c40, %c0_36] : memref<64x640xf32, #tpu.memory_space<vmem>>, vector<8x640xf32>
    %c0_37 = arith.constant 0 : index
    %c0_38 = arith.constant 0 : index
    %133 = vector.load %arg5[%c0_37, %c0_38] : memref<160x640xf32, #tpu.memory_space<vmem>>, vector<160x640xf32>
    %cst_39 = arith.constant dense<0.000000e+00> : vector<8x640xf32>
    %134 = tpu.matmul %129, %133, %cst_39 {dimension_numbers = #tpu.dot_dimension_numbers<[1], [0], [0], [1], [0, 0, 1, 1], [], []>} : vector<8x160xf32>, vector<160x640xf32>, vector<8x640xf32> -> vector<8x640xf32>
    %135 = arith.addf %132, %134 : vector<8x640xf32>
    %136 = vector.broadcast %9 : vector<1x640xf32> to vector<8x640xf32>
    %137 = arith.mulf %135, %136 : vector<8x640xf32>
    %138 = math.tanh %137 : vector<8x640xf32>
    %139 = vector.broadcast %9 : vector<1x640xf32> to vector<8x640xf32>
    %140 = arith.mulf %138, %139 : vector<8x640xf32>
    %141 = vector.broadcast %10 : vector<1x640xf32> to vector<8x640xf32>
    %142 = arith.addf %140, %141 : vector<8x640xf32>
    %143 = vector.extract_strided_slice %142 {offsets = [0, 0], sizes = [8, 160], strides = [1, 1]} : vector<8x640xf32> to vector<8x160xf32>
    %144 = vector.extract_strided_slice %142 {offsets = [0, 160], sizes = [8, 160], strides = [1, 1]} : vector<8x640xf32> to vector<8x160xf32>
    %145 = vector.extract_strided_slice %142 {offsets = [0, 320], sizes = [8, 160], strides = [1, 1]} : vector<8x640xf32> to vector<8x160xf32>
    %146 = vector.extract_strided_slice %142 {offsets = [0, 480], sizes = [8, 160], strides = [1, 1]} : vector<8x640xf32> to vector<8x160xf32>
    %147 = arith.mulf %144, %127 : vector<8x160xf32>
    %148 = arith.mulf %143, %145 : vector<8x160xf32>
    %149 = arith.addf %147, %148 : vector<8x160xf32>
    %150 = math.tanh %149 : vector<8x160xf32>
    %151 = arith.mulf %146, %150 : vector<8x160xf32>
    %152 = vector.extract_strided_slice %151 {offsets = [0, 128], sizes = [8, 32], strides = [1, 1]} : vector<8x160xf32> to vector<8x32xf32>
    %c8_40 = arith.constant 8 : index
    %c0_41 = arith.constant 0 : index
    %153 = vector.load %arg14[%c8_40, %c0_41] : memref<64x32xf32, #tpu.memory_space<vmem>>, vector<8x32xf32>
    tpu.vector_store %arg14[%c8_40, %c0_41], %152 {strides = array<i32>} : memref<64x32xf32, #tpu.memory_space<vmem>>, vector<8x32xf32>,
    %c48 = arith.constant 48 : index
    %c0_42 = arith.constant 0 : index
    %154 = vector.load %arg13[%c48, %c0_42] : memref<64x640xf32, #tpu.memory_space<vmem>>, vector<8x640xf32>
    %c0_43 = arith.constant 0 : index
    %c0_44 = arith.constant 0 : index
    %155 = vector.load %arg5[%c0_43, %c0_44] : memref<160x640xf32, #tpu.memory_space<vmem>>, vector<160x640xf32>
    %cst_45 = arith.constant dense<0.000000e+00> : vector<8x640xf32>
    %156 = tpu.matmul %151, %155, %cst_45 {dimension_numbers = #tpu.dot_dimension_numbers<[1], [0], [0], [1], [0, 0, 1, 1], [], []>} : vector<8x160xf32>, vector<160x640xf32>, vector<8x640xf32> -> vector<8x640xf32>
    %157 = arith.addf %154, %156 : vector<8x640xf32>
    %158 = vector.broadcast %9 : vector<1x640xf32> to vector<8x640xf32>
    %159 = arith.mulf %157, %158 : vector<8x640xf32>
    %160 = math.tanh %159 : vector<8x640xf32>
    %161 = vector.broadcast %9 : vector<1x640xf32> to vector<8x640xf32>
    %162 = arith.mulf %160, %161 : vector<8x640xf32>
    %163 = vector.broadcast %10 : vector<1x640xf32> to vector<8x640xf32>
    %164 = arith.addf %162, %163 : vector<8x640xf32>
    %165 = vector.extract_strided_slice %164 {offsets = [0, 0], sizes = [8, 160], strides = [1, 1]} : vector<8x640xf32> to vector<8x160xf32>
    %166 = vector.extract_strided_slice %164 {offsets = [0, 160], sizes = [8, 160], strides = [1, 1]} : vector<8x640xf32> to vector<8x160xf32>
    %167 = vector.extract_strided_slice %164 {offsets = [0, 320], sizes = [8, 160], strides = [1, 1]} : vector<8x640xf32> to vector<8x160xf32>
    %168 = vector.extract_strided_slice %164 {offsets = [0, 480], sizes = [8, 160], strides = [1, 1]} : vector<8x640xf32> to vector<8x160xf32>
    %169 = arith.mulf %166, %149 : vector<8x160xf32>
    %170 = arith.mulf %165, %167 : vector<8x160xf32>
    %171 = arith.addf %169, %170 : vector<8x160xf32>
    %172 = math.tanh %171 : vector<8x160xf32>
    %173 = arith.mulf %168, %172 : vector<8x160xf32>
    %174 = vector.extract_strided_slice %173 {offsets = [0, 128], sizes = [8, 32], strides = [1, 1]} : vector<8x160xf32> to vector<8x32xf32>
    %c16_46 = arith.constant 16 : index
    %c0_47 = arith.constant 0 : index
    %175 = vector.load %arg14[%c16_46, %c0_47] : memref<64x32xf32, #tpu.memory_space<vmem>>, vector<8x32xf32>
    tpu.vector_store %arg14[%c16_46, %c0_47], %174 {strides = array<i32>} : memref<64x32xf32, #tpu.memory_space<vmem>>, vector<8x32xf32>,
    %c56 = arith.constant 56 : index
    %c0_48 = arith.constant 0 : index
    %176 = vector.load %arg13[%c56, %c0_48] : memref<64x640xf32, #tpu.memory_space<vmem>>, vector<8x640xf32>
    %c0_49 = arith.constant 0 : index
    %c0_50 = arith.constant 0 : index
    %177 = vector.load %arg5[%c0_49, %c0_50] : memref<160x640xf32, #tpu.memory_space<vmem>>, vector<160x640xf32>
    %cst_51 = arith.constant dense<0.000000e+00> : vector<8x640xf32>
    %178 = tpu.matmul %173, %177, %cst_51 {dimension_numbers = #tpu.dot_dimension_numbers<[1], [0], [0], [1], [0, 0, 1, 1], [], []>} : vector<8x160xf32>, vector<160x640xf32>, vector<8x640xf32> -> vector<8x640xf32>
    %179 = arith.addf %176, %178 : vector<8x640xf32>
    %180 = vector.broadcast %9 : vector<1x640xf32> to vector<8x640xf32>
    %181 = arith.mulf %179, %180 : vector<8x640xf32>
    %182 = math.tanh %181 : vector<8x640xf32>
    %183 = vector.broadcast %9 : vector<1x640xf32> to vector<8x640xf32>
    %184 = arith.mulf %182, %183 : vector<8x640xf32>
    %185 = vector.broadcast %10 : vector<1x640xf32> to vector<8x640xf32>
    %186 = arith.addf %184, %185 : vector<8x640xf32>
    %187 = vector.extract_strided_slice %186 {offsets = [0, 0], sizes = [8, 160], strides = [1, 1]} : vector<8x640xf32> to vector<8x160xf32>
    %188 = vector.extract_strided_slice %186 {offsets = [0, 160], sizes = [8, 160], strides = [1, 1]} : vector<8x640xf32> to vector<8x160xf32>
    %189 = vector.extract_strided_slice %186 {offsets = [0, 320], sizes = [8, 160], strides = [1, 1]} : vector<8x640xf32> to vector<8x160xf32>
    %190 = vector.extract_strided_slice %186 {offsets = [0, 480], sizes = [8, 160], strides = [1, 1]} : vector<8x640xf32> to vector<8x160xf32>
    %191 = arith.mulf %188, %171 : vector<8x160xf32>
    %192 = arith.mulf %187, %189 : vector<8x160xf32>
    %193 = arith.addf %191, %192 : vector<8x160xf32>
    %194 = math.tanh %193 : vector<8x160xf32>
    %195 = arith.mulf %190, %194 : vector<8x160xf32>
    %196 = vector.extract_strided_slice %195 {offsets = [0, 128], sizes = [8, 32], strides = [1, 1]} : vector<8x160xf32> to vector<8x32xf32>
    %c24_52 = arith.constant 24 : index
    %c0_53 = arith.constant 0 : index
    %197 = vector.load %arg14[%c24_52, %c0_53] : memref<64x32xf32, #tpu.memory_space<vmem>>, vector<8x32xf32>
    tpu.vector_store %arg14[%c24_52, %c0_53], %196 {strides = array<i32>} : memref<64x32xf32, #tpu.memory_space<vmem>>, vector<8x32xf32>,
    %c56_54 = arith.constant 56 : index
    %c0_55 = arith.constant 0 : index
    %198 = vector.load %arg13[%c56_54, %c0_55] : memref<64x640xf32, #tpu.memory_space<vmem>>, vector<8x640xf32>
    %c0_56 = arith.constant 0 : index
    %c0_57 = arith.constant 0 : index
    %199 = vector.load %arg5[%c0_56, %c0_57] : memref<160x640xf32, #tpu.memory_space<vmem>>, vector<160x640xf32>
    %cst_58 = arith.constant dense<0.000000e+00> : vector<8x640xf32>
    %200 = tpu.matmul %195, %199, %cst_58 {dimension_numbers = #tpu.dot_dimension_numbers<[1], [0], [0], [1], [0, 0, 1, 1], [], []>} : vector<8x160xf32>, vector<160x640xf32>, vector<8x640xf32> -> vector<8x640xf32>
    %201 = arith.addf %198, %200 : vector<8x640xf32>
    %202 = vector.broadcast %9 : vector<1x640xf32> to vector<8x640xf32>
    %203 = arith.mulf %201, %202 : vector<8x640xf32>
    %204 = math.tanh %203 : vector<8x640xf32>
    %205 = vector.broadcast %9 : vector<1x640xf32> to vector<8x640xf32>
    %206 = arith.mulf %204, %205 : vector<8x640xf32>
    %207 = vector.broadcast %10 : vector<1x640xf32> to vector<8x640xf32>
    %208 = arith.addf %206, %207 : vector<8x640xf32>
    %209 = vector.extract_strided_slice %208 {offsets = [0, 0], sizes = [8, 160], strides = [1, 1]} : vector<8x640xf32> to vector<8x160xf32>
    %210 = vector.extract_strided_slice %208 {offsets = [0, 160], sizes = [8, 160], strides = [1, 1]} : vector<8x640xf32> to vector<8x160xf32>
    %211 = vector.extract_strided_slice %208 {offsets = [0, 320], sizes = [8, 160], strides = [1, 1]} : vector<8x640xf32> to vector<8x160xf32>
    %212 = vector.extract_strided_slice %208 {offsets = [0, 480], sizes = [8, 160], strides = [1, 1]} : vector<8x640xf32> to vector<8x160xf32>
    %213 = arith.mulf %210, %193 : vector<8x160xf32>
    %214 = arith.mulf %209, %211 : vector<8x160xf32>
    %215 = arith.addf %213, %214 : vector<8x160xf32>
    %216 = math.tanh %215 : vector<8x160xf32>
    %217 = arith.mulf %212, %216 : vector<8x160xf32>
    %c32_i32_59 = arith.constant 32 : i32
    %218 = vector.broadcast %c32_i32_59 : i32 to vector<8x160xi32>
    %219 = arith.cmpi sge, %11, %218 : vector<8x160xi32>
    %220 = arith.select %219, %217, %195 : vector<8x160xi1>, vector<8x160xf32>
    %221 = arith.select %219, %215, %193 : vector<8x160xi1>, vector<8x160xf32>
    %222 = vector.extract_strided_slice %220 {offsets = [0, 128], sizes = [8, 32], strides = [1, 1]} : vector<8x160xf32> to vector<8x32xf32>
    %c32_60 = arith.constant 32 : index
    %c0_61 = arith.constant 0 : index
    %223 = vector.load %arg14[%c32_60, %c0_61] : memref<64x32xf32, #tpu.memory_space<vmem>>, vector<8x32xf32>
    tpu.vector_store %arg14[%c32_60, %c0_61], %222 {strides = array<i32>} : memref<64x32xf32, #tpu.memory_space<vmem>>, vector<8x32xf32>,
    %c56_62 = arith.constant 56 : index
    %c0_63 = arith.constant 0 : index
    %224 = vector.load %arg13[%c56_62, %c0_63] : memref<64x640xf32, #tpu.memory_space<vmem>>, vector<8x640xf32>
    %c0_64 = arith.constant 0 : index
    %c0_65 = arith.constant 0 : index
    %225 = vector.load %arg5[%c0_64, %c0_65] : memref<160x640xf32, #tpu.memory_space<vmem>>, vector<160x640xf32>
    %cst_66 = arith.constant dense<0.000000e+00> : vector<8x640xf32>
    %226 = tpu.matmul %220, %225, %cst_66 {dimension_numbers = #tpu.dot_dimension_numbers<[1], [0], [0], [1], [0, 0, 1, 1], [], []>} : vector<8x160xf32>, vector<160x640xf32>, vector<8x640xf32> -> vector<8x640xf32>
    %227 = arith.addf %224, %226 : vector<8x640xf32>
    %228 = vector.broadcast %9 : vector<1x640xf32> to vector<8x640xf32>
    %229 = arith.mulf %227, %228 : vector<8x640xf32>
    %230 = math.tanh %229 : vector<8x640xf32>
    %231 = vector.broadcast %9 : vector<1x640xf32> to vector<8x640xf32>
    %232 = arith.mulf %230, %231 : vector<8x640xf32>
    %233 = vector.broadcast %10 : vector<1x640xf32> to vector<8x640xf32>
    %234 = arith.addf %232, %233 : vector<8x640xf32>
    %235 = vector.extract_strided_slice %234 {offsets = [0, 0], sizes = [8, 160], strides = [1, 1]} : vector<8x640xf32> to vector<8x160xf32>
    %236 = vector.extract_strided_slice %234 {offsets = [0, 160], sizes = [8, 160], strides = [1, 1]} : vector<8x640xf32> to vector<8x160xf32>
    %237 = vector.extract_strided_slice %234 {offsets = [0, 320], sizes = [8, 160], strides = [1, 1]} : vector<8x640xf32> to vector<8x160xf32>
    %238 = vector.extract_strided_slice %234 {offsets = [0, 480], sizes = [8, 160], strides = [1, 1]} : vector<8x640xf32> to vector<8x160xf32>
    %239 = arith.mulf %236, %221 : vector<8x160xf32>
    %240 = arith.mulf %235, %237 : vector<8x160xf32>
    %241 = arith.addf %239, %240 : vector<8x160xf32>
    %242 = math.tanh %241 : vector<8x160xf32>
    %243 = arith.mulf %238, %242 : vector<8x160xf32>
    %c64_i32_67 = arith.constant 64 : i32
    %244 = vector.broadcast %c64_i32_67 : i32 to vector<8x160xi32>
    %245 = arith.cmpi sge, %11, %244 : vector<8x160xi32>
    %246 = arith.select %245, %243, %220 : vector<8x160xi1>, vector<8x160xf32>
    %247 = arith.select %245, %241, %221 : vector<8x160xi1>, vector<8x160xf32>
    %248 = vector.extract_strided_slice %246 {offsets = [0, 128], sizes = [8, 32], strides = [1, 1]} : vector<8x160xf32> to vector<8x32xf32>
    %c40_68 = arith.constant 40 : index
    %c0_69 = arith.constant 0 : index
    %249 = vector.load %arg14[%c40_68, %c0_69] : memref<64x32xf32, #tpu.memory_space<vmem>>, vector<8x32xf32>
    tpu.vector_store %arg14[%c40_68, %c0_69], %248 {strides = array<i32>} : memref<64x32xf32, #tpu.memory_space<vmem>>, vector<8x32xf32>,
    %c56_70 = arith.constant 56 : index
    %c0_71 = arith.constant 0 : index
    %250 = vector.load %arg13[%c56_70, %c0_71] : memref<64x640xf32, #tpu.memory_space<vmem>>, vector<8x640xf32>
    %c0_72 = arith.constant 0 : index
    %c0_73 = arith.constant 0 : index
    %251 = vector.load %arg5[%c0_72, %c0_73] : memref<160x640xf32, #tpu.memory_space<vmem>>, vector<160x640xf32>
    %cst_74 = arith.constant dense<0.000000e+00> : vector<8x640xf32>
    %252 = tpu.matmul %246, %251, %cst_74 {dimension_numbers = #tpu.dot_dimension_numbers<[1], [0], [0], [1], [0, 0, 1, 1], [], []>} : vector<8x160xf32>, vector<160x640xf32>, vector<8x640xf32> -> vector<8x640xf32>
    %253 = arith.addf %250, %252 : vector<8x640xf32>
    %254 = vector.broadcast %9 : vector<1x640xf32> to vector<8x640xf32>
    %255 = arith.mulf %253, %254 : vector<8x640xf32>
    %256 = math.tanh %255 : vector<8x640xf32>
    %257 = vector.broadcast %9 : vector<1x640xf32> to vector<8x640xf32>
    %258 = arith.mulf %256, %257 : vector<8x640xf32>
    %259 = vector.broadcast %10 : vector<1x640xf32> to vector<8x640xf32>
    %260 = arith.addf %258, %259 : vector<8x640xf32>
    %261 = vector.extract_strided_slice %260 {offsets = [0, 0], sizes = [8, 160], strides = [1, 1]} : vector<8x640xf32> to vector<8x160xf32>
    %262 = vector.extract_strided_slice %260 {offsets = [0, 160], sizes = [8, 160], strides = [1, 1]} : vector<8x640xf32> to vector<8x160xf32>
    %263 = vector.extract_strided_slice %260 {offsets = [0, 320], sizes = [8, 160], strides = [1, 1]} : vector<8x640xf32> to vector<8x160xf32>
    %264 = vector.extract_strided_slice %260 {offsets = [0, 480], sizes = [8, 160], strides = [1, 1]} : vector<8x640xf32> to vector<8x160xf32>
    %265 = arith.mulf %262, %247 : vector<8x160xf32>
    %266 = arith.mulf %261, %263 : vector<8x160xf32>
    %267 = arith.addf %265, %266 : vector<8x160xf32>
    %268 = math.tanh %267 : vector<8x160xf32>
    %269 = arith.mulf %264, %268 : vector<8x160xf32>
    %c96_i32_75 = arith.constant 96 : i32
    %270 = vector.broadcast %c96_i32_75 : i32 to vector<8x160xi32>
    %271 = arith.cmpi sge, %11, %270 : vector<8x160xi32>
    %272 = arith.select %271, %269, %246 : vector<8x160xi1>, vector<8x160xf32>
    %273 = arith.select %271, %267, %247 : vector<8x160xi1>, vector<8x160xf32>
    %274 = vector.extract_strided_slice %272 {offsets = [0, 128], sizes = [8, 32], strides = [1, 1]} : vector<8x160xf32> to vector<8x32xf32>
    %c48_76 = arith.constant 48 : index
    %c0_77 = arith.constant 0 : index
    %275 = vector.load %arg14[%c48_76, %c0_77] : memref<64x32xf32, #tpu.memory_space<vmem>>, vector<8x32xf32>
    tpu.vector_store %arg14[%c48_76, %c0_77], %274 {strides = array<i32>} : memref<64x32xf32, #tpu.memory_space<vmem>>, vector<8x32xf32>,
    %c56_78 = arith.constant 56 : index
    %c0_79 = arith.constant 0 : index
    %276 = vector.load %arg13[%c56_78, %c0_79] : memref<64x640xf32, #tpu.memory_space<vmem>>, vector<8x640xf32>
    %c0_80 = arith.constant 0 : index
    %c0_81 = arith.constant 0 : index
    %277 = vector.load %arg5[%c0_80, %c0_81] : memref<160x640xf32, #tpu.memory_space<vmem>>, vector<160x640xf32>
    %cst_82 = arith.constant dense<0.000000e+00> : vector<8x640xf32>
    %278 = tpu.matmul %272, %277, %cst_82 {dimension_numbers = #tpu.dot_dimension_numbers<[1], [0], [0], [1], [0, 0, 1, 1], [], []>} : vector<8x160xf32>, vector<160x640xf32>, vector<8x640xf32> -> vector<8x640xf32>
    %279 = arith.addf %276, %278 : vector<8x640xf32>
    %280 = vector.broadcast %9 : vector<1x640xf32> to vector<8x640xf32>
    %281 = arith.mulf %279, %280 : vector<8x640xf32>
    %282 = math.tanh %281 : vector<8x640xf32>
    %283 = vector.broadcast %9 : vector<1x640xf32> to vector<8x640xf32>
    %284 = arith.mulf %282, %283 : vector<8x640xf32>
    %285 = vector.broadcast %10 : vector<1x640xf32> to vector<8x640xf32>
    %286 = arith.addf %284, %285 : vector<8x640xf32>
    %287 = vector.extract_strided_slice %286 {offsets = [0, 0], sizes = [8, 160], strides = [1, 1]} : vector<8x640xf32> to vector<8x160xf32>
    %288 = vector.extract_strided_slice %286 {offsets = [0, 160], sizes = [8, 160], strides = [1, 1]} : vector<8x640xf32> to vector<8x160xf32>
    %289 = vector.extract_strided_slice %286 {offsets = [0, 320], sizes = [8, 160], strides = [1, 1]} : vector<8x640xf32> to vector<8x160xf32>
    %290 = vector.extract_strided_slice %286 {offsets = [0, 480], sizes = [8, 160], strides = [1, 1]} : vector<8x640xf32> to vector<8x160xf32>
    %291 = arith.mulf %288, %273 : vector<8x160xf32>
    %292 = arith.mulf %287, %289 : vector<8x160xf32>
    %293 = arith.addf %291, %292 : vector<8x160xf32>
    %294 = math.tanh %293 : vector<8x160xf32>
    %295 = arith.mulf %290, %294 : vector<8x160xf32>
    %c128_i32_83 = arith.constant 128 : i32
    %296 = vector.broadcast %c128_i32_83 : i32 to vector<8x160xi32>
    %297 = arith.cmpi sge, %11, %296 : vector<8x160xi32>
    %298 = arith.select %297, %295, %272 : vector<8x160xi1>, vector<8x160xf32>
    %299 = arith.select %297, %293, %273 : vector<8x160xi1>, vector<8x160xf32>
    %300 = vector.extract_strided_slice %298 {offsets = [0, 128], sizes = [8, 32], strides = [1, 1]} : vector<8x160xf32> to vector<8x32xf32>
    %c56_84 = arith.constant 56 : index
    %c0_85 = arith.constant 0 : index
    %301 = vector.load %arg14[%c56_84, %c0_85] : memref<64x32xf32, #tpu.memory_space<vmem>>, vector<8x32xf32>
    tpu.vector_store %arg14[%c56_84, %c0_85], %300 {strides = array<i32>} : memref<64x32xf32, #tpu.memory_space<vmem>>, vector<8x32xf32>,
    %c0_86 = arith.constant 0 : index
    %c0_87 = arith.constant 0 : index
    %302 = vector.load %arg14[%c0_86, %c0_87] : memref<64x32xf32, #tpu.memory_space<vmem>>, vector<64x32xf32>
    %c0_88 = arith.constant 0 : index
    %c0_89 = arith.constant 0 : index
    %303 = vector.load %arg8[%c0_88, %c0_89] : memref<32x128xf32, #tpu.memory_space<vmem>>, vector<32x128xf32>
    %cst_90 = arith.constant dense<0.000000e+00> : vector<64x128xf32>
    %304 = tpu.matmul %302, %303, %cst_90 {dimension_numbers = #tpu.dot_dimension_numbers<[1], [0], [0], [1], [0, 0, 1, 1], [], []>} : vector<64x32xf32>, vector<32x128xf32>, vector<64x128xf32> -> vector<64x128xf32>
    %c0_91 = arith.constant 0 : index
    %c0_92 = arith.constant 0 : index
    %305 = vector.load %arg9[%c0_91, %c0_92] : memref<1x128xf32, #tpu.memory_space<vmem>>, vector<1x128xf32>
    %306 = vector.broadcast %305 : vector<1x128xf32> to vector<64x128xf32>
    %307 = arith.addf %304, %306 : vector<64x128xf32>
    %308 = vector.extract_strided_slice %307 {offsets = [0, 0], sizes = [8, 128], strides = [1, 1]} : vector<64x128xf32> to vector<8x128xf32>
    %c0_93 = arith.constant 0 : index
    %c0_94 = arith.constant 0 : index
    %309 = vector.load %arg10[%c0_93, %c0_94] : memref<8x1024xf32, #tpu.memory_space<vmem>>, vector<8x128xf32>
    tpu.vector_store %arg10[%c0_93, %c0_94], %308 {strides = array<i32>} : memref<8x1024xf32, #tpu.memory_space<vmem>>, vector<8x128xf32>,
    %310 = vector.extract_strided_slice %307 {offsets = [8, 0], sizes = [8, 128], strides = [1, 1]} : vector<64x128xf32> to vector<8x128xf32>
    %c0_95 = arith.constant 0 : index
    %c128 = arith.constant 128 : index
    %311 = vector.load %arg10[%c0_95, %c128] : memref<8x1024xf32, #tpu.memory_space<vmem>>, vector<8x128xf32>
    tpu.vector_store %arg10[%c0_95, %c128], %310 {strides = array<i32>} : memref<8x1024xf32, #tpu.memory_space<vmem>>, vector<8x128xf32>,
    %312 = vector.extract_strided_slice %307 {offsets = [16, 0], sizes = [8, 128], strides = [1, 1]} : vector<64x128xf32> to vector<8x128xf32>
    %c0_96 = arith.constant 0 : index
    %c256 = arith.constant 256 : index
    %313 = vector.load %arg10[%c0_96, %c256] : memref<8x1024xf32, #tpu.memory_space<vmem>>, vector<8x128xf32>
    tpu.vector_store %arg10[%c0_96, %c256], %312 {strides = array<i32>} : memref<8x1024xf32, #tpu.memory_space<vmem>>, vector<8x128xf32>,
    %314 = vector.extract_strided_slice %307 {offsets = [24, 0], sizes = [8, 128], strides = [1, 1]} : vector<64x128xf32> to vector<8x128xf32>
    %c0_97 = arith.constant 0 : index
    %c384 = arith.constant 384 : index
    %315 = vector.load %arg10[%c0_97, %c384] : memref<8x1024xf32, #tpu.memory_space<vmem>>, vector<8x128xf32>
    tpu.vector_store %arg10[%c0_97, %c384], %314 {strides = array<i32>} : memref<8x1024xf32, #tpu.memory_space<vmem>>, vector<8x128xf32>,
    %316 = vector.extract_strided_slice %307 {offsets = [32, 0], sizes = [8, 128], strides = [1, 1]} : vector<64x128xf32> to vector<8x128xf32>
    %c0_98 = arith.constant 0 : index
    %c512 = arith.constant 512 : index
    %317 = vector.load %arg10[%c0_98, %c512] : memref<8x1024xf32, #tpu.memory_space<vmem>>, vector<8x128xf32>
    tpu.vector_store %arg10[%c0_98, %c512], %316 {strides = array<i32>} : memref<8x1024xf32, #tpu.memory_space<vmem>>, vector<8x128xf32>,
    %318 = vector.extract_strided_slice %307 {offsets = [40, 0], sizes = [8, 128], strides = [1, 1]} : vector<64x128xf32> to vector<8x128xf32>
    %c0_99 = arith.constant 0 : index
    %c640 = arith.constant 640 : index
    %319 = vector.load %arg10[%c0_99, %c640] : memref<8x1024xf32, #tpu.memory_space<vmem>>, vector<8x128xf32>
    tpu.vector_store %arg10[%c0_99, %c640], %318 {strides = array<i32>} : memref<8x1024xf32, #tpu.memory_space<vmem>>, vector<8x128xf32>,
    %320 = vector.extract_strided_slice %307 {offsets = [48, 0], sizes = [8, 128], strides = [1, 1]} : vector<64x128xf32> to vector<8x128xf32>
    %c0_100 = arith.constant 0 : index
    %c768 = arith.constant 768 : index
    %321 = vector.load %arg10[%c0_100, %c768] : memref<8x1024xf32, #tpu.memory_space<vmem>>, vector<8x128xf32>
    tpu.vector_store %arg10[%c0_100, %c768], %320 {strides = array<i32>} : memref<8x1024xf32, #tpu.memory_space<vmem>>, vector<8x128xf32>,
    %322 = vector.extract_strided_slice %307 {offsets = [56, 0], sizes = [8, 128], strides = [1, 1]} : vector<64x128xf32> to vector<8x128xf32>
    %c0_101 = arith.constant 0 : index
    %c896 = arith.constant 896 : index
    %323 = vector.load %arg10[%c0_101, %c896] : memref<8x1024xf32, #tpu.memory_space<vmem>>, vector<8x128xf32>
    tpu.vector_store %arg10[%c0_101, %c896], %322 {strides = array<i32>} : memref<8x1024xf32, #tpu.memory_space<vmem>>, vector<8x128xf32>,
    %324 = vector.extract_strided_slice %298 {offsets = [0, 0], sizes = [8, 32], strides = [1, 1]} : vector<8x160xf32> to vector<8x32xf32>
    %c0_102 = arith.constant 0 : index
    %c0_103 = arith.constant 0 : index
    %c0_104 = arith.constant 0 : index
    %325 = vector.load %arg11[%c0_102, %c0_103, %c0_104] : memref<5x8x32xf32, #tpu.memory_space<vmem>>, vector<1x8x32xf32>
    %326 = vector.shape_cast %325 : vector<1x8x32xf32> to vector<8x32xf32>
    %327 = vector.shape_cast %324 : vector<8x32xf32> to vector<1x8x32xf32>
    tpu.vector_store %arg11[%c0_102, %c0_103, %c0_104], %327 {strides = array<i32>} : memref<5x8x32xf32, #tpu.memory_space<vmem>>, vector<1x8x32xf32>,
    %328 = vector.extract_strided_slice %299 {offsets = [0, 0], sizes = [8, 32], strides = [1, 1]} : vector<8x160xf32> to vector<8x32xf32>
    %c0_105 = arith.constant 0 : index
    %c0_106 = arith.constant 0 : index
    %c0_107 = arith.constant 0 : index
    %329 = vector.load %arg12[%c0_105, %c0_106, %c0_107] : memref<5x8x32xf32, #tpu.memory_space<vmem>>, vector<1x8x32xf32>
    %330 = vector.shape_cast %329 : vector<1x8x32xf32> to vector<8x32xf32>
    %331 = vector.shape_cast %328 : vector<8x32xf32> to vector<1x8x32xf32>
    tpu.vector_store %arg12[%c0_105, %c0_106, %c0_107], %331 {strides = array<i32>} : memref<5x8x32xf32, #tpu.memory_space<vmem>>, vector<1x8x32xf32>,
    %332 = vector.extract_strided_slice %298 {offsets = [0, 32], sizes = [8, 32], strides = [1, 1]} : vector<8x160xf32> to vector<8x32xf32>
    %c1 = arith.constant 1 : index
    %c0_108 = arith.constant 0 : index
    %c0_109 = arith.constant 0 : index
    %333 = vector.load %arg11[%c1, %c0_108, %c0_109] : memref<5x8x32xf32, #tpu.memory_space<vmem>>, vector<1x8x32xf32>
    %334 = vector.shape_cast %333 : vector<1x8x32xf32> to vector<8x32xf32>
    %335 = vector.shape_cast %332 : vector<8x32xf32> to vector<1x8x32xf32>
    tpu.vector_store %arg11[%c1, %c0_108, %c0_109], %335 {strides = array<i32>} : memref<5x8x32xf32, #tpu.memory_space<vmem>>, vector<1x8x32xf32>,
    %336 = vector.extract_strided_slice %299 {offsets = [0, 32], sizes = [8, 32], strides = [1, 1]} : vector<8x160xf32> to vector<8x32xf32>
    %c1_110 = arith.constant 1 : index
    %c0_111 = arith.constant 0 : index
    %c0_112 = arith.constant 0 : index
    %337 = vector.load %arg12[%c1_110, %c0_111, %c0_112] : memref<5x8x32xf32, #tpu.memory_space<vmem>>, vector<1x8x32xf32>
    %338 = vector.shape_cast %337 : vector<1x8x32xf32> to vector<8x32xf32>
    %339 = vector.shape_cast %336 : vector<8x32xf32> to vector<1x8x32xf32>
    tpu.vector_store %arg12[%c1_110, %c0_111, %c0_112], %339 {strides = array<i32>} : memref<5x8x32xf32, #tpu.memory_space<vmem>>, vector<1x8x32xf32>,
    %340 = vector.extract_strided_slice %298 {offsets = [0, 64], sizes = [8, 32], strides = [1, 1]} : vector<8x160xf32> to vector<8x32xf32>
    %c2 = arith.constant 2 : index
    %c0_113 = arith.constant 0 : index
    %c0_114 = arith.constant 0 : index
    %341 = vector.load %arg11[%c2, %c0_113, %c0_114] : memref<5x8x32xf32, #tpu.memory_space<vmem>>, vector<1x8x32xf32>
    %342 = vector.shape_cast %341 : vector<1x8x32xf32> to vector<8x32xf32>
    %343 = vector.shape_cast %340 : vector<8x32xf32> to vector<1x8x32xf32>
    tpu.vector_store %arg11[%c2, %c0_113, %c0_114], %343 {strides = array<i32>} : memref<5x8x32xf32, #tpu.memory_space<vmem>>, vector<1x8x32xf32>,
    %344 = vector.extract_strided_slice %299 {offsets = [0, 64], sizes = [8, 32], strides = [1, 1]} : vector<8x160xf32> to vector<8x32xf32>
    %c2_115 = arith.constant 2 : index
    %c0_116 = arith.constant 0 : index
    %c0_117 = arith.constant 0 : index
    %345 = vector.load %arg12[%c2_115, %c0_116, %c0_117] : memref<5x8x32xf32, #tpu.memory_space<vmem>>, vector<1x8x32xf32>
    %346 = vector.shape_cast %345 : vector<1x8x32xf32> to vector<8x32xf32>
    %347 = vector.shape_cast %344 : vector<8x32xf32> to vector<1x8x32xf32>
    tpu.vector_store %arg12[%c2_115, %c0_116, %c0_117], %347 {strides = array<i32>} : memref<5x8x32xf32, #tpu.memory_space<vmem>>, vector<1x8x32xf32>,
    %348 = vector.extract_strided_slice %298 {offsets = [0, 96], sizes = [8, 32], strides = [1, 1]} : vector<8x160xf32> to vector<8x32xf32>
    %c3 = arith.constant 3 : index
    %c0_118 = arith.constant 0 : index
    %c0_119 = arith.constant 0 : index
    %349 = vector.load %arg11[%c3, %c0_118, %c0_119] : memref<5x8x32xf32, #tpu.memory_space<vmem>>, vector<1x8x32xf32>
    %350 = vector.shape_cast %349 : vector<1x8x32xf32> to vector<8x32xf32>
    %351 = vector.shape_cast %348 : vector<8x32xf32> to vector<1x8x32xf32>
    tpu.vector_store %arg11[%c3, %c0_118, %c0_119], %351 {strides = array<i32>} : memref<5x8x32xf32, #tpu.memory_space<vmem>>, vector<1x8x32xf32>,
    %352 = vector.extract_strided_slice %299 {offsets = [0, 96], sizes = [8, 32], strides = [1, 1]} : vector<8x160xf32> to vector<8x32xf32>
    %c3_120 = arith.constant 3 : index
    %c0_121 = arith.constant 0 : index
    %c0_122 = arith.constant 0 : index
    %353 = vector.load %arg12[%c3_120, %c0_121, %c0_122] : memref<5x8x32xf32, #tpu.memory_space<vmem>>, vector<1x8x32xf32>
    %354 = vector.shape_cast %353 : vector<1x8x32xf32> to vector<8x32xf32>
    %355 = vector.shape_cast %352 : vector<8x32xf32> to vector<1x8x32xf32>
    tpu.vector_store %arg12[%c3_120, %c0_121, %c0_122], %355 {strides = array<i32>} : memref<5x8x32xf32, #tpu.memory_space<vmem>>, vector<1x8x32xf32>,
    %356 = vector.extract_strided_slice %298 {offsets = [0, 128], sizes = [8, 32], strides = [1, 1]} : vector<8x160xf32> to vector<8x32xf32>
    %c4 = arith.constant 4 : index
    %c0_123 = arith.constant 0 : index
    %c0_124 = arith.constant 0 : index
    %357 = vector.load %arg11[%c4, %c0_123, %c0_124] : memref<5x8x32xf32, #tpu.memory_space<vmem>>, vector<1x8x32xf32>
    %358 = vector.shape_cast %357 : vector<1x8x32xf32> to vector<8x32xf32>
    %359 = vector.shape_cast %356 : vector<8x32xf32> to vector<1x8x32xf32>
    tpu.vector_store %arg11[%c4, %c0_123, %c0_124], %359 {strides = array<i32>} : memref<5x8x32xf32, #tpu.memory_space<vmem>>, vector<1x8x32xf32>,
    %360 = vector.extract_strided_slice %299 {offsets = [0, 128], sizes = [8, 32], strides = [1, 1]} : vector<8x160xf32> to vector<8x32xf32>
    %c4_125 = arith.constant 4 : index
    %c0_126 = arith.constant 0 : index
    %c0_127 = arith.constant 0 : index
    %361 = vector.load %arg12[%c4_125, %c0_126, %c0_127] : memref<5x8x32xf32, #tpu.memory_space<vmem>>, vector<1x8x32xf32>
    %362 = vector.shape_cast %361 : vector<1x8x32xf32> to vector<8x32xf32>
    %363 = vector.shape_cast %360 : vector<8x32xf32> to vector<1x8x32xf32>
    tpu.vector_store %arg12[%c4_125, %c0_126, %c0_127], %363 {strides = array<i32>} : memref<5x8x32xf32, #tpu.memory_space<vmem>>, vector<1x8x32xf32>,
    return
  }
  func.func @transform_0(%arg0: i32) -> (i32, i32) {
    %c0_i32 = arith.constant 0 : i32
    %c0_i32_0 = arith.constant 0 : i32
    %c0_i32_1 = arith.constant 0 : i32
    return %c0_i32, %c0_i32_0 : i32, i32
  }
  func.func @transform_1(%arg0: i32) -> (i32, i32) {
    %c0_i32 = arith.constant 0 : i32
    %c0_i32_0 = arith.constant 0 : i32
    %c0_i32_1 = arith.constant 0 : i32
    return %c0_i32, %c0_i32_0 : i32, i32
  }
  func.func @transform_2(%arg0: i32) -> (i32, i32) {
    %c0_i32 = arith.constant 0 : i32
    %c0_i32_0 = arith.constant 0 : i32
    %c0_i32_1 = arith.constant 0 : i32
    return %c0_i32, %c0_i32_0 : i32, i32
  }
  func.func @transform_3(%arg0: i32) -> (i32, i32) {
    %c0_i32 = arith.constant 0 : i32
    %c0_i32_0 = arith.constant 0 : i32
    %c0_i32_1 = arith.constant 0 : i32
    return %c0_i32, %c0_i32_0 : i32, i32
  }
  func.func @transform_4(%arg0: i32) -> (i32, i32) {
    %c0_i32 = arith.constant 0 : i32
    %c0_i32_0 = arith.constant 0 : i32
    %c0_i32_1 = arith.constant 0 : i32
    return %c0_i32, %c0_i32_0 : i32, i32
  }
  func.func @transform_5(%arg0: i32) -> (i32, i32) {
    %c0_i32 = arith.constant 0 : i32
    %c0_i32_0 = arith.constant 0 : i32
    %c0_i32_1 = arith.constant 0 : i32
    return %c0_i32, %c0_i32_0 : i32, i32
  }
  func.func @transform_6(%arg0: i32) -> (i32, i32) {
    %c0_i32 = arith.constant 0 : i32
    %c0_i32_0 = arith.constant 0 : i32
    %c0_i32_1 = arith.constant 0 : i32
    return %c0_i32, %c0_i32_0 : i32, i32
  }
  func.func @transform_7(%arg0: i32) -> (i32, i32) {
    %c0_i32 = arith.constant 0 : i32
    %c0_i32_0 = arith.constant 0 : i32
    %c0_i32_1 = arith.constant 0 : i32
    return %c0_i32, %c0_i32_0 : i32, i32
  }
  func.func @transform_8(%arg0: i32) -> (i32, i32) {
    %c0_i32 = arith.constant 0 : i32
    %c0_i32_0 = arith.constant 0 : i32
    %c0_i32_1 = arith.constant 0 : i32
    return %c0_i32, %c0_i32_0 : i32, i32
  }
  func.func @transform_9(%arg0: i32) -> (i32, i32) {
    %c0_i32 = arith.constant 0 : i32
    %c0_i32_0 = arith.constant 0 : i32
    %c0_i32_1 = arith.constant 0 : i32
    return %c0_i32, %c0_i32_0 : i32, i32
  }
  func.func @transform_10(%arg0: i32) -> (i32, i32, i32) {
    %c0_i32 = arith.constant 0 : i32
    %c0_i32_0 = arith.constant 0 : i32
    %c0_i32_1 = arith.constant 0 : i32
    %c0_i32_2 = arith.constant 0 : i32
    return %c0_i32, %c0_i32_0, %c0_i32_1 : i32, i32, i32
  }
  func.func @transform_11(%arg0: i32) -> (i32, i32, i32) {
    %c0_i32 = arith.constant 0 : i32
    %c0_i32_0 = arith.constant 0 : i32
    %c0_i32_1 = arith.constant 0 : i32
    %c0_i32_2 = arith.constant 0 : i32
    return %c0_i32, %c0_i32_0, %c0_i32_1 : i32, i32, i32
  }
}

</mosaic_0001>

<bundles_post_ra>
// kernel: char_lstm_forward.1
= control target key start
LH: loop header
LB: loop body
LE: loop exit
PB: predicated region body
PF: predicated region fallthrough
CT: control target
= control target key end

     0   :  { %17 = vsyncpa [#allocation5], 0  ;;  %s5372_s20 = smov [#allocation4]   ;;  %s5373_s22 = smov 640   ;;  %s8657_s0 = inlined_call_operand.vmem [shape: s32[64,1], index: 0, kind: input, shape index: {}]   ;;  %s8658_s1 = inlined_call_operand.vmem [shape: f32[8,160], index: 1, kind: input, shape index: {}]   ;;  %s8659_s2 = inlined_call_operand.vmem [shape: f32[8,160], index: 2, kind: input, shape index: {}]   ;;  %s8660_s3 = inlined_call_operand.vmem [shape: f32[16,640], index: 3, kind: input, shape index: {}]   ;;  %s8661_s4 = inlined_call_operand.hbm [shape: f32[160,640], index: 4, kind: input, shape index: {}]   ;;  %s8662_s5 = inlined_call_operand.vmem [shape: f32[1,640], index: 5, kind: input, shape index: {}]   ;;  %s8663_s6 = inlined_call_operand.vmem [shape: f32[1,640], index: 6, kind: input, shape index: {}]   ;;  %s8664_s7 = inlined_call_operand.vmem [shape: f32[32,128], index: 7, kind: input, shape index: {}]   ;;  %s8665_s8 = inlined_call_operand.vmem [shape: f32[1,128], index: 8, kind: input, shape index: {}]   ;;  %s8666_s9 = inlined_call_operand.vmem [shape: f32[8,1024], index: 9, kind: output, shape index: {0}]   ;;  %s8667_s10 = inlined_call_operand.vmem [shape: f32[5,8,32], index: 10, kind: output, shape index: {1}]   ;;  %s8668_s11 = inlined_call_operand.vmem [shape: f32[5,8,32], index: 11, kind: output, shape index: {2}]  }
   0x1   :  { %s30_s19 = sshll.u32 %s8661_s4, 4  ;;  %s32_s21 = sshll.u32 %s5372_s20, 4  ;;  %s31_s19 = int_to_ptr.hbm [resolvable:$true] %s30_s19  ;;  %s33_s21 = int_to_ptr.vmem [resolvable:$true] %s32_s21 }
   0x2   :  { %s5374_s23 = smov 40  }
   0x3   :  { %38 = dma.hbm_to_vmem [thread:$0]  %s31_s19, 12800, %s33_s21, [#allocation5], %s5373_s22, %s5373_s22, %s5374_s23  }
   0x4   :  { %5370 = dma.done.wait [#allocation5], 12800  }
   0x5   :  { %5371 = vsyncadd [#allocation5], 4294954496  ;;  %v5375_v0 = vmov 0   ;;  %v53_v1 = vld [vmem:[%s8657_s0 + $0x10] sm:$0xff]  ;;  %v51_v2 = vld [vmem:[%s8657_s0] sm:$0xff]  ;;  %v59_v15 = vlaneseq  ;;  %vm119_vm0 = vcmask 130048  }
   0x6   :  { %5053 = vset.pattern.permute.xlu1 %v5375_v0  ;;  %5052 = vset.pattern.permute.xlu0 %v5375_v0  ;;  %v58_v3 = vld [vmem:[%s8657_s0 + $0x38] sm:$0xff]  ;;  %v114_v4 = vld [vmem:[%s8660_s3 + $0x28] sm:$0xff]  ;;  %v55_v7 = vld [vmem:[%s8657_s0 + $0x20] sm:$0xff]  ;;  %v5376_v20 = vmov 0.0   ;;  %vm501_vm9 = vcmask 261120   ;;  %s5377_s24 = smov 32  }
   0x7   :  { %5054 = vset.pattern.permute.xlu2 %v5375_v0  ;;  %68 = vperm.xlu1 %5053, %v53_v1   ;;  %v54_v5 = vld [vmem:[%s8657_s0 + $0x18] sm:$0xff]  ;;  %v52_v6 = vld [vmem:[%s8657_s0 + $0x8] sm:$0xff]  ;;  %v57_v8 = vld [vmem:[%s8657_s0 + $0x30] sm:$0xff]  ;;  %v5488_v17 = vand.u32 127, %v59_v15  ;;  %vm769_vm10 = vcmask 523264   ;;  %vm818_vm11 = vcmask 785408  }
   0x8   :  { %62 = vperm.xlu0 %5052, %v51_v2   ;;  %83 = vperm.xlu2 %5054, %v58_v3   ;;  %v56_v9 = vld [vmem:[%s8657_s0 + $0x28] sm:$0xff]  ;;  %v109_v10 = vld [vmem:[%s8660_s3] sm:$0xff]  ;;  %v115_v11 = vld [vmem:[%s8660_s3 + $0x30] sm:$0xff] }
   0x9   :  { %5038 = vmatpush.msra.mxu2 %v114_v4  ;;  %158 = vmatpush.msra.mxu0 %v114_v4  ;;  %v110_v12 = vld [vmem:[%s8660_s3 + $0x8] sm:$0xff]  ;;  %v117_v13 = vld [vmem:[%s8660_s3 + $0x40] sm:$0xff]  ;;  %v112_v14 = vld [vmem:[%s8660_s3 + $0x18] sm:$0xff]  ;;  %8901 = vst [vmem:[#allocation7_spill] sm:$0xff] %v5488_v17 }
   0xa   :  { %199 = vmatpush.msra.mxu1 %v115_v11  ;;  %281 = vmatpush.msra.mxu3 %v117_v13  ;;  %v118_v16 = vld [vmem:[%s8660_s3 + $0x48] sm:$0xff]  ;;  %v116_v19 = vld [vmem:[%s8660_s3 + $0x38] sm:$0xff]  ;;  %v111_v22 = vld [vmem:[%s8660_s3 + $0x10] sm:$0xff] }
   0xb   :  { %5039 = vmatpush.msra.mxu2 %v109_v10  ;;  %159 = vmatpush.msra.mxu0 %v109_v10  ;;  %v5504_v23 = vld [vmem:[#allocation4 + $0x260] sm:$0xff]  ;;  %v5509_v25 = vld [vmem:[#allocation4 + $0x238] sm:$0xff]  ;;  %v5512_v26 = vld [vmem:[#allocation4 + $0x210] sm:$0xff] }
   0xc   :  { %200 = vmatpush.msra.mxu1 %v110_v12  ;;  %282 = vmatpush.msra.mxu3 %v112_v14  ;;  %v113_v24 = vld [vmem:[%s8660_s3 + $0x20] sm:$0xff]  ;;  %v5528_v29 = vld [vmem:[#allocation4 + $0x1e8] sm:$0xff]  ;;  %v5530_v30 = vld [vmem:[#allocation4 + $0x2f8] sm:$0xff] }
   0xd   :  { %5040 = vmatpush.msrb.mxu2 %v115_v11  ;;  %322 = vmatpush.msrb.mxu0 %v118_v16  ;;  %v5532_v31 = vld [vmem:[#allocation4 + $0x1c0] sm:$0xff]  ;;  %v5536_v32 = vld [vmem:[#allocation4 + $0x2d0] sm:$0xff]  ;;  %v5538_v33 = vld [vmem:[#allocation4 + $0x198] sm:$0xff] }
   0xe   :  { %5042 = vmatpush.msrb.mxu1 %v118_v16  ;;  %545 = vmatpush.msrb.mxu3 %v5504_v23  ;;  %v5540_v34 = vld [vmem:[#allocation4 + $0x2a8] sm:$0xff]  ;;  %v5550_v37 = vld [vmem:[#allocation4 + $0x170] sm:$0xff]  ;;  %v5556_v38 = vld [vmem:[#allocation4 + $0x280] sm:$0xff] }
   0xf   :  { %71 = vperm.xlu1 %5053, %v54_v5   ;;  %5041 = vmatpush.msrb.mxu2 %v110_v12  ;;  %v5562_v40 = vld [vmem:[#allocation4 + $0x148] sm:$0xff]  ;;  %v5569_v42 = vld [vmem:[#allocation4 + $0x240] sm:$0xff]  ;;  %v5575_v44 = vld [vmem:[#allocation4 + $0x218] sm:$0xff] }
  0x10   :  { %65 = vperm.xlu0 %5052, %v52_v6   ;;  %74 = vperm.xlu2 %5054, %v55_v7   ;;  %v5564_v41 = vld [vmem:[#allocation4 + $0x268] sm:$0xff]  ;;  %v5572_v43 = vld [vmem:[#allocation4 + $0x120] sm:$0xff]  ;;  %v5582_v46 = vld [vmem:[#allocation4 + $0xf8] sm:$0xff] }
  0x11   :  { %5043 = vmatpush.msrb.mxu1 %v113_v24  ;;  %323 = vmatpush.msrb.mxu0 %v113_v24  ;;  %v5585_v47 = vld [vmem:[#allocation4 + $0x1f0] sm:$0xff]  ;;  %v5597_v49 = vld [vmem:[#allocation4 + $0x1c8] sm:$0xff]  ;;  %v5599_v50 = vld [vmem:[#allocation4 + $0x258] sm:$0xff] }
  0x12   :  { %546 = vmatpush.msrb.mxu3 %v5509_v25  ;;  %v5595_v48 = vld [vmem:[#allocation4 + $0xd0] sm:$0xff]  ;;  %8902 = vst [vmem:[#allocation8_spill] sm:$0xff] %v5599_v50  ;;  %v5605_v53 = vld [vmem:[#allocation4 + $0xa8] sm:$0xff]  ;;  %v5608_v54 = vld [vmem:[#allocation4 + $0x1a0] sm:$0xff] }
  0x13   :  { %v5603_v51 = vld [vmem:[#allocation4 + $0x230] sm:$0xff]  ;;  %v5614_v55 = vld [vmem:[#allocation4 + $0x208] sm:$0xff]  ;;  %v5623_v57 = vld [vmem:[#allocation4 + $0x80] sm:$0xff] }
  0x14   :  { %547 = vmatpush.msrb.mxu3 %v5512_v26  ;;  %8903 = vst [vmem:[#allocation9_spill] sm:$0xff] %v5603_v51  ;;  %v5625_v58 = vld [vmem:[#allocation4 + $0x178] sm:$0xff]  ;;  %v5633_v59 = vld [vmem:[#allocation4 + $0x1e0] sm:$0xff]  ;;  %v5641_v62 = vld [vmem:[#allocation4 + $0x150] sm:$0xff] }
  0x15   :  { %8904 = vst [vmem:[#allocation10_spill] sm:$0xff] %v5614_v55  ;;  %v5639_v61 = vld [vmem:[#allocation4 + $0x58] sm:$0xff]  ;;  %v5647_v0 = vld [vmem:[#allocation4 + $0x30] sm:$0xff]  ;;  %v5650_v1 = vld [vmem:[#allocation4 + $0x128] sm:$0xff] }
  0x16   :  { %548 = vmatpush.msrb.mxu3 %v5528_v29  ;;  %8905 = vst [vmem:[#allocation11_spill] sm:$0xff] %v5633_v59  ;;  %v5645_v63 = vld [vmem:[#allocation4 + $0x1b8] sm:$0xff]  ;;  %v5656_v2 = vld [vmem:[#allocation4 + $0x190] sm:$0xff]  ;;  %v5665_v4 = vld [vmem:[#allocation4 + $0x8] sm:$0xff] }
  0x17   :  { %80 = vperm.xlu1 %5053, %v57_v8   ;;  %8906 = vst [vmem:[#allocation12_spill] sm:$0xff] %v5645_v63  ;;  %v5667_v5 = vld [vmem:[#allocation4 + $0x100] sm:$0xff]  ;;  %v5675_v6 = vld [vmem:[#allocation4 + $0x308] sm:$0xff]  ;;  %v5693_v12 = vld [vmem:[#allocation4 + $0xb0] sm:$0xff] }
  0x18   :  { %77 = vperm.xlu0 %5052, %v56_v9   ;;  %549 = vmatpush.msrb.mxu3 %v5532_v31  ;;  %8907 = vst [vmem:[#allocation13_spill] sm:$0xff] %v5656_v2  ;;  %v5677_v7 = vld [vmem:[#allocation4 + $0x168] sm:$0xff]  ;;  %v5683_v9 = vld [vmem:[#allocation4 + $0xd8] sm:$0xff]  ;;  %v5687_v10 = vld [vmem:[#allocation4 + $0x2e0] sm:$0xff] }
  0x19   :  { %8908 = vst [vmem:[#allocation14_spill] sm:$0xff] %v5677_v7  ;;  %v5689_v11 = vld [vmem:[#allocation4 + $0x140] sm:$0xff]  ;;  %v5697_v13 = vld [vmem:[#allocation4 + $0x2b8] sm:$0xff]  ;;  %v5710_v16 = vld [vmem:[#allocation4 + $0x290] sm:$0xff] }
  0x1a   :  { %550 = vmatpush.msrb.mxu3 %v5538_v33  ;;  %8909 = vst [vmem:[#allocation15_spill] sm:$0xff] %v5689_v11  ;;  %v5699_v14 = vld [vmem:[#allocation4 + $0x118] sm:$0xff]  ;;  %v5725_v24 = vld [vmem:[#allocation4 + $0x60] sm:$0xff] }
  0x1b   :  { %8910 = vst [vmem:[#allocation16_spill] sm:$0xff] %v5699_v14 }
  0x1c   :  { %551 = vmatpush.msrb.mxu3 %v5550_v37 }
  0x1e   :  { %552 = vmatpush.msrb.mxu3 %v5562_v40 }
  0x20   :  { %553 = vmatpush.msrb.mxu3 %v5572_v43 }
  0x22   :  { %554 = vmatpush.msrb.mxu3 %v5582_v46 }
  0x24   :  { %555 = vmatpush.msrb.mxu3 %v5595_v48 }
  0x26   :  { %556 = vmatpush.msrb.mxu3 %v5605_v53 }
  0x28   :  { %557 = vmatpush.msrb.mxu3 %v5623_v57 }
  0x2a   :  { %558 = vmatpush.msrb.mxu3 %v5639_v61 }
  0x2c   :  { %559 = vmatpush.msrb.mxu3 %v5647_v0 }
  0x2e   :  { %560 = vmatpush.msrb.mxu3 %v5665_v4 }
  0x62   :  { %v84_v18 = vpop.permute.xlu2 %83 }
  0x63   :  { %vm92_vm1 = vcmp.eq.s32.totalorder %v5488_v17, %v84_v18  ;;  %v5712_v18 = vld [vmem:[#allocation4 + $0x88] sm:$0xff] }
  0x64   :  { %v5495_v21 = vsel %vm92_vm1, 1.0, %v5376_v20 }
  0x65   :  { %4929 = vmatmul.msk.f32.vlgmr.msra.gmra.mxu2 %vm119_vm0, %v5495_v21 }
  0x66   :  { %240 = vmatpush.msra.mxu2 %v116_v19  ;;  %v5719_v19 = vld [vmem:[#allocation4 + $0xf0] sm:$0xff] }
  0x67   :  { %8911 = vst [vmem:[#allocation17_spill] sm:$0xff] %v5719_v19 }
  0x68   :  { %241 = vmatpush.msra.mxu2 %v111_v22 }
  0x6a   :  { %v75_v60 = vpop.permute.xlu2 %74 }
  0x6b   :  { %vm89_vm6 = vcmp.eq.s32.totalorder %v5488_v17, %v75_v60  ;;  %v5745_v60 = vld [vmem:[#allocation4 + $0x10] sm:$0xff] }
  0x6c   :  { %v5663_v3 = vsel %vm89_vm6, 1.0, %v5376_v20 }
  0x6d   :  { %4937 = vmatmul.msk.f32.vlgmr.msrb.gmra.mxu2 %vm119_vm0, %v5495_v21 }
  0x6e   :  { %537 = vmatpush.msrb.mxu2 %v5530_v30 }
  0x70   :  { %538 = vmatpush.msrb.mxu2 %v5536_v32 }
  0x72   :  { %539 = vmatpush.msrb.mxu2 %v5540_v34 }
  0x74   :  { %540 = vmatpush.msrb.mxu2 %v5556_v38 }
  0x79   :  { %v69_v39 = vpop.permute.xlu1 %68 }
  0x7a   :  { %v63_v27 = vpop.permute.xlu0 %62  ;;  %vm87_vm4 = vcmp.eq.s32.totalorder %v5488_v17, %v69_v39  ;;  %v5737_v39 = vld [vmem:[#allocation4 + $0xa0] sm:$0xff] }
  0x7b   :  { %vm85_vm2 = vcmp.eq.s32.totalorder %v5488_v17, %v63_v27  ;;  %v5578_v45 = vsel %vm87_vm4, 1.0, %v5376_v20  ;;  %v5729_v27 = vld [vmem:[#allocation4 + $0xc8] sm:$0xff]  ;;  %8913 = vst [vmem:[#allocation19_spill] sm:$0xff] %v5737_v39 }
  0x7c   :  { %v5518_v28 = vsel %vm85_vm2, 1.0, %v5376_v20  ;;  %8912 = vst [vmem:[#allocation18_spill] sm:$0xff] %v5729_v27 }
  0x7d   :  { %4922 = vmatmul.msk.f32.vlgmr.msra.gmra.mxu0 %vm119_vm0, %v5518_v28  ;;  %4930 = vmatmul.msk.f32.vlgmr.msra.gmra.mxu1 %vm119_vm0, %v5518_v28 }
  0x7e   :  { %4938 = vmatmul.msk.f32.vlgmr.msra.gmra.mxu2 %vm119_vm0, %v5518_v28  ;;  %4946 = vmatmul.msk.f32.vlgmr.msra.gmra.mxu3 %vm119_vm0, %v5518_v28 }
  0x7f   :  { %585 = vmatpush.msra.mxu2 %v5564_v41  ;;  %505 = vmatpush.msra.mxu1 %v5599_v50 }
  0x80   :  { %832 = vmatpush.msra.mxu0 %v5599_v50  ;;  %617 = vmatpush.msra.mxu3 %v5675_v6  ;;  %v5850_v50 = vld [vmem:[#allocation4 + $0x278] sm:$0xff] }
  0x81   :  { %586 = vmatpush.msra.mxu2 %v5569_v42  ;;  %v72_v52 = vpop.permute.xlu1 %71  ;;  %506 = vmatpush.msra.mxu1 %v5603_v51  ;;  %8926 = vst [vmem:[#allocation32_spill] sm:$0xff] %v5850_v50 }
  0x82   :  { %v66_v35 = vpop.permute.xlu0 %65  ;;  %vm88_vm5 = vcmp.eq.s32.totalorder %v5488_v17, %v72_v52  ;;  %833 = vmatpush.msra.mxu0 %v5603_v51  ;;  %618 = vmatpush.msra.mxu3 %v5687_v10  ;;  %v5843_v51 = vld [vmem:[#allocation4 + $0x2c8] sm:$0xff] }
  0x83   :  { %vm86_vm3 = vcmp.eq.s32.totalorder %v5488_v17, %v66_v35  ;;  %587 = vmatpush.msra.mxu2 %v5575_v44  ;;  %v5621_v56 = vsel %vm88_vm5, 1.0, %v5376_v20  ;;  %507 = vmatpush.msra.mxu1 %v5614_v55  ;;  %v5732_v35 = vld [vmem:[#allocation4 + $0x38] sm:$0xff] }
  0x84   :  { %v5548_v36 = vsel %vm86_vm3, 1.0, %v5376_v20  ;;  %834 = vmatpush.msra.mxu0 %v5614_v55  ;;  %619 = vmatpush.msra.mxu3 %v5697_v13  ;;  %v5841_v55 = vld [vmem:[#allocation4 + $0x1d0] sm:$0xff] }
  0x85   :  { %4923 = vmatmul.msk.f32.gmra.mxu0 %vm119_vm0, %v5548_v36  ;;  %4931 = vmatmul.msk.f32.gmra.mxu1 %vm119_vm0, %v5548_v36  ;;  %8925 = vst [vmem:[#allocation31_spill] sm:$0xff] %v5841_v55 }
  0x86   :  { %4939 = vmatmul.msk.f32.gmra.mxu2 %vm119_vm0, %v5548_v36  ;;  %4947 = vmatmul.msk.f32.gmra.mxu3 %vm119_vm0, %v5548_v36 }
  0x87   :  { %588 = vmatpush.msra.mxu2 %v5585_v47  ;;  %508 = vmatpush.msra.mxu1 %v5633_v59 }
  0x88   :  { %835 = vmatpush.msra.mxu0 %v5633_v59  ;;  %620 = vmatpush.msra.mxu3 %v5710_v16  ;;  %v5836_v59 = vld [vmem:[#allocation4 + $0x298] sm:$0xff] }
  0x89   :  { %589 = vmatpush.msra.mxu2 %v5597_v49  ;;  %509 = vmatpush.msra.mxu1 %v5645_v63  ;;  %v81_v22 = vpop.permute.xlu1 %80  ;;  %8924 = vst [vmem:[#allocation30_spill] sm:$0xff] %v5836_v59 }
  0x8a   :  { %836 = vmatpush.msra.mxu0 %v5645_v63  ;;  %v78_v8 = vpop.permute.xlu0 %77  ;;  %vm91_vm8 = vcmp.eq.s32.totalorder %v5488_v17, %v81_v22  ;;  %v5763_v22 = vld [vmem:[#allocation4 + $0x28] sm:$0xff]  ;;  %v5827_v63 = vld [vmem:[#allocation4 + $0x2c0] sm:$0xff] }
  0x8b   :  { %590 = vmatpush.msra.mxu2 %v5608_v54  ;;  %510 = vmatpush.msra.mxu1 %v5656_v2  ;;  %vm90_vm7 = vcmp.eq.s32.totalorder %v5488_v17, %v78_v8  ;;  %v5743_v52 = vsel %vm91_vm8, 1.0, %v5376_v20  ;;  %v5748_v8 = vld [vmem:[#allocation4 + $0x78] sm:$0xff]  ;;  %8916 = vst [vmem:[#allocation22_spill] sm:$0xff] %v5763_v22  ;;  %v5852_v17 = vld [vmem:[#allocation4 + $0x2a0] sm:$0xff] }
  0x8c   :  { %837 = vmatpush.msra.mxu0 %v5656_v2  ;;  %v5707_v15 = vsel %vm90_vm7, 1.0, %v5376_v20  ;;  %8914 = vst [vmem:[#allocation20_spill] sm:$0xff] %v5748_v8  ;;  %v5759_v20 = vld [vmem:[#allocation4 + $0x50] sm:$0xff]  ;;  %v5825_v2 = vld [vmem:[#allocation4 + $0x318] sm:$0xff] }
  0x8d   :  { %4924 = vmatmul.msk.f32.gmra.mxu0 %vm119_vm0, %v5578_v45  ;;  %4932 = vmatmul.msk.f32.gmra.mxu1 %vm119_vm0, %v5578_v45  ;;  %8915 = vst [vmem:[#allocation21_spill] sm:$0xff] %v5759_v20 }
  0x8e   :  { %4940 = vmatmul.msk.f32.gmra.mxu2 %vm119_vm0, %v5578_v45  ;;  %4948 = vmatmul.msk.f32.gmra.mxu3 %vm119_vm0, %v5578_v45  ;;  %8922 = vst [vmem:[#allocation28_spill] sm:$0xff] %v5827_v63 }
  0x8f   :  { %591 = vmatpush.msra.mxu2 %v5625_v58  ;;  %511 = vmatpush.msra.mxu1 %v5677_v7 }
  0x90   :  { %838 = vmatpush.msra.mxu0 %v5677_v7  ;;  %v5823_v7 = vld [vmem:[#allocation4 + $0x220] sm:$0xff] }
  0x91   :  { %592 = vmatpush.msra.mxu2 %v5641_v62  ;;  %512 = vmatpush.msra.mxu1 %v5689_v11  ;;  %8921 = vst [vmem:[#allocation27_spill] sm:$0xff] %v5823_v7 }
  0x92   :  { %839 = vmatpush.msra.mxu0 %v5689_v11  ;;  %v5819_v11 = vld [vmem:[#allocation4 + $0x2e8] sm:$0xff] }
  0x93   :  { %593 = vmatpush.msra.mxu2 %v5650_v1  ;;  %513 = vmatpush.msra.mxu1 %v5699_v14  ;;  %8920 = vst [vmem:[#allocation26_spill] sm:$0xff] %v5819_v11 }
  0x94   :  { %840 = vmatpush.msra.mxu0 %v5699_v14  ;;  %v5806_v14 = vld [vmem:[#allocation4 + $0x310] sm:$0xff] }
  0x95   :  { %4925 = vmatmul.msk.f32.gmra.mxu0 %vm119_vm0, %v5621_v56  ;;  %4933 = vmatmul.msk.f32.gmra.mxu1 %vm119_vm0, %v5621_v56 }
  0x96   :  { %4941 = vmatmul.msk.f32.gmra.mxu2 %vm119_vm0, %v5621_v56  ;;  %4949 = vmatmul.msk.f32.gmra.mxu3 %vm119_vm0, %v5621_v56 }
  0x97   :  { %594 = vmatpush.msra.mxu2 %v5667_v5  ;;  %514 = vmatpush.msra.mxu1 %v5719_v19 }
  0x98   :  { %841 = vmatpush.msra.mxu0 %v5719_v19  ;;  %v5776_v19 = vld [vmem:[#allocation4 + $0x300] sm:$0xff] }
  0x99   :  { %595 = vmatpush.msra.mxu2 %v5683_v9  ;;  %515 = vmatpush.msra.mxu1 %v5729_v27 }
  0x9a   :  { %842 = vmatpush.msra.mxu0 %v5729_v27  ;;  %v5769_v27 = vld [vmem:[#allocation4] sm:$0xff] }
  0x9b   :  { %596 = vmatpush.msra.mxu2 %v5693_v12  ;;  %516 = vmatpush.msra.mxu1 %v5737_v39  ;;  %8917 = vst [vmem:[#allocation23_spill] sm:$0xff] %v5769_v27 }
  0x9c   :  { %843 = vmatpush.msra.mxu0 %v5737_v39  ;;  %v5804_v39 = vld [vmem:[#allocation4 + $0x248] sm:$0xff] }
  0x9d   :  { %4926 = vmatmul.msk.f32.gmra.mxu0 %vm119_vm0, %v5663_v3  ;;  %4934 = vmatmul.msk.f32.gmra.mxu1 %vm119_vm0, %v5663_v3  ;;  %8919 = vst [vmem:[#allocation25_spill] sm:$0xff] %v5804_v39 }
  0x9e   :  { %4942 = vmatmul.msk.f32.gmra.mxu2 %vm119_vm0, %v5663_v3  ;;  %4950 = vmatmul.msk.f32.gmra.mxu3 %vm119_vm0, %v5663_v3 }
  0x9f   :  { %597 = vmatpush.msra.mxu2 %v5712_v18  ;;  %517 = vmatpush.msra.mxu1 %v5748_v8 }
  0xa0   :  { %844 = vmatpush.msra.mxu0 %v5748_v8  ;;  %v5783_v8 = vld [vmem:[#allocation4 + $0x2d8] sm:$0xff] }
  0xa1   :  { %598 = vmatpush.msra.mxu2 %v5725_v24  ;;  %518 = vmatpush.msra.mxu1 %v5759_v20 }
  0xa2   :  { %845 = vmatpush.msra.mxu0 %v5759_v20  ;;  %v5789_v20 = vld [vmem:[#allocation4 + $0x270] sm:$0xff] }
  0xa3   :  { %599 = vmatpush.msra.mxu2 %v5732_v35  ;;  %519 = vmatpush.msra.mxu1 %v5763_v22  ;;  %8918 = vst [vmem:[#allocation24_spill] sm:$0xff] %v5789_v20 }
  0xa4   :  { %846 = vmatpush.msra.mxu0 %v5763_v22  ;;  %v5802_v22 = vld [vmem:[%s8658_s1] sm:$0xff] }
  0xa5   :  { %4927 = vmatmul.msk.f32.gmra.mxu0 %vm119_vm0, %v5707_v15  ;;  %4935 = vmatmul.msk.f32.gmra.mxu1 %vm119_vm0, %v5707_v15 }
  0xa6   :  { %4943 = vmatmul.msk.f32.gmra.mxu2 %vm119_vm0, %v5707_v15  ;;  %4951 = vmatmul.msk.f32.gmra.mxu3 %vm119_vm0, %v5707_v15 }
  0xa7   :  { %600 = vmatpush.msra.mxu2 %v5745_v60  ;;  %520 = vmatpush.msra.mxu1 %v5769_v27 }
  0xa8   :  { %847 = vmatpush.msra.mxu0 %v5769_v27  ;;  %v5809_v27 = vld [vmem:[#allocation4 + $0x288] sm:$0xff] }
  0xad   :  { %4928 = vmatmul.msk.f32.gmra.mxu0 %vm119_vm0, %v5743_v52  ;;  %4936 = vmatmul.msk.f32.gmra.mxu1 %vm119_vm0, %v5743_v52 }
  0xae   :  { %4944 = vmatmul.msk.f32.gmra.mxu2 %vm119_vm0, %v5743_v52  ;;  %4952 = vmatmul.msk.f32.gmra.mxu3 %vm119_vm0, %v5743_v52 }
  0xb5   :  { %4954 = vmatmul.msk.f32.vlgmr.msrb.gmra.mxu0 %vm119_vm0, %v5518_v28  ;;  %4958 = vmatmul.msk.f32.vlgmr.msrb.gmra.mxu1 %vm119_vm0, %v5663_v3  ;;  %v5787_v28 = vld [vmem:[#allocation4 + $0x2b0] sm:$0xff]  ;;  %v5797_v3 = vld [vmem:[%s8658_s1 + $0x8] sm:$0xff] }
  0xb6   :  { %4945 = vmatmul.msk.f32.gmra.mxu2 %vm119_vm0, %v5495_v21  ;;  %4953 = vmatmul.msk.f32.gmra.mxu3 %vm119_vm0, %v5495_v21 }
  0xb7   :  { %577 = vmatpush.msrb.mxu1 %v5776_v19  ;;  %952 = vmatpush.msrb.mxu0 %v5789_v20 }
  0xb9   :  { %578 = vmatpush.msrb.mxu1 %v5783_v8  ;;  %953 = vmatpush.msrb.mxu0 %v5804_v39 }
  0xbb   :  { %579 = vmatpush.msrb.mxu1 %v5787_v28  ;;  %954 = vmatpush.msrb.mxu0 %v5823_v7 }
  0xbd   :  { %4955 = vmatmul.msk.f32.gmra.mxu0 %vm119_vm0, %v5548_v36  ;;  %4959 = vmatmul.msk.f32.gmra.mxu1 %vm119_vm0, %v5707_v15  ;;  %v5832_v36 = vld [vmem:[#allocation4 + $0x1f8] sm:$0xff]  ;;  %v5834_v15 = vld [vmem:[#allocation4 + $0x2f0] sm:$0xff] }
  0xbe   :  { %4962 = vmatmul.msk.f32.vlgmr.msrb.gmra.mxu2 %vm501_vm9, %v5797_v3  ;;  %561 = vmatmul.f32.vlgmr.msrb.gmra.mxu3 %v5802_v22  ;;  %8923 = vst [vmem:[#allocation29_spill] sm:$0xff] %v5832_v36 }
  0xbf   :  { %657 = vmatpush.msrb.mxu3 %v5806_v14  ;;  %580 = vmatpush.msrb.mxu1 %v5809_v27 }
  0xc0   :  { %697 = vmatpush.msrb.mxu2 %v5825_v2  ;;  %955 = vmatpush.msrb.mxu0 %v5832_v36 }
  0xc1   :  { %658 = vmatpush.msrb.mxu3 %v5819_v11  ;;  %v5873_v11 = vld [vmem:[#allocation4 + $0x200] sm:$0xff] }
  0xc2   :  { %698 = vmatpush.msrb.mxu2 %v5834_v15  ;;  %956 = vmatpush.msrb.mxu0 %v5841_v55  ;;  %8929 = vst [vmem:[#allocation35_spill] sm:$0xff] %v5873_v11 }
  0xc3   :  { %659 = vmatpush.msrb.mxu3 %v5827_v63  ;;  %v5859_v63 = vld [vmem:[#allocation4 + $0x250] sm:$0xff] }
  0xc4   :  { %699 = vmatpush.msrb.mxu2 %v5843_v51  ;;  %8927 = vst [vmem:[#allocation33_spill] sm:$0xff] %v5859_v63 }
  0xc5   :  { %660 = vmatpush.msrb.mxu3 %v5836_v59  ;;  %4956 = vmatmul.msk.f32.gmra.mxu0 %vm119_vm0, %v5578_v45  ;;  %v5863_v59 = vld [vmem:[#allocation4 + $0x1a8] sm:$0xff] }
  0xc6   :  { %4960 = vmatmul.msk.f32.gmra.mxu1 %vm119_vm0, %v5743_v52  ;;  %601 = vmatmul.f32.vlgmr.msra.gmra.mxu2 %v5802_v22  ;;  %v5866_v45 = vld [vmem:[#allocation4 + $0x228] sm:$0xff]  ;;  %v5870_v52 = vld [vmem:[#allocation4 + $0x180] sm:$0xff] }
  0xc7   :  { %4964 = vmatmul.msk.f32.vlgmr.msra.gmra.mxu3 %vm501_vm9, %v5797_v3  ;;  %700 = vmatpush.msrb.mxu2 %v5852_v17  ;;  %8928 = vst [vmem:[#allocation34_spill] sm:$0xff] %v5866_v45 }
  0xc8   :  { %665 = vmatpush.msra.mxu3 %v5850_v50  ;;  %957 = vmatpush.msrb.mxu0 %v5863_v59 }
  0xc9   :  { %872 = vmatpush.msra.mxu2 %v5504_v23  ;;  %v5880_v23 = vld [vmem:[#allocation4 + $0x1d8] sm:$0xff] }
  0xca   :  { %666 = vmatpush.msra.mxu3 %v5859_v63  ;;  %958 = vmatpush.msrb.mxu0 %v5870_v52  ;;  %8930 = vst [vmem:[#allocation36_spill] sm:$0xff] %v5880_v23  ;;  %v5885_v63 = vld [vmem:[#allocation4 + $0x1b0] sm:$0xff] }
  0xcb   :  { %873 = vmatpush.msra.mxu2 %v5509_v25  ;;  %8931 = vst [vmem:[#allocation37_spill] sm:$0xff] %v5885_v63  ;;  %v5892_v25 = vld [vmem:[#allocation4 + $0x158] sm:$0xff] }
  0xcc   :  { %667 = vmatpush.msra.mxu3 %v5866_v45  ;;  %959 = vmatpush.msrb.mxu0 %v5892_v25 }
  0xcd   :  { %874 = vmatpush.msra.mxu2 %v5512_v26  ;;  %4957 = vmatmul.msk.f32.gmra.mxu0 %vm119_vm0, %v5621_v56  ;;  %v5895_v26 = vld [vmem:[#allocation4 + $0x188] sm:$0xff]  ;;  %v5902_v56 = vld [vmem:[#allocation4 + $0x160] sm:$0xff] }
  0xce   :  { %668 = vmatpush.msra.mxu3 %v5873_v11  ;;  %4961 = vmatmul.msk.f32.gmra.mxu1 %vm119_vm0, %v5495_v21  ;;  %8932 = vst [vmem:[#allocation38_spill] sm:$0xff] %v5895_v26  ;;  %v5899_v21 = vld [vmem:[#allocation4 + $0x130] sm:$0xff] }
  0xcf   :  { %4965 = vmatmul.msk.f32.vlgmr.msrb.gmra.mxu3 %vm501_vm9, %v5797_v3  ;;  %4966 = vmatmul.msk.f32.vlgmr.msrb.gmra.mxu2 %vm501_vm9, %v5797_v3  ;;  %8933 = vst [vmem:[#allocation39_spill] sm:$0xff] %v5902_v56 }
  0xd0   :  { %669 = vmatpush.msra.mxu3 %v5880_v23  ;;  %875 = vmatpush.msra.mxu2 %v5528_v29  ;;  %v5906_v23 = vld [vmem:[#allocation4 + $0x108] sm:$0xff]  ;;  %v5909_v29 = vld [vmem:[#allocation4 + $0x138] sm:$0xff] }
  0xd1   :  { %960 = vmatpush.msrb.mxu0 %v5899_v21  ;;  %8934 = vst [vmem:[#allocation40_spill] sm:$0xff] %v5909_v29 }
  0xd2   :  { %670 = vmatpush.msra.mxu3 %v5885_v63  ;;  %876 = vmatpush.msra.mxu2 %v5532_v31  ;;  %v5917_v31 = vld [vmem:[%s8659_s2] sm:$0xff] }
  0xd3   :  { %961 = vmatpush.msrb.mxu0 %v5906_v23  ;;  %8935 = vst [vmem:[#allocation41_spill] sm:$0xff] %v5917_v31  ;;  %754 = vrot.lane.b32.xlu1 %v5917_v31, %s5377_s24  ;;  %v5937_v31 = vld [vmem:[#allocation4 + $0xc0] sm:$0xff] }
  0xd4   :  { %671 = vmatpush.msra.mxu3 %v5895_v26  ;;  %877 = vmatpush.msra.mxu2 %v5538_v33  ;;  %v5920_v26 = vld [vmem:[#allocation4 + $0x110] sm:$0xff]  ;;  %v5925_v33 = vld [vmem:[#allocation4 + $0xe0] sm:$0xff]  ;;  %8938 = vst [vmem:[#allocation44_spill] sm:$0xff] %v5937_v31 }
  0xd5   :  { %8936 = vst [vmem:[#allocation42_spill] sm:$0xff] %v5920_v26  ;;  %962 = vmatpush.msrb.mxu0 %v5925_v33 }
  0xd6   :  { %672 = vmatpush.msra.mxu3 %v5902_v56  ;;  %521 = vmatmul.f32.vlgmr.msra.gmra.mxu1 %v5802_v22  ;;  %v5929_v56 = vld [vmem:[#allocation4 + $0xe8] sm:$0xff] }
  0xd7   :  { %625 = vmatpush.msra.mxu1 %v5789_v20  ;;  %878 = vmatpush.msra.mxu2 %v5550_v37  ;;  %8937 = vst [vmem:[#allocation43_spill] sm:$0xff] %v5929_v56  ;;  %v5933_v20 = vld [vmem:[#allocation4 + $0xb8] sm:$0xff]  ;;  %v5941_v37 = vld [vmem:[#allocation4 + $0x90] sm:$0xff] }
  0xd8   :  { %673 = vmatpush.msra.mxu3 %v5909_v29  ;;  %963 = vmatpush.msrb.mxu0 %v5933_v20 }
  0xd9   :  { %626 = vmatpush.msra.mxu1 %v5804_v39  ;;  %879 = vmatpush.msra.mxu2 %v5562_v40  ;;  %v5945_v39 = vld [vmem:[#allocation4 + $0x98] sm:$0xff]  ;;  %v5952_v40 = vld [vmem:[#allocation4 + $0x70] sm:$0xff] }
  0xda   :  { %674 = vmatpush.msra.mxu3 %v5920_v26  ;;  %8939 = vst [vmem:[#allocation45_spill] sm:$0xff] %v5945_v39  ;;  %964 = vmatpush.msrb.mxu0 %v5941_v37 }
  0xdb   :  { %627 = vmatpush.msra.mxu1 %v5823_v7  ;;  %880 = vmatpush.msra.mxu2 %v5572_v43  ;;  %8940 = vst [vmem:[#allocation46_spill] sm:$0xff] %v5952_v40  ;;  %v5954_v7 = vld [vmem:[#allocation4 + $0x68] sm:$0xff] }
  0xdc   :  { %675 = vmatpush.msra.mxu3 %v5929_v56  ;;  %965 = vmatpush.msrb.mxu0 %v5954_v7  ;;  %v5960_v43 = vld [vmem:[#allocation4 + $0x48] sm:$0xff] }
  0xdd   :  { %628 = vmatpush.msra.mxu1 %v5832_v36  ;;  %881 = vmatpush.msra.mxu2 %v5582_v46  ;;  %8941 = vst [vmem:[#allocation47_spill] sm:$0xff] %v5960_v43  ;;  %v5962_v36 = vld [vmem:[#allocation4 + $0x40] sm:$0xff]  ;;  %v5970_v46 = vld [vmem:[#allocation4 + $0x18] sm:$0xff] }
  0xde   :  { %676 = vmatpush.msra.mxu3 %v5937_v31  ;;  %4963 = vmatmul.msk.f32.vlgmr.msrb.gmra.mxu1 %vm501_vm9, %v5797_v3 }
  0xdf   :  { %629 = vmatpush.msra.mxu1 %v5841_v55  ;;  %882 = vmatpush.msra.mxu2 %v5595_v48  ;;  %v5968_v55 = vld [vmem:[#allocation4 + $0x20] sm:$0xff] }
  0xe0   :  { %677 = vmatpush.msra.mxu3 %v5945_v39  ;;  %966 = vmatpush.msrb.mxu0 %v5962_v36  ;;  %8942 = vst [vmem:[#allocation48_spill] sm:$0xff] %v5968_v55 }
  0xe1   :  { %630 = vmatpush.msra.mxu1 %v5863_v59  ;;  %883 = vmatpush.msra.mxu2 %v5605_v53 }
  0xe2   :  { %678 = vmatpush.msra.mxu3 %v5952_v40  ;;  %967 = vmatpush.msrb.mxu0 %v5970_v46 }
  0xe3   :  { %631 = vmatpush.msra.mxu1 %v5870_v52  ;;  %884 = vmatpush.msra.mxu2 %v5623_v57 }
  0xe4   :  { %679 = vmatpush.msra.mxu3 %v5960_v43 }
  0xe5   :  { %632 = vmatpush.msra.mxu1 %v5892_v25  ;;  %885 = vmatpush.msra.mxu2 %v5639_v61 }
  0xe6   :  { %680 = vmatpush.msra.mxu3 %v5968_v55 }
  0xe7   :  { %681 = vmatmul.f32.vlgmr.msra.gmra.mxu3 %v5802_v22  ;;  %633 = vmatpush.msra.mxu1 %v5899_v21 }
  0xe8   :  { %912 = vmatpush.msrb.mxu3 %v5564_v41  ;;  %886 = vmatpush.msra.mxu2 %v5647_v0  ;;  %v5989_v48 = vpop.f32.mrf.mxu2  ;;  %v8948_v0 = vld [vmem:[#allocation28_spill] sm:$0xff] }
  0xe9   :  { %634 = vmatpush.msra.mxu1 %v5906_v23  ;;  %8943 = vst [vmem:[#allocation49_spill] sm:$0xff] %v5989_v48 }
  0xea   :  { %913 = vmatpush.msrb.mxu3 %v5569_v42  ;;  %887 = vmatpush.msra.mxu2 %v5665_v4 }
  0xeb   :  { %635 = vmatpush.msra.mxu1 %v5925_v33 }
  0xec   :  { %914 = vmatpush.msrb.mxu3 %v5575_v44  ;;  %1024 = vmatpush.msrb.mxu2 %v5825_v2 }
  0xed   :  { %636 = vmatpush.msra.mxu1 %v5933_v20 }
  0xee   :  { %915 = vmatpush.msrb.mxu3 %v5585_v47  ;;  %1025 = vmatpush.msrb.mxu2 %v5834_v15 }
  0xef   :  { %637 = vmatpush.msra.mxu1 %v5941_v37 }
  0xf0   :  { %916 = vmatpush.msrb.mxu3 %v5597_v49  ;;  %1026 = vmatpush.msrb.mxu2 %v5843_v51  ;;  %v6005_v41 = vpop.f32.mrf.mxu2 }
  0xf1   :  { %638 = vmatpush.msra.mxu1 %v5954_v7  ;;  %8944 = vst [vmem:[#allocation50_spill] sm:$0xff] %v6005_v41 }
  0xf2   :  { %917 = vmatpush.msrb.mxu3 %v5608_v54  ;;  %1027 = vmatpush.msrb.mxu2 %v5852_v17 }
  0xf3   :  { %639 = vmatpush.msra.mxu1 %v5962_v36 }
  0xf4   :  { %918 = vmatpush.msrb.mxu3 %v5625_v58 }
  0xf5   :  { %640 = vmatpush.msra.mxu1 %v5970_v46 }
  0xf6   :  { %641 = vmatmul.f32.vlgmr.msra.gmra.mxu1 %v5802_v22  ;;  %919 = vmatpush.msrb.mxu3 %v5641_v62 }
  0xf7   :  { %864 = vmatpush.msrb.mxu1 %v5530_v30 }
  0xf8   :  { %920 = vmatpush.msrb.mxu3 %v5650_v1 }
  0xf9   :  { %865 = vmatpush.msrb.mxu1 %v5536_v32 }
  0xfa   :  { %v6010_v42 = vpop.f32.mrf.mxu1  ;;  %921 = vmatpush.msrb.mxu3 %v5667_v5 }
  0xfb   :  { %866 = vmatpush.msrb.mxu1 %v5540_v34 }
  0xfc   :  { %922 = vmatpush.msrb.mxu3 %v5683_v9 }
  0xfd   :  { %867 = vmatpush.msrb.mxu1 %v5556_v38 }
  0xfe   :  { %923 = vmatpush.msrb.mxu3 %v5693_v12  ;;  %4967 = vmatmul.msk.f32.vlgmr.msrb.gmra.mxu1 %vm501_vm9, %v5797_v3 }
  0xff   :  { %904 = vmatpush.msra.mxu1 %v5776_v19 }
 0x100   :  { %924 = vmatpush.msrb.mxu3 %v5712_v18 }
 0x101   :  { %905 = vmatpush.msra.mxu1 %v5783_v8  ;;  %v6022_v44 = vpop.f32.mrf.mxu2  ;;  %v6024_v47 = vpop.f32.mrf.mxu3 }
 0x102   :  { %v6026_v49 = vpop.f32.mrf.mxu1  ;;  %925 = vmatpush.msrb.mxu3 %v5725_v24 }
 0x103   :  { %8945 = vst [vmem:[#allocation51_spill] sm:$0xff] %v6026_v49  ;;  %906 = vmatpush.msra.mxu1 %v5787_v28 }
 0x104   :  { %926 = vmatpush.msrb.mxu3 %v5732_v35 }
 0x105   :  { %907 = vmatpush.msra.mxu1 %v5809_v27 }
 0x106   :  { %927 = vmatpush.msrb.mxu3 %v5745_v60  ;;  %4968 = vmatmul.msk.f32.vlgmr.msra.gmra.mxu1 %vm501_vm9, %v5797_v3 }
 0x107   :  { %944 = vmatpush.msrb.mxu1 %v5675_v6 }
 0x108   :  { %1167 = vmatpush.msra.mxu3 %v5530_v30  ;;  %v8947_v30 = vld [vmem:[#allocation26_spill] sm:$0xff] }
 0x109   :  { %945 = vmatpush.msrb.mxu1 %v5687_v10  ;;  %v6038_v53 = vpop.f32.mrf.mxu2  ;;  %v6040_v57 = vpop.f32.mrf.mxu3 }
 0x10a   :  { %1168 = vmatpush.msra.mxu3 %v5536_v32  ;;  %v6044_v61 = vpop.f32.mrf.mxu1 }
 0x10b   :  { %946 = vmatpush.msrb.mxu1 %v5697_v13  ;;  %8946 = vst [vmem:[#allocation52_spill] sm:$0xff] %v6044_v61  ;;  %v8952_v61 = vld [vmem:[#allocation30_spill] sm:$0xff] }
 0x10c   :  { %1169 = vmatpush.msra.mxu3 %v5540_v34  ;;  %v8953_v34 = vld [vmem:[#allocation33_spill] sm:$0xff] }
 0x10d   :  { %947 = vmatpush.msrb.mxu1 %v5710_v16 }
 0x10e   :  { %1170 = vmatpush.msra.mxu3 %v5556_v38  ;;  %4969 = vmatmul.msk.f32.vlgmr.msrb.gmra.mxu1 %vm501_vm9, %v5797_v3 }
 0x10f   :  { %984 = vmatpush.msra.mxu1 %v5806_v14 }
 0x111   :  { %985 = vmatpush.msra.mxu1 %v8947_v30  ;;  %v6052_v48 = vpop.f32.mrf.mxu2  ;;  %v6054_v41 = vpop.f32.mrf.mxu3 }
 0x112   :  { %8949 = vst [vmem:[#allocation26_spill] sm:$0xff] %v6052_v48  ;;  %v6058_v32 = vpop.f32.mrf.mxu1  ;;  %v8958_v48 = vld [vmem:[#allocation38_spill] sm:$0xff] }
 0x113   :  { %986 = vmatpush.msra.mxu1 %v8948_v0  ;;  %8950 = vst [vmem:[#allocation28_spill] sm:$0xff] %v6054_v41 }
 0x114   :  { %8951 = vst [vmem:[#allocation53_spill] sm:$0xff] %v6058_v32  ;;  %v8957_v32 = vld [vmem:[#allocation36_spill] sm:$0xff] }
 0x115   :  { %987 = vmatpush.msra.mxu1 %v8952_v61 }
 0x116   :  { %4970 = vmatmul.msk.f32.vlgmr.msra.gmra.mxu1 %vm501_vm9, %v5797_v3 }
 0x117   :  { %992 = vmatpush.msrb.mxu1 %v5850_v50 }
 0x119   :  { %993 = vmatpush.msrb.mxu1 %v8953_v34  ;;  %v6064_v38 = vpop.f32.mrf.mxu2  ;;  %v6066_v49 = vpop.f32.mrf.mxu3 }
 0x11a   :  { %8954 = vst [vmem:[#allocation30_spill] sm:$0xff] %v6064_v38  ;;  %v6069_v41 = vpop.f32.mrf.mxu1  ;;  %v8961_v38 = vld [vmem:[#allocation39_spill] sm:$0xff] }
 0x11b   :  { %994 = vmatpush.msrb.mxu1 %v5866_v45  ;;  %8955 = vst [vmem:[#allocation54_spill] sm:$0xff] %v6066_v49 }
 0x11c   :  { %8956 = vst [vmem:[#allocation55_spill] sm:$0xff] %v6069_v41 }
 0x11d   :  { %995 = vmatpush.msrb.mxu1 %v5873_v11 }
 0x11f   :  { %996 = vmatpush.msrb.mxu1 %v8957_v32 }
 0x121   :  { %997 = vmatpush.msrb.mxu1 %v5885_v63  ;;  %v6076_v34 = vpop.f32.mrf.mxu2  ;;  %v6078_v45 = vpop.f32.mrf.mxu3 }
 0x122   :  { %8959 = vst [vmem:[#allocation56_spill] sm:$0xff] %v6076_v34  ;;  %v6082_v49 = vpop.f32.mrf.mxu1  ;;  %v161_v63 = vpop.f32.mrf.mxu0 }
 0x123   :  { %998 = vmatpush.msrb.mxu1 %v8958_v48  ;;  %8960 = vst [vmem:[#allocation57_spill] sm:$0xff] %v6078_v45 }
 0x124   :  { %8962 = vst [vmem:[#allocation58_spill] sm:$0xff] %v6082_v49 }
 0x125   :  { %999 = vmatpush.msrb.mxu1 %v8961_v38 }
 0x127   :  { %1000 = vmatpush.msrb.mxu1 %v5909_v29 }
 0x129   :  { %1001 = vmatpush.msrb.mxu1 %v5920_v26  ;;  %v6086_v41 = vpop.f32.mrf.mxu2  ;;  %v6088_v32 = vpop.f32.mrf.mxu3 }
 0x12a   :  { %8963 = vst [vmem:[#allocation59_spill] sm:$0xff] %v6086_v41  ;;  %v6093_v45 = vpop.f32.mrf.mxu1 }
 0x12b   :  { %1002 = vmatpush.msrb.mxu1 %v5929_v56  ;;  %8964 = vst [vmem:[#allocation60_spill] sm:$0xff] %v6088_v32 }
 0x12c   :  { %8965 = vst [vmem:[#allocation61_spill] sm:$0xff] %v6093_v45 }
 0x12d   :  { %1003 = vmatpush.msrb.mxu1 %v5937_v31 }
 0x12f   :  { %1004 = vmatpush.msrb.mxu1 %v5945_v39 }
 0x131   :  { %1005 = vmatpush.msrb.mxu1 %v5952_v40  ;;  %v6096_v34 = vpop.f32.mrf.mxu2  ;;  %v6098_v49 = vpop.f32.mrf.mxu3 }
 0x132   :  { %8966 = vst [vmem:[#allocation62_spill] sm:$0xff] %v6096_v34  ;;  %v6104_v41 = vpop.f32.mrf.mxu1 }
 0x133   :  { %1006 = vmatpush.msrb.mxu1 %v5960_v43  ;;  %8967 = vst [vmem:[#allocation63_spill] sm:$0xff] %v6098_v49 }
 0x134   :  { %8968 = vst [vmem:[#allocation64_spill] sm:$0xff] %v6104_v41 }
 0x135   :  { %1007 = vmatpush.msrb.mxu1 %v5968_v55 }
 0x137   :  { %1247 = vmatpush.msra.mxu1 %v5675_v6  ;;  %v6116_v6 = vld [vmem:[%s8662_s5] sm:$0x1f]  ;;  %s5378_s5 = smov 64  }
 0x138   :  { %v6119_v41 = vperm.slane %v6116_v6, 2 }
 0x139   :  { %1248 = vmatpush.msra.mxu1 %v5687_v10  ;;  %v6107_v32 = vpop.f32.mrf.mxu2  ;;  %v6109_v45 = vpop.f32.mrf.mxu3 }
 0x13a   :  { %8969 = vst [vmem:[#allocation65_spill] sm:$0xff] %v6107_v32  ;;  %v6111_v40 = vpop.f32.mrf.mxu1 }
 0x13b   :  { %1249 = vmatpush.msra.mxu1 %v5697_v13  ;;  %8970 = vst [vmem:[#allocation66_spill] sm:$0xff] %v6109_v45 }
 0x13c   :  { %8971 = vst [vmem:[#allocation67_spill] sm:$0xff] %v6111_v40  ;;  %v6128_v40 = vld [vmem:[%s8663_s6] sm:$0x1f]  ;;  %s5379_s6 = smov 96  }
 0x13d   :  { %1250 = vmatpush.msra.mxu1 %v5710_v16  ;;  %8972 = vst [vmem:[#allocation68_spill] sm:$0xff] %v6119_v41  ;;  %v6131_v55 = vperm.slane %v6128_v40, 2  ;;  %v6151_v26 = vperm.slane %v6128_v40, 3 }
 0x13f   :  { %8974 = vst [vmem:[#allocation70_spill] sm:$0xff] %v6131_v55 }
 0x140   :  { %8978 = vst [vmem:[#allocation74_spill] sm:$0xff] %v6151_v26 }
 0x141   :  { %v542_v43 = vpop.f32.mrf.mxu2  ;;  %v562_v34 = vpop.f32.mrf.mxu3 }
 0x143   :  { %v6121_v16 = vpop.f32.mrf.mxu1 }
 0x144   :  { %8973 = vst [vmem:[#allocation69_spill] sm:$0xff] %v6121_v16 }
 0x149   :  { %v602_v10 = vpop.f32.mrf.mxu2 }
 0x14a   :  { %v622_v49 = vpop.f32.mrf.mxu3 }
 0x14b   :  { %v623_v13 = vadd.f32 %v622_v49, %v602_v10  ;;  %v6133_v49 = vpop.f32.mrf.mxu1 }
 0x14c   :  { %8975 = vst [vmem:[#allocation71_spill] sm:$0xff] %v6133_v49 }
 0x14d   :  { %v707_v32 = vadd.f32 %v623_v13, %v6022_v44 }
 0x14f   :  { %v723_v45 = vmul.f32 %v6119_v41, %v707_v32 }
 0x151   :  { %5076 = vtanh.f32 %v723_v45  ;;  %v6141_v45 = vld [vmem:[%s8659_s2 + $0x8] sm:$0xff] }
 0x152   :  { %8976 = vst [vmem:[#allocation72_spill] sm:$0xff] %v6141_v45  ;;  %v662_v13 = vpop.f32.mrf.mxu3 }
 0x153   :  { %v522_v44 = vpop.f32.mrf.mxu1 }
 0x157   :  { %v5077_v39 = vpop.eup %5076 }
 0x158   :  { %v733_v10 = vmul.f32 %v5077_v39, %v6119_v41  ;;  %v6146_v39 = vperm.slane %v6116_v6, 3 }
 0x15a   :  { %v749_v16 = vadd.f32 %v6131_v55, %v733_v10  ;;  %8977 = vst [vmem:[#allocation73_spill] sm:$0xff] %v6146_v39 }
 0x15b   :  { %v582_v32 = vpop.f32.mrf.mxu1 }
 0x15c   :  { %765 = vrot.lane.b32.xlu2 %v749_v16, %s5378_s5 }
 0x164   :  { %756 = vrot.lane.b32.xlu2 %v6141_v45, %s5377_s24 }
 0x173   :  { %v642_v31 = vpop.f32.mrf.mxu1 }
 0x174   :  { %v663_v49 = vadd.f32 %v662_v13, %v642_v31  ;;  %v583_v31 = vadd.f32 %v582_v32, %v562_v34  ;;  %v543_v13 = vadd.f32 %v542_v43, %v522_v44  ;;  %v6169_v43 = vperm.slane %v6128_v40, 1 }
 0x175   :  { %v6173_v34 = vperm.slane %v6128_v40, 0 }
 0x176   :  { %v708_v10 = vadd.f32 %v663_v49, %v6024_v47  ;;  %v706_v47 = vadd.f32 %v583_v31, %v6010_v42  ;;  %v6161_v49 = vperm.slane %v6116_v6, 1  ;;  %8981 = vst [vmem:[#allocation77_spill] sm:$0xff] %v6169_v43 }
 0x177   :  { %8982 = vst [vmem:[#allocation78_spill] sm:$0xff] %v6173_v34 }
 0x178   :  { %v724_v56 = vmul.f32 %v6146_v39, %v708_v10  ;;  %8979 = vst [vmem:[#allocation75_spill] sm:$0xff] %v6161_v49  ;;  %v6164_v10 = vperm.slane %v6116_v6, 0 }
 0x17a   :  { %5078 = vtanh.f32 %v724_v56  ;;  %v705_v56 = vadd.f32 %v543_v13, %v161_v63  ;;  %8980 = vst [vmem:[#allocation76_spill] sm:$0xff] %v6164_v10 }
 0x180   :  { %v5079_v29 = vpop.eup %5078 }
 0x181   :  { %v734_v38 = vmul.f32 %v5079_v29, %v6146_v39  ;;  %v722_v29 = vmul.f32 %v6161_v49, %v706_v47 }
 0x183   :  { %v6155_v48 = vadd.f32 %v6151_v26, %v734_v38  ;;  %v721_v38 = vmul.f32 %v6164_v10, %v705_v56  ;;  %5080 = vtanh.f32 %v722_v29 }
 0x185   :  { %767 = vrot.lane.b32.xlu0 %v6155_v48, %s5378_s5  ;;  %5082 = vtanh.f32 %v721_v38 }
 0x189   :  { %v5081_v11 = vpop.eup %5080 }
 0x18a   :  { %v732_v42 = vmul.f32 %v5081_v11, %v6161_v49  ;;  %v755_v11 = vpop.permute.xlu1 %754 }
 0x18b   :  { %v5083_v50 = vpop.eup %5082 }
 0x18c   :  { %v731_v63 = vmul.f32 %v5083_v50, %v6164_v10  ;;  %v748_v44 = vadd.f32 %v6169_v43, %v732_v42 }
 0x18e   :  { %v747_v13 = vadd.f32 %v6173_v34, %v731_v63  ;;  %v761_v50 = vmul.f32 %v755_v11, %v748_v44 }
 0x1b6   :  { %v766_v32 = vpop.permute.xlu2 %765 }
 0x1be   :  { %v757_v38 = vpop.permute.xlu2 %756 }
 0x1bf   :  { %v758_v49 = vsel %vm501_vm9, %v755_v11, %v757_v38 }
 0x1c0   :  { %v762_v45 = vmul.f32 %v758_v49, %v749_v16 }
 0x1f7   :  { %v768_v31 = vpop.permute.xlu0 %767 }
 0x1f8   :  { %v770_v47 = vsel %vm769_vm10, %v766_v32, %v768_v31  ;;  %v774_v56 = vmul.f32 %v768_v31, %v748_v44  ;;  %v6187_v44 = vpop.f32.mrf.mxu0 }
 0x1f9   :  { %v773_v29 = vmul.f32 %v770_v47, %v747_v13  ;;  %v682_v13 = vpop.f32.mrf.mxu3  ;;  %v702_v47 = vpop.f32.mrf.mxu2 }
 0x1fa   :  { %779 = vrot.lane.b32.xlu1 %v774_v56, %s5377_s24  ;;  %v703_v56 = vadd.f32 %v702_v47, %v682_v13 }
 0x1fb   :  { %777 = vrot.lane.b32.xlu0 %v773_v29, %s5377_s24 }
 0x200   :  { %v6189_v16 = vpop.f32.mrf.mxu0 }
 0x201   :  { %8983 = vst [vmem:[#allocation79_spill] sm:$0xff] %v6189_v16  ;;  %v9007_v16 = vld [vmem:[#allocation18_spill] sm:$0xff] }
 0x208   :  { %v6191_v49 = vpop.f32.mrf.mxu0 }
 0x209   :  { %8984 = vst [vmem:[#allocation80_spill] sm:$0xff] %v6191_v49  ;;  %v6284_v49 = vld [vmem:[#allocation4 + $0x148] sm:$0xff] }
 0x26c   :  { %v780_v10 = vpop.permute.xlu1 %779 }
 0x26d   :  { %v778_v42 = vpop.permute.xlu0 %777 }
 0x26e   :  { %v781_v43 = vsel %vm501_vm9, %v778_v42, %v780_v10  ;;  %v784_v26 = vadd.f32 %v778_v42, %v761_v50  ;;  %v6204_v42 = vperm.slane %v6128_v40, 4 }
 0x26f   :  { %v785_v63 = vadd.f32 %v781_v43, %v762_v45  ;;  %v6193_v45 = vpop.f32.mrf.mxu0 }
 0x270   :  { %5084 = vtanh.f32 %v784_v26  ;;  %8985 = vst [vmem:[#allocation81_spill] sm:$0xff] %v6193_v45  ;;  %v6276_v45 = vld [vmem:[#allocation4 + $0x170] sm:$0xff] }
 0x271   :  { %5086 = vtanh.f32 %v785_v63  ;;  %8989 = vst [vmem:[#allocation85_spill] sm:$0xff] %v6204_v42 }
 0x276   :  { %v5085_v32 = vpop.eup %5084 }
 0x277   :  { %v5087_v31 = vpop.eup %5086  ;;  %790 = vrot.lane.b32.xlu2 %v5085_v32, %s5378_s5  ;;  %v6195_v10 = vpop.f32.mrf.mxu0 }
 0x278   :  { %792 = vrot.lane.b32.xlu0 %v5087_v31, %s5378_s5  ;;  %8986 = vst [vmem:[#allocation82_spill] sm:$0xff] %v6195_v10 }
 0x27f   :  { %814 = vrot.lane.b32.xlu2 %v784_v26, %s5379_s6  ;;  %v6197_v43 = vpop.f32.mrf.mxu0  ;;  %v6200_v26 = vperm.slane %v6116_v6, 4 }
 0x280   :  { %816 = vrot.lane.b32.xlu0 %v785_v63, %s5379_s6  ;;  %8987 = vst [vmem:[#allocation83_spill] sm:$0xff] %v6197_v43 }
 0x281   :  { %8988 = vst [vmem:[#allocation84_spill] sm:$0xff] %v6200_v26 }
 0x287   :  { %v325_v29 = vpop.f32.mrf.mxu0 }
 0x288   :  { %v709_v11 = vadd.f32 %v703_v56, %v325_v29  ;;  %v8990_v29 = vld [vmem:[#allocation7_spill] sm:$0xff] }
 0x289   :  { %vm799_vm12 = vcmp.lt.s32.totalorder %v8990_v29, 32  ;;  %vm1103_vm13 = vcmp.lt.s32.totalorder %v8990_v29, 64  ;;  %vm1406_vm14 = vcmp.lt.s32.totalorder %v8990_v29, 96  ;;  %v7073_v29 = vld [vmem:[#allocation4 + $0x120] sm:$0xff] }
 0x28a   :  { %v725_v38 = vmul.f32 %v6200_v26, %v709_v11 }
 0x28c   :  { %5088 = vtanh.f32 %v725_v38 }
 0x292   :  { %v5089_v50 = vpop.eup %5088 }
 0x293   :  { %v735_v63 = vmul.f32 %v5089_v50, %v6200_v26  ;;  %v8991_v50 = vld [vmem:[#allocation41_spill] sm:$0xff] }
 0x295   :  { %v751_v43 = vadd.f32 %v6204_v42, %v735_v63 }
 0x2d1   :  { %v791_v32 = vpop.permute.xlu2 %790 }
 0x2d2   :  { %v797_v47 = vmul.f32 %v791_v32, %v6155_v48 }
 0x2d9   :  { %v815_v11 = vpop.permute.xlu2 %814 }
 0x2ea   :  { %v793_v31 = vpop.permute.xlu0 %792 }
 0x2eb   :  { %v794_v13 = vsel %vm769_vm10, %v791_v32, %v793_v31 }
 0x2ec   :  { %v798_v56 = vmul.f32 %v794_v13, %v751_v43  ;;  %v8992_v13 = vld [vmem:[#allocation8_spill] sm:$0xff] }
 0x2ee   :  { %v5055_v6 = vpack.i.bf16 %v798_v56, %v797_v47  ;;  %v6228_v47 = vld [vmem:[#allocation4 + $0x260] sm:$0xff]  ;;  %v8993_v56 = vld [vmem:[#allocation24_spill] sm:$0xff] }
 0x2f0   :  { %5056 = vrot.lane.b32.xlu1 %v5055_v6, %s5377_s24  ;;  %v6234_v6 = vld [vmem:[#allocation4 + $0x238] sm:$0xff] }
 0x2f2   :  { %v817_v40 = vpop.permute.xlu0 %816 }
 0x2f3   :  { %v819_v38 = vsel %vm818_vm11, %v815_v11, %v817_v40  ;;  %v8995_v11 = vld [vmem:[#allocation25_spill] sm:$0xff]  ;;  %v8996_v40 = vld [vmem:[#allocation10_spill] sm:$0xff] }
 0x2f4   :  { %v6214_v10 = vsel %vm799_vm12, %v819_v38, %v8991_v50  ;;  %v6240_v38 = vld [vmem:[#allocation4 + $0x210] sm:$0xff]  ;;  %v8997_v50 = vld [vmem:[#allocation27_spill] sm:$0xff] }
 0x2f5   :  { %1059 = vrot.lane.b32.xlu0 %v6214_v10, %s5377_s24 }
 0x362   :  { %v5057_v63 = vpop.permute.xlu1 %5056 }
 0x363   :  { %v5059_v31 = vunpack.i.h.bf16 %v5057_v63  ;;  %v5058_v48 = vunpack.i.l.bf16 %v5057_v63  ;;  %v8998_v63 = vld [vmem:[#allocation11_spill] sm:$0xff] }
 0x365   :  { %v807_v43 = vsel %vm501_vm9, %v5058_v48, %v5059_v31  ;;  %v6249_v31 = vld [vmem:[#allocation4 + $0x268] sm:$0xff] }
 0x366   :  { %v6220_v32 = vsel %vm799_vm12, %v807_v43, %v5802_v22  ;;  %v8994_v22 = vld [vmem:[#allocation9_spill] sm:$0xff]  ;;  %v6252_v48 = vld [vmem:[#allocation4 + $0x1e8] sm:$0xff] }
 0x367   :  { %848 = vmatmul.f32.vlgmr.msra.gmra.mxu0 %v6220_v32  ;;  %888 = vmatmul.f32.vlgmr.msra.gmra.mxu2 %v6220_v32  ;;  %v8999_v43 = vld [vmem:[#allocation12_spill] sm:$0xff] }
 0x368   :  { %928 = vmatmul.f32.vlgmr.msrb.gmra.mxu3 %v6220_v32  ;;  %1008 = vmatmul.f32.vlgmr.msrb.gmra.mxu1 %v6220_v32 }
 0x369   :  { %1135 = vmatpush.msra.mxu2 %v8992_v13  ;;  %1207 = vmatpush.msra.mxu0 %v5776_v19  ;;  %v9000_v13 = vld [vmem:[#allocation29_spill] sm:$0xff] }
 0x36a   :  { %1175 = vmatpush.msrb.mxu3 %v6228_v47  ;;  %1255 = vmatpush.msrb.mxu1 %v8993_v56  ;;  %v6257_v56 = vld [vmem:[#allocation4 + $0x240] sm:$0xff] }
 0x36b   :  { %1136 = vmatpush.msra.mxu2 %v8994_v22  ;;  %1208 = vmatpush.msra.mxu0 %v5783_v8  ;;  %v6260_v22 = vld [vmem:[#allocation4 + $0x1c0] sm:$0xff] }
 0x36c   :  { %1176 = vmatpush.msrb.mxu3 %v6234_v6  ;;  %1256 = vmatpush.msrb.mxu1 %v8995_v11  ;;  %v9001_v11 = vld [vmem:[#allocation13_spill] sm:$0xff] }
 0x36d   :  { %1137 = vmatpush.msra.mxu2 %v8996_v40  ;;  %1209 = vmatpush.msra.mxu0 %v5787_v28  ;;  %v9002_v40 = vld [vmem:[#allocation31_spill] sm:$0xff] }
 0x36e   :  { %1177 = vmatpush.msrb.mxu3 %v6240_v38  ;;  %1257 = vmatpush.msrb.mxu1 %v8997_v50  ;;  %v6265_v50 = vld [vmem:[#allocation4 + $0x218] sm:$0xff] }
 0x36f   :  { %968 = vmatmul.f32.vlgmr.msrb.gmra.mxu0 %v6220_v32  ;;  %4971 = vmatmul.msk.f32.vlgmr.msrb.gmra.mxu2 %vm501_vm9, %v5797_v3 }
 0x370   :  { %1138 = vmatpush.msra.mxu2 %v8998_v63  ;;  %1210 = vmatpush.msra.mxu0 %v5809_v27  ;;  %v6268_v63 = vld [vmem:[#allocation4 + $0x198] sm:$0xff] }
 0x371   :  { %1178 = vmatpush.msrb.mxu3 %v6252_v48  ;;  %1258 = vmatpush.msrb.mxu1 %v9000_v13  ;;  %v6273_v13 = vld [vmem:[#allocation4 + $0x1f0] sm:$0xff] }
 0x372   :  { %1215 = vmatpush.msrb.mxu0 %v6249_v31  ;;  %1139 = vmatpush.msra.mxu2 %v8999_v43  ;;  %v9003_v43 = vld [vmem:[#allocation14_spill] sm:$0xff] }
 0x373   :  { %1179 = vmatpush.msrb.mxu3 %v6260_v22  ;;  %1259 = vmatpush.msrb.mxu1 %v9002_v40  ;;  %v6281_v40 = vld [vmem:[#allocation4 + $0x1c8] sm:$0xff] }
 0x374   :  { %1216 = vmatpush.msrb.mxu0 %v6257_v56  ;;  %1140 = vmatpush.msra.mxu2 %v9001_v11  ;;  %v9004_v11 = vld [vmem:[#allocation15_spill] sm:$0xff] }
 0x375   :  { %1180 = vmatpush.msrb.mxu3 %v6268_v63  ;;  %1260 = vmatpush.msrb.mxu1 %v5863_v59  ;;  %v9005_v59 = vld [vmem:[#allocation16_spill] sm:$0xff] }
 0x376   :  { %1217 = vmatpush.msrb.mxu0 %v6265_v50  ;;  %1141 = vmatpush.msra.mxu2 %v9003_v43  ;;  %v6290_v43 = vld [vmem:[#allocation4 + $0x120] sm:$0xff] }
 0x377   :  { %1181 = vmatpush.msrb.mxu3 %v6276_v45  ;;  %1261 = vmatpush.msrb.mxu1 %v5870_v52  ;;  %v6296_v52 = vld [vmem:[#allocation4 + $0xf8] sm:$0xff] }
 0x378   :  { %1218 = vmatpush.msrb.mxu0 %v6273_v13  ;;  %1142 = vmatpush.msra.mxu2 %v9004_v11  ;;  %v9006_v11 = vld [vmem:[#allocation17_spill] sm:$0xff] }
 0x379   :  { %1182 = vmatpush.msrb.mxu3 %v6284_v49  ;;  %1262 = vmatpush.msrb.mxu1 %v5892_v25  ;;  %v9008_v25 = vld [vmem:[#allocation19_spill] sm:$0xff] }
 0x37a   :  { %1219 = vmatpush.msrb.mxu0 %v6281_v40  ;;  %1143 = vmatpush.msra.mxu2 %v9005_v59  ;;  %v9018_v59 = vld [vmem:[#allocation74_spill] sm:$0xff] }
 0x37b   :  { %1183 = vmatpush.msrb.mxu3 %v6290_v43  ;;  %1263 = vmatpush.msrb.mxu1 %v5899_v21  ;;  %v9010_v21 = vld [vmem:[#allocation20_spill] sm:$0xff] }
 0x37c   :  { %1220 = vmatpush.msrb.mxu0 %v5608_v54  ;;  %1144 = vmatpush.msra.mxu2 %v9006_v11  ;;  %v6302_v54 = vld [vmem:[#allocation4 + $0xd0] sm:$0xff] }
 0x37d   :  { %1184 = vmatpush.msrb.mxu3 %v6296_v52  ;;  %1264 = vmatpush.msrb.mxu1 %v5906_v23  ;;  %v6323_v23 = vld [vmem:[#allocation4 + $0x80] sm:$0xff] }
 0x37e   :  { %1221 = vmatpush.msrb.mxu0 %v5625_v58  ;;  %1145 = vmatpush.msra.mxu2 %v9007_v16  ;;  %v6308_v58 = vld [vmem:[#allocation4 + $0xa8] sm:$0xff]  ;;  %9013 = vst [vmem:[#allocation8_spill] sm:$0xff] %v6323_v23 }
 0x37f   :  { %1185 = vmatpush.msrb.mxu3 %v6302_v54  ;;  %1265 = vmatpush.msrb.mxu1 %v5925_v33  ;;  %9009 = vst [vmem:[#allocation41_spill] sm:$0xff] %v6308_v58 }
 0x380   :  { %1222 = vmatpush.msrb.mxu0 %v5641_v62  ;;  %1146 = vmatpush.msra.mxu2 %v9008_v25  ;;  %v9011_v62 = vld [vmem:[#allocation21_spill] sm:$0xff] }
 0x381   :  { %1186 = vmatpush.msrb.mxu3 %v6308_v58  ;;  %1266 = vmatpush.msrb.mxu1 %v5933_v20  ;;  %v6329_v20 = vld [vmem:[#allocation4 + $0x58] sm:$0xff] }
 0x382   :  { %1223 = vmatpush.msrb.mxu0 %v5650_v1  ;;  %1147 = vmatpush.msra.mxu2 %v9010_v21  ;;  %v9012_v1 = vld [vmem:[#allocation22_spill] sm:$0xff]  ;;  %9015 = vst [vmem:[#allocation24_spill] sm:$0xff] %v6329_v20  ;;  %v9020_v21 = vld [vmem:[#allocation51_spill] sm:$0xff] }
 0x383   :  { %4972 = vmatmul.msk.f32.vlgmr.msra.gmra.mxu3 %vm501_vm9, %v5797_v3  ;;  %4973 = vmatmul.msk.f32.vlgmr.msra.gmra.mxu0 %vm501_vm9, %v5797_v3 }
 0x384   :  { %1224 = vmatpush.msrb.mxu0 %v5667_v5  ;;  %1148 = vmatpush.msra.mxu2 %v9011_v62  ;;  %v9014_v5 = vld [vmem:[#allocation23_spill] sm:$0xff] }
 0x385   :  { %4974 = vmatmul.msk.f32.vlgmr.msra.gmra.mxu1 %vm501_vm9, %v5797_v3  ;;  %1187 = vmatpush.msrb.mxu3 %v6323_v23 }
 0x386   :  { %1225 = vmatpush.msrb.mxu0 %v5683_v9  ;;  %1149 = vmatpush.msra.mxu2 %v9012_v1  ;;  %v6335_v9 = vld [vmem:[#allocation4 + $0x30] sm:$0xff]  ;;  %v9021_v1 = vld [vmem:[#allocation75_spill] sm:$0xff] }
 0x387   :  { %1267 = vmatpush.msrb.mxu1 %v5941_v37  ;;  %1188 = vmatpush.msrb.mxu3 %v6329_v20  ;;  %9016 = vst [vmem:[#allocation9_spill] sm:$0xff] %v6335_v9 }
 0x388   :  { %1226 = vmatpush.msrb.mxu0 %v5693_v12  ;;  %1150 = vmatpush.msra.mxu2 %v9014_v5  ;;  %v6363_v12 = vld [vmem:[#allocation4 + $0x280] sm:$0xff] }
 0x389   :  { %1268 = vmatpush.msrb.mxu1 %v5954_v7  ;;  %1189 = vmatpush.msrb.mxu3 %v6335_v9  ;;  %v6349_v7 = vld [vmem:[#allocation4 + $0x2f8] sm:$0xff] }
 0x38a   :  { %1227 = vmatpush.msrb.mxu0 %v5712_v18  ;;  %1287 = vmatpush.msrb.mxu2 %v5806_v14  ;;  %v869_v14 = vpop.f32.mrf.mxu1 }
 0x38b   :  { %1269 = vmatpush.msrb.mxu1 %v5962_v36  ;;  %1190 = vmatpush.msrb.mxu3 %v5665_v4  ;;  %v6354_v4 = vld [vmem:[#allocation4 + $0x2d0] sm:$0xff] }
 0x38c   :  { %1228 = vmatpush.msrb.mxu0 %v5725_v24  ;;  %1288 = vmatpush.msrb.mxu2 %v8947_v30 }
 0x38d   :  { %1270 = vmatpush.msrb.mxu1 %v5970_v46  ;;  %1327 = vmatpush.msra.mxu3 %v5825_v2  ;;  %v6359_v2 = vld [vmem:[#allocation4 + $0x2a8] sm:$0xff] }
 0x38e   :  { %1229 = vmatpush.msrb.mxu0 %v5732_v35  ;;  %1289 = vmatpush.msrb.mxu2 %v8948_v0 }
 0x38f   :  { %1328 = vmatpush.msra.mxu3 %v5834_v15  ;;  %1510 = vmatpush.msra.mxu1 %v5776_v19 }
 0x390   :  { %1230 = vmatpush.msrb.mxu0 %v5745_v60  ;;  %1290 = vmatpush.msrb.mxu2 %v8952_v61 }
 0x391   :  { %1329 = vmatpush.msra.mxu3 %v5843_v51  ;;  %1511 = vmatpush.msra.mxu1 %v5783_v8  ;;  %v6367_v51 = vpop.f32.mrf.mxu0 }
 0x392   :  { %1470 = vmatpush.msra.mxu0 %v6349_v7  ;;  %v909_v19 = vpop.f32.mrf.mxu1 }
 0x393   :  { %1330 = vmatpush.msra.mxu3 %v5852_v17  ;;  %1512 = vmatpush.msra.mxu1 %v5787_v28 }
 0x394   :  { %1471 = vmatpush.msra.mxu0 %v6354_v4 }
 0x395   :  { %1513 = vmatpush.msra.mxu1 %v5809_v27 }
 0x396   :  { %1472 = vmatpush.msra.mxu0 %v6359_v2 }
 0x398   :  { %1473 = vmatpush.msra.mxu0 %v6363_v12 }
 0x399   :  { %v6369_v18 = vpop.f32.mrf.mxu0 }
 0x39a   :  { %v949_v17 = vpop.f32.mrf.mxu1 }
 0x3a1   :  { %v6371_v24 = vpop.f32.mrf.mxu0 }
 0x3a2   :  { %9017 = vst [vmem:[#allocation25_spill] sm:$0xff] %v6371_v24  ;;  %v989_v8 = vpop.f32.mrf.mxu1  ;;  %v6532_v24 = vld [vmem:[#allocation4 + $0x28] sm:$0xff] }
 0x3a3   :  { %9044 = vst [vmem:[#allocation13_spill] sm:$0xff] %v6532_v24 }
 0x3e4   :  { %v849_v35 = vpop.f32.mrf.mxu0 }
 0x3eb   :  { %v929_v60 = vpop.f32.mrf.mxu3 }
 0x3ec   :  { %v950_v3 = vadd.f32 %v949_v17, %v929_v60  ;;  %v969_v28 = vpop.f32.mrf.mxu0 }
 0x3ed   :  { %v990_v36 = vadd.f32 %v989_v8, %v969_v28  ;;  %v870_v8 = vadd.f32 %v869_v14, %v849_v35  ;;  %v1060_v35 = vpop.permute.xlu0 %1059 }
 0x3ee   :  { %v1034_v15 = vadd.f32 %v950_v3, %v6038_v53  ;;  %v9019_v53 = vld [vmem:[#allocation72_spill] sm:$0xff]  ;;  %v9022_v3 = vld [vmem:[#allocation77_spill] sm:$0xff] }
 0x3ef   :  { %v1035_v33 = vadd.f32 %v990_v36, %v6040_v57  ;;  %v889_v57 = vpop.f32.mrf.mxu2 }
 0x3f0   :  { %v1039_v27 = vmul.f32 %v1034_v15, %v6119_v41  ;;  %v910_v25 = vadd.f32 %v909_v19, %v889_v57 }
 0x3f1   :  { %v1040_v37 = vmul.f32 %v1035_v33, %v6146_v39  ;;  %v1032_v33 = vadd.f32 %v870_v8, %v6187_v44 }
 0x3f2   :  { %5090 = vtanh.f32 %v1039_v27  ;;  %v1033_v62 = vadd.f32 %v910_v25, %v9020_v21  ;;  %v9023_v27 = vld [vmem:[#allocation76_spill] sm:$0xff] }
 0x3f3   :  { %5092 = vtanh.f32 %v1040_v37  ;;  %v1037_v37 = vmul.f32 %v1032_v33, %v9023_v27 }
 0x3f4   :  { %v1038_v5 = vmul.f32 %v1033_v62, %v9021_v1 }
 0x3f6   :  { %5094 = vtanh.f32 %v1038_v5 }
 0x3f7   :  { %5096 = vtanh.f32 %v1037_v37 }
 0x3f8   :  { %v5091_v46 = vpop.eup %5090 }
 0x3f9   :  { %v5093_v61 = vpop.eup %5092  ;;  %v1049_v30 = vmul.f32 %v5091_v46, %v6119_v41 }
 0x3fa   :  { %v1050_v0 = vmul.f32 %v5093_v61, %v6146_v39 }
 0x3fb   :  { %v1054_v16 = vadd.f32 %v1049_v30, %v6131_v55 }
 0x3fc   :  { %v1055_v11 = vadd.f32 %v1050_v0, %v9018_v59  ;;  %v5095_v17 = vpop.eup %5094 }
 0x3fd   :  { %1070 = vrot.lane.b32.xlu1 %v1054_v16, %s5378_s5  ;;  %v1048_v60 = vmul.f32 %v5095_v17, %v9021_v1  ;;  %v5097_v19 = vpop.eup %5096 }
 0x3fe   :  { %1072 = vrot.lane.b32.xlu2 %v1055_v11, %s5378_s5  ;;  %v1047_v46 = vmul.f32 %v5097_v19, %v9023_v27 }
 0x3ff   :  { %v1053_v28 = vadd.f32 %v1048_v60, %v9022_v3 }
 0x400   :  { %v1052_v30 = vadd.f32 %v1047_v46, %v6173_v34 }
 0x401   :  { %v1066_v25 = vmul.f32 %v1060_v35, %v1053_v28 }
 0x405   :  { %1061 = vrot.lane.b32.xlu1 %v9019_v53, %s5377_s24 }
 0x458   :  { %v1073_v36 = vpop.permute.xlu2 %1072 }
 0x459   :  { %v1078_v15 = vmul.f32 %v1073_v36, %v1053_v28  ;;  %v1029_v28 = vpop.f32.mrf.mxu2 }
 0x45b   :  { %1083 = vrot.lane.b32.xlu0 %v1078_v15, %s5377_s24 }
 0x46f   :  { %v1071_v61 = vpop.permute.xlu1 %1070 }
 0x470   :  { %v1074_v0 = vsel %vm769_vm10, %v1071_v61, %v1073_v36 }
 0x471   :  { %v1077_v14 = vmul.f32 %v1074_v0, %v1052_v30 }
 0x473   :  { %1081 = vrot.lane.b32.xlu2 %v1077_v14, %s5377_s24 }
 0x477   :  { %v1062_v57 = vpop.permute.xlu1 %1061 }
 0x478   :  { %v1063_v44 = vsel %vm501_vm9, %v1060_v35, %v1062_v57 }
 0x479   :  { %v1067_v21 = vmul.f32 %v1063_v44, %v1054_v16  ;;  %v1009_v16 = vpop.f32.mrf.mxu1 }
 0x47a   :  { %v1030_v36 = vadd.f32 %v1029_v28, %v1009_v16  ;;  %v6430_v28 = vld [vmem:[#allocation4 + $0x230] sm:$0xff]  ;;  %v9026_v16 = vld [vmem:[#allocation34_spill] sm:$0xff] }
 0x47c   :  { %v1036_v37 = vadd.f32 %v1030_v36, %v6367_v51  ;;  %v6436_v36 = vld [vmem:[#allocation4 + $0x208] sm:$0xff] }
 0x47e   :  { %v1041_v19 = vmul.f32 %v1036_v37, %v6200_v26  ;;  %v9027_v37 = vld [vmem:[#allocation35_spill] sm:$0xff] }
 0x4cd   :  { %v1082_v62 = vpop.permute.xlu2 %1081  ;;  %v1084_v5 = vpop.permute.xlu0 %1083 }
 0x4ce   :  { %v1088_v17 = vadd.f32 %v1082_v62, %v1066_v25  ;;  %v1085_v60 = vsel %vm501_vm9, %v1082_v62, %v1084_v5 }
 0x4cf   :  { %v1089_v8 = vadd.f32 %v1085_v60, %v1067_v21 }
 0x4d0   :  { %5098 = vtanh.f32 %v1088_v17 }
 0x4d1   :  { %5100 = vtanh.f32 %v1089_v8 }
 0x4d2   :  { %5102 = vtanh.f32 %v1041_v19  ;;  %v6445_v19 = vld [vmem:[%s8658_s1 + $0x8] sm:$0xff] }
 0x4d6   :  { %v5099_v15 = vpop.eup %5098 }
 0x4d7   :  { %v5101_v33 = vpop.eup %5100  ;;  %1094 = vrot.lane.b32.xlu1 %v5099_v15, %s5378_s5 }
 0x4d8   :  { %1096 = vrot.lane.b32.xlu2 %v5101_v33, %s5378_s5  ;;  %v5103_v46 = vpop.eup %5102  ;;  %v6424_v33 = vld [vmem:[#allocation4 + $0x258] sm:$0xff] }
 0x4d9   :  { %v1051_v61 = vmul.f32 %v5103_v46, %v6200_v26  ;;  %v6451_v46 = vld [vmem:[#allocation4 + $0x1e0] sm:$0xff] }
 0x4db   :  { %v1056_v0 = vadd.f32 %v1051_v61, %v6204_v42  ;;  %v9028_v61 = vld [vmem:[#allocation36_spill] sm:$0xff] }
 0x4df   :  { %1118 = vrot.lane.b32.xlu1 %v1088_v17, %s5379_s6 }
 0x4e0   :  { %1120 = vrot.lane.b32.xlu2 %v1089_v8, %s5379_s6 }
 0x532   :  { %v1097_v30 = vpop.permute.xlu2 %1096 }
 0x53a   :  { %v1121_v51 = vpop.permute.xlu2 %1120 }
 0x549   :  { %v1095_v14 = vpop.permute.xlu1 %1094 }
 0x54a   :  { %v1098_v35 = vsel %vm769_vm10, %v1095_v14, %v1097_v30  ;;  %v1101_v57 = vmul.f32 %v1095_v14, %v1055_v11  ;;  %v6456_v30 = vld [vmem:[#allocation4 + $0x1b8] sm:$0xff]  ;;  %v6462_v14 = vld [vmem:[#allocation4 + $0x190] sm:$0xff] }
 0x54b   :  { %v1102_v44 = vmul.f32 %v1098_v35, %v1056_v0  ;;  %v9029_v0 = vld [vmem:[#allocation37_spill] sm:$0xff]  ;;  %v9030_v35 = vld [vmem:[#allocation38_spill] sm:$0xff] }
 0x54d   :  { %v5060_v25 = vpack.i.bf16 %v1102_v44, %v1101_v57  ;;  %v6468_v57 = vld [vmem:[#allocation4 + $0x168] sm:$0xff]  ;;  %v6471_v44 = vld [vmem:[#allocation4 + $0x1a0] sm:$0xff] }
 0x54f   :  { %5061 = vrot.lane.b32.xlu0 %v5060_v25, %s5377_s24  ;;  %v9031_v25 = vld [vmem:[#allocation39_spill] sm:$0xff] }
 0x551   :  { %v1119_v21 = vpop.permute.xlu1 %1118 }
 0x552   :  { %v1122_v62 = vsel %vm818_vm11, %v1119_v21, %v1121_v51  ;;  %v6476_v51 = vld [vmem:[#allocation4 + $0x140] sm:$0xff]  ;;  %v6479_v21 = vld [vmem:[#allocation4 + $0x178] sm:$0xff] }
 0x553   :  { %v6411_v5 = vsel %vm1103_vm13, %v1122_v62, %v6214_v10  ;;  %v9024_v10 = vld [vmem:[#allocation32_spill] sm:$0xff] }
 0x554   :  { %1362 = vrot.lane.b32.xlu2 %v6411_v5, %s5377_s24  ;;  %v9032_v62 = vld [vmem:[#allocation40_spill] sm:$0xff] }
 0x5c1   :  { %v5062_v17 = vpop.permute.xlu0 %5061 }
 0x5c2   :  { %v5064_v60 = vunpack.i.h.bf16 %v5062_v17  ;;  %v5063_v8 = vunpack.i.l.bf16 %v5062_v17  ;;  %v6484_v17 = vld [vmem:[#allocation4 + $0x118] sm:$0xff] }
 0x5c4   :  { %v1111_v11 = vsel %vm501_vm9, %v5063_v8, %v5064_v60  ;;  %v6487_v60 = vld [vmem:[#allocation4 + $0x150] sm:$0xff]  ;;  %v9033_v8 = vld [vmem:[#allocation42_spill] sm:$0xff] }
 0x5c5   :  { %v6417_v15 = vsel %vm1103_vm13, %v1111_v11, %v6220_v32  ;;  %v9025_v32 = vld [vmem:[#allocation33_spill] sm:$0xff] }
 0x5c6   :  { %1151 = vmatmul.f32.vlgmr.msra.gmra.mxu2 %v6417_v15  ;;  %1191 = vmatmul.f32.vlgmr.msrb.gmra.mxu3 %v6417_v15  ;;  %v6492_v11 = vld [vmem:[#allocation4 + $0xf0] sm:$0xff] }
 0x5c7   :  { %1231 = vmatmul.f32.vlgmr.msrb.gmra.mxu0 %v6417_v15  ;;  %1271 = vmatmul.f32.vlgmr.msrb.gmra.mxu1 %v6417_v15 }
 0x5c8   :  { %1295 = vmatpush.msra.mxu2 %v9024_v10  ;;  %1438 = vmatpush.msrb.mxu3 %v6424_v33  ;;  %v6495_v10 = vld [vmem:[#allocation4 + $0x128] sm:$0xff] }
 0x5c9   :  { %1478 = vmatpush.msrb.mxu0 %v6228_v47  ;;  %1518 = vmatpush.msrb.mxu1 %v6249_v31 }
 0x5ca   :  { %1296 = vmatpush.msra.mxu2 %v9025_v32  ;;  %1439 = vmatpush.msrb.mxu3 %v6430_v28  ;;  %v9034_v32 = vld [vmem:[#allocation43_spill] sm:$0xff] }
 0x5cb   :  { %1479 = vmatpush.msrb.mxu0 %v6234_v6  ;;  %1519 = vmatpush.msrb.mxu1 %v6257_v56 }
 0x5cc   :  { %1297 = vmatpush.msra.mxu2 %v9026_v16  ;;  %1440 = vmatpush.msrb.mxu3 %v6436_v36  ;;  %v6500_v16 = vld [vmem:[#allocation4 + $0xc8] sm:$0xff] }
 0x5cd   :  { %1480 = vmatpush.msrb.mxu0 %v6240_v38  ;;  %1520 = vmatpush.msrb.mxu1 %v6265_v50 }
 0x5ce   :  { %1298 = vmatpush.msra.mxu2 %v9027_v37  ;;  %4976 = vmatmul.msk.f32.vlgmr.msra.gmra.mxu3 %vm501_vm9, %v6445_v19  ;;  %v6503_v37 = vld [vmem:[#allocation4 + $0x100] sm:$0xff] }
 0x5cf   :  { %4975 = vmatmul.msk.f32.vlgmr.msrb.gmra.mxu2 %vm501_vm9, %v6445_v19  ;;  %1441 = vmatpush.msrb.mxu3 %v6451_v46 }
 0x5d0   :  { %1299 = vmatpush.msra.mxu2 %v9028_v61  ;;  %1481 = vmatpush.msrb.mxu0 %v6252_v48  ;;  %v9035_v61 = vld [vmem:[#allocation44_spill] sm:$0xff] }
 0x5d1   :  { %1442 = vmatpush.msrb.mxu3 %v6456_v30  ;;  %1521 = vmatpush.msrb.mxu1 %v6273_v13 }
 0x5d2   :  { %1300 = vmatpush.msra.mxu2 %v9029_v0  ;;  %1482 = vmatpush.msrb.mxu0 %v6260_v22  ;;  %v6508_v0 = vld [vmem:[#allocation4 + $0xa0] sm:$0xff] }
 0x5d3   :  { %1443 = vmatpush.msrb.mxu3 %v6462_v14  ;;  %1522 = vmatpush.msrb.mxu1 %v6281_v40  ;;  %9036 = vst [vmem:[#allocation10_spill] sm:$0xff] %v6508_v0 }
 0x5d4   :  { %1301 = vmatpush.msra.mxu2 %v9030_v35  ;;  %1483 = vmatpush.msrb.mxu0 %v6268_v63  ;;  %v6511_v35 = vld [vmem:[#allocation4 + $0xd8] sm:$0xff] }
 0x5d5   :  { %1444 = vmatpush.msrb.mxu3 %v6468_v57  ;;  %1523 = vmatpush.msrb.mxu1 %v6471_v44  ;;  %9037 = vst [vmem:[#allocation27_spill] sm:$0xff] %v6511_v35 }
 0x5d6   :  { %1302 = vmatpush.msra.mxu2 %v9031_v25  ;;  %1484 = vmatpush.msrb.mxu0 %v6276_v45  ;;  %v9038_v25 = vld [vmem:[#allocation45_spill] sm:$0xff] }
 0x5d7   :  { %1445 = vmatpush.msrb.mxu3 %v6476_v51  ;;  %1524 = vmatpush.msrb.mxu1 %v6479_v21 }
 0x5d8   :  { %1303 = vmatpush.msra.mxu2 %v9032_v62  ;;  %1485 = vmatpush.msrb.mxu0 %v6284_v49  ;;  %v6516_v62 = vld [vmem:[#allocation4 + $0x78] sm:$0xff] }
 0x5d9   :  { %1446 = vmatpush.msrb.mxu3 %v6484_v17  ;;  %1525 = vmatpush.msrb.mxu1 %v6487_v60  ;;  %9039 = vst [vmem:[#allocation11_spill] sm:$0xff] %v6516_v62 }
 0x5da   :  { %1304 = vmatpush.msra.mxu2 %v9033_v8  ;;  %1486 = vmatpush.msrb.mxu0 %v6290_v43  ;;  %v6519_v8 = vld [vmem:[#allocation4 + $0xb0] sm:$0xff] }
 0x5db   :  { %1447 = vmatpush.msrb.mxu3 %v6492_v11  ;;  %1526 = vmatpush.msrb.mxu1 %v6495_v10  ;;  %9040 = vst [vmem:[#allocation12_spill] sm:$0xff] %v6519_v8 }
 0x5dc   :  { %1305 = vmatpush.msra.mxu2 %v9034_v32  ;;  %1487 = vmatpush.msrb.mxu0 %v6296_v52  ;;  %v9041_v32 = vld [vmem:[#allocation46_spill] sm:$0xff] }
 0x5dd   :  { %1448 = vmatpush.msrb.mxu3 %v6500_v16  ;;  %1527 = vmatpush.msrb.mxu1 %v6503_v37 }
 0x5de   :  { %1306 = vmatpush.msra.mxu2 %v9035_v61  ;;  %1488 = vmatpush.msrb.mxu0 %v6302_v54  ;;  %v6525_v61 = vld [vmem:[#allocation4 + $0x50] sm:$0xff] }
 0x5df   :  { %1449 = vmatpush.msrb.mxu3 %v6508_v0  ;;  %1528 = vmatpush.msrb.mxu1 %v6511_v35  ;;  %9042 = vst [vmem:[#allocation29_spill] sm:$0xff] %v6525_v61  ;;  %v9081_v0 = vld [vmem:[#allocation28_spill] sm:$0xff] }
 0x5e0   :  { %1307 = vmatpush.msra.mxu2 %v9038_v25  ;;  %1489 = vmatpush.msrb.mxu0 %v6308_v58  ;;  %v9043_v25 = vld [vmem:[#allocation47_spill] sm:$0xff] }
 0x5e1   :  { %1450 = vmatpush.msrb.mxu3 %v6516_v62  ;;  %1529 = vmatpush.msrb.mxu1 %v6519_v8  ;;  %v6535_v8 = vld [vmem:[#allocation4 + $0x88] sm:$0xff] }
 0x5e2   :  { %1308 = vmatpush.msra.mxu2 %v9041_v32  ;;  %4977 = vmatmul.msk.f32.vlgmr.msra.gmra.mxu0 %vm501_vm9, %v6445_v19  ;;  %9045 = vst [vmem:[#allocation31_spill] sm:$0xff] %v6535_v8  ;;  %v9046_v32 = vld [vmem:[#allocation48_spill] sm:$0xff] }
 0x5e3   :  { %1451 = vmatpush.msrb.mxu3 %v6525_v61  ;;  %4978 = vmatmul.msk.f32.vlgmr.msra.gmra.mxu1 %vm501_vm9, %v6445_v19  ;;  %v6541_v61 = vld [vmem:[#allocation4] sm:$0xff] }
 0x5e4   :  { %1309 = vmatpush.msra.mxu2 %v9043_v25  ;;  %1490 = vmatpush.msrb.mxu0 %v6323_v23  ;;  %9047 = vst [vmem:[#allocation14_spill] sm:$0xff] %v6541_v61  ;;  %v6544_v25 = vld [vmem:[#allocation4 + $0x308] sm:$0xff]  ;;  %v6547_v23 = vld [vmem:[#allocation4 + $0x310] sm:$0xff] }
 0x5e5   :  { %1452 = vmatpush.msrb.mxu3 %v6532_v24  ;;  %1530 = vmatpush.msrb.mxu1 %v6535_v8  ;;  %9048 = vst [vmem:[#allocation15_spill] sm:$0xff] %v6544_v25  ;;  %v6550_v24 = vld [vmem:[#allocation4 + $0x60] sm:$0xff] }
 0x5e6   :  { %1310 = vmatpush.msra.mxu2 %v9046_v32  ;;  %1491 = vmatpush.msrb.mxu0 %v6329_v20  ;;  %9049 = vst [vmem:[#allocation16_spill] sm:$0xff] %v6547_v23  ;;  %v6554_v32 = vld [vmem:[#allocation4 + $0x2e0] sm:$0xff]  ;;  %v6557_v20 = vld [vmem:[#allocation4 + $0x2e8] sm:$0xff] }
 0x5e7   :  { %1311 = vmatmul.f32.vlgmr.msra.gmra.mxu2 %v6417_v15  ;;  %1453 = vmatpush.msrb.mxu3 %v6541_v61  ;;  %9050 = vst [vmem:[#allocation17_spill] sm:$0xff] %v6550_v24  ;;  %v6560_v61 = vld [vmem:[#allocation4 + $0x38] sm:$0xff] }
 0x5e8   :  { %1550 = vmatpush.msrb.mxu2 %v6544_v25  ;;  %1531 = vmatpush.msrb.mxu1 %v6550_v24  ;;  %9051 = vst [vmem:[#allocation18_spill] sm:$0xff] %v6554_v32  ;;  %v6563_v25 = vld [vmem:[#allocation4 + $0x8] sm:$0xff]  ;;  %v9080_v24 = vld [vmem:[#allocation26_spill] sm:$0xff] }
 0x5e9   :  { %1590 = vmatpush.msra.mxu3 %v6547_v23  ;;  %1492 = vmatpush.msrb.mxu0 %v6335_v9  ;;  %9052 = vst [vmem:[#allocation19_spill] sm:$0xff] %v6557_v20  ;;  %v6566_v23 = vld [vmem:[#allocation4 + $0x2b8] sm:$0xff]  ;;  %v6569_v9 = vld [vmem:[#allocation4 + $0x2c0] sm:$0xff] }
 0x5ea   :  { %1551 = vmatpush.msrb.mxu2 %v6554_v32  ;;  %9053 = vst [vmem:[#allocation20_spill] sm:$0xff] %v6560_v61  ;;  %1532 = vmatpush.msrb.mxu1 %v6560_v61  ;;  %v6572_v32 = vld [vmem:[#allocation4 + $0x10] sm:$0xff] }
 0x5eb   :  { %1591 = vmatpush.msra.mxu3 %v6557_v20  ;;  %9054 = vst [vmem:[#allocation21_spill] sm:$0xff] %v6563_v25  ;;  %1493 = vmatpush.msrb.mxu0 %v6563_v25  ;;  %v6575_v20 = vld [vmem:[#allocation4 + $0x318] sm:$0xff]  ;;  %v6578_v61 = vld [vmem:[#allocation4 + $0x290] sm:$0xff] }
 0x5ec   :  { %9055 = vst [vmem:[#allocation22_spill] sm:$0xff] %v6566_v23  ;;  %1552 = vmatpush.msrb.mxu2 %v6566_v23  ;;  %1533 = vmatpush.msrb.mxu1 %v6572_v32  ;;  %v6581_v25 = vld [vmem:[#allocation4 + $0x298] sm:$0xff]  ;;  %v6584_v23 = vld [vmem:[#allocation4 + $0x270] sm:$0xff] }
 0x5ed   :  { %9056 = vst [vmem:[#allocation23_spill] sm:$0xff] %v6569_v9  ;;  %1592 = vmatpush.msra.mxu3 %v6569_v9  ;;  %1630 = vmatpush.msra.mxu0 %v6575_v20  ;;  %v6587_v9 = vld [vmem:[#allocation4 + $0x2f0] sm:$0xff] }
 0x5ee   :  { %9057 = vst [vmem:[#allocation72_spill] sm:$0xff] %v6572_v32  ;;  %1553 = vmatpush.msrb.mxu2 %v6578_v61  ;;  %1773 = vmatpush.msra.mxu1 %v6349_v7  ;;  %v6607_v7 = vld [vmem:[#allocation4 + $0x1f8] sm:$0xff] }
 0x5ef   :  { %9058 = vst [vmem:[#allocation51_spill] sm:$0xff] %v6575_v20  ;;  %1593 = vmatpush.msra.mxu3 %v6581_v25  ;;  %1631 = vmatpush.msra.mxu0 %v6587_v9  ;;  %v6593_v20 = vld [vmem:[#allocation4 + $0x248] sm:$0xff] }
 0x5f0   :  { %9059 = vst [vmem:[#allocation32_spill] sm:$0xff] %v6578_v61  ;;  %1558 = vmatpush.msra.mxu2 %v6584_v23  ;;  %v6596_v61 = vld [vmem:[#allocation4 + $0x2c8] sm:$0xff]  ;;  %1774 = vmatpush.msra.mxu1 %v6354_v4 }
 0x5f1   :  { %9060 = vst [vmem:[#allocation33_spill] sm:$0xff] %v6581_v25  ;;  %4979 = vmatmul.msk.f32.vlgmr.msrb.gmra.mxu2 %vm501_vm9, %v6445_v19  ;;  %1632 = vmatpush.msra.mxu0 %v6596_v61  ;;  %v6614_v4 = vld [vmem:[#allocation4 + $0x1a8] sm:$0xff]  ;;  %v1252_v25 = vpop.f32.mrf.mxu1 }
 0x5f2   :  { %9061 = vst [vmem:[#allocation34_spill] sm:$0xff] %v6584_v23  ;;  %1559 = vmatpush.msra.mxu2 %v6593_v20  ;;  %v6600_v23 = vld [vmem:[#allocation4 + $0x220] sm:$0xff]  ;;  %1775 = vmatpush.msra.mxu1 %v6359_v2  ;;  %v6623_v2 = vld [vmem:[#allocation4 + $0x130] sm:$0xff] }
 0x5f3   :  { %9062 = vst [vmem:[#allocation35_spill] sm:$0xff] %v6587_v9  ;;  %v6603_v9 = vld [vmem:[#allocation4 + $0x2a0] sm:$0xff] }
 0x5f4   :  { %9063 = vst [vmem:[#allocation36_spill] sm:$0xff] %v6593_v20  ;;  %1560 = vmatpush.msra.mxu2 %v6600_v23  ;;  %1633 = vmatpush.msra.mxu0 %v6603_v9  ;;  %v6611_v20 = vld [vmem:[#allocation4 + $0x1d0] sm:$0xff] }
 0x5f5   :  { %9064 = vst [vmem:[#allocation37_spill] sm:$0xff] %v6596_v61  ;;  %1776 = vmatpush.msra.mxu1 %v6363_v12  ;;  %v6626_v12 = vld [vmem:[#allocation4 + $0x108] sm:$0xff] }
 0x5f6   :  { %9065 = vst [vmem:[#allocation38_spill] sm:$0xff] %v6600_v23  ;;  %1561 = vmatpush.msra.mxu2 %v6607_v7  ;;  %v6617_v23 = vld [vmem:[#allocation4 + $0x180] sm:$0xff]  ;;  %v5328_v61 = vld [vmem:[#allocation4 + $0x288] sm:$0xff] }
 0x5f7   :  { %9066 = vst [vmem:[#allocation39_spill] sm:$0xff] %v6603_v9  ;;  %v6620_v9 = vld [vmem:[#allocation4 + $0x158] sm:$0xff] }
 0x5f8   :  { %9067 = vst [vmem:[#allocation40_spill] sm:$0xff] %v6607_v7  ;;  %1562 = vmatpush.msra.mxu2 %v6611_v20  ;;  %v5326_v7 = vld [vmem:[#allocation4 + $0x2d8] sm:$0xff] }
 0x5f9   :  { %9068 = vst [vmem:[#allocation42_spill] sm:$0xff] %v6611_v20  ;;  %v6629_v20 = vld [vmem:[#allocation4 + $0xe0] sm:$0xff] }
 0x5fa   :  { %9069 = vst [vmem:[#allocation43_spill] sm:$0xff] %v6614_v4  ;;  %1563 = vmatpush.msra.mxu2 %v6614_v4  ;;  %v6632_v4 = vld [vmem:[#allocation4 + $0xb8] sm:$0xff] }
 0x5fb   :  { %9070 = vst [vmem:[#allocation44_spill] sm:$0xff] %v6617_v23 }
 0x5fc   :  { %1564 = vmatpush.msra.mxu2 %v6617_v23  ;;  %9071 = vst [vmem:[#allocation45_spill] sm:$0xff] %v6620_v9  ;;  %v6635_v23 = vld [vmem:[#allocation4 + $0x90] sm:$0xff] }
 0x5fd   :  { %9072 = vst [vmem:[#allocation46_spill] sm:$0xff] %v6623_v2 }
 0x5fe   :  { %1565 = vmatpush.msra.mxu2 %v6620_v9  ;;  %9073 = vst [vmem:[#allocation47_spill] sm:$0xff] %v6626_v12  ;;  %v6638_v9 = vld [vmem:[#allocation4 + $0x68] sm:$0xff] }
 0x5ff   :  { %9074 = vst [vmem:[#allocation48_spill] sm:$0xff] %v6629_v20 }
 0x600   :  { %1566 = vmatpush.msra.mxu2 %v6623_v2  ;;  %9075 = vst [vmem:[#allocation86_spill] sm:$0xff] %v6632_v4  ;;  %v6641_v2 = vld [vmem:[#allocation4 + $0x40] sm:$0xff] }
 0x601   :  { %9076 = vst [vmem:[#allocation87_spill] sm:$0xff] %v6635_v23 }
 0x602   :  { %1567 = vmatpush.msra.mxu2 %v6626_v12  ;;  %9077 = vst [vmem:[#allocation88_spill] sm:$0xff] %v6638_v9  ;;  %v6644_v12 = vld [vmem:[#allocation4 + $0x18] sm:$0xff] }
 0x603   :  { %9078 = vst [vmem:[#allocation89_spill] sm:$0xff] %v6641_v2 }
 0x604   :  { %1568 = vmatpush.msra.mxu2 %v6629_v20  ;;  %9079 = vst [vmem:[#allocation90_spill] sm:$0xff] %v6644_v12  ;;  %v5325_v20 = vld [vmem:[#allocation4 + $0x300] sm:$0xff] }
 0x606   :  { %1569 = vmatpush.msra.mxu2 %v6632_v4  ;;  %v5327_v4 = vld [vmem:[#allocation4 + $0x2b0] sm:$0xff] }
 0x608   :  { %1570 = vmatpush.msra.mxu2 %v6635_v23  ;;  %v1212_v23 = vpop.f32.mrf.mxu0 }
 0x60a   :  { %1571 = vmatpush.msra.mxu2 %v6638_v9 }
 0x60c   :  { %1572 = vmatpush.msra.mxu2 %v6641_v2 }
 0x60e   :  { %1573 = vmatpush.msra.mxu2 %v6644_v12 }
 0x610   :  { %1813 = vmatpush.msrb.mxu2 %v5325_v20 }
 0x612   :  { %1814 = vmatpush.msrb.mxu2 %v5326_v7 }
 0x614   :  { %1815 = vmatpush.msrb.mxu2 %v5327_v4 }
 0x616   :  { %1816 = vmatpush.msrb.mxu2 %v5328_v61 }
 0x644   :  { %v1232_v32 = vpop.f32.mrf.mxu0  ;;  %v1272_v12 = vpop.f32.mrf.mxu1 }
 0x645   :  { %v1253_v9 = vadd.f32 %v1252_v25, %v1232_v32 }
 0x647   :  { %v1337_v8 = vadd.f32 %v1253_v9, %v9080_v24 }
 0x649   :  { %v1342_v2 = vmul.f32 %v1337_v8, %v6119_v41  ;;  %v1152_v62 = vpop.f32.mrf.mxu2 }
 0x64b   :  { %5104 = vtanh.f32 %v1342_v2 }
 0x651   :  { %v5105_v58 = vpop.eup %5104 }
 0x652   :  { %v1292_v35 = vpop.f32.mrf.mxu2  ;;  %v1352_v20 = vmul.f32 %v5105_v58, %v6119_v41  ;;  %v1172_v58 = vpop.f32.mrf.mxu3 }
 0x653   :  { %v1293_v7 = vadd.f32 %v1292_v35, %v1272_v12  ;;  %v1173_v2 = vadd.f32 %v1172_v58, %v1152_v62 }
 0x654   :  { %v1357_v4 = vadd.f32 %v1352_v20, %v6131_v55  ;;  %v9083_v20 = vld [vmem:[#allocation79_spill] sm:$0xff] }
 0x655   :  { %v1338_v61 = vadd.f32 %v1293_v7, %v9081_v0  ;;  %v9082_v0 = vld [vmem:[#allocation52_spill] sm:$0xff]  ;;  %v1335_v7 = vadd.f32 %v1173_v2, %v9083_v20 }
 0x656   :  { %1373 = vrot.lane.b32.xlu0 %v1357_v4, %s5378_s5 }
 0x657   :  { %v1343_v25 = vmul.f32 %v1338_v61, %v6146_v39 }
 0x659   :  { %5106 = vtanh.f32 %v1343_v25  ;;  %v1340_v25 = vmul.f32 %v1335_v7, %v9023_v27 }
 0x65a   :  { %v1192_v35 = vpop.f32.mrf.mxu3 }
 0x65b   :  { %v1213_v32 = vadd.f32 %v1212_v23, %v1192_v35 }
 0x65d   :  { %v1336_v12 = vadd.f32 %v1213_v32, %v9082_v0  ;;  %v1363_v0 = vpop.permute.xlu2 %1362 }
 0x65e   :  { %1364 = vrot.lane.b32.xlu0 %v9019_v53, %s5377_s24 }
 0x65f   :  { %v5107_v9 = vpop.eup %5106  ;;  %v1341_v61 = vmul.f32 %v1336_v12, %v9021_v1 }
 0x660   :  { %v1353_v24 = vmul.f32 %v5107_v9, %v6146_v39 }
 0x661   :  { %5108 = vtanh.f32 %v1341_v61 }
 0x662   :  { %v1358_v8 = vadd.f32 %v1353_v24, %v9018_v59  ;;  %5110 = vtanh.f32 %v1340_v25 }
 0x664   :  { %1375 = vrot.lane.b32.xlu1 %v1358_v8, %s5378_s5 }
 0x667   :  { %v5109_v53 = vpop.eup %5108 }
 0x668   :  { %v5111_v9 = vpop.eup %5110  ;;  %v1351_v24 = vmul.f32 %v5109_v53, %v9021_v1 }
 0x669   :  { %v1350_v59 = vmul.f32 %v5111_v9, %v9023_v27 }
 0x66a   :  { %v1356_v39 = vadd.f32 %v1351_v24, %v9022_v3 }
 0x66b   :  { %v1355_v58 = vadd.f32 %v1350_v59, %v6173_v34 }
 0x66c   :  { %v1369_v7 = vmul.f32 %v1363_v0, %v1356_v39 }
 0x6c8   :  { %v1374_v23 = vpop.permute.xlu0 %1373 }
 0x6d0   :  { %v1365_v12 = vpop.permute.xlu0 %1364 }
 0x6d1   :  { %v1366_v20 = vsel %vm501_vm9, %v1363_v0, %v1365_v12 }
 0x6d2   :  { %v1370_v61 = vmul.f32 %v1366_v20, %v1357_v4  ;;  %v1332_v4 = vpop.f32.mrf.mxu3 }
 0x6d6   :  { %v1376_v62 = vpop.permute.xlu1 %1375 }
 0x6d7   :  { %v1377_v35 = vsel %vm769_vm10, %v1374_v23, %v1376_v62  ;;  %v1381_v32 = vmul.f32 %v1376_v62, %v1356_v39  ;;  %v1312_v39 = vpop.f32.mrf.mxu2 }
 0x6d8   :  { %v1380_v2 = vmul.f32 %v1377_v35, %v1355_v58  ;;  %v1333_v58 = vadd.f32 %v1332_v4, %v1312_v39 }
 0x6d9   :  { %1386 = vrot.lane.b32.xlu2 %v1381_v32, %s5377_s24 }
 0x6da   :  { %1384 = vrot.lane.b32.xlu1 %v1380_v2, %s5377_s24  ;;  %v1339_v35 = vadd.f32 %v1333_v58, %v6369_v18 }
 0x6dc   :  { %v1344_v32 = vmul.f32 %v1339_v35, %v6200_v26  ;;  %v6694_v35 = vld [vmem:[#allocation4 + $0x278] sm:$0xff] }
 0x733   :  { %v1387_v25 = vpop.permute.xlu2 %1386 }
 0x74c   :  { %v1385_v53 = vpop.permute.xlu1 %1384 }
 0x74d   :  { %v1388_v9 = vsel %vm501_vm9, %v1385_v53, %v1387_v25  ;;  %v1391_v24 = vadd.f32 %v1385_v53, %v1369_v7 }
 0x74e   :  { %v1392_v59 = vadd.f32 %v1388_v9, %v1370_v61 }
 0x74f   :  { %5112 = vtanh.f32 %v1391_v24 }
 0x750   :  { %5114 = vtanh.f32 %v1392_v59 }
 0x751   :  { %5116 = vtanh.f32 %v1344_v32  ;;  %v9103_v32 = vld [vmem:[#allocation22_spill] sm:$0xff] }
 0x755   :  { %v5113_v23 = vpop.eup %5112 }
 0x756   :  { %v5115_v62 = vpop.eup %5114  ;;  %1397 = vrot.lane.b32.xlu0 %v5113_v23, %s5378_s5 }
 0x757   :  { %1399 = vrot.lane.b32.xlu1 %v5115_v62, %s5378_s5  ;;  %v5117_v2 = vpop.eup %5116 }
 0x758   :  { %v1354_v0 = vmul.f32 %v5117_v2, %v6200_v26  ;;  %v9104_v2 = vld [vmem:[#allocation23_spill] sm:$0xff] }
 0x75a   :  { %v1359_v20 = vadd.f32 %v1354_v0, %v6204_v42  ;;  %v9105_v0 = vld [vmem:[#allocation72_spill] sm:$0xff] }
 0x75e   :  { %1421 = vrot.lane.b32.xlu0 %v1391_v24, %s5379_s6 }
 0x75f   :  { %1423 = vrot.lane.b32.xlu1 %v1392_v59, %s5379_s6 }
 0x7c8   :  { %v1398_v12 = vpop.permute.xlu0 %1397 }
 0x7c9   :  { %v1400_v7 = vpop.permute.xlu1 %1399  ;;  %v1404_v25 = vmul.f32 %v1398_v12, %v1358_v8 }
 0x7ca   :  { %v1401_v61 = vsel %vm769_vm10, %v1398_v12, %v1400_v7  ;;  %v9106_v12 = vld [vmem:[#allocation51_spill] sm:$0xff]  ;;  %v9108_v7 = vld [vmem:[#allocation33_spill] sm:$0xff] }
 0x7cb   :  { %v1405_v53 = vmul.f32 %v1401_v61, %v1359_v20  ;;  %v9107_v20 = vld [vmem:[#allocation32_spill] sm:$0xff]  ;;  %v9109_v61 = vld [vmem:[#allocation34_spill] sm:$0xff] }
 0x7cd   :  { %v5065_v9 = vpack.i.bf16 %v1405_v53, %v1404_v25  ;;  %v9110_v25 = vld [vmem:[#allocation35_spill] sm:$0xff]  ;;  %v9111_v53 = vld [vmem:[#allocation36_spill] sm:$0xff] }
 0x7cf   :  { %5066 = vrot.lane.b32.xlu2 %v5065_v9, %s5377_s24  ;;  %v9112_v9 = vld [vmem:[#allocation37_spill] sm:$0xff] }
 0x7d0   :  { %v1422_v24 = vpop.permute.xlu0 %1421 }
 0x7d1   :  { %v1424_v18 = vpop.permute.xlu1 %1423 }
 0x7d2   :  { %v1425_v59 = vsel %vm818_vm11, %v1422_v24, %v1424_v18  ;;  %v9113_v24 = vld [vmem:[#allocation38_spill] sm:$0xff]  ;;  %v9114_v18 = vld [vmem:[#allocation39_spill] sm:$0xff] }
 0x7d3   :  { %v1428_v23 = vsel %vm1406_vm14, %v1425_v59, %v6411_v5  ;;  %v6700_v5 = vld [vmem:[#allocation4 + $0x250] sm:$0xff]  ;;  %v9115_v59 = vld [vmem:[#allocation40_spill] sm:$0xff] }
 0x7d4   :  { %1665 = vrot.lane.b32.xlu1 %v1428_v23, %s5377_s24  ;;  %v9116_v23 = vld [vmem:[#allocation42_spill] sm:$0xff] }
 0x829   :  { %v5067_v62 = vpop.permute.xlu2 %5066 }
 0x82a   :  { %v5069_v39 = vunpack.i.h.bf16 %v5067_v62  ;;  %v5068_v4 = vunpack.i.l.bf16 %v5067_v62  ;;  %v9117_v62 = vld [vmem:[#allocation43_spill] sm:$0xff] }
 0x82c   :  { %v1414_v58 = vsel %vm501_vm9, %v5068_v4, %v5069_v39  ;;  %v9118_v39 = vld [vmem:[#allocation44_spill] sm:$0xff]  ;;  %v9119_v4 = vld [vmem:[#allocation45_spill] sm:$0xff] }
 0x82d   :  { %v6688_v8 = vsel %vm1406_vm14, %v1414_v58, %v6417_v15  ;;  %v6706_v15 = vld [vmem:[#allocation4 + $0x228] sm:$0xff]  ;;  %v9120_v58 = vld [vmem:[#allocation46_spill] sm:$0xff] }
 0x82e   :  { %1454 = vmatmul.f32.vlgmr.msrb.gmra.mxu3 %v6688_v8  ;;  %1494 = vmatmul.f32.vlgmr.msrb.gmra.mxu0 %v6688_v8 }
 0x82f   :  { %1534 = vmatmul.f32.vlgmr.msrb.gmra.mxu1 %v6688_v8  ;;  %1574 = vmatmul.f32.vlgmr.msra.gmra.mxu2 %v6688_v8 }
 0x830   :  { %1598 = vmatpush.msrb.mxu3 %v6694_v35  ;;  %1741 = vmatpush.msrb.mxu0 %v6424_v33  ;;  %v6774_v33 = vld [vmem:[#allocation4 + $0x70] sm:$0xff] }
 0x831   :  { %1781 = vmatpush.msrb.mxu1 %v6228_v47  ;;  %1821 = vmatpush.msra.mxu2 %v6249_v31  ;;  %v6712_v47 = vld [vmem:[#allocation4 + $0x200] sm:$0xff]  ;;  %v6732_v31 = vld [vmem:[#allocation4 + $0x188] sm:$0xff] }
 0x832   :  { %1599 = vmatpush.msrb.mxu3 %v6700_v5  ;;  %1742 = vmatpush.msrb.mxu0 %v6430_v28  ;;  %v6782_v28 = vld [vmem:[#allocation4 + $0x48] sm:$0xff] }
 0x833   :  { %1782 = vmatpush.msrb.mxu1 %v6234_v6  ;;  %1822 = vmatpush.msra.mxu2 %v6257_v56  ;;  %v6720_v6 = vld [vmem:[#allocation4 + $0x1d8] sm:$0xff] }
 0x834   :  { %1600 = vmatpush.msrb.mxu3 %v6706_v15  ;;  %1743 = vmatpush.msrb.mxu0 %v6436_v36  ;;  %v6744_v56 = vld [vmem:[#allocation4 + $0x138] sm:$0xff]  ;;  %v9090_v36 = vld [vmem:[#allocation8_spill] sm:$0xff] }
 0x835   :  { %1783 = vmatpush.msrb.mxu1 %v6240_v38  ;;  %1823 = vmatpush.msra.mxu2 %v6265_v50  ;;  %v6726_v38 = vld [vmem:[#allocation4 + $0x1b0] sm:$0xff]  ;;  %v9084_v50 = vld [vmem:[#allocation10_spill] sm:$0xff] }
 0x836   :  { %1601 = vmatpush.msrb.mxu3 %v6712_v47  ;;  %4981 = vmatmul.msk.f32.vlgmr.msra.gmra.mxu0 %vm501_vm9, %v6445_v19 }
 0x837   :  { %4980 = vmatmul.msk.f32.vlgmr.msra.gmra.mxu3 %vm501_vm9, %v6445_v19  ;;  %1744 = vmatpush.msrb.mxu0 %v6451_v46  ;;  %v9091_v46 = vld [vmem:[#allocation13_spill] sm:$0xff] }
 0x838   :  { %1602 = vmatpush.msrb.mxu3 %v6720_v6  ;;  %1784 = vmatpush.msrb.mxu1 %v6252_v48  ;;  %v6738_v48 = vld [vmem:[#allocation4 + $0x160] sm:$0xff] }
 0x839   :  { %1745 = vmatpush.msrb.mxu0 %v6456_v30  ;;  %1824 = vmatpush.msra.mxu2 %v6273_v13  ;;  %v6768_v13 = vld [vmem:[#allocation4 + $0x98] sm:$0xff]  ;;  %v9092_v30 = vld [vmem:[#allocation31_spill] sm:$0xff] }
 0x83a   :  { %1603 = vmatpush.msrb.mxu3 %v6726_v38  ;;  %1785 = vmatpush.msrb.mxu1 %v6260_v22  ;;  %v6750_v22 = vld [vmem:[#allocation4 + $0x110] sm:$0xff] }
 0x83b   :  { %1746 = vmatpush.msrb.mxu0 %v6462_v14  ;;  %1825 = vmatpush.msra.mxu2 %v6281_v40  ;;  %v9086_v40 = vld [vmem:[#allocation41_spill] sm:$0xff]  ;;  %v6788_v14 = vld [vmem:[#allocation4 + $0x20] sm:$0xff] }
 0x83c   :  { %1604 = vmatpush.msrb.mxu3 %v6732_v31  ;;  %1786 = vmatpush.msrb.mxu1 %v6268_v63  ;;  %v9085_v63 = vld [vmem:[#allocation27_spill] sm:$0xff] }
 0x83d   :  { %1747 = vmatpush.msrb.mxu0 %v6468_v57  ;;  %1826 = vmatpush.msra.mxu2 %v6471_v44  ;;  %v9093_v57 = vld [vmem:[#allocation24_spill] sm:$0xff]  ;;  %v9094_v44 = vld [vmem:[#allocation14_spill] sm:$0xff] }
 0x83e   :  { %1605 = vmatpush.msrb.mxu3 %v6738_v48  ;;  %1787 = vmatpush.msrb.mxu1 %v6276_v45  ;;  %v6756_v45 = vld [vmem:[#allocation4 + $0xe8] sm:$0xff] }
 0x83f   :  { %1748 = vmatpush.msrb.mxu0 %v6476_v51  ;;  %1827 = vmatpush.msra.mxu2 %v6479_v21  ;;  %v9095_v51 = vld [vmem:[#allocation15_spill] sm:$0xff]  ;;  %v9096_v21 = vld [vmem:[#allocation16_spill] sm:$0xff] }
 0x840   :  { %1606 = vmatpush.msrb.mxu3 %v6744_v56  ;;  %1788 = vmatpush.msrb.mxu1 %v6284_v49  ;;  %v6762_v49 = vld [vmem:[#allocation4 + $0xc0] sm:$0xff] }
 0x841   :  { %1749 = vmatpush.msrb.mxu0 %v6484_v17  ;;  %1828 = vmatpush.msra.mxu2 %v6487_v60  ;;  %v9097_v17 = vld [vmem:[#allocation17_spill] sm:$0xff] }
 0x842   :  { %1607 = vmatpush.msrb.mxu3 %v6750_v22  ;;  %1789 = vmatpush.msrb.mxu1 %v6290_v43  ;;  %v9087_v43 = vld [vmem:[#allocation11_spill] sm:$0xff]  ;;  %v9098_v60 = vld [vmem:[#allocation9_spill] sm:$0xff] }
 0x843   :  { %1750 = vmatpush.msrb.mxu0 %v6492_v11  ;;  %1829 = vmatpush.msra.mxu2 %v6495_v10  ;;  %v9099_v11 = vld [vmem:[#allocation18_spill] sm:$0xff]  ;;  %v9100_v10 = vld [vmem:[#allocation19_spill] sm:$0xff] }
 0x844   :  { %1608 = vmatpush.msrb.mxu3 %v6756_v45  ;;  %1790 = vmatpush.msrb.mxu1 %v6296_v52  ;;  %v9088_v52 = vld [vmem:[#allocation12_spill] sm:$0xff] }
 0x845   :  { %1751 = vmatpush.msrb.mxu0 %v6500_v16  ;;  %1830 = vmatpush.msra.mxu2 %v6503_v37  ;;  %v9101_v16 = vld [vmem:[#allocation20_spill] sm:$0xff]  ;;  %v9102_v37 = vld [vmem:[#allocation21_spill] sm:$0xff] }
 0x846   :  { %1609 = vmatpush.msrb.mxu3 %v6762_v49  ;;  %1791 = vmatpush.msrb.mxu1 %v6302_v54  ;;  %v9089_v54 = vld [vmem:[#allocation29_spill] sm:$0xff] }
 0x847   :  { %1752 = vmatpush.msrb.mxu0 %v9084_v50  ;;  %1831 = vmatpush.msra.mxu2 %v9085_v63  ;;  %v9122_v50 = vld [vmem:[#allocation48_spill] sm:$0xff]  ;;  %v9123_v63 = vld [vmem:[#allocation86_spill] sm:$0xff] }
 0x848   :  { %1610 = vmatpush.msrb.mxu3 %v6768_v13  ;;  %1792 = vmatpush.msrb.mxu1 %v9086_v40  ;;  %v9124_v40 = vld [vmem:[#allocation87_spill] sm:$0xff] }
 0x849   :  { %1753 = vmatpush.msrb.mxu0 %v9087_v43  ;;  %1832 = vmatpush.msra.mxu2 %v9088_v52  ;;  %v9125_v43 = vld [vmem:[#allocation88_spill] sm:$0xff]  ;;  %v9126_v52 = vld [vmem:[#allocation89_spill] sm:$0xff] }
 0x84a   :  { %1611 = vmatpush.msrb.mxu3 %v6774_v33  ;;  %4982 = vmatmul.msk.f32.vlgmr.msra.gmra.mxu1 %vm501_vm9, %v6445_v19 }
 0x84b   :  { %1754 = vmatpush.msrb.mxu0 %v9089_v54  ;;  %4983 = vmatmul.msk.f32.vlgmr.msrb.gmra.mxu2 %vm501_vm9, %v6445_v19  ;;  %v9127_v54 = vld [vmem:[#allocation90_spill] sm:$0xff] }
 0x84c   :  { %1612 = vmatpush.msrb.mxu3 %v6782_v28  ;;  %1793 = vmatpush.msrb.mxu1 %v9090_v36  ;;  %v1515_v36 = vpop.f32.mrf.mxu1 }
 0x84d   :  { %1755 = vmatpush.msrb.mxu0 %v9091_v46  ;;  %1833 = vmatpush.msra.mxu2 %v9092_v30  ;;  %v1555_v46 = vpop.f32.mrf.mxu2 }
 0x84e   :  { %1613 = vmatpush.msrb.mxu3 %v6788_v14  ;;  %1794 = vmatpush.msrb.mxu1 %v9093_v57 }
 0x84f   :  { %1614 = vmatmul.f32.vlgmr.msrb.gmra.mxu3 %v6688_v8  ;;  %1756 = vmatpush.msrb.mxu0 %v9094_v44  ;;  %v9121_v8 = vld [vmem:[#allocation47_spill] sm:$0xff]  ;;  %v9128_v44 = vld [vmem:[#allocation30_spill] sm:$0xff] }
 0x850   :  { %1853 = vmatpush.msra.mxu3 %v9095_v51  ;;  %1834 = vmatpush.msra.mxu2 %v9097_v17 }
 0x851   :  { %1893 = vmatpush.msra.mxu0 %v9096_v21  ;;  %1795 = vmatpush.msrb.mxu1 %v9098_v60 }
 0x852   :  { %1854 = vmatpush.msra.mxu3 %v9099_v11  ;;  %1835 = vmatpush.msra.mxu2 %v9101_v16 }
 0x853   :  { %1894 = vmatpush.msra.mxu0 %v9100_v10  ;;  %1796 = vmatpush.msrb.mxu1 %v9102_v37 }
 0x854   :  { %1855 = vmatpush.msra.mxu3 %v9103_v32  ;;  %1836 = vmatpush.msra.mxu2 %v9105_v0 }
 0x855   :  { %1895 = vmatpush.msra.mxu0 %v9104_v2  ;;  %1933 = vmatpush.msra.mxu1 %v9106_v12  ;;  %v9129_v2 = vld [vmem:[#allocation54_spill] sm:$0xff]  ;;  %v9130_v12 = vld [vmem:[#allocation73_spill] sm:$0xff] }
 0x856   :  { %1856 = vmatpush.msra.mxu3 %v9107_v20 }
 0x857   :  { %1896 = vmatpush.msra.mxu0 %v9108_v7  ;;  %1934 = vmatpush.msra.mxu1 %v9110_v25  ;;  %v6839_v7 = vld [vmem:[%s8659_s2 + $0x8] sm:$0xff] }
 0x858   :  { %1861 = vmatpush.msrb.mxu3 %v9109_v61 }
 0x859   :  { %4984 = vmatmul.msk.f32.vlgmr.msra.gmra.mxu3 %vm501_vm9, %v6445_v19  ;;  %1935 = vmatpush.msra.mxu1 %v9112_v9 }
 0x85a   :  { %1862 = vmatpush.msrb.mxu3 %v9111_v53  ;;  %v9131_v53 = vld [vmem:[#allocation74_spill] sm:$0xff] }
 0x85b   :  { %1936 = vmatpush.msra.mxu1 %v9114_v18 }
 0x85c   :  { %1863 = vmatpush.msrb.mxu3 %v9113_v24  ;;  %v1475_v24 = vpop.f32.mrf.mxu0 }
 0x85e   :  { %1864 = vmatpush.msrb.mxu3 %v9115_v59 }
 0x860   :  { %1865 = vmatpush.msrb.mxu3 %v9116_v23 }
 0x862   :  { %1866 = vmatpush.msrb.mxu3 %v9117_v62  ;;  %v9132_v62 = vld [vmem:[#allocation53_spill] sm:$0xff] }
 0x864   :  { %1867 = vmatpush.msrb.mxu3 %v9118_v39 }
 0x866   :  { %1868 = vmatpush.msrb.mxu3 %v9119_v4  ;;  %v9133_v4 = vld [vmem:[#allocation80_spill] sm:$0xff] }
 0x868   :  { %1869 = vmatpush.msrb.mxu3 %v9120_v58 }
 0x86a   :  { %1870 = vmatpush.msrb.mxu3 %v9121_v8 }
 0x86c   :  { %1871 = vmatpush.msrb.mxu3 %v9122_v50 }
 0x86e   :  { %1872 = vmatpush.msrb.mxu3 %v9123_v63 }
 0x870   :  { %1873 = vmatpush.msrb.mxu3 %v9124_v40 }
 0x872   :  { %1874 = vmatpush.msrb.mxu3 %v9125_v43 }
 0x874   :  { %1875 = vmatpush.msrb.mxu3 %v9126_v52 }
 0x876   :  { %1876 = vmatpush.msrb.mxu3 %v9127_v54 }
 0x8ab   :  { %v1495_v18 = vpop.f32.mrf.mxu0 }
 0x8ac   :  { %v1535_v30 = vpop.f32.mrf.mxu1  ;;  %v1516_v59 = vadd.f32 %v1515_v36, %v1495_v18 }
 0x8ad   :  { %v1556_v57 = vadd.f32 %v1555_v46, %v1535_v30 }
 0x8ae   :  { %v1639_v39 = vadd.f32 %v1516_v59, %v9132_v62  ;;  %v9134_v59 = vld [vmem:[#allocation25_spill] sm:$0xff] }
 0x8af   :  { %v1640_v51 = vadd.f32 %v1556_v57, %v9128_v44 }
 0x8b0   :  { %v1644_v8 = vmul.f32 %v1639_v39, %v9021_v1 }
 0x8b1   :  { %v1645_v21 = vmul.f32 %v1640_v51, %v6119_v41  ;;  %v1455_v17 = vpop.f32.mrf.mxu3 }
 0x8b2   :  { %v1575_v11 = vpop.f32.mrf.mxu2  ;;  %v1476_v23 = vadd.f32 %v1475_v24, %v1455_v17 }
 0x8b3   :  { %5118 = vtanh.f32 %v1645_v21  ;;  %v1666_v21 = vpop.permute.xlu1 %1665  ;;  %v1635_v18 = vpop.f32.mrf.mxu0 }
 0x8b4   :  { %v1638_v58 = vadd.f32 %v1476_v23, %v9133_v4 }
 0x8b6   :  { %v1643_v50 = vmul.f32 %v1638_v58, %v9023_v27 }
 0x8b9   :  { %v5119_v60 = vpop.eup %5118 }
 0x8ba   :  { %v1595_v10 = vpop.f32.mrf.mxu3  ;;  %v1655_v16 = vmul.f32 %v5119_v60, %v6119_v41 }
 0x8bb   :  { %v1596_v37 = vadd.f32 %v1595_v10, %v1575_v11 }
 0x8bc   :  { %v1660_v32 = vadd.f32 %v1655_v16, %v6131_v55 }
 0x8bd   :  { %v1641_v0 = vadd.f32 %v1596_v37, %v9129_v2 }
 0x8be   :  { %1676 = vrot.lane.b32.xlu2 %v1660_v32, %s5378_s5 }
 0x8bf   :  { %v1646_v20 = vmul.f32 %v1641_v0, %v9130_v12 }
 0x8c1   :  { %5120 = vtanh.f32 %v1646_v20 }
 0x8c2   :  { %5122 = vtanh.f32 %v1644_v8 }
 0x8c3   :  { %5124 = vtanh.f32 %v1643_v50 }
 0x8c6   :  { %1667 = vrot.lane.b32.xlu2 %v6839_v7, %s5377_s24 }
 0x8c7   :  { %v5121_v61 = vpop.eup %5120 }
 0x8c8   :  { %v1656_v25 = vmul.f32 %v5121_v61, %v9130_v12  ;;  %v5123_v63 = vpop.eup %5122 }
 0x8c9   :  { %v5125_v40 = vpop.eup %5124  ;;  %v1654_v43 = vmul.f32 %v5123_v63, %v9021_v1 }
 0x8ca   :  { %v1661_v9 = vadd.f32 %v1656_v25, %v9131_v53  ;;  %v1653_v52 = vmul.f32 %v5125_v40, %v9023_v27 }
 0x8cb   :  { %v1659_v54 = vadd.f32 %v1654_v43, %v9022_v3 }
 0x8cc   :  { %1678 = vrot.lane.b32.xlu0 %v1661_v9, %s5378_s5  ;;  %v1658_v30 = vadd.f32 %v1653_v52, %v6173_v34 }
 0x8cd   :  { %v1672_v10 = vmul.f32 %v1666_v21, %v1659_v54 }
 0x8d2   :  { %v1615_v24 = vpop.f32.mrf.mxu3 }
 0x918   :  { %v1677_v36 = vpop.permute.xlu2 %1676 }
 0x920   :  { %v1668_v17 = vpop.permute.xlu2 %1667 }
 0x921   :  { %v1669_v60 = vsel %vm501_vm9, %v1666_v21, %v1668_v17 }
 0x922   :  { %v1673_v16 = vmul.f32 %v1669_v60, %v1660_v32  ;;  %v1636_v32 = vadd.f32 %v1635_v18, %v1615_v24  ;;  %v1778_v60 = vpop.f32.mrf.mxu1  ;;  %v9138_v18 = vld [vmem:[#allocation81_spill] sm:$0xff] }
 0x924   :  { %v1642_v23 = vadd.f32 %v1636_v32, %v9134_v59 }
 0x926   :  { %v1647_v62 = vmul.f32 %v1642_v23, %v6200_v26 }
 0x93e   :  { %v1679_v46 = vpop.permute.xlu0 %1678 }
 0x93f   :  { %v1680_v57 = vsel %vm769_vm10, %v1677_v36, %v1679_v46  ;;  %v1684_v44 = vmul.f32 %v1679_v46, %v1659_v54 }
 0x940   :  { %v1683_v51 = vmul.f32 %v1680_v57, %v1658_v30 }
 0x941   :  { %1689 = vrot.lane.b32.xlu1 %v1684_v44, %s5377_s24 }
 0x942   :  { %1687 = vrot.lane.b32.xlu0 %v1683_v51, %s5377_s24 }
 0x9b3   :  { %v1690_v11 = vpop.permute.xlu1 %1689 }
 0x9b4   :  { %v1688_v37 = vpop.permute.xlu0 %1687 }
 0x9b5   :  { %v1691_v2 = vsel %vm501_vm9, %v1688_v37, %v1690_v11  ;;  %v1694_v0 = vadd.f32 %v1688_v37, %v1672_v10 }
 0x9b6   :  { %v1695_v20 = vadd.f32 %v1691_v2, %v1673_v16  ;;  %v9137_v16 = vld [vmem:[#allocation55_spill] sm:$0xff] }
 0x9b7   :  { %5126 = vtanh.f32 %v1694_v0 }
 0x9b8   :  { %5128 = vtanh.f32 %v1695_v20 }
 0x9b9   :  { %5130 = vtanh.f32 %v1647_v62 }
 0x9bd   :  { %v5127_v61 = vpop.eup %5126 }
 0x9be   :  { %v5129_v25 = vpop.eup %5128  ;;  %1700 = vrot.lane.b32.xlu2 %v5127_v61, %s5378_s5 }
 0x9bf   :  { %1702 = vrot.lane.b32.xlu0 %v5129_v25, %s5378_s5  ;;  %v5131_v39 = vpop.eup %5130 }
 0x9c0   :  { %v1657_v4 = vmul.f32 %v5131_v39, %v6200_v26 }
 0x9c2   :  { %v1662_v8 = vadd.f32 %v1657_v4, %v6204_v42 }
 0x9c6   :  { %1724 = vrot.lane.b32.xlu2 %v1694_v0, %s5379_s6 }
 0x9c7   :  { %1726 = vrot.lane.b32.xlu0 %v1695_v20, %s5379_s6 }
 0xa18   :  { %v1701_v58 = vpop.permute.xlu2 %1700 }
 0xa19   :  { %v1707_v40 = vmul.f32 %v1701_v58, %v1661_v9 }
 0xa20   :  { %v1725_v54 = vpop.permute.xlu2 %1724 }
 0xa31   :  { %v1703_v50 = vpop.permute.xlu0 %1702 }
 0xa32   :  { %v1704_v63 = vsel %vm769_vm10, %v1701_v58, %v1703_v50 }
 0xa33   :  { %v1708_v43 = vmul.f32 %v1704_v63, %v1662_v8 }
 0xa35   :  { %v5070_v52 = vpack.i.bf16 %v1708_v43, %v1707_v40 }
 0xa37   :  { %5071 = vrot.lane.b32.xlu1 %v5070_v52, %s5377_s24 }
 0xa39   :  { %v1727_v36 = vpop.permute.xlu0 %1726 }
 0xa3a   :  { %v1728_v46 = vsel %vm818_vm11, %v1725_v54, %v1727_v36 }
 0xa3b   :  { %1968 = vrot.lane.b32.xlu0 %v1728_v46, %s5377_s24 }
 0xaa9   :  { %v5072_v30 = vpop.permute.xlu1 %5071 }
 0xaaa   :  { %v5074_v57 = vunpack.i.h.bf16 %v5072_v30  ;;  %v5073_v44 = vunpack.i.l.bf16 %v5072_v30 }
 0xaac   :  { %v1717_v51 = vsel %vm501_vm9, %v5073_v44, %v5074_v57 }
 0xaad   :  { %1757 = vmatmul.f32.vlgmr.msrb.gmra.mxu0 %v1717_v51  ;;  %1797 = vmatmul.f32.vlgmr.msrb.gmra.mxu1 %v1717_v51  ;;  %v1969_v50 = vpop.permute.xlu0 %1968 }
 0xaae   :  { %1837 = vmatmul.f32.vlgmr.msra.gmra.mxu2 %v1717_v51  ;;  %1877 = vmatmul.f32.vlgmr.msrb.gmra.mxu3 %v1717_v51 }
 0xaaf   :  { %1901 = vmatpush.msrb.mxu0 %v6694_v35  ;;  %v1858_v35 = vpop.f32.mrf.mxu3 }
 0xab1   :  { %1902 = vmatpush.msrb.mxu0 %v6700_v5 }
 0xab3   :  { %1903 = vmatpush.msrb.mxu0 %v6706_v15 }
 0xab5   :  { %1904 = vmatpush.msrb.mxu0 %v6712_v47  ;;  %4986 = vmatmul.msk.f32.vlgmr.msra.gmra.mxu1 %vm501_vm9, %v6445_v19 }
 0xab6   :  { %4985 = vmatmul.msk.f32.vlgmr.msra.gmra.mxu0 %vm501_vm9, %v6445_v19  ;;  %v1818_v19 = vpop.f32.mrf.mxu2 }
 0xab7   :  { %1905 = vmatpush.msrb.mxu0 %v6720_v6 }
 0xab9   :  { %1906 = vmatpush.msrb.mxu0 %v6726_v38 }
 0xabb   :  { %1907 = vmatpush.msrb.mxu0 %v6732_v31  ;;  %v9135_v31 = vld [vmem:[#allocation56_spill] sm:$0xff] }
 0xabd   :  { %1908 = vmatpush.msrb.mxu0 %v6738_v48 }
 0xabf   :  { %1909 = vmatpush.msrb.mxu0 %v6744_v56 }
 0xac1   :  { %1910 = vmatpush.msrb.mxu0 %v6750_v22 }
 0xac3   :  { %1911 = vmatpush.msrb.mxu0 %v6756_v45  ;;  %v9136_v45 = vld [vmem:[#allocation57_spill] sm:$0xff] }
 0xac5   :  { %1912 = vmatpush.msrb.mxu0 %v6762_v49 }
 0xac7   :  { %1913 = vmatpush.msrb.mxu0 %v6768_v13 }
 0xac9   :  { %1914 = vmatpush.msrb.mxu0 %v6774_v33 }
 0xacb   :  { %1915 = vmatpush.msrb.mxu0 %v6782_v28 }
 0xacd   :  { %1916 = vmatpush.msrb.mxu0 %v6788_v14 }
 0xace   :  { %1917 = vmatmul.f32.vlgmr.msrb.gmra.mxu0 %v1717_v51 }
 0xb2a   :  { %v1758_v5 = vpop.f32.mrf.mxu0  ;;  %v1798_v11 = vpop.f32.mrf.mxu1 }
 0xb2b   :  { %v1819_v10 = vadd.f32 %v1818_v19, %v1798_v11  ;;  %v1779_v61 = vadd.f32 %v1778_v60, %v1758_v5  ;;  %v6928_v5 = vld [vmem:[#allocation4 + $0x258] sm:$0xff]  ;;  %v6971_v60 = vld [vmem:[#allocation4 + $0x290] sm:$0xff]  ;;  %v9141_v11 = vld [vmem:[#allocation64_spill] sm:$0xff] }
 0xb2c   :  { %2129 = vmatpush.msrb.mxu1 %v6928_v5 }
 0xb2d   :  { %v1942_v37 = vadd.f32 %v1819_v10, %v9137_v16  ;;  %v1941_v32 = vadd.f32 %v1779_v61, %v9138_v18  ;;  %v6976_v16 = vld [vmem:[#allocation4 + $0x260] sm:$0xff] }
 0xb2e   :  { %v6990_v61 = vld [vmem:[#allocation4 + $0x240] sm:$0xff] }
 0xb2f   :  { %v1947_v2 = vmul.f32 %v1942_v37, %v9021_v1  ;;  %v6978_v37 = vld [vmem:[#allocation4 + $0x268] sm:$0xff] }
 0xb31   :  { %v1838_v15 = vpop.f32.mrf.mxu2  ;;  %v1878_v6 = vpop.f32.mrf.mxu3 }
 0xb32   :  { %v1859_v47 = vadd.f32 %v1858_v35, %v1838_v15  ;;  %v1938_v35 = vpop.f32.mrf.mxu1  ;;  %v6930_v15 = vld [vmem:[#allocation4 + $0x230] sm:$0xff] }
 0xb33   :  { %v1898_v38 = vpop.f32.mrf.mxu0  ;;  %2130 = vmatpush.msrb.mxu1 %v6930_v15 }
 0xb34   :  { %v1943_v48 = vadd.f32 %v1859_v47, %v9135_v31  ;;  %v1899_v56 = vadd.f32 %v1898_v38, %v1878_v6  ;;  %v6933_v47 = vld [vmem:[#allocation4 + $0x2f8] sm:$0xff]  ;;  %v6935_v6 = vld [vmem:[#allocation4 + $0x300] sm:$0xff]  ;;  %v6937_v38 = vld [vmem:[#allocation4 + $0x208] sm:$0xff] }
 0xb35   :  { %2161 = vmatpush.msrb.mxu2 %v6933_v47  ;;  %2201 = vmatpush.msra.mxu3 %v6935_v6  ;;  %v6941_v31 = vld [vmem:[#allocation4 + $0x308] sm:$0xff] }
 0xb36   :  { %v1948_v22 = vmul.f32 %v1943_v48, %v6119_v41  ;;  %v1944_v49 = vadd.f32 %v1899_v56, %v9136_v45  ;;  %v6943_v48 = vld [vmem:[#allocation4 + $0x2d0] sm:$0xff]  ;;  %2241 = vmatpush.msra.mxu0 %v6941_v31  ;;  %v6949_v45 = vld [vmem:[#allocation4 + $0x2d8] sm:$0xff]  ;;  %2131 = vmatpush.msrb.mxu1 %v6937_v38 }
 0xb37   :  { %2162 = vmatpush.msrb.mxu2 %v6943_v48  ;;  %2202 = vmatpush.msra.mxu3 %v6949_v45 }
 0xb38   :  { %5132 = vtanh.f32 %v1948_v22  ;;  %v1949_v13 = vmul.f32 %v1944_v49, %v9130_v12  ;;  %v6946_v22 = vld [vmem:[#allocation4 + $0x1e0] sm:$0xff] }
 0xb39   :  { %v6951_v49 = vld [vmem:[#allocation4 + $0x2e0] sm:$0xff]  ;;  %2132 = vmatpush.msrb.mxu1 %v6946_v22 }
 0xb3a   :  { %5134 = vtanh.f32 %v1949_v13  ;;  %v6955_v13 = vld [vmem:[#allocation4 + $0x2a8] sm:$0xff]  ;;  %2242 = vmatpush.msra.mxu0 %v6951_v49 }
 0xb3b   :  { %5136 = vtanh.f32 %v1947_v2  ;;  %2163 = vmatpush.msrb.mxu2 %v6955_v13  ;;  %v6980_v2 = vld [vmem:[#allocation4 + $0x190] sm:$0xff] }
 0xb3e   :  { %v5133_v33 = vpop.eup %5132 }
 0xb3f   :  { %v1958_v28 = vmul.f32 %v5133_v33, %v6119_v41  ;;  %v6957_v33 = vld [vmem:[#allocation4 + $0x2b0] sm:$0xff] }
 0xb40   :  { %v5135_v14 = vpop.eup %5134  ;;  %2203 = vmatpush.msra.mxu3 %v6957_v33 }
 0xb41   :  { %v1963_v9 = vadd.f32 %v1958_v28, %v6131_v55  ;;  %v1959_v21 = vmul.f32 %v5135_v14, %v9130_v12  ;;  %v5137_v0 = vpop.eup %5136  ;;  %v6959_v28 = vld [vmem:[#allocation4 + $0x2b8] sm:$0xff]  ;;  %v6963_v14 = vld [vmem:[#allocation4 + $0x280] sm:$0xff]  ;;  %v7090_v55 = vld [vmem:[#allocation4 + $0x28] sm:$0xff] }
 0xb42   :  { %v1957_v20 = vmul.f32 %v5137_v0, %v9021_v1  ;;  %2243 = vmatpush.msra.mxu0 %v6959_v28  ;;  %2164 = vmatpush.msrb.mxu2 %v6963_v14  ;;  %v6984_v0 = vld [vmem:[#allocation4 + $0x270] sm:$0xff]  ;;  %v7088_v1 = vld [vmem:[#allocation4 + $0x100] sm:$0xff] }
 0xb43   :  { %1979 = vrot.lane.b32.xlu1 %v1963_v9, %s5378_s5  ;;  %v6901_v17 = vadd.f32 %v1959_v21, %v9131_v53  ;;  %v6967_v21 = vld [vmem:[#allocation4 + $0x1b8] sm:$0xff] }
 0xb44   :  { %v1962_v25 = vadd.f32 %v1957_v20, %v9022_v3  ;;  %2133 = vmatpush.msrb.mxu1 %v6967_v21  ;;  %2244 = vmatpush.msra.mxu0 %v6971_v60  ;;  %v6988_v20 = vld [vmem:[#allocation4 + $0x238] sm:$0xff]  ;;  %v7082_v3 = vld [vmem:[#allocation4 + $0x130] sm:$0xff] }
 0xb45   :  { %1981 = vrot.lane.b32.xlu2 %v6901_v17, %s5378_s5  ;;  %2169 = vmatpush.msra.mxu2 %v6976_v16  ;;  %9149 = vst [vmem:[#allocation29_spill] sm:$0xff] %v7082_v3  ;;  %v7100_v53 = vld [vmem:[#allocation4 + $0xd8] sm:$0xff] }
 0xb46   :  { %v1975_v43 = vmul.f32 %v1969_v50, %v1962_v25  ;;  %2134 = vmatpush.msrb.mxu1 %v6980_v2  ;;  %2249 = vmatpush.msrb.mxu0 %v6984_v0 }
 0xb47   :  { %2170 = vmatpush.msra.mxu2 %v6988_v20 }
 0xb4b   :  { %1970 = vrot.lane.b32.xlu1 %v6839_v7, %s5377_s24  ;;  %v1946_v7 = vmul.f32 %v1941_v32, %v9023_v27  ;;  %v1918_v19 = vpop.f32.mrf.mxu0  ;;  %v7001_v32 = vld [vmem:[#allocation4 + $0x210] sm:$0xff] }
 0xb4c   :  { %v1939_v56 = vadd.f32 %v1938_v35, %v1918_v19  ;;  %2171 = vmatpush.msra.mxu2 %v7001_v32  ;;  %v7057_v19 = vld [vmem:[#allocation4 + $0x180] sm:$0xff] }
 0xb4d   :  { %5138 = vtanh.f32 %v1946_v7  ;;  %v7005_v7 = vld [vmem:[#allocation4 + $0x140] sm:$0xff]  ;;  %9147 = vst [vmem:[#allocation11_spill] sm:$0xff] %v7057_v19 }
 0xb4e   :  { %v1945_v10 = vadd.f32 %v1939_v56, %v9141_v11  ;;  %v7061_v56 = vld [vmem:[#allocation4 + $0x148] sm:$0xff]  ;;  %v7063_v11 = vld [vmem:[#allocation4 + $0x150] sm:$0xff] }
 0xb50   :  { %v1950_v18 = vmul.f32 %v1945_v10, %v6200_v26  ;;  %v7065_v10 = vld [vmem:[#allocation4 + $0x78] sm:$0xff] }
 0xb53   :  { %v5139_v23 = vpop.eup %5138 }
 0xb54   :  { %v1956_v62 = vmul.f32 %v5139_v23, %v9023_v27  ;;  %v7009_v23 = vld [vmem:[#allocation4 + $0x220] sm:$0xff]  ;;  %v7086_v27 = vld [vmem:[#allocation4 + $0xf8] sm:$0xff] }
 0xb55   :  { %9143 = vst [vmem:[#allocation79_spill] sm:$0xff] %v7009_v23 }
 0xb56   :  { %v1961_v4 = vadd.f32 %v1956_v62, %v6173_v34  ;;  %v7013_v62 = vld [vmem:[#allocation4 + $0x1e8] sm:$0xff]  ;;  %v7078_v34 = vld [vmem:[#allocation4 + $0x50] sm:$0xff] }
 0xb57   :  { %2172 = vmatpush.msra.mxu2 %v7013_v62 }
 0xb9f   :  { %v1982_v24 = vpop.permute.xlu2 %1981 }
 0xba0   :  { %v1987_v59 = vmul.f32 %v1982_v24, %v1962_v25  ;;  %v6992_v25 = vld [vmem:[#allocation4 + $0x168] sm:$0xff] }
 0xba1   :  { %2135 = vmatpush.msrb.mxu1 %v6992_v25 }
 0xba2   :  { %1992 = vrot.lane.b32.xlu0 %v1987_v59, %s5377_s24  ;;  %v7003_v59 = vld [vmem:[#allocation4 + $0x218] sm:$0xff] }
 0xba3   :  { %2136 = vmatpush.msrb.mxu1 %v7005_v7 }
 0xbb5   :  { %v1980_v39 = vpop.permute.xlu1 %1979 }
 0xbb6   :  { %v1983_v58 = vsel %vm769_vm10, %v1980_v39, %v1982_v24  ;;  %v6996_v24 = vld [vmem:[#allocation4 + $0x248] sm:$0xff]  ;;  %v7015_v39 = vld [vmem:[#allocation4 + $0x1f0] sm:$0xff] }
 0xbb7   :  { %v1986_v8 = vmul.f32 %v1983_v58, %v1961_v4  ;;  %9142 = vst [vmem:[#allocation52_spill] sm:$0xff] %v6996_v24  ;;  %2250 = vmatpush.msrb.mxu0 %v6996_v24  ;;  %v7017_v4 = vld [vmem:[#allocation4 + $0x118] sm:$0xff]  ;;  %v7166_v24 = vld [vmem:[#allocation4 + $0x8] sm:$0xff] }
 0xbb8   :  { %v7021_v58 = vld [vmem:[#allocation4 + $0x1f8] sm:$0xff]  ;;  %2137 = vmatpush.msrb.mxu1 %v7017_v4  ;;  %9164 = vst [vmem:[#allocation23_spill] sm:$0xff] %v7166_v24 }
 0xbb9   :  { %1990 = vrot.lane.b32.xlu2 %v1986_v8, %s5377_s24  ;;  %9144 = vst [vmem:[#allocation10_spill] sm:$0xff] %v7021_v58  ;;  %2251 = vmatpush.msrb.mxu0 %v7009_v23  ;;  %v7025_v8 = vld [vmem:[#allocation4 + $0x1c0] sm:$0xff]  ;;  %v7159_v23 = vld [vmem:[#allocation4 + $0x38] sm:$0xff] }
 0xbba   :  { %2173 = vmatpush.msra.mxu2 %v7025_v8  ;;  %9162 = vst [vmem:[#allocation21_spill] sm:$0xff] %v7159_v23 }
 0xbbb   :  { %2252 = vmatpush.msrb.mxu0 %v7021_v58 }
 0xbbd   :  { %v1971_v63 = vpop.permute.xlu1 %1970 }
 0xbbe   :  { %v1972_v40 = vsel %vm501_vm9, %v1969_v50, %v1971_v63  ;;  %v7027_v50 = vld [vmem:[#allocation4 + $0x1c8] sm:$0xff]  ;;  %v7029_v63 = vld [vmem:[#allocation4 + $0xf0] sm:$0xff] }
 0xbbf   :  { %v1976_v54 = vmul.f32 %v1972_v40, %v1963_v9  ;;  %v6965_v9 = vld [vmem:[#allocation4 + $0x288] sm:$0xff]  ;;  %v7033_v40 = vld [vmem:[#allocation4 + $0x1d0] sm:$0xff]  ;;  %2138 = vmatpush.msrb.mxu1 %v7029_v63 }
 0xbc0   :  { %2204 = vmatpush.msra.mxu3 %v6965_v9  ;;  %9145 = vst [vmem:[#allocation27_spill] sm:$0xff] %v7033_v40  ;;  %2253 = vmatpush.msrb.mxu0 %v7033_v40 }
 0xbc2   :  { %2209 = vmatpush.msrb.mxu3 %v6978_v37 }
 0xbc4   :  { %2210 = vmatpush.msrb.mxu3 %v6990_v61 }
 0xbc6   :  { %2211 = vmatpush.msrb.mxu3 %v7003_v59 }
 0xbc8   :  { %2212 = vmatpush.msrb.mxu3 %v7015_v39 }
 0xbca   :  { %2213 = vmatpush.msrb.mxu3 %v7027_v50 }
 0xc13   :  { %v1991_v52 = vpop.permute.xlu2 %1990 }
 0xc14   :  { %v6919_v36 = vadd.f32 %v1991_v52, %v1975_v43  ;;  %v1993_v46 = vpop.permute.xlu0 %1992  ;;  %v7037_v43 = vld [vmem:[#allocation4 + $0x198] sm:$0xff] }
 0xc15   :  { %v1994_v30 = vsel %vm501_vm9, %v1991_v52, %v1993_v46  ;;  %v7039_v52 = vld [vmem:[#allocation4 + $0x1a0] sm:$0xff]  ;;  %v7045_v46 = vld [vmem:[#allocation4 + $0x1a8] sm:$0xff]  ;;  %2174 = vmatpush.msra.mxu2 %v7037_v43 }
 0xc16   :  { %9139 = vst [vmem:[#allocation26_spill] sm:$0xff] %v6919_v36  ;;  %5140 = vtanh.f32 %v6919_v36  ;;  %v6923_v57 = vadd.f32 %v1994_v30, %v1976_v54  ;;  %v7041_v54 = vld [vmem:[#allocation4 + $0xc8] sm:$0xff]  ;;  %v7049_v30 = vld [vmem:[#allocation4 + $0x170] sm:$0xff]  ;;  %2214 = vmatpush.msrb.mxu3 %v7039_v52  ;;  %2254 = vmatpush.msrb.mxu0 %v7045_v46 }
 0xc17   :  { %9146 = vst [vmem:[#allocation41_spill] sm:$0xff] %v7045_v46  ;;  %2139 = vmatpush.msrb.mxu1 %v7041_v54  ;;  %2175 = vmatpush.msra.mxu2 %v7049_v30 }
 0xc18   :  { %9140 = vst [vmem:[#allocation28_spill] sm:$0xff] %v6923_v57  ;;  %5142 = vtanh.f32 %v6923_v57  ;;  %2255 = vmatpush.msrb.mxu0 %v7057_v19  ;;  %v7075_v57 = vld [vmem:[#allocation4 + $0x128] sm:$0xff]  ;;  %v7103_v19 = vld [vmem:[#allocation4] sm:$0xff] }
 0xc19   :  { %5144 = vtanh.f32 %v1950_v18  ;;  %v7069_v18 = vld [vmem:[#allocation4 + $0x158] sm:$0xff]  ;;  %2176 = vmatpush.msra.mxu2 %v7061_v56 }
 0xc1a   :  { %9148 = vst [vmem:[#allocation12_spill] sm:$0xff] %v7069_v18  ;;  %2256 = vmatpush.msrb.mxu0 %v7069_v18 }
 0xc1b   :  { %2177 = vmatpush.msra.mxu2 %v7073_v29 }
 0xc1c   :  { %v5141_v44 = vpop.eup %5140  ;;  %2257 = vmatpush.msrb.mxu0 %v7082_v3  ;;  %v7110_v3 = vld [vmem:[#allocation4 + $0x310] sm:$0xff] }
 0xc1d   :  { %2003 = vrot.lane.b32.xlu1 %v5141_v44, %s5378_s5  ;;  %v7051_v44 = vld [vmem:[#allocation4 + $0x178] sm:$0xff]  ;;  %2178 = vmatpush.msra.mxu2 %v7086_v27  ;;  %9151 = vst [vmem:[#allocation13_spill] sm:$0xff] %v7110_v3 }
 0xc1e   :  { %v5143_v51 = vpop.eup %5142  ;;  %2215 = vmatpush.msrb.mxu3 %v7051_v44 }
 0xc1f   :  { %2005 = vrot.lane.b32.xlu2 %v5143_v51, %s5378_s5  ;;  %v7053_v51 = vld [vmem:[#allocation4 + $0xa0] sm:$0xff]  ;;  %v5145_v35 = vpop.eup %5144 }
 0xc20   :  { %2140 = vmatpush.msrb.mxu1 %v7053_v51  ;;  %v1960_v36 = vmul.f32 %v5145_v35, %v6200_v26  ;;  %2216 = vmatpush.msrb.mxu3 %v7063_v11  ;;  %v7094_v35 = vld [vmem:[#allocation4 + $0x108] sm:$0xff]  ;;  %v7098_v26 = vld [vmem:[#allocation4 + $0xd0] sm:$0xff] }
 0xc21   :  { %9150 = vst [vmem:[#allocation8_spill] sm:$0xff] %v7094_v35  ;;  %2258 = vmatpush.msrb.mxu0 %v7094_v35  ;;  %2179 = vmatpush.msra.mxu2 %v7098_v26  ;;  %v7148_v35 = vld [vmem:[#allocation4 + $0x58] sm:$0xff] }
 0xc22   :  { %2141 = vmatpush.msrb.mxu1 %v7065_v10  ;;  %2217 = vmatpush.msrb.mxu3 %v7075_v57  ;;  %v1965_v12 = vadd.f32 %v1960_v36, %v6204_v42  ;;  %v7115_v36 = vld [vmem:[#allocation4 + $0xe0] sm:$0xff]  ;;  %v7142_v42 = vld [vmem:[#allocation4 + $0x88] sm:$0xff]  ;;  %9158 = vst [vmem:[#allocation9_spill] sm:$0xff] %v7148_v35 }
 0xc23   :  { %9152 = vst [vmem:[#allocation31_spill] sm:$0xff] %v7115_v36  ;;  %2259 = vmatpush.msrb.mxu0 %v7115_v36  ;;  %v7144_v36 = vld [vmem:[#allocation4 + $0x90] sm:$0xff] }
 0xc24   :  { %2142 = vmatpush.msrb.mxu1 %v7078_v34  ;;  %2218 = vmatpush.msrb.mxu3 %v7088_v1  ;;  %9157 = vst [vmem:[#allocation17_spill] sm:$0xff] %v7144_v36 }
 0xc26   :  { %2143 = vmatpush.msrb.mxu1 %v7090_v55  ;;  %2219 = vmatpush.msrb.mxu3 %v7100_v53 }
 0xc28   :  { %2144 = vmatpush.msrb.mxu1 %v7103_v19 }
 0xc2a   :  { %2281 = vmatpush.msra.mxu1 %v7110_v3  ;;  %v7170_v3 = vld [vmem:[#allocation4 + $0x18] sm:$0xff] }
 0xc2b   :  { %9166 = vst [vmem:[#allocation51_spill] sm:$0xff] %v7170_v3 }
 0xc79   :  { %v2006_v41 = vpop.permute.xlu2 %2005 }
 0xc8f   :  { %v2004_v18 = vpop.permute.xlu1 %2003 }
 0xc90   :  { %v2007_v46 = vsel %vm769_vm10, %v2004_v18, %v2006_v41  ;;  %v2010_v40 = vmul.f32 %v2004_v18, %v6901_v17  ;;  %v7119_v41 = vld [vmem:[#allocation4 + $0x2e8] sm:$0xff]  ;;  %v7124_v17 = vld [vmem:[#allocation4 + $0x2c0] sm:$0xff] }
 0xc91   :  { %v2011_v58 = vmul.f32 %v2007_v46, %v1965_v12  ;;  %9153 = vst [vmem:[#allocation24_spill] sm:$0xff] %v7119_v41  ;;  %2282 = vmatpush.msra.mxu1 %v7119_v41  ;;  %v7128_v12 = vld [vmem:[#allocation4 + $0xa8] sm:$0xff]  ;;  %v7130_v46 = vld [vmem:[#allocation4 + $0xb0] sm:$0xff]  ;;  %v7140_v18 = vld [vmem:[#allocation4 + $0x80] sm:$0xff] }
 0xc92   :  { %2123 = vrot.lane.b32.xlu1 %v2010_v40, %s5377_s24  ;;  %9154 = vst [vmem:[#allocation14_spill] sm:$0xff] %v7124_v17  ;;  %v7132_v40 = vld [vmem:[#allocation4 + $0xb8] sm:$0xff]  ;;  %2180 = vmatpush.msra.mxu2 %v7128_v12  ;;  %v7161_v41 = vld [vmem:[#allocation4 + $0x40] sm:$0xff] }
 0xc93   :  { %2013 = vrot.lane.b32.xlu0 %v2011_v58, %s5377_s24  ;;  %2283 = vmatpush.msra.mxu1 %v7124_v17  ;;  %9155 = vst [vmem:[#allocation15_spill] sm:$0xff] %v7132_v40  ;;  %v7137_v58 = vld [vmem:[#allocation4 + $0x298] sm:$0xff]  ;;  %v7150_v17 = vld [vmem:[#allocation4 + $0x60] sm:$0xff] }
 0xc94   :  { %2220 = vmatpush.msrb.mxu3 %v7130_v46  ;;  %2260 = vmatpush.msrb.mxu0 %v7132_v40  ;;  %9156 = vst [vmem:[#allocation16_spill] sm:$0xff] %v7137_v58  ;;  %v7153_v40 = vld [vmem:[#allocation4 + $0x68] sm:$0xff] }
 0xc95   :  { %2284 = vmatpush.msra.mxu1 %v7137_v58  ;;  %2181 = vmatpush.msra.mxu2 %v7140_v18  ;;  %9159 = vst [vmem:[#allocation18_spill] sm:$0xff] %v7150_v17  ;;  %v7157_v58 = vld [vmem:[#allocation4 + $0x30] sm:$0xff] }
 0xc96   :  { %2221 = vmatpush.msrb.mxu3 %v7142_v42  ;;  %2261 = vmatpush.msrb.mxu0 %v7144_v36  ;;  %9160 = vst [vmem:[#allocation19_spill] sm:$0xff] %v7153_v40  ;;  %v7168_v36 = vld [vmem:[#allocation4 + $0x10] sm:$0xff] }
 0xc97   :  { %2182 = vmatpush.msra.mxu2 %v7148_v35  ;;  %9161 = vst [vmem:[#allocation20_spill] sm:$0xff] %v7157_v58  ;;  %v7176_v35 = vld [vmem:[#allocation4 + $0x278] sm:$0xff] }
 0xc98   :  { %2222 = vmatpush.msrb.mxu3 %v7150_v17  ;;  %9163 = vst [vmem:[#allocation22_spill] sm:$0xff] %v7161_v41  ;;  %2262 = vmatpush.msrb.mxu0 %v7153_v40 }
 0xc99   :  { %2183 = vmatpush.msra.mxu2 %v7157_v58  ;;  %9165 = vst [vmem:[#allocation72_spill] sm:$0xff] %v7168_v36  ;;  %v7178_v58 = vld [vmem:[#allocation4 + $0x318] sm:$0xff] }
 0xc9a   :  { %2223 = vmatpush.msrb.mxu3 %v7159_v23  ;;  %2263 = vmatpush.msrb.mxu0 %v7161_v41  ;;  %9167 = vst [vmem:[#allocation32_spill] sm:$0xff] %v7176_v35  ;;  %v7196_v23 = vld [vmem:[#allocation4 + $0x2c8] sm:$0xff] }
 0xc9b   :  { %2184 = vmatpush.msra.mxu2 %v7166_v24  ;;  %v7194_v24 = vld [vmem:[#allocation4 + $0x228] sm:$0xff] }
 0xc9c   :  { %2224 = vmatpush.msrb.mxu3 %v7168_v36  ;;  %2264 = vmatpush.msrb.mxu0 %v7170_v3  ;;  %v7188_v3 = vld [vmem:[#allocation4 + $0x250] sm:$0xff] }
 0xc9d   :  { %v7190_v36 = vld [vmem:[#allocation4 + $0x2f0] sm:$0xff] }
 0xd04   :  { %v2124_v17 = vpop.permute.xlu1 %2123 }
 0xd05   :  { %v2014_v40 = vpop.permute.xlu0 %2013 }
 0xd06   :  { %2016 = vst.msk [vmem:[#allocation3] sm:$0xff] %vm501_vm9, %v2014_v40  ;;  %4987 = vmatmul.msk.f32.vlgmr.msrb.gmra.mxu2 %vm501_vm9, %v2014_v40  ;;  %4988 = vmatmul.msk.f32.vlgmr.msra.gmra.mxu3 %vm501_vm9, %v2014_v40  ;;  %v7184_v41 = vsel %vm501_vm9, %v2124_v17, %v2014_v40  ;;  %v7202_v17 = vld [vmem:[#allocation4 + $0x200] sm:$0xff] }
 0xd07   :  { %4989 = vmatmul.msk.f32.vlgmr.msra.gmra.mxu0 %vm501_vm9, %v2014_v40  ;;  %2145 = vmatmul.f32.vlgmr.msrb.gmra.mxu1 %v7184_v41 }
 0xd08   :  { %2289 = vmatpush.msrb.mxu1 %v7176_v35  ;;  %2321 = vmatpush.msrb.mxu2 %v7178_v58  ;;  %v7208_v35 = vld [vmem:[#allocation4 + $0x2a0] sm:$0xff] }
 0xd09   :  { %2540 = vmatpush.msra.mxu3 %v6933_v47  ;;  %2580 = vmatpush.msra.mxu0 %v6935_v6  ;;  %v7214_v47 = vld [vmem:[#allocation4 + $0x1d8] sm:$0xff]  ;;  %v7219_v6 = vld [vmem:[#allocation4 + $0x1b0] sm:$0xff] }
 0xd0a   :  { %2290 = vmatpush.msrb.mxu1 %v7188_v3  ;;  %2322 = vmatpush.msrb.mxu2 %v7190_v36 }
 0xd0b   :  { %2541 = vmatpush.msra.mxu3 %v6943_v48  ;;  %2581 = vmatpush.msra.mxu0 %v6949_v45  ;;  %v7224_v48 = vld [vmem:[#allocation4 + $0x188] sm:$0xff]  ;;  %v7230_v45 = vld [vmem:[#allocation4 + $0x160] sm:$0xff] }
 0xd0c   :  { %2291 = vmatpush.msrb.mxu1 %v7194_v24  ;;  %2323 = vmatpush.msrb.mxu2 %v7196_v23 }
 0xd0d   :  { %2542 = vmatpush.msra.mxu3 %v6955_v13  ;;  %2582 = vmatpush.msra.mxu0 %v6957_v33  ;;  %v7260_v13 = vld [vmem:[#allocation4 + $0x98] sm:$0xff]  ;;  %v7266_v33 = vld [vmem:[#allocation4 + $0x70] sm:$0xff] }
 0xd0e   :  { %2292 = vmatpush.msrb.mxu1 %v7202_v17  ;;  %2185 = vmatmul.f32.vlgmr.msra.gmra.mxu2 %v7184_v41 }
 0xd0f   :  { %2225 = vmatmul.f32.vlgmr.msrb.gmra.mxu3 %v7184_v41  ;;  %2265 = vmatmul.f32.vlgmr.msrb.gmra.mxu0 %v7184_v41 }
 0xd10   :  { %4990 = vmatmul.msk.f32.vlgmr.msra.gmra.mxu1 %vm501_vm9, %v2014_v40  ;;  %2324 = vmatpush.msrb.mxu2 %v7208_v35 }
 0xd11   :  { %2293 = vmatpush.msrb.mxu1 %v7214_v47  ;;  %2543 = vmatpush.msra.mxu3 %v6963_v14  ;;  %v7272_v14 = vld [vmem:[#allocation4 + $0x48] sm:$0xff] }
 0xd12   :  { %2508 = vmatpush.msra.mxu2 %v6928_v5  ;;  %2583 = vmatpush.msra.mxu0 %v6965_v9  ;;  %v7237_v5 = vld [vmem:[#allocation4 + $0x138] sm:$0xff]  ;;  %v7278_v9 = vld [vmem:[#allocation4 + $0x20] sm:$0xff] }
 0xd13   :  { %2294 = vmatpush.msrb.mxu1 %v7219_v6  ;;  %2548 = vmatpush.msrb.mxu3 %v6976_v16  ;;  %v9182_v16 = vld [vmem:[#allocation41_spill] sm:$0xff] }
 0xd14   :  { %2509 = vmatpush.msra.mxu2 %v6930_v15  ;;  %2588 = vmatpush.msrb.mxu0 %v6978_v37  ;;  %v7242_v15 = vld [vmem:[#allocation4 + $0x110] sm:$0xff]  ;;  %v9183_v37 = vld [vmem:[#allocation11_spill] sm:$0xff] }
 0xd15   :  { %2295 = vmatpush.msrb.mxu1 %v7224_v48  ;;  %2549 = vmatpush.msrb.mxu3 %v6988_v20  ;;  %v9186_v20 = vld [vmem:[#allocation8_spill] sm:$0xff] }
 0xd16   :  { %2510 = vmatpush.msra.mxu2 %v6937_v38  ;;  %2589 = vmatpush.msrb.mxu0 %v6990_v61  ;;  %v7248_v38 = vld [vmem:[#allocation4 + $0xe8] sm:$0xff]  ;;  %v9187_v61 = vld [vmem:[#allocation31_spill] sm:$0xff] }
 0xd17   :  { %4991 = vmatmul.msk.f32.vlgmr.msrb.gmra.mxu2 %vm501_vm9, %v2014_v40  ;;  %2296 = vmatpush.msrb.mxu1 %v7230_v45  ;;  %v9197_v40 = vld [vmem:[#allocation74_spill] sm:$0xff] }
 0xd18   :  { %2511 = vmatpush.msra.mxu2 %v6946_v22  ;;  %2550 = vmatpush.msrb.mxu3 %v7001_v32  ;;  %v7254_v22 = vld [vmem:[#allocation4 + $0xc0] sm:$0xff]  ;;  %v9189_v32 = vld [vmem:[#allocation17_spill] sm:$0xff] }
 0xd19   :  { %2297 = vmatpush.msrb.mxu1 %v7237_v5  ;;  %2590 = vmatpush.msrb.mxu0 %v7003_v59  ;;  %v9190_v59 = vld [vmem:[#allocation19_spill] sm:$0xff] }
 0xd1a   :  { %2512 = vmatpush.msra.mxu2 %v6967_v21  ;;  %2551 = vmatpush.msrb.mxu3 %v7013_v62  ;;  %v9180_v21 = vld [vmem:[#allocation16_spill] sm:$0xff]  ;;  %v9192_v62 = vld [vmem:[#allocation51_spill] sm:$0xff] }
 0xd1b   :  { %2298 = vmatpush.msrb.mxu1 %v7242_v15  ;;  %2591 = vmatpush.msrb.mxu0 %v7015_v39 }
 0xd1c   :  { %2513 = vmatpush.msra.mxu2 %v6980_v2  ;;  %2552 = vmatpush.msrb.mxu3 %v7025_v8  ;;  %v9184_v2 = vld [vmem:[#allocation12_spill] sm:$0xff] }
 0xd1d   :  { %2299 = vmatpush.msrb.mxu1 %v7248_v38  ;;  %2592 = vmatpush.msrb.mxu0 %v7027_v50 }
 0xd1e   :  { %2514 = vmatpush.msra.mxu2 %v6992_v25  ;;  %2553 = vmatpush.msrb.mxu3 %v7037_v43  ;;  %v9188_v25 = vld [vmem:[#allocation15_spill] sm:$0xff] }
 0xd1f   :  { %2300 = vmatpush.msrb.mxu1 %v7254_v22  ;;  %2593 = vmatpush.msrb.mxu0 %v7039_v52  ;;  %v9193_v52 = vld [vmem:[#allocation60_spill] sm:$0xff] }
 0xd20   :  { %2515 = vmatpush.msra.mxu2 %v7005_v7  ;;  %2554 = vmatpush.msrb.mxu3 %v7049_v30  ;;  %v9191_v7 = vld [vmem:[#allocation22_spill] sm:$0xff]  ;;  %v9194_v30 = vld [vmem:[#allocation73_spill] sm:$0xff] }
 0xd21   :  { %2301 = vmatpush.msrb.mxu1 %v7260_v13  ;;  %2594 = vmatpush.msrb.mxu0 %v7051_v44 }
 0xd22   :  { %2516 = vmatpush.msra.mxu2 %v7017_v4  ;;  %2555 = vmatpush.msrb.mxu3 %v7061_v56  ;;  %v9195_v56 = vld [vmem:[#allocation59_spill] sm:$0xff] }
 0xd23   :  { %2302 = vmatpush.msrb.mxu1 %v7266_v33  ;;  %2595 = vmatpush.msrb.mxu0 %v7063_v11 }
 0xd24   :  { %2517 = vmatpush.msra.mxu2 %v7029_v63  ;;  %2556 = vmatpush.msrb.mxu3 %v7073_v29  ;;  %v9170_v29 = vld [vmem:[#allocation18_spill] sm:$0xff] }
 0xd25   :  { %2303 = vmatpush.msrb.mxu1 %v7272_v14  ;;  %2596 = vmatpush.msrb.mxu0 %v7075_v57  ;;  %v9176_v57 = vld [vmem:[#allocation14_spill] sm:$0xff] }
 0xd26   :  { %2518 = vmatpush.msra.mxu2 %v7041_v54  ;;  %2557 = vmatpush.msrb.mxu3 %v7086_v27  ;;  %v9172_v27 = vld [vmem:[#allocation24_spill] sm:$0xff] }
 0xd27   :  { %2304 = vmatpush.msrb.mxu1 %v7278_v9  ;;  %2597 = vmatpush.msrb.mxu0 %v7088_v1  ;;  %v9171_v1 = vld [vmem:[#allocation52_spill] sm:$0xff] }
 0xd28   :  { %2519 = vmatpush.msra.mxu2 %v7053_v51  ;;  %2305 = vmatmul.f32.vlgmr.msrb.gmra.mxu1 %v7184_v41 }
 0xd29   :  { %2620 = vmatpush.msra.mxu1 %v6941_v31  ;;  %2558 = vmatpush.msrb.mxu3 %v7098_v26  ;;  %v9168_v26 = vld [vmem:[#allocation13_spill] sm:$0xff]  ;;  %v9177_v31 = vld [vmem:[#allocation23_spill] sm:$0xff] }
 0xd2a   :  { %2520 = vmatpush.msra.mxu2 %v7065_v10  ;;  %2598 = vmatpush.msrb.mxu0 %v7100_v53  ;;  %v9174_v53 = vld [vmem:[#allocation21_spill] sm:$0xff]  ;;  %v9196_v10 = vld [vmem:[#allocation68_spill] sm:$0xff] }
 0xd2b   :  { %2621 = vmatpush.msra.mxu1 %v6951_v49  ;;  %2559 = vmatpush.msrb.mxu3 %v7128_v12  ;;  %v9178_v49 = vld [vmem:[#allocation72_spill] sm:$0xff] }
 0xd2c   :  { %2521 = vmatpush.msra.mxu2 %v7078_v34  ;;  %2599 = vmatpush.msrb.mxu0 %v7130_v46  ;;  %v9169_v34 = vld [vmem:[#allocation9_spill] sm:$0xff] }
 0xd2d   :  { %2622 = vmatpush.msra.mxu1 %v6959_v28  ;;  %2560 = vmatpush.msrb.mxu3 %v7140_v18  ;;  %v9179_v28 = vld [vmem:[#allocation10_spill] sm:$0xff] }
 0xd2e   :  { %2522 = vmatpush.msra.mxu2 %v7090_v55  ;;  %2600 = vmatpush.msrb.mxu0 %v7142_v42  ;;  %v9173_v55 = vld [vmem:[#allocation20_spill] sm:$0xff]  ;;  %v9175_v42 = vld [vmem:[#allocation79_spill] sm:$0xff] }
 0xd2f   :  { %2623 = vmatpush.msra.mxu1 %v6971_v60  ;;  %2561 = vmatpush.msrb.mxu3 %v9169_v34  ;;  %v9181_v60 = vld [vmem:[#allocation27_spill] sm:$0xff] }
 0xd30   :  { %2523 = vmatpush.msra.mxu2 %v7103_v19  ;;  %2601 = vmatpush.msrb.mxu0 %v9170_v29  ;;  %v9198_v29 = vld [vmem:[#allocation70_spill] sm:$0xff] }
 0xd31   :  { %2628 = vmatpush.msrb.mxu1 %v6984_v0  ;;  %2562 = vmatpush.msrb.mxu3 %v9173_v55  ;;  %v9185_v0 = vld [vmem:[#allocation29_spill] sm:$0xff] }
 0xd32   :  { %2660 = vmatpush.msrb.mxu2 %v9168_v26  ;;  %2602 = vmatpush.msrb.mxu0 %v9174_v53 }
 0xd33   :  { %2629 = vmatpush.msrb.mxu1 %v9171_v1  ;;  %2563 = vmatpush.msrb.mxu3 %v9177_v31 }
 0xd34   :  { %2661 = vmatpush.msrb.mxu2 %v9172_v27  ;;  %2603 = vmatpush.msrb.mxu0 %v9178_v49  ;;  %v9200_v49 = vld [vmem:[#allocation82_spill] sm:$0xff] }
 0xd35   :  { %2630 = vmatpush.msrb.mxu1 %v9175_v42 }
 0xd36   :  { %2662 = vmatpush.msrb.mxu2 %v9176_v57  ;;  %v9199_v57 = vld [vmem:[#allocation58_spill] sm:$0xff] }
 0xd37   :  { %2631 = vmatpush.msrb.mxu1 %v9179_v28 }
 0xd38   :  { %2663 = vmatpush.msrb.mxu2 %v9180_v21  ;;  %v9201_v21 = vld [vmem:[#allocation75_spill] sm:$0xff] }
 0xd39   :  { %2632 = vmatpush.msrb.mxu1 %v9181_v60 }
 0xd3b   :  { %2633 = vmatpush.msrb.mxu1 %v9182_v16  ;;  %v9202_v16 = vld [vmem:[#allocation76_spill] sm:$0xff] }
 0xd3d   :  { %2634 = vmatpush.msrb.mxu1 %v9183_v37 }
 0xd3f   :  { %2635 = vmatpush.msrb.mxu1 %v9184_v2 }
 0xd41   :  { %2636 = vmatpush.msrb.mxu1 %v9185_v0 }
 0xd43   :  { %2637 = vmatpush.msrb.mxu1 %v9186_v20 }
 0xd45   :  { %2638 = vmatpush.msrb.mxu1 %v9187_v61 }
 0xd47   :  { %2639 = vmatpush.msrb.mxu1 %v9188_v25  ;;  %v9203_v25 = vld [vmem:[#allocation77_spill] sm:$0xff] }
 0xd49   :  { %2640 = vmatpush.msrb.mxu1 %v9189_v32 }
 0xd4b   :  { %2641 = vmatpush.msrb.mxu1 %v9190_v59 }
 0xd4d   :  { %2642 = vmatpush.msrb.mxu1 %v9191_v7 }
 0xd4f   :  { %2643 = vmatpush.msrb.mxu1 %v9192_v62  ;;  %v9204_v62 = vld [vmem:[#allocation78_spill] sm:$0xff] }
 0xd84   :  { %v2246_v39 = vpop.f32.mrf.mxu0  ;;  %v2146_v4 = vpop.f32.mrf.mxu1 }
 0xd89   :  { %v2206_v8 = vpop.f32.mrf.mxu3  ;;  %v2166_v27 = vpop.f32.mrf.mxu2 }
 0xd8a   :  { %v2167_v42 = vadd.f32 %v2166_v27, %v2146_v4 }
 0xd8c   :  { %v2266_v50 = vpop.f32.mrf.mxu0  ;;  %v2329_v28 = vadd.f32 %v2167_v42, %v9200_v49 }
 0xd8d   :  { %v2286_v63 = vpop.f32.mrf.mxu1 }
 0xd8e   :  { %v2287_v43 = vadd.f32 %v2286_v63, %v2266_v50  ;;  %v2334_v37 = vmul.f32 %v2329_v28, %v9202_v16  ;;  %v9205_v63 = vld [vmem:[#allocation26_spill] sm:$0xff]  ;;  %v9209_v28 = vld [vmem:[#allocation85_spill] sm:$0xff] }
 0xd90   :  { %v2332_v54 = vadd.f32 %v2287_v43, %v9193_v52 }
 0xd91   :  { %v2186_v55 = vpop.f32.mrf.mxu2 }
 0xd92   :  { %v2337_v44 = vmul.f32 %v2332_v54, %v9194_v30  ;;  %v2226_v51 = vpop.f32.mrf.mxu3  ;;  %v2207_v53 = vadd.f32 %v2206_v8, %v2186_v55  ;;  %v9206_v54 = vld [vmem:[#allocation28_spill] sm:$0xff] }
 0xd93   :  { %v2247_v19 = vadd.f32 %v2246_v39, %v2226_v51  ;;  %v9208_v55 = vld [vmem:[#allocation84_spill] sm:$0xff] }
 0xd94   :  { %5146 = vtanh.f32 %v2337_v44  ;;  %v2330_v31 = vadd.f32 %v2207_v53, %v9199_v57 }
 0xd95   :  { %v2331_v11 = vadd.f32 %v2247_v19, %v9195_v56 }
 0xd96   :  { %v2335_v60 = vmul.f32 %v2330_v31, %v9201_v21 }
 0xd97   :  { %v2336_v41 = vmul.f32 %v2331_v11, %v9196_v10 }
 0xd99   :  { %5148 = vtanh.f32 %v2336_v41 }
 0xd9a   :  { %v5147_v12 = vpop.eup %5146  ;;  %5150 = vtanh.f32 %v2335_v60 }
 0xd9b   :  { %v2347_v46 = vmul.f32 %v5147_v12, %v9194_v30  ;;  %5152 = vtanh.f32 %v2334_v37 }
 0xd9d   :  { %v2352_v18 = vadd.f32 %v2347_v46, %v9197_v40 }
 0xd9f   :  { %v5149_v26 = vpop.eup %5148  ;;  %2360 = vrot.lane.b32.xlu0 %v2352_v18, %s5378_s5 }
 0xda0   :  { %v2346_v34 = vmul.f32 %v5149_v26, %v9196_v10  ;;  %v5151_v2 = vpop.eup %5150  ;;  %v2326_v26 = vpop.f32.mrf.mxu2 }
 0xda1   :  { %v5153_v0 = vpop.eup %5152  ;;  %v2345_v20 = vmul.f32 %v5151_v2, %v9201_v21 }
 0xda2   :  { %v2351_v1 = vadd.f32 %v2346_v34, %v9198_v29  ;;  %v2344_v61 = vmul.f32 %v5153_v0, %v9202_v16 }
 0xda3   :  { %v2350_v32 = vadd.f32 %v2345_v20, %v9203_v25 }
 0xda4   :  { %2358 = vrot.lane.b32.xlu2 %v2351_v1, %s5378_s5  ;;  %v2349_v39 = vadd.f32 %v2344_v61, %v9204_v62  ;;  %v2355_v44 = vmul.f32 %v2351_v1, %v9206_v54  ;;  %v9207_v1 = vld [vmem:[#allocation67_spill] sm:$0xff] }
 0xda5   :  { %v2354_v43 = vmul.f32 %v2350_v32, %v9205_v63  ;;  %v2306_v46 = vpop.f32.mrf.mxu1 }
 0xda6   :  { %v2327_v34 = vadd.f32 %v2326_v26, %v2306_v46 }
 0xda8   :  { %v2333_v27 = vadd.f32 %v2327_v34, %v9207_v1 }
 0xdaa   :  { %v2338_v53 = vmul.f32 %v2333_v27, %v9208_v55 }
 0xdfe   :  { %v2359_v59 = vpop.permute.xlu2 %2358 }
 0xe11   :  { %v2361_v7 = vpop.permute.xlu0 %2360 }
 0xe12   :  { %v2362_v4 = vsel %vm769_vm10, %v2359_v59, %v2361_v7  ;;  %v2366_v8 = vmul.f32 %v2361_v7, %v2350_v32  ;;  %v9210_v32 = vld [vmem:[#allocation32_spill] sm:$0xff] }
 0xe13   :  { %v2365_v50 = vmul.f32 %v2362_v4, %v2349_v39 }
 0xe14   :  { %2371 = vrot.lane.b32.xlu2 %v2366_v8, %s5377_s24  ;;  %v9213_v8 = vld [vmem:[#allocation61_spill] sm:$0xff] }
 0xe15   :  { %2369 = vrot.lane.b32.xlu1 %v2365_v50, %s5377_s24 }
 0xe6e   :  { %v2372_v52 = vpop.permute.xlu2 %2371 }
 0xe87   :  { %v2370_v51 = vpop.permute.xlu1 %2369 }
 0xe88   :  { %v2373_v19 = vsel %vm501_vm9, %v2370_v51, %v2372_v52  ;;  %v7354_v56 = vadd.f32 %v2370_v51, %v2354_v43  ;;  %v9214_v52 = vld [vmem:[#allocation83_spill] sm:$0xff] }
 0xe89   :  { %v7356_v11 = vadd.f32 %v2373_v19, %v2355_v44 }
 0xe8a   :  { %5154 = vtanh.f32 %v7354_v56 }
 0xe8b   :  { %5156 = vtanh.f32 %v7356_v11 }
 0xe8c   :  { %5158 = vtanh.f32 %v2338_v53 }
 0xe90   :  { %v5155_v41 = vpop.eup %5154 }
 0xe91   :  { %v5157_v12 = vpop.eup %5156  ;;  %2382 = vrot.lane.b32.xlu0 %v5155_v41, %s5378_s5 }
 0xe92   :  { %2384 = vrot.lane.b32.xlu1 %v5157_v12, %s5378_s5  ;;  %v5159_v42 = vpop.eup %5158 }
 0xe93   :  { %v2348_v57 = vmul.f32 %v5159_v42, %v9208_v55 }
 0xe95   :  { %v2353_v60 = vadd.f32 %v2348_v57, %v9209_v28 }
 0xf03   :  { %v2383_v31 = vpop.permute.xlu0 %2382 }
 0xf04   :  { %v2389_v49 = vmul.f32 %v2383_v31, %v2352_v18  ;;  %v2385_v37 = vpop.permute.xlu1 %2384 }
 0xf05   :  { %v2386_v2 = vsel %vm769_vm10, %v2383_v31, %v2385_v37 }
 0xf06   :  { %v2390_v0 = vmul.f32 %v2386_v2, %v2353_v60  ;;  %2502 = vrot.lane.b32.xlu0 %v2389_v49, %s5377_s24 }
 0xf08   :  { %2392 = vrot.lane.b32.xlu2 %v2390_v0, %s5377_s24 }
 0xf62   :  { %v2393_v20 = vpop.permute.xlu2 %2392 }
 0xf63   :  { %2395 = vst.msk [vmem:[#allocation3 + $0x8] sm:$0xff] %vm501_vm9, %v2393_v20  ;;  %4992 = vmatmul.msk.f32.vlgmr.msra.gmra.mxu3 %vm501_vm9, %v2393_v20  ;;  %4993 = vmatmul.msk.f32.vlgmr.msra.gmra.mxu0 %vm501_vm9, %v2393_v20 }
 0xf64   :  { %4994 = vmatmul.msk.f32.vlgmr.msra.gmra.mxu1 %vm501_vm9, %v2393_v20  ;;  %2700 = vmatpush.msra.mxu3 %v7178_v58 }
 0xf66   :  { %2701 = vmatpush.msra.mxu3 %v7190_v36  ;;  %v9211_v36 = vld [vmem:[#allocation62_spill] sm:$0xff] }
 0xf68   :  { %2702 = vmatpush.msra.mxu3 %v7196_v23 }
 0xf6a   :  { %2703 = vmatpush.msra.mxu3 %v7208_v35 }
 0xf78   :  { %v2503_v18 = vpop.permute.xlu0 %2502 }
 0xf79   :  { %v2504_v61 = vsel %vm501_vm9, %v2503_v18, %v2393_v20 }
 0xf7a   :  { %2524 = vmatmul.f32.vlgmr.msra.gmra.mxu2 %v2504_v61  ;;  %2564 = vmatmul.f32.vlgmr.msrb.gmra.mxu3 %v2504_v61 }
 0xf7b   :  { %2604 = vmatmul.f32.vlgmr.msrb.gmra.mxu0 %v2504_v61  ;;  %2644 = vmatmul.f32.vlgmr.msrb.gmra.mxu1 %v2504_v61 }
 0xf7c   :  { %2668 = vmatpush.msra.mxu2 %v9210_v32 }
 0xf7e   :  { %2669 = vmatpush.msra.mxu2 %v7188_v3 }
 0xf80   :  { %2670 = vmatpush.msra.mxu2 %v7194_v24 }
 0xf82   :  { %2671 = vmatpush.msra.mxu2 %v7202_v17  ;;  %4996 = vmatmul.msk.f32.vlgmr.msra.gmra.mxu3 %vm501_vm9, %v2393_v20 }
 0xf83   :  { %4995 = vmatmul.msk.f32.vlgmr.msrb.gmra.mxu2 %vm501_vm9, %v2393_v20 }
 0xf84   :  { %2672 = vmatpush.msra.mxu2 %v7214_v47 }
 0xf86   :  { %2673 = vmatpush.msra.mxu2 %v7219_v6 }
 0xf88   :  { %2674 = vmatpush.msra.mxu2 %v7224_v48 }
 0xf8a   :  { %2675 = vmatpush.msra.mxu2 %v7230_v45 }
 0xf8c   :  { %2676 = vmatpush.msra.mxu2 %v7237_v5 }
 0xf8e   :  { %2677 = vmatpush.msra.mxu2 %v7242_v15 }
 0xf90   :  { %2678 = vmatpush.msra.mxu2 %v7248_v38 }
 0xf92   :  { %2679 = vmatpush.msra.mxu2 %v7254_v22  ;;  %v9212_v22 = vld [vmem:[#allocation63_spill] sm:$0xff] }
 0xf94   :  { %2680 = vmatpush.msra.mxu2 %v7260_v13 }
 0xf96   :  { %2681 = vmatpush.msra.mxu2 %v7266_v33 }
 0xf98   :  { %2682 = vmatpush.msra.mxu2 %v7272_v14 }
 0xf9a   :  { %2683 = vmatpush.msra.mxu2 %v7278_v9 }
 0xf9b   :  { %2684 = vmatmul.f32.vlgmr.msra.gmra.mxu2 %v2504_v61 }
 0xfe0   :  { %v2585_v3 = vpop.f32.mrf.mxu0 }
 0xfe1   :  { %v2625_v24 = vpop.f32.mrf.mxu1 }
 0xfe6   :  { %v2545_v7 = vpop.f32.mrf.mxu3 }
 0xff8   :  { %v2605_v23 = vpop.f32.mrf.mxu0  ;;  %v2645_v48 = vpop.f32.mrf.mxu1 }
 0xff9   :  { %v2626_v35 = vadd.f32 %v2625_v24, %v2605_v23  ;;  %v9217_v24 = vld [vmem:[#allocation69_spill] sm:$0xff] }
 0xffb   :  { %v2710_v58 = vadd.f32 %v2626_v35, %v9211_v36 }
 0xffd   :  { %v2715_v17 = vmul.f32 %v2710_v58, %v9196_v10  ;;  %v2525_v47 = vpop.f32.mrf.mxu2  ;;  %v2565_v39 = vpop.f32.mrf.mxu3 }
 0xffe   :  { %v2586_v4 = vadd.f32 %v2585_v3, %v2565_v39  ;;  %v2546_v43 = vadd.f32 %v2545_v7, %v2525_v47  ;;  %v7462_v7 = vld [vmem:[#allocation4 + $0x2a8] sm:$0xff]  ;;  %v7464_v39 = vld [vmem:[#allocation4 + $0x2b0] sm:$0xff] }
 0xfff   :  { %5160 = vtanh.f32 %v2715_v17 }
0x1000   :  { %v2709_v50 = vadd.f32 %v2586_v4, %v9213_v8  ;;  %v2708_v54 = vadd.f32 %v2546_v43, %v9214_v52  ;;  %v7466_v4 = vld [vmem:[#allocation4 + $0x2b8] sm:$0xff]  ;;  %v7470_v8 = vld [vmem:[#allocation4 + $0x280] sm:$0xff]  ;;  %v7478_v43 = vld [vmem:[#allocation4 + $0x290] sm:$0xff] }
0x1001   :  { %v7482_v52 = vld [vmem:[#allocation4 + $0x260] sm:$0xff] }
0x1002   :  { %v2714_v63 = vmul.f32 %v2709_v50, %v9201_v21  ;;  %v2713_v51 = vmul.f32 %v2708_v54, %v9202_v16  ;;  %v7472_v50 = vld [vmem:[#allocation4 + $0x288] sm:$0xff] }
0x1003   :  { %v7484_v54 = vld [vmem:[#allocation4 + $0x268] sm:$0xff] }
0x1005   :  { %v5161_v6 = vpop.eup %5160  ;;  %v2705_v61 = vpop.f32.mrf.mxu3 }
0x1006   :  { %v2665_v45 = vpop.f32.mrf.mxu2  ;;  %v2725_v5 = vmul.f32 %v5161_v6, %v9196_v10  ;;  %v7620_v10 = vld [vmem:[#allocation4 + $0xb0] sm:$0xff] }
0x1007   :  { %v2666_v15 = vadd.f32 %v2665_v45, %v2645_v48  ;;  %v7435_v45 = vld [vmem:[#allocation4 + $0x258] sm:$0xff] }
0x1008   :  { %v2730_v38 = vadd.f32 %v2725_v5, %v9198_v29  ;;  %v7437_v5 = vld [vmem:[#allocation4 + $0x230] sm:$0xff]  ;;  %2887 = vmatpush.msrb.mxu3 %v7435_v45 }
0x1009   :  { %v2711_v13 = vadd.f32 %v2666_v15, %v9212_v22  ;;  %v7440_v15 = vld [vmem:[#allocation4 + $0x2f8] sm:$0xff]  ;;  %v7444_v22 = vld [vmem:[#allocation4 + $0x208] sm:$0xff]  ;;  %v7613_v29 = vld [vmem:[#allocation4 + $0x310] sm:$0xff] }
0x100a   :  { %2737 = vrot.lane.b32.xlu1 %v2730_v38, %s5378_s5  ;;  %v2734_v49 = vmul.f32 %v2730_v38, %v7356_v11  ;;  %v7442_v38 = vld [vmem:[#allocation4 + $0x300] sm:$0xff]  ;;  %2919 = vmatpush.msra.mxu0 %v7440_v15  ;;  %9228 = vst [vmem:[#allocation46_spill] sm:$0xff] %v7613_v29 }
0x100b   :  { %v2716_v33 = vmul.f32 %v2711_v13, %v9194_v30  ;;  %2959 = vmatpush.msra.mxu1 %v7442_v38  ;;  %v7448_v13 = vld [vmem:[#allocation4 + $0x308] sm:$0xff]  ;;  %2888 = vmatpush.msrb.mxu3 %v7437_v5 }
0x100c   :  { %2999 = vmatpush.msrb.mxu2 %v7448_v13 }
0x100d   :  { %5162 = vtanh.f32 %v2716_v33  ;;  %v7450_v33 = vld [vmem:[#allocation4 + $0x2d0] sm:$0xff]  ;;  %2889 = vmatpush.msrb.mxu3 %v7444_v22 }
0x100e   :  { %5164 = vtanh.f32 %v2714_v63  ;;  %2920 = vmatpush.msra.mxu0 %v7450_v33  ;;  %v7474_v63 = vld [vmem:[#allocation4 + $0x1b8] sm:$0xff] }
0x100f   :  { %5166 = vtanh.f32 %v2713_v51  ;;  %v7490_v51 = vld [vmem:[#allocation4 + $0x270] sm:$0xff] }
0x1010   :  { %2921 = vmatpush.msra.mxu0 %v7462_v7 }
0x1012   :  { %2922 = vmatpush.msra.mxu0 %v7470_v8 }
0x1013   :  { %v5163_v14 = vpop.eup %5162 }
0x1014   :  { %v2726_v9 = vmul.f32 %v5163_v14, %v9194_v30  ;;  %v5165_v44 = vpop.eup %5164  ;;  %v7453_v14 = vld [vmem:[#allocation4 + $0x1e0] sm:$0xff]  ;;  %2927 = vmatpush.msrb.mxu0 %v7482_v52  ;;  %v7616_v30 = vld [vmem:[#allocation4 + $0xa8] sm:$0xff] }
0x1015   :  { %v2724_v19 = vmul.f32 %v5165_v44, %v9201_v21  ;;  %v5167_v26 = vpop.eup %5166  ;;  %2890 = vmatpush.msrb.mxu3 %v7453_v14  ;;  %v7486_v44 = vld [vmem:[#allocation4 + $0x190] sm:$0xff]  ;;  %v7606_v21 = vld [vmem:[#allocation4] sm:$0xff] }
0x1016   :  { %v2731_v59 = vadd.f32 %v2726_v9, %v9197_v40  ;;  %v2723_v34 = vmul.f32 %v5167_v26, %v9202_v16  ;;  %v7456_v9 = vld [vmem:[#allocation4 + $0x2d8] sm:$0xff]  ;;  %v7506_v26 = vld [vmem:[#allocation4 + $0x210] sm:$0xff]  ;;  %v7610_v40 = vld [vmem:[#allocation4 + $0xe0] sm:$0xff] }
0x1017   :  { %v2729_v41 = vadd.f32 %v2724_v19, %v9203_v25  ;;  %2960 = vmatpush.msra.mxu1 %v7456_v9  ;;  %2891 = vmatpush.msrb.mxu3 %v7474_v63  ;;  %v7494_v19 = vld [vmem:[#allocation4 + $0x238] sm:$0xff]  ;;  %v7602_v25 = vld [vmem:[#allocation4 + $0xd0] sm:$0xff]  ;;  %9227 = vst [vmem:[#allocation45_spill] sm:$0xff] %v7610_v40 }
0x1018   :  { %2739 = vrot.lane.b32.xlu2 %v2731_v59, %s5378_s5  ;;  %v2728_v27 = vadd.f32 %v2723_v34, %v9204_v62  ;;  %v7508_v34 = vld [vmem:[#allocation4 + $0x218] sm:$0xff]  ;;  %2928 = vmatpush.msrb.mxu0 %v7494_v19  ;;  %v7598_v62 = vld [vmem:[#allocation4 + $0x108] sm:$0xff] }
0x1019   :  { %v2733_v57 = vmul.f32 %v2729_v41, %v7354_v56  ;;  %2961 = vmatpush.msra.mxu1 %v7464_v39  ;;  %2892 = vmatpush.msrb.mxu3 %v7486_v44  ;;  %9226 = vst [vmem:[#allocation44_spill] sm:$0xff] %v7598_v62  ;;  %v7604_v16 = vld [vmem:[#allocation4 + $0xd8] sm:$0xff] }
0x101a   :  { %2929 = vmatpush.msrb.mxu0 %v7506_v26 }
0x101b   :  { %2962 = vmatpush.msra.mxu1 %v7472_v50 }
0x101d   :  { %2967 = vmatpush.msrb.mxu1 %v7484_v54 }
0x101e   :  { %v2685_v56 = vpop.f32.mrf.mxu2 }
0x101f   :  { %v2706_v11 = vadd.f32 %v2705_v61, %v2685_v56  ;;  %v7544_v56 = vld [vmem:[#allocation4 + $0x1a0] sm:$0xff]  ;;  %v7546_v61 = vld [vmem:[#allocation4 + $0xc8] sm:$0xff] }
0x1021   :  { %v2712_v23 = vadd.f32 %v2706_v11, %v9217_v24  ;;  %v7550_v11 = vld [vmem:[#allocation4 + $0x1a8] sm:$0xff]  ;;  %v7558_v24 = vld [vmem:[#allocation4 + $0xa0] sm:$0xff] }
0x1022   :  { %9222 = vst [vmem:[#allocation39_spill] sm:$0xff] %v7550_v11 }
0x1023   :  { %v2717_v35 = vmul.f32 %v2712_v23, %v9208_v55  ;;  %v7562_v23 = vld [vmem:[#allocation4 + $0x180] sm:$0xff] }
0x1024   :  { %9223 = vst [vmem:[#allocation40_spill] sm:$0xff] %v7562_v23 }
0x1072   :  { %v2740_v12 = vpop.permute.xlu2 %2739 }
0x1073   :  { %v2745_v46 = vmul.f32 %v2740_v12, %v2729_v41  ;;  %v7496_v41 = vld [vmem:[#allocation4 + $0x240] sm:$0xff] }
0x1074   :  { %2968 = vmatpush.msrb.mxu1 %v7496_v41 }
0x1075   :  { %2750 = vrot.lane.b32.xlu1 %v2745_v46, %s5377_s24  ;;  %v7502_v46 = vld [vmem:[#allocation4 + $0x248] sm:$0xff] }
0x1076   :  { %9218 = vst [vmem:[#allocation35_spill] sm:$0xff] %v7502_v46  ;;  %2969 = vmatpush.msrb.mxu1 %v7508_v34 }
0x107c   :  { %v2738_v1 = vpop.permute.xlu1 %2737 }
0x107d   :  { %v2741_v53 = vsel %vm769_vm10, %v2738_v1, %v2740_v12  ;;  %v7498_v12 = vld [vmem:[#allocation4 + $0x168] sm:$0xff]  ;;  %v7510_v1 = vld [vmem:[#allocation4 + $0x140] sm:$0xff] }
0x107e   :  { %v2744_v42 = vmul.f32 %v2741_v53, %v2728_v27  ;;  %v7514_v27 = vld [vmem:[#allocation4 + $0x220] sm:$0xff]  ;;  %2893 = vmatpush.msrb.mxu3 %v7498_v12  ;;  %v7518_v53 = vld [vmem:[#allocation4 + $0x1e8] sm:$0xff] }
0x107f   :  { %9219 = vst [vmem:[#allocation36_spill] sm:$0xff] %v7514_v27  ;;  %2930 = vmatpush.msrb.mxu0 %v7518_v53 }
0x1080   :  { %2748 = vrot.lane.b32.xlu0 %v2744_v42, %s5377_s24  ;;  %v7520_v42 = vld [vmem:[#allocation4 + $0x1f0] sm:$0xff]  ;;  %2894 = vmatpush.msrb.mxu3 %v7510_v1 }
0x1081   :  { %2970 = vmatpush.msrb.mxu1 %v7520_v42 }
0x10e7   :  { %v2751_v31 = vpop.permute.xlu1 %2750 }
0x10f2   :  { %v2749_v60 = vpop.permute.xlu0 %2748 }
0x10f3   :  { %v2752_v37 = vsel %vm501_vm9, %v2749_v60, %v2751_v31  ;;  %v7420_v2 = vadd.f32 %v2749_v60, %v2733_v57  ;;  %v7522_v57 = vld [vmem:[#allocation4 + $0x118] sm:$0xff]  ;;  %v7532_v60 = vld [vmem:[#allocation4 + $0x1c8] sm:$0xff] }
0x10f4   :  { %v7422_v0 = vadd.f32 %v2752_v37, %v2734_v49  ;;  %v7526_v31 = vld [vmem:[#allocation4 + $0x1f8] sm:$0xff]  ;;  %v7530_v49 = vld [vmem:[#allocation4 + $0x1c0] sm:$0xff]  ;;  %v7534_v37 = vld [vmem:[#allocation4 + $0xf0] sm:$0xff]  ;;  %2895 = vmatpush.msrb.mxu3 %v7522_v57  ;;  %2971 = vmatpush.msrb.mxu1 %v7532_v60 }
0x10f5   :  { %9215 = vst [vmem:[#allocation33_spill] sm:$0xff] %v7420_v2  ;;  %5168 = vtanh.f32 %v7420_v2  ;;  %2931 = vmatpush.msrb.mxu0 %v7530_v49  ;;  %v7594_v2 = vld [vmem:[#allocation4 + $0x28] sm:$0xff] }
0x10f6   :  { %9216 = vst [vmem:[#allocation34_spill] sm:$0xff] %v7422_v0  ;;  %5170 = vtanh.f32 %v7422_v0  ;;  %2896 = vmatpush.msrb.mxu3 %v7534_v37  ;;  %2972 = vmatpush.msrb.mxu1 %v7544_v56  ;;  %v7592_v0 = vld [vmem:[#allocation4 + $0x100] sm:$0xff] }
0x10f7   :  { %5172 = vtanh.f32 %v2717_v35  ;;  %9220 = vst [vmem:[#allocation37_spill] sm:$0xff] %v7526_v31  ;;  %v7566_v35 = vld [vmem:[#allocation4 + $0x148] sm:$0xff] }
0x10f8   :  { %2897 = vmatpush.msrb.mxu3 %v7546_v61 }
0x10fa   :  { %2898 = vmatpush.msrb.mxu3 %v7558_v24 }
0x10fb   :  { %v5169_v20 = vpop.eup %5168 }
0x10fc   :  { %v5171_v18 = vpop.eup %5170  ;;  %2761 = vrot.lane.b32.xlu2 %v5169_v20, %s5378_s5  ;;  %v7538_v20 = vld [vmem:[#allocation4 + $0x1d0] sm:$0xff] }
0x10fd   :  { %2763 = vrot.lane.b32.xlu0 %v5171_v18, %s5378_s5  ;;  %v5173_v36 = vpop.eup %5172  ;;  %9221 = vst [vmem:[#allocation38_spill] sm:$0xff] %v7538_v20  ;;  %v7542_v18 = vld [vmem:[#allocation4 + $0x198] sm:$0xff] }
0x10fe   :  { %v2727_v58 = vmul.f32 %v5173_v36, %v9208_v55  ;;  %2932 = vmatpush.msrb.mxu0 %v7542_v18  ;;  %v7568_v36 = vld [vmem:[#allocation4 + $0x150] sm:$0xff]  ;;  %v7590_v55 = vld [vmem:[#allocation4 + $0xf8] sm:$0xff] }
0x1100   :  { %v2732_v17 = vadd.f32 %v2727_v58, %v9209_v28  ;;  %v7570_v58 = vld [vmem:[#allocation4 + $0x78] sm:$0xff]  ;;  %v7586_v28 = vld [vmem:[#allocation4 + $0x130] sm:$0xff] }
0x1101   :  { %9225 = vst [vmem:[#allocation43_spill] sm:$0xff] %v7586_v28  ;;  %2899 = vmatpush.msrb.mxu3 %v7570_v58 }
0x1156   :  { %v2762_v32 = vpop.permute.xlu2 %2761 }
0x1157   :  { %v2768_v3 = vmul.f32 %v2762_v32, %v2731_v59  ;;  %v7458_v59 = vld [vmem:[#allocation4 + $0x2e0] sm:$0xff] }
0x1158   :  { %3000 = vmatpush.msrb.mxu2 %v7458_v59 }
0x1159   :  { %2881 = vrot.lane.b32.xlu2 %v2768_v3, %s5377_s24  ;;  %v7556_v3 = vld [vmem:[#allocation4 + $0x178] sm:$0xff] }
0x115a   :  { %3001 = vmatpush.msrb.mxu2 %v7466_v4  ;;  %2973 = vmatpush.msrb.mxu1 %v7556_v3 }
0x115c   :  { %3002 = vmatpush.msrb.mxu2 %v7478_v43  ;;  %2974 = vmatpush.msrb.mxu1 %v7568_v36 }
0x115e   :  { %3007 = vmatpush.msra.mxu2 %v7490_v51 }
0x1160   :  { %3008 = vmatpush.msra.mxu2 %v7502_v46  ;;  %v7665_v46 = vld [vmem:[#allocation4 + $0x8] sm:$0xff] }
0x1161   :  { %9240 = vst [vmem:[#allocation25_spill] sm:$0xff] %v7665_v46 }
0x1162   :  { %3009 = vmatpush.msra.mxu2 %v7514_v27  ;;  %v7658_v27 = vld [vmem:[#allocation4 + $0x38] sm:$0xff] }
0x1163   :  { %9238 = vst [vmem:[#allocation53_spill] sm:$0xff] %v7658_v27 }
0x1164   :  { %3010 = vmatpush.msra.mxu2 %v7526_v31  ;;  %v7647_v31 = vld [vmem:[#allocation4 + $0x58] sm:$0xff] }
0x1165   :  { %9234 = vst [vmem:[#allocation89_spill] sm:$0xff] %v7647_v31 }
0x1166   :  { %3011 = vmatpush.msra.mxu2 %v7538_v20  ;;  %v7643_v20 = vld [vmem:[#allocation4 + $0x90] sm:$0xff] }
0x1167   :  { %9233 = vst [vmem:[#allocation88_spill] sm:$0xff] %v7643_v20 }
0x1168   :  { %3012 = vmatpush.msra.mxu2 %v7550_v11  ;;  %v7639_v11 = vld [vmem:[#allocation4 + $0x80] sm:$0xff] }
0x116a   :  { %3013 = vmatpush.msra.mxu2 %v7562_v23  ;;  %v7636_v23 = vld [vmem:[#allocation4 + $0x298] sm:$0xff] }
0x116b   :  { %9232 = vst [vmem:[#allocation87_spill] sm:$0xff] %v7636_v23 }
0x116f   :  { %v2764_v47 = vpop.permute.xlu0 %2763 }
0x1170   :  { %v2765_v6 = vsel %vm769_vm10, %v2762_v32, %v2764_v47  ;;  %v7554_v32 = vld [vmem:[#allocation4 + $0x170] sm:$0xff]  ;;  %v7578_v47 = vld [vmem:[#allocation4 + $0x120] sm:$0xff] }
0x1171   :  { %v2769_v48 = vmul.f32 %v2765_v6, %v2732_v17  ;;  %2933 = vmatpush.msrb.mxu0 %v7554_v32  ;;  %v7574_v17 = vld [vmem:[#allocation4 + $0x158] sm:$0xff]  ;;  %v7580_v6 = vld [vmem:[#allocation4 + $0x128] sm:$0xff] }
0x1172   :  { %9224 = vst [vmem:[#allocation42_spill] sm:$0xff] %v7574_v17  ;;  %3014 = vmatpush.msra.mxu2 %v7574_v17  ;;  %2975 = vmatpush.msrb.mxu1 %v7580_v6  ;;  %v7625_v17 = vld [vmem:[#allocation4 + $0x2e8] sm:$0xff] }
0x1173   :  { %2771 = vrot.lane.b32.xlu1 %v2769_v48, %s5377_s24  ;;  %v7582_v48 = vld [vmem:[#allocation4 + $0x50] sm:$0xff]  ;;  %2934 = vmatpush.msrb.mxu0 %v7566_v35  ;;  %9230 = vst [vmem:[#allocation48_spill] sm:$0xff] %v7625_v17 }
0x1174   :  { %2900 = vmatpush.msrb.mxu3 %v7582_v48  ;;  %3015 = vmatpush.msra.mxu2 %v7586_v28  ;;  %v7622_v28 = vld [vmem:[#allocation4 + $0xb8] sm:$0xff] }
0x1175   :  { %2935 = vmatpush.msrb.mxu0 %v7578_v47  ;;  %2976 = vmatpush.msrb.mxu1 %v7592_v0  ;;  %9229 = vst [vmem:[#allocation47_spill] sm:$0xff] %v7622_v28 }
0x1176   :  { %2901 = vmatpush.msrb.mxu3 %v7594_v2  ;;  %3016 = vmatpush.msra.mxu2 %v7598_v62  ;;  %v7630_v62 = vld [vmem:[#allocation4 + $0x2c0] sm:$0xff] }
0x1177   :  { %2936 = vmatpush.msrb.mxu0 %v7590_v55  ;;  %2977 = vmatpush.msrb.mxu1 %v7604_v16  ;;  %9231 = vst [vmem:[#allocation86_spill] sm:$0xff] %v7630_v62 }
0x1178   :  { %2902 = vmatpush.msrb.mxu3 %v7606_v21  ;;  %3017 = vmatpush.msra.mxu2 %v7610_v40  ;;  %v7641_v40 = vld [vmem:[#allocation4 + $0x88] sm:$0xff] }
0x1179   :  { %2937 = vmatpush.msrb.mxu0 %v7602_v25  ;;  %2978 = vmatpush.msrb.mxu1 %v7620_v10 }
0x117a   :  { %3039 = vmatpush.msra.mxu3 %v7613_v29  ;;  %3018 = vmatpush.msra.mxu2 %v7622_v28  ;;  %v7649_v28 = vld [vmem:[#allocation4 + $0x60] sm:$0xff]  ;;  %v7669_v29 = vld [vmem:[#allocation4 + $0x18] sm:$0xff] }
0x117b   :  { %2938 = vmatpush.msrb.mxu0 %v7616_v30  ;;  %2979 = vmatpush.msrb.mxu1 %v7641_v40  ;;  %9235 = vst [vmem:[#allocation90_spill] sm:$0xff] %v7649_v28 }
0x117c   :  { %3040 = vmatpush.msra.mxu3 %v7625_v17  ;;  %3019 = vmatpush.msra.mxu2 %v7643_v20  ;;  %v7660_v17 = vld [vmem:[#allocation4 + $0x40] sm:$0xff]  ;;  %v7667_v20 = vld [vmem:[#allocation4 + $0x10] sm:$0xff]  ;;  %9242 = vst [vmem:[#allocation57_spill] sm:$0xff] %v7669_v29 }
0x117d   :  { %2939 = vmatpush.msrb.mxu0 %v7639_v11  ;;  %2980 = vmatpush.msrb.mxu1 %v7649_v28  ;;  %9239 = vst [vmem:[#allocation80_spill] sm:$0xff] %v7660_v17 }
0x117e   :  { %3041 = vmatpush.msra.mxu3 %v7630_v62  ;;  %v7652_v62 = vld [vmem:[#allocation4 + $0x68] sm:$0xff]  ;;  %9241 = vst [vmem:[#allocation56_spill] sm:$0xff] %v7667_v20 }
0x117f   :  { %9236 = vst [vmem:[#allocation30_spill] sm:$0xff] %v7652_v62  ;;  %2940 = vmatpush.msrb.mxu0 %v7647_v31  ;;  %3020 = vmatpush.msra.mxu2 %v7652_v62  ;;  %v7675_v31 = vld [vmem:[#allocation4 + $0x278] sm:$0xff] }
0x1180   :  { %3042 = vmatpush.msra.mxu3 %v7636_v23  ;;  %v7656_v23 = vld [vmem:[#allocation4 + $0x30] sm:$0xff]  ;;  %2981 = vmatpush.msrb.mxu1 %v7658_v27  ;;  %v7695_v27 = vld [vmem:[#allocation4 + $0x2c8] sm:$0xff] }
0x1181   :  { %9237 = vst [vmem:[#allocation54_spill] sm:$0xff] %v7656_v23  ;;  %2941 = vmatpush.msrb.mxu0 %v7656_v23  ;;  %3021 = vmatpush.msra.mxu2 %v7660_v17  ;;  %v7677_v23 = vld [vmem:[#allocation4 + $0x318] sm:$0xff] }
0x1182   :  { %2982 = vmatpush.msrb.mxu1 %v7667_v20  ;;  %9243 = vst [vmem:[#allocation55_spill] sm:$0xff] %v7677_v23  ;;  %v7689_v20 = vld [vmem:[#allocation4 + $0x2f0] sm:$0xff] }
0x1183   :  { %2942 = vmatpush.msrb.mxu0 %v7665_v46  ;;  %3022 = vmatpush.msra.mxu2 %v7669_v29  ;;  %v7687_v29 = vld [vmem:[#allocation4 + $0x250] sm:$0xff]  ;;  %v7693_v46 = vld [vmem:[#allocation4 + $0x228] sm:$0xff] }
0x11b3   :  { %v2882_v28 = vpop.permute.xlu2 %2881 }
0x11e5   :  { %v2772_v62 = vpop.permute.xlu1 %2771 }
0x11e6   :  { %2774 = vst.msk [vmem:[#allocation3 + $0x10] sm:$0xff] %vm501_vm9, %v2772_v62  ;;  %4997 = vmatmul.msk.f32.vlgmr.msra.gmra.mxu0 %vm501_vm9, %v2772_v62  ;;  %4998 = vmatmul.msk.f32.vlgmr.msra.gmra.mxu1 %vm501_vm9, %v2772_v62  ;;  %v7683_v17 = vsel %vm501_vm9, %v2882_v28, %v2772_v62  ;;  %v7701_v28 = vld [vmem:[#allocation4 + $0x200] sm:$0xff] }
0x11e7   :  { %4999 = vmatmul.msk.f32.vlgmr.msrb.gmra.mxu2 %vm501_vm9, %v2772_v62  ;;  %2903 = vmatmul.f32.vlgmr.msrb.gmra.mxu3 %v7683_v17 }
0x11e8   :  { %3047 = vmatpush.msrb.mxu3 %v7675_v31  ;;  %3079 = vmatpush.msra.mxu0 %v7677_v23  ;;  %v7707_v23 = vld [vmem:[#allocation4 + $0x2a0] sm:$0xff] }
0x11e9   :  { %3298 = vmatpush.msra.mxu1 %v7440_v15  ;;  %3338 = vmatpush.msrb.mxu2 %v7442_v38  ;;  %v7713_v15 = vld [vmem:[#allocation4 + $0x1d8] sm:$0xff]  ;;  %v7718_v38 = vld [vmem:[#allocation4 + $0x1b0] sm:$0xff] }
0x11ea   :  { %3048 = vmatpush.msrb.mxu3 %v7687_v29  ;;  %3080 = vmatpush.msra.mxu0 %v7689_v20 }
0x11eb   :  { %3299 = vmatpush.msra.mxu1 %v7450_v33  ;;  %3339 = vmatpush.msrb.mxu2 %v7456_v9  ;;  %v7723_v33 = vld [vmem:[#allocation4 + $0x188] sm:$0xff]  ;;  %v7729_v9 = vld [vmem:[#allocation4 + $0x160] sm:$0xff] }
0x11ec   :  { %3049 = vmatpush.msrb.mxu3 %v7693_v46  ;;  %3081 = vmatpush.msra.mxu0 %v7695_v27 }
0x11ed   :  { %3300 = vmatpush.msra.mxu1 %v7462_v7  ;;  %3340 = vmatpush.msrb.mxu2 %v7464_v39  ;;  %v7765_v7 = vld [vmem:[#allocation4 + $0x70] sm:$0xff]  ;;  %v7771_v39 = vld [vmem:[#allocation4 + $0x48] sm:$0xff] }
0x11ee   :  { %3050 = vmatpush.msrb.mxu3 %v7701_v28  ;;  %2943 = vmatmul.f32.vlgmr.msrb.gmra.mxu0 %v7683_v17 }
0x11ef   :  { %2983 = vmatmul.f32.vlgmr.msrb.gmra.mxu1 %v7683_v17  ;;  %3023 = vmatmul.f32.vlgmr.msra.gmra.mxu2 %v7683_v17 }
0x11f0   :  { %5000 = vmatmul.msk.f32.vlgmr.msra.gmra.mxu3 %vm501_vm9, %v2772_v62  ;;  %3082 = vmatpush.msra.mxu0 %v7707_v23 }
0x11f1   :  { %3051 = vmatpush.msrb.mxu3 %v7713_v15  ;;  %3301 = vmatpush.msra.mxu1 %v7470_v8  ;;  %v7777_v8 = vld [vmem:[#allocation4 + $0x20] sm:$0xff] }
0x11f2   :  { %3266 = vmatpush.msrb.mxu0 %v7435_v45  ;;  %3341 = vmatpush.msrb.mxu2 %v7472_v50  ;;  %v7736_v45 = vld [vmem:[#allocation4 + $0x138] sm:$0xff]  ;;  %v9256_v50 = vld [vmem:[#allocation87_spill] sm:$0xff] }
0x11f3   :  { %3052 = vmatpush.msrb.mxu3 %v7718_v38  ;;  %3306 = vmatpush.msrb.mxu1 %v7482_v52  ;;  %v9259_v52 = vld [vmem:[#allocation40_spill] sm:$0xff] }
0x11f4   :  { %3267 = vmatpush.msrb.mxu0 %v7437_v5  ;;  %3346 = vmatpush.msra.mxu2 %v7484_v54  ;;  %v7741_v5 = vld [vmem:[#allocation4 + $0x110] sm:$0xff]  ;;  %v9260_v54 = vld [vmem:[#allocation42_spill] sm:$0xff] }
0x11f5   :  { %3053 = vmatpush.msrb.mxu3 %v7723_v33  ;;  %3307 = vmatpush.msrb.mxu1 %v7494_v19  ;;  %v9263_v19 = vld [vmem:[#allocation45_spill] sm:$0xff] }
0x11f6   :  { %3268 = vmatpush.msrb.mxu0 %v7444_v22  ;;  %3347 = vmatpush.msra.mxu2 %v7496_v41  ;;  %v7747_v22 = vld [vmem:[#allocation4 + $0xe8] sm:$0xff]  ;;  %v9264_v41 = vld [vmem:[#allocation47_spill] sm:$0xff] }
0x11f7   :  { %5001 = vmatmul.msk.f32.vlgmr.msra.gmra.mxu0 %vm501_vm9, %v2772_v62  ;;  %3054 = vmatpush.msrb.mxu3 %v7729_v9  ;;  %v7753_v62 = vld [vmem:[#allocation4 + $0xc0] sm:$0xff] }
0x11f8   :  { %3269 = vmatpush.msrb.mxu0 %v7453_v14  ;;  %3308 = vmatpush.msrb.mxu1 %v7506_v26  ;;  %v7759_v14 = vld [vmem:[#allocation4 + $0x98] sm:$0xff] }
0x11f9   :  { %3055 = vmatpush.msrb.mxu3 %v7736_v45  ;;  %3348 = vmatpush.msra.mxu2 %v7508_v34  ;;  %v9266_v26 = vld [vmem:[#allocation30_spill] sm:$0xff]  ;;  %v9267_v34 = vld [vmem:[#allocation80_spill] sm:$0xff] }
0x11fa   :  { %3270 = vmatpush.msrb.mxu0 %v7474_v63  ;;  %3309 = vmatpush.msrb.mxu1 %v7518_v53  ;;  %v9257_v63 = vld [vmem:[#allocation38_spill] sm:$0xff] }
0x11fb   :  { %3056 = vmatpush.msrb.mxu3 %v7741_v5  ;;  %3349 = vmatpush.msra.mxu2 %v7520_v42 }
0x11fc   :  { %3271 = vmatpush.msrb.mxu0 %v7486_v44  ;;  %3310 = vmatpush.msrb.mxu1 %v7530_v49  ;;  %v9261_v44 = vld [vmem:[#allocation43_spill] sm:$0xff] }
0x11fd   :  { %3057 = vmatpush.msrb.mxu3 %v7747_v22  ;;  %3350 = vmatpush.msra.mxu2 %v7532_v60 }
0x11fe   :  { %3272 = vmatpush.msrb.mxu0 %v7498_v12  ;;  %3311 = vmatpush.msrb.mxu1 %v7542_v18  ;;  %v9265_v12 = vld [vmem:[#allocation88_spill] sm:$0xff] }
0x11ff   :  { %3058 = vmatpush.msrb.mxu3 %v7753_v62  ;;  %3351 = vmatpush.msra.mxu2 %v7544_v56  ;;  %v9270_v56 = vld [vmem:[#allocation68_spill] sm:$0xff] }
0x1200   :  { %3273 = vmatpush.msrb.mxu0 %v7510_v1  ;;  %3312 = vmatpush.msrb.mxu1 %v7554_v32  ;;  %v9268_v1 = vld [vmem:[#allocation57_spill] sm:$0xff] }
0x1201   :  { %3059 = vmatpush.msrb.mxu3 %v7759_v14  ;;  %3352 = vmatpush.msra.mxu2 %v7556_v3 }
0x1202   :  { %3274 = vmatpush.msrb.mxu0 %v7522_v57  ;;  %3313 = vmatpush.msrb.mxu1 %v7566_v35 }
0x1203   :  { %3060 = vmatpush.msrb.mxu3 %v7765_v7  ;;  %3353 = vmatpush.msra.mxu2 %v7568_v36  ;;  %v9272_v36 = vld [vmem:[#allocation73_spill] sm:$0xff] }
0x1204   :  { %3275 = vmatpush.msrb.mxu0 %v7534_v37  ;;  %3314 = vmatpush.msrb.mxu1 %v7578_v47  ;;  %v9269_v37 = vld [vmem:[#allocation65_spill] sm:$0xff] }
0x1205   :  { %3061 = vmatpush.msrb.mxu3 %v7771_v39  ;;  %3354 = vmatpush.msra.mxu2 %v7580_v6  ;;  %v9273_v6 = vld [vmem:[#allocation70_spill] sm:$0xff] }
0x1206   :  { %3276 = vmatpush.msrb.mxu0 %v7546_v61  ;;  %3315 = vmatpush.msrb.mxu1 %v7590_v55  ;;  %v9248_v55 = vld [vmem:[#allocation48_spill] sm:$0xff] }
0x1207   :  { %3062 = vmatpush.msrb.mxu3 %v7777_v8  ;;  %3355 = vmatpush.msra.mxu2 %v7592_v0  ;;  %v9250_v0 = vld [vmem:[#allocation53_spill] sm:$0xff] }
0x1208   :  { %3277 = vmatpush.msrb.mxu0 %v7558_v24  ;;  %3063 = vmatmul.f32.vlgmr.msrb.gmra.mxu3 %v7683_v17  ;;  %v9271_v24 = vld [vmem:[#allocation66_spill] sm:$0xff] }
0x1209   :  { %3378 = vmatpush.msra.mxu3 %v7448_v13  ;;  %3316 = vmatpush.msrb.mxu1 %v7602_v25  ;;  %v9245_v25 = vld [vmem:[#allocation89_spill] sm:$0xff]  ;;  %v9252_v13 = vld [vmem:[#allocation86_spill] sm:$0xff] }
0x120a   :  { %3278 = vmatpush.msrb.mxu0 %v7570_v58  ;;  %3356 = vmatpush.msra.mxu2 %v7604_v16  ;;  %v9244_v16 = vld [vmem:[#allocation46_spill] sm:$0xff] }
0x120b   :  { %3379 = vmatpush.msra.mxu3 %v7458_v59  ;;  %3317 = vmatpush.msrb.mxu1 %v7616_v30  ;;  %v9246_v30 = vld [vmem:[#allocation90_spill] sm:$0xff]  ;;  %v9254_v59 = vld [vmem:[#allocation56_spill] sm:$0xff] }
0x120c   :  { %3279 = vmatpush.msrb.mxu0 %v7582_v48  ;;  %3357 = vmatpush.msra.mxu2 %v7620_v10  ;;  %v9247_v10 = vld [vmem:[#allocation35_spill] sm:$0xff] }
0x120d   :  { %3380 = vmatpush.msra.mxu3 %v7466_v4  ;;  %3318 = vmatpush.msrb.mxu1 %v7639_v11  ;;  %v9255_v4 = vld [vmem:[#allocation37_spill] sm:$0xff] }
0x120e   :  { %3280 = vmatpush.msrb.mxu0 %v7594_v2  ;;  %3358 = vmatpush.msra.mxu2 %v7641_v40  ;;  %v9249_v2 = vld [vmem:[#allocation54_spill] sm:$0xff]  ;;  %v9251_v40 = vld [vmem:[#allocation36_spill] sm:$0xff] }
0x120f   :  { %3381 = vmatpush.msra.mxu3 %v7478_v43  ;;  %3319 = vmatpush.msrb.mxu1 %v9245_v25  ;;  %v9258_v43 = vld [vmem:[#allocation39_spill] sm:$0xff] }
0x1210   :  { %3281 = vmatpush.msrb.mxu0 %v7606_v21  ;;  %3359 = vmatpush.msra.mxu2 %v9246_v30  ;;  %v9253_v21 = vld [vmem:[#allocation25_spill] sm:$0xff]  ;;  %v9274_v30 = vld [vmem:[#allocation74_spill] sm:$0xff] }
0x1211   :  { %3386 = vmatpush.msrb.mxu3 %v7490_v51  ;;  %3320 = vmatpush.msrb.mxu1 %v9249_v2  ;;  %v9262_v51 = vld [vmem:[#allocation44_spill] sm:$0xff] }
0x1212   :  { %3418 = vmatpush.msra.mxu0 %v9244_v16  ;;  %3360 = vmatpush.msra.mxu2 %v9250_v0 }
0x1213   :  { %3387 = vmatpush.msrb.mxu3 %v9247_v10  ;;  %3321 = vmatpush.msrb.mxu1 %v9253_v21 }
0x1214   :  { %3419 = vmatpush.msra.mxu0 %v9248_v55  ;;  %3361 = vmatpush.msra.mxu2 %v9254_v59  ;;  %v9276_v59 = vld [vmem:[#allocation49_spill] sm:$0xff] }
0x1215   :  { %3388 = vmatpush.msrb.mxu3 %v9251_v40 }
0x1216   :  { %3420 = vmatpush.msra.mxu0 %v9252_v13  ;;  %v9275_v13 = vld [vmem:[#allocation50_spill] sm:$0xff] }
0x1217   :  { %3389 = vmatpush.msrb.mxu3 %v9255_v4 }
0x1218   :  { %3421 = vmatpush.msra.mxu0 %v9256_v50  ;;  %v9277_v50 = vld [vmem:[#allocation75_spill] sm:$0xff] }
0x1219   :  { %3390 = vmatpush.msrb.mxu3 %v9257_v63 }
0x121b   :  { %3391 = vmatpush.msrb.mxu3 %v9258_v43  ;;  %v9278_v43 = vld [vmem:[#allocation76_spill] sm:$0xff] }
0x121d   :  { %3392 = vmatpush.msrb.mxu3 %v9259_v52 }
0x121f   :  { %3393 = vmatpush.msrb.mxu3 %v9260_v54 }
0x1221   :  { %3394 = vmatpush.msrb.mxu3 %v9261_v44 }
0x1223   :  { %3395 = vmatpush.msrb.mxu3 %v9262_v51 }
0x1225   :  { %3396 = vmatpush.msrb.mxu3 %v9263_v19 }
0x1227   :  { %3397 = vmatpush.msrb.mxu3 %v9264_v41  ;;  %v9279_v41 = vld [vmem:[#allocation77_spill] sm:$0xff] }
0x1229   :  { %3398 = vmatpush.msrb.mxu3 %v9265_v12 }
0x122b   :  { %3399 = vmatpush.msrb.mxu3 %v9266_v26 }
0x122d   :  { %3400 = vmatpush.msrb.mxu3 %v9267_v34 }
0x122f   :  { %3401 = vmatpush.msrb.mxu3 %v9268_v1  ;;  %v9280_v1 = vld [vmem:[#allocation78_spill] sm:$0xff] }
0x1263   :  { %v2964_v53 = vpop.f32.mrf.mxu1  ;;  %v2924_v55 = vpop.f32.mrf.mxu0 }
0x126a   :  { %v3004_v42 = vpop.f32.mrf.mxu2  ;;  %v2904_v57 = vpop.f32.mrf.mxu3 }
0x126b   :  { %v2944_v2 = vpop.f32.mrf.mxu0  ;;  %v2925_v40 = vadd.f32 %v2924_v55, %v2904_v57 }
0x126c   :  { %v2984_v49 = vpop.f32.mrf.mxu1  ;;  %v2965_v0 = vadd.f32 %v2964_v53, %v2944_v2 }
0x126d   :  { %v3005_v60 = vadd.f32 %v3004_v42, %v2984_v49  ;;  %v3087_v4 = vadd.f32 %v2925_v40, %v9276_v59 }
0x126e   :  { %v3088_v21 = vadd.f32 %v2965_v0, %v9275_v13  ;;  %v9283_v0 = vld [vmem:[#allocation71_spill] sm:$0xff] }
0x126f   :  { %v3089_v18 = vadd.f32 %v3005_v60, %v9269_v37  ;;  %v3092_v52 = vmul.f32 %v3087_v4, %v9278_v43  ;;  %v9281_v60 = vld [vmem:[#allocation33_spill] sm:$0xff] }
0x1270   :  { %v3093_v63 = vmul.f32 %v3088_v21, %v9277_v50  ;;  %v9284_v21 = vld [vmem:[#allocation84_spill] sm:$0xff] }
0x1271   :  { %v3094_v61 = vmul.f32 %v3089_v18, %v9270_v56 }
0x1272   :  { %v3024_v11 = vpop.f32.mrf.mxu2 }
0x1273   :  { %5174 = vtanh.f32 %v3094_v61  ;;  %v3044_v32 = vpop.f32.mrf.mxu3 }
0x1274   :  { %v3045_v3 = vadd.f32 %v3044_v32, %v3024_v11  ;;  %v3084_v55 = vpop.f32.mrf.mxu0 }
0x1276   :  { %v3090_v35 = vadd.f32 %v3045_v3, %v9271_v24  ;;  %v9282_v3 = vld [vmem:[#allocation34_spill] sm:$0xff] }
0x1278   :  { %v3095_v58 = vmul.f32 %v3090_v35, %v9272_v36 }
0x1279   :  { %v5175_v17 = vpop.eup %5174 }
0x127a   :  { %5176 = vtanh.f32 %v3095_v58  ;;  %v3104_v47 = vmul.f32 %v5175_v17, %v9270_v56 }
0x127b   :  { %5178 = vtanh.f32 %v3093_v63 }
0x127c   :  { %v3109_v48 = vadd.f32 %v3104_v47, %v9273_v6  ;;  %5180 = vtanh.f32 %v3092_v52 }
0x127e   :  { %3116 = vrot.lane.b32.xlu0 %v3109_v48, %s5378_s5  ;;  %v3113_v35 = vmul.f32 %v3109_v48, %v9282_v3 }
0x1280   :  { %v5177_v16 = vpop.eup %5176 }
0x1281   :  { %v3105_v25 = vmul.f32 %v5177_v16, %v9272_v36  ;;  %v5179_v54 = vpop.eup %5178 }
0x1282   :  { %v5181_v44 = vpop.eup %5180  ;;  %v3103_v51 = vmul.f32 %v5179_v54, %v9277_v50  ;;  %v9285_v54 = vld [vmem:[#allocation85_spill] sm:$0xff] }
0x1283   :  { %v3110_v10 = vadd.f32 %v3105_v25, %v9274_v30  ;;  %v3102_v19 = vmul.f32 %v5181_v44, %v9278_v43 }
0x1284   :  { %v3108_v12 = vadd.f32 %v3103_v51, %v9279_v41 }
0x1285   :  { %3118 = vrot.lane.b32.xlu1 %v3110_v10, %s5378_s5  ;;  %v3107_v53 = vadd.f32 %v3102_v19, %v9280_v1 }
0x1286   :  { %v3112_v18 = vmul.f32 %v3108_v12, %v9281_v60 }
0x128b   :  { %v3064_v25 = vpop.f32.mrf.mxu3 }
0x128c   :  { %v3085_v2 = vadd.f32 %v3084_v55, %v3064_v25 }
0x128e   :  { %v3091_v40 = vadd.f32 %v3085_v2, %v9283_v0 }
0x1290   :  { %v3096_v4 = vmul.f32 %v3091_v40, %v9284_v21 }
0x12f0   :  { %v3117_v26 = vpop.permute.xlu0 %3116 }
0x12f7   :  { %v3119_v34 = vpop.permute.xlu1 %3118 }
0x12f8   :  { %v3120_v42 = vsel %vm769_vm10, %v3117_v26, %v3119_v34  ;;  %v3124_v57 = vmul.f32 %v3119_v34, %v3108_v12 }
0x12f9   :  { %v3123_v49 = vmul.f32 %v3120_v42, %v3107_v53 }
0x12fa   :  { %3129 = vrot.lane.b32.xlu0 %v3124_v57, %s5377_s24 }
0x12fb   :  { %3127 = vrot.lane.b32.xlu2 %v3123_v49, %s5377_s24 }
0x1355   :  { %v3128_v61 = vpop.permute.xlu2 %3127 }
0x1356   :  { %v7851_v11 = vadd.f32 %v3128_v61, %v3112_v18 }
0x1358   :  { %5182 = vtanh.f32 %v7851_v11 }
0x135e   :  { %v5183_v32 = vpop.eup %5182 }
0x135f   :  { %3140 = vrot.lane.b32.xlu1 %v5183_v32, %s5378_s5 }
0x136c   :  { %v3130_v58 = vpop.permute.xlu0 %3129 }
0x136d   :  { %v3131_v17 = vsel %vm501_vm9, %v3128_v61, %v3130_v58 }
0x136e   :  { %v7857_v47 = vadd.f32 %v3131_v17, %v3113_v35 }
0x1370   :  { %5184 = vtanh.f32 %v7857_v47 }
0x1371   :  { %5186 = vtanh.f32 %v3096_v4 }
0x1376   :  { %v5185_v16 = vpop.eup %5184 }
0x1377   :  { %3142 = vrot.lane.b32.xlu2 %v5185_v16, %s5378_s5  ;;  %v5187_v63 = vpop.eup %5186 }
0x1378   :  { %v3106_v48 = vmul.f32 %v5187_v63, %v9284_v21 }
0x137a   :  { %v3111_v44 = vadd.f32 %v3106_v48, %v9285_v54 }
0x13d1   :  { %v3141_v52 = vpop.permute.xlu1 %3140  ;;  %v3143_v51 = vpop.permute.xlu2 %3142 }
0x13d2   :  { %v3147_v19 = vmul.f32 %v3141_v52, %v3110_v10  ;;  %v3144_v12 = vsel %vm769_vm10, %v3141_v52, %v3143_v51  ;;  %v9286_v10 = vld [vmem:[#allocation55_spill] sm:$0xff] }
0x13d3   :  { %v3148_v26 = vmul.f32 %v3144_v12, %v3111_v44 }
0x13d4   :  { %3260 = vrot.lane.b32.xlu1 %v3147_v19, %s5377_s24 }
0x13d5   :  { %3150 = vrot.lane.b32.xlu0 %v3148_v26, %s5377_s24 }
0x1446   :  { %v3261_v34 = vpop.permute.xlu1 %3260 }
0x1447   :  { %v3151_v53 = vpop.permute.xlu0 %3150 }
0x1448   :  { %3153 = vst.msk [vmem:[#allocation3 + $0x18] sm:$0xff] %vm501_vm9, %v3151_v53  ;;  %5002 = vmatmul.msk.f32.vlgmr.msra.gmra.mxu1 %vm501_vm9, %v3151_v53  ;;  %5003 = vmatmul.msk.f32.vlgmr.msrb.gmra.mxu2 %vm501_vm9, %v3151_v53  ;;  %v7872_v42 = vsel %vm501_vm9, %v3261_v34, %v3151_v53 }
0x1449   :  { %5004 = vmatmul.msk.f32.vlgmr.msra.gmra.mxu3 %vm501_vm9, %v3151_v53  ;;  %3282 = vmatmul.f32.vlgmr.msrb.gmra.mxu0 %v7872_v42 }
0x144a   :  { %3426 = vmatpush.msrb.mxu0 %v7675_v31  ;;  %3458 = vmatpush.msra.mxu1 %v9286_v10 }
0x144c   :  { %3427 = vmatpush.msrb.mxu0 %v7687_v29  ;;  %3459 = vmatpush.msra.mxu1 %v7689_v20 }
0x144e   :  { %3428 = vmatpush.msrb.mxu0 %v7693_v46  ;;  %3460 = vmatpush.msra.mxu1 %v7695_v27 }
0x1450   :  { %3429 = vmatpush.msrb.mxu0 %v7701_v28  ;;  %3322 = vmatmul.f32.vlgmr.msrb.gmra.mxu1 %v7872_v42 }
0x1451   :  { %3362 = vmatmul.f32.vlgmr.msra.gmra.mxu2 %v7872_v42  ;;  %3402 = vmatmul.f32.vlgmr.msrb.gmra.mxu3 %v7872_v42 }
0x1452   :  { %5005 = vmatmul.msk.f32.vlgmr.msra.gmra.mxu0 %vm501_vm9, %v3151_v53  ;;  %3461 = vmatpush.msra.mxu1 %v7707_v23 }
0x1453   :  { %3430 = vmatpush.msrb.mxu0 %v7713_v15 }
0x1455   :  { %3431 = vmatpush.msrb.mxu0 %v7718_v38 }
0x1457   :  { %3432 = vmatpush.msrb.mxu0 %v7723_v33 }
0x1458   :  { %5006 = vmatmul.msk.f32.vlgmr.msra.gmra.mxu1 %vm501_vm9, %v3151_v53 }
0x1459   :  { %3433 = vmatpush.msrb.mxu0 %v7729_v9 }
0x145b   :  { %3434 = vmatpush.msrb.mxu0 %v7736_v45 }
0x145d   :  { %3435 = vmatpush.msrb.mxu0 %v7741_v5 }
0x145f   :  { %3436 = vmatpush.msrb.mxu0 %v7747_v22 }
0x1461   :  { %3437 = vmatpush.msrb.mxu0 %v7753_v62 }
0x1463   :  { %3438 = vmatpush.msrb.mxu0 %v7759_v14 }
0x1465   :  { %3439 = vmatpush.msrb.mxu0 %v7765_v7 }
0x1467   :  { %3440 = vmatpush.msrb.mxu0 %v7771_v39 }
0x1469   :  { %3441 = vmatpush.msrb.mxu0 %v7777_v8 }
0x146a   :  { %3442 = vmatmul.f32.vlgmr.msrb.gmra.mxu0 %v7872_v42 }
0x14c5   :  { %v3303_v8 = vpop.f32.mrf.mxu1 }
0x14c6   :  { %v3283_v29 = vpop.f32.mrf.mxu0 }
0x14c7   :  { %v3304_v60 = vadd.f32 %v3303_v8, %v3283_v29  ;;  %v7973_v8 = vld [vmem:[#allocation4 + $0x280] sm:$0xff] }
0x14c9   :  { %v3466_v61 = vadd.f32 %v3304_v60, %v9276_v59  ;;  %v7983_v60 = vld [vmem:[#allocation4 + $0x260] sm:$0xff]  ;;  %v8109_v59 = vld [vmem:[#allocation4 + $0x50] sm:$0xff] }
0x14cb   :  { %v3343_v46 = vpop.f32.mrf.mxu2  ;;  %v3471_v3 = vmul.f32 %v3466_v61, %v9278_v43  ;;  %v7989_v61 = vld [vmem:[#allocation4 + $0x270] sm:$0xff] }
0x14cc   :  { %v3383_v27 = vpop.f32.mrf.mxu3  ;;  %9290 = vst [vmem:[#allocation9_spill] sm:$0xff] %v7989_v61 }
0x14cd   :  { %v3323_v57 = vpop.f32.mrf.mxu1 }
0x14ce   :  { %v3344_v49 = vadd.f32 %v3343_v46, %v3323_v57  ;;  %v7977_v57 = vld [vmem:[#allocation4 + $0x288] sm:$0xff] }
0x14cf   :  { %v3423_v31 = vpop.f32.mrf.mxu0 }
0x14d0   :  { %v3467_v18 = vadd.f32 %v3344_v49, %v9275_v13  ;;  %v7979_v49 = vld [vmem:[#allocation4 + $0x290] sm:$0xff] }
0x14d1   :  { %9289 = vst [vmem:[#allocation13_spill] sm:$0xff] %v7979_v49  ;;  %v8113_v13 = vld [vmem:[#allocation4 + $0xd0] sm:$0xff] }
0x14d2   :  { %v3472_v32 = vmul.f32 %v3467_v18, %v9277_v50  ;;  %v7985_v18 = vld [vmem:[#allocation4 + $0x268] sm:$0xff] }
0x14d4   :  { %v3363_v20 = vpop.f32.mrf.mxu2  ;;  %v3403_v23 = vpop.f32.mrf.mxu3 }
0x14d5   :  { %v3384_v28 = vadd.f32 %v3383_v27, %v3363_v20  ;;  %v3424_v15 = vadd.f32 %v3423_v31, %v3403_v23  ;;  %v3463_v46 = vpop.f32.mrf.mxu1  ;;  %v7939_v23 = vld [vmem:[#allocation4 + $0x258] sm:$0xff] }
0x14d6   :  { %3670 = vmatpush.msrb.mxu1 %v7939_v23 }
0x14d7   :  { %v3468_v38 = vadd.f32 %v3384_v28, %v9269_v37  ;;  %v3469_v33 = vadd.f32 %v3424_v15, %v9271_v24  ;;  %v7941_v28 = vld [vmem:[#allocation4 + $0x2f8] sm:$0xff]  ;;  %v7943_v15 = vld [vmem:[#allocation4 + $0x300] sm:$0xff]  ;;  %v8125_v24 = vld [vmem:[#allocation4 + $0xa8] sm:$0xff] }
0x14d8   :  { %3702 = vmatpush.msrb.mxu2 %v7941_v28  ;;  %3742 = vmatpush.msra.mxu3 %v7943_v15  ;;  %v8131_v37 = vld [vmem:[#allocation4 + $0xb8] sm:$0xff] }
0x14d9   :  { %v3473_v9 = vmul.f32 %v3468_v38, %v9270_v56  ;;  %v3474_v45 = vmul.f32 %v3469_v33, %v9272_v36  ;;  %v7947_v38 = vld [vmem:[#allocation4 + $0x308] sm:$0xff]  ;;  %v7951_v33 = vld [vmem:[#allocation4 + $0x2d0] sm:$0xff]  ;;  %9301 = vst [vmem:[#allocation16_spill] sm:$0xff] %v8131_v37 }
0x14da   :  { %3782 = vmatpush.msra.mxu0 %v7947_v38  ;;  %3703 = vmatpush.msrb.mxu2 %v7951_v33 }
0x14db   :  { %5188 = vtanh.f32 %v3473_v9  ;;  %v7955_v9 = vld [vmem:[#allocation4 + $0x2d8] sm:$0xff] }
0x14dc   :  { %5190 = vtanh.f32 %v3474_v45  ;;  %v7957_v45 = vld [vmem:[#allocation4 + $0x2e0] sm:$0xff]  ;;  %3743 = vmatpush.msra.mxu3 %v7955_v9 }
0x14dd   :  { %5192 = vtanh.f32 %v3472_v32  ;;  %9287 = vst [vmem:[#allocation81_spill] sm:$0xff] %v7957_v45  ;;  %3783 = vmatpush.msra.mxu0 %v7957_v45  ;;  %v7991_v32 = vld [vmem:[#allocation4 + $0x1b8] sm:$0xff] }
0x14de   :  { %5194 = vtanh.f32 %v3471_v3  ;;  %v7995_v3 = vld [vmem:[#allocation4 + $0x238] sm:$0xff] }
0x14df   :  { %v8181_v45 = vld [vmem:[#allocation4 + $0x18] sm:$0xff] }
0x14e0   :  { %9308 = vst [vmem:[#allocation31_spill] sm:$0xff] %v8181_v45 }
0x14e1   :  { %v5189_v5 = vpop.eup %5188 }
0x14e2   :  { %v5191_v22 = vpop.eup %5190  ;;  %v3483_v62 = vmul.f32 %v5189_v5, %v9270_v56  ;;  %v7959_v5 = vld [vmem:[#allocation4 + $0x208] sm:$0xff]  ;;  %v8127_v56 = vld [vmem:[#allocation4 + $0xb0] sm:$0xff] }
0x14e3   :  { %v3484_v14 = vmul.f32 %v5191_v22, %v9272_v36  ;;  %v5193_v35 = vpop.eup %5192  ;;  %v7963_v22 = vld [vmem:[#allocation4 + $0x2a8] sm:$0xff] }
0x14e4   :  { %v3488_v7 = vadd.f32 %v3483_v62, %v9273_v6  ;;  %v5195_v58 = vpop.eup %5194  ;;  %v3482_v17 = vmul.f32 %v5193_v35, %v9277_v50  ;;  %v7965_v62 = vld [vmem:[#allocation4 + $0x2b0] sm:$0xff]  ;;  %3704 = vmatpush.msrb.mxu2 %v7963_v22  ;;  %v7997_v35 = vld [vmem:[#allocation4 + $0x240] sm:$0xff]  ;;  %v8107_v50 = vld [vmem:[#allocation4 + $0x108] sm:$0xff] }
0x14e5   :  { %v7910_v39 = vadd.f32 %v3484_v14, %v9274_v30  ;;  %v3481_v16 = vmul.f32 %v5195_v58, %v9278_v43  ;;  %v7967_v14 = vld [vmem:[#allocation4 + $0x2b8] sm:$0xff]  ;;  %3744 = vmatpush.msra.mxu3 %v7965_v62  ;;  %v8105_v43 = vld [vmem:[#allocation4 + $0x100] sm:$0xff]  ;;  %9299 = vst [vmem:[#allocation72_spill] sm:$0xff] %v8107_v50  ;;  %v8121_v36 = vld [vmem:[#allocation4 + $0x28] sm:$0xff] }
0x14e6   :  { %3495 = vrot.lane.b32.xlu2 %v3488_v7, %s5378_s5  ;;  %v3487_v25 = vadd.f32 %v3482_v17, %v9279_v41  ;;  %v3492_v51 = vmul.f32 %v3488_v7, %v7857_v47  ;;  %9288 = vst [vmem:[#allocation64_spill] sm:$0xff] %v7967_v14  ;;  %v7971_v7 = vld [vmem:[#allocation4 + $0x1e0] sm:$0xff]  ;;  %3784 = vmatpush.msra.mxu0 %v7967_v14  ;;  %v8001_v17 = vld [vmem:[#allocation4 + $0x248] sm:$0xff]  ;;  %v8101_v41 = vld [vmem:[#allocation4 + $0xf8] sm:$0xff] }
0x14e7   :  { %3497 = vrot.lane.b32.xlu0 %v7910_v39, %s5378_s5  ;;  %v3486_v40 = vadd.f32 %v3481_v16, %v9280_v1  ;;  %v3443_v29 = vpop.f32.mrf.mxu0  ;;  %3705 = vmatpush.msrb.mxu2 %v7973_v8  ;;  %9291 = vst [vmem:[#allocation18_spill] sm:$0xff] %v8001_v17  ;;  %v8003_v16 = vld [vmem:[#allocation4 + $0x190] sm:$0xff]  ;;  %v8099_v1 = vld [vmem:[#allocation4 + $0x78] sm:$0xff]  ;;  %v8119_v6 = vld [vmem:[#allocation4 + $0xe0] sm:$0xff] }
0x14e8   :  { %v3491_v52 = vmul.f32 %v3487_v25, %v7851_v11  ;;  %v3464_v27 = vadd.f32 %v3463_v46, %v3443_v29  ;;  %3745 = vmatpush.msra.mxu3 %v7977_v57  ;;  %3785 = vmatpush.msra.mxu0 %v7979_v49  ;;  %v8047_v29 = vld [vmem:[#allocation4 + $0x1c8] sm:$0xff]  ;;  %v8049_v46 = vld [vmem:[#allocation4 + $0x1d0] sm:$0xff]  ;;  %v8115_v30 = vld [vmem:[#allocation4 + $0xd8] sm:$0xff]  ;;  %9300 = vst [vmem:[#allocation10_spill] sm:$0xff] %v8119_v6 }
0x14e9   :  { %3710 = vmatpush.msra.mxu2 %v7983_v60  ;;  %9294 = vst [vmem:[#allocation20_spill] sm:$0xff] %v8049_v46  ;;  %v8169_v49 = vld [vmem:[#allocation4 + $0x2c0] sm:$0xff]  ;;  %v8179_v14 = vld [vmem:[#allocation4 + $0x10] sm:$0xff] }
0x14ea   :  { %v3470_v31 = vadd.f32 %v3464_v27, %v9283_v0  ;;  %3750 = vmatpush.msrb.mxu3 %v7985_v18  ;;  %3790 = vmatpush.msrb.mxu0 %v7989_v61  ;;  %v8053_v27 = vld [vmem:[#allocation4 + $0x118] sm:$0xff]  ;;  %v8097_v0 = vld [vmem:[#allocation4 + $0x130] sm:$0xff]  ;;  %v8167_v61 = vld [vmem:[#allocation4 + $0x40] sm:$0xff]  ;;  %9306 = vst [vmem:[#allocation29_spill] sm:$0xff] %v8169_v49 }
0x14eb   :  { %3711 = vmatpush.msra.mxu2 %v7995_v3  ;;  %9298 = vst [vmem:[#allocation23_spill] sm:$0xff] %v8097_v0 }
0x14ec   :  { %v3475_v20 = vmul.f32 %v3470_v31, %v9284_v21  ;;  %3751 = vmatpush.msrb.mxu3 %v7997_v35  ;;  %3791 = vmatpush.msrb.mxu0 %v8001_v17  ;;  %v8057_v31 = vld [vmem:[#allocation4 + $0x1a0] sm:$0xff]  ;;  %v8161_v17 = vld [vmem:[#allocation4 + $0x30] sm:$0xff]  ;;  %9305 = vst [vmem:[#allocation12_spill] sm:$0xff] %v8167_v61 }
0x14ed   :  { %9307 = vst [vmem:[#allocation8_spill] sm:$0xff] %v8179_v14 }
0x1540   :  { %v3496_v55 = vpop.permute.xlu2 %3495 }
0x1559   :  { %v3498_v2 = vpop.permute.xlu0 %3497 }
0x155a   :  { %v3499_v4 = vsel %vm769_vm10, %v3496_v55, %v3498_v2  ;;  %v3503_v63 = vmul.f32 %v3498_v2, %v3487_v25  ;;  %v8007_v25 = vld [vmem:[#allocation4 + $0x210] sm:$0xff]  ;;  %v8009_v55 = vld [vmem:[#allocation4 + $0x218] sm:$0xff]  ;;  %v8013_v2 = vld [vmem:[#allocation4 + $0x220] sm:$0xff] }
0x155b   :  { %v3502_v48 = vmul.f32 %v3499_v4, %v3486_v40  ;;  %9292 = vst [vmem:[#allocation52_spill] sm:$0xff] %v8013_v2  ;;  %v8015_v40 = vld [vmem:[#allocation4 + $0x168] sm:$0xff]  ;;  %3712 = vmatpush.msra.mxu2 %v8007_v25  ;;  %3752 = vmatpush.msrb.mxu3 %v8009_v55 }
0x155c   :  { %3508 = vrot.lane.b32.xlu2 %v3503_v63, %s5377_s24  ;;  %v8020_v63 = vld [vmem:[#allocation4 + $0x1e8] sm:$0xff]  ;;  %3792 = vmatpush.msrb.mxu0 %v8013_v2 }
0x155d   :  { %3506 = vrot.lane.b32.xlu1 %v3502_v48, %s5377_s24  ;;  %v8022_v48 = vld [vmem:[#allocation4 + $0x1f0] sm:$0xff]  ;;  %3713 = vmatpush.msra.mxu2 %v8020_v63  ;;  %v8157_v2 = vld [vmem:[#allocation4 + $0x2e8] sm:$0xff] }
0x155e   :  { %3753 = vmatpush.msrb.mxu3 %v8022_v48  ;;  %9304 = vst [vmem:[#allocation11_spill] sm:$0xff] %v8157_v2 }
0x1560   :  { %3754 = vmatpush.msrb.mxu3 %v8047_v29 }
0x1562   :  { %3755 = vmatpush.msrb.mxu3 %v8057_v31 }
0x15b6   :  { %v3509_v44 = vpop.permute.xlu2 %3508 }
0x15cf   :  { %v3507_v19 = vpop.permute.xlu1 %3506 }
0x15d0   :  { %v3510_v12 = vsel %vm501_vm9, %v3507_v19, %v3509_v44  ;;  %v3513_v26 = vadd.f32 %v3507_v19, %v3491_v52  ;;  %v8026_v52 = vld [vmem:[#allocation4 + $0x1f8] sm:$0xff] }
0x15d1   :  { %v7929_v34 = vadd.f32 %v3510_v12, %v3492_v51  ;;  %9293 = vst [vmem:[#allocation24_spill] sm:$0xff] %v8026_v52  ;;  %3793 = vmatpush.msrb.mxu0 %v8026_v52  ;;  %v8155_v52 = vld [vmem:[#allocation4 + $0x68] sm:$0xff] }
0x15d2   :  { %5196 = vtanh.f32 %v3513_v26  ;;  %9303 = vst [vmem:[#allocation41_spill] sm:$0xff] %v8155_v52 }
0x15d3   :  { %5198 = vtanh.f32 %v7929_v34  ;;  %3794 = vmatpush.msrb.mxu0 %v8049_v46  ;;  %v8149_v46 = vld [vmem:[#allocation4 + $0x58] sm:$0xff] }
0x15d4   :  { %5200 = vtanh.f32 %v3475_v20  ;;  %v8063_v20 = vld [vmem:[#allocation4 + $0xf0] sm:$0xff] }
0x15d8   :  { %v5197_v53 = vpop.eup %5196 }
0x15d9   :  { %v5199_v10 = vpop.eup %5198  ;;  %3519 = vrot.lane.b32.xlu0 %v5197_v53, %s5378_s5 }
0x15da   :  { %3521 = vrot.lane.b32.xlu1 %v5199_v10, %s5378_s5  ;;  %v5201_v58 = vpop.eup %5200  ;;  %v8042_v10 = vld [vmem:[#allocation4 + $0x140] sm:$0xff] }
0x15db   :  { %v3485_v4 = vmul.f32 %v5201_v58, %v9284_v21  ;;  %v8065_v58 = vld [vmem:[#allocation4 + $0x170] sm:$0xff]  ;;  %v8093_v21 = vld [vmem:[#allocation4 + $0x128] sm:$0xff] }
0x15dd   :  { %v3490_v19 = vadd.f32 %v3485_v4, %v9285_v54  ;;  %v8069_v4 = vld [vmem:[#allocation4 + $0x178] sm:$0xff]  ;;  %v8091_v54 = vld [vmem:[#allocation4 + $0x120] sm:$0xff] }
0x15de   :  { %3756 = vmatpush.msrb.mxu3 %v8069_v4 }
0x15e2   :  { %3543 = vrot.lane.b32.xlu1 %v3513_v26, %s5379_s6 }
0x15ea   :  { %3554 = vrot.lane.b32.xlu1 %v7857_v47, %s5379_s6  ;;  %v7949_v47 = vld [vmem:[#allocation4 + $0x230] sm:$0xff] }
0x15eb   :  { %3671 = vmatpush.msrb.mxu1 %v7949_v47 }
0x15ed   :  { %3672 = vmatpush.msrb.mxu1 %v7959_v5 }
0x15ef   :  { %3673 = vmatpush.msrb.mxu1 %v7971_v7 }
0x15f1   :  { %3674 = vmatpush.msrb.mxu1 %v7991_v32 }
0x15f3   :  { %3675 = vmatpush.msrb.mxu1 %v8003_v16 }
0x15f5   :  { %3676 = vmatpush.msrb.mxu1 %v8015_v40 }
0x15f7   :  { %3677 = vmatpush.msrb.mxu1 %v8042_v10 }
0x15f9   :  { %3678 = vmatpush.msrb.mxu1 %v8053_v27 }
0x15fb   :  { %3679 = vmatpush.msrb.mxu1 %v8063_v20 }
0x164b   :  { %v3520_v44 = vpop.permute.xlu0 %3519 }
0x164c   :  { %v3526_v51 = vmul.f32 %v3520_v44, %v7910_v39  ;;  %v3522_v12 = vpop.permute.xlu1 %3521  ;;  %v8045_v39 = vld [vmem:[#allocation4 + $0x1c0] sm:$0xff] }
0x164d   :  { %v3523_v26 = vsel %vm769_vm10, %v3520_v44, %v3522_v12  ;;  %3714 = vmatpush.msra.mxu2 %v8045_v39  ;;  %v8071_v44 = vld [vmem:[#allocation4 + $0x180] sm:$0xff]  ;;  %v8079_v12 = vld [vmem:[#allocation4 + $0x150] sm:$0xff] }
0x164e   :  { %v3527_v53 = vmul.f32 %v3523_v26, %v3490_v19  ;;  %3532 = vrot.lane.b32.xlu0 %v3526_v51, %s5377_s24  ;;  %9296 = vst [vmem:[#allocation79_spill] sm:$0xff] %v8071_v44  ;;  %v8073_v51 = vld [vmem:[#allocation4 + $0xc8] sm:$0xff]  ;;  %v8083_v26 = vld [vmem:[#allocation4 + $0x158] sm:$0xff]  ;;  %3757 = vmatpush.msrb.mxu3 %v8079_v12 }
0x164f   :  { %v8077_v19 = vld [vmem:[#allocation4 + $0x148] sm:$0xff]  ;;  %9297 = vst [vmem:[#allocation14_spill] sm:$0xff] %v8083_v26  ;;  %3680 = vmatpush.msrb.mxu1 %v8073_v51 }
0x1650   :  { %3534 = vrot.lane.b32.xlu2 %v3527_v53, %s5377_s24  ;;  %v8089_v53 = vld [vmem:[#allocation4 + $0xa0] sm:$0xff]  ;;  %3758 = vmatpush.msrb.mxu3 %v8093_v21 }
0x1651   :  { %3681 = vmatpush.msrb.mxu1 %v8089_v53 }
0x1652   :  { %3759 = vmatpush.msrb.mxu3 %v8105_v43 }
0x1653   :  { %3682 = vmatpush.msrb.mxu1 %v8099_v1 }
0x1654   :  { %3760 = vmatpush.msrb.mxu3 %v8115_v30 }
0x1655   :  { %3683 = vmatpush.msrb.mxu1 %v8109_v59 }
0x1656   :  { %3552 = vrot.lane.b32.xlu0 %v7851_v11, %s5379_s6  ;;  %v8055_v11 = vld [vmem:[#allocation4 + $0x198] sm:$0xff]  ;;  %3761 = vmatpush.msrb.mxu3 %v8127_v56 }
0x1657   :  { %3715 = vmatpush.msra.mxu2 %v8055_v11  ;;  %3684 = vmatpush.msrb.mxu1 %v8121_v36 }
0x1658   :  { %3545 = vrot.lane.b32.xlu2 %v7929_v34, %s5379_s6  ;;  %v8061_v34 = vld [vmem:[#allocation4 + $0x1a8] sm:$0xff] }
0x1659   :  { %9295 = vst [vmem:[#allocation21_spill] sm:$0xff] %v8061_v34  ;;  %3795 = vmatpush.msrb.mxu0 %v8061_v34  ;;  %3716 = vmatpush.msra.mxu2 %v8065_v58  ;;  %v8145_v34 = vld [vmem:[#allocation4 + $0x310] sm:$0xff] }
0x165b   :  { %3796 = vmatpush.msrb.mxu0 %v8071_v44  ;;  %3717 = vmatpush.msra.mxu2 %v8077_v19  ;;  %v8143_v44 = vld [vmem:[#allocation4 + $0x90] sm:$0xff] }
0x165c   :  { %9302 = vst [vmem:[#allocation27_spill] sm:$0xff] %v8143_v44 }
0x165d   :  { %3797 = vmatpush.msrb.mxu0 %v8083_v26  ;;  %3718 = vmatpush.msra.mxu2 %v8091_v54  ;;  %v8137_v26 = vld [vmem:[#allocation4 + $0x80] sm:$0xff] }
0x165f   :  { %3798 = vmatpush.msrb.mxu0 %v8097_v0  ;;  %3719 = vmatpush.msra.mxu2 %v8101_v41  ;;  %v8133_v0 = vld [vmem:[#allocation4] sm:$0xff] }
0x1660   :  { %3685 = vmatpush.msrb.mxu1 %v8133_v0 }
0x1661   :  { %3799 = vmatpush.msrb.mxu0 %v8107_v50  ;;  %3720 = vmatpush.msra.mxu2 %v8113_v13  ;;  %v8139_v50 = vld [vmem:[#allocation4 + $0x88] sm:$0xff] }
0x1662   :  { %3762 = vmatpush.msrb.mxu3 %v8139_v50  ;;  %3822 = vmatpush.msra.mxu1 %v8145_v34 }
0x1663   :  { %3800 = vmatpush.msrb.mxu0 %v8119_v6  ;;  %3721 = vmatpush.msra.mxu2 %v8125_v24  ;;  %v8151_v6 = vld [vmem:[#allocation4 + $0x60] sm:$0xff] }
0x1664   :  { %3763 = vmatpush.msrb.mxu3 %v8151_v6  ;;  %3823 = vmatpush.msra.mxu1 %v8157_v2  ;;  %v8189_v2 = vld [vmem:[#allocation4 + $0x318] sm:$0xff] }
0x1665   :  { %3801 = vmatpush.msrb.mxu0 %v8131_v37  ;;  %3722 = vmatpush.msra.mxu2 %v8137_v26  ;;  %v8163_v37 = vld [vmem:[#allocation4 + $0x38] sm:$0xff] }
0x1666   :  { %3764 = vmatpush.msrb.mxu3 %v8163_v37  ;;  %3824 = vmatpush.msra.mxu1 %v8169_v49  ;;  %v8194_v49 = vld [vmem:[#allocation4 + $0x2f0] sm:$0xff] }
0x1667   :  { %3802 = vmatpush.msrb.mxu0 %v8143_v44  ;;  %3723 = vmatpush.msra.mxu2 %v8149_v46  ;;  %v8177_v44 = vld [vmem:[#allocation4 + $0x8] sm:$0xff]  ;;  %9309 = vst [vmem:[#allocation15_spill] sm:$0xff] %v8194_v49 }
0x1668   :  { %3765 = vmatpush.msrb.mxu3 %v8179_v14  ;;  %v8198_v14 = vld [vmem:[#allocation4 + $0x2c8] sm:$0xff] }
0x1669   :  { %3803 = vmatpush.msrb.mxu0 %v8155_v52  ;;  %3724 = vmatpush.msra.mxu2 %v8161_v17  ;;  %v8185_v52 = vld [vmem:[#allocation4 + $0x298] sm:$0xff] }
0x166a   :  { %3825 = vmatpush.msra.mxu1 %v8185_v52 }
0x166b   :  { %3804 = vmatpush.msrb.mxu0 %v8167_v61  ;;  %3725 = vmatpush.msra.mxu2 %v8177_v44 }
0x166d   :  { %3805 = vmatpush.msrb.mxu0 %v8181_v45  ;;  %v8203_v45 = vld [vmem:[#allocation4 + $0x2a0] sm:$0xff] }
0x16aa   :  { %v3535_v61 = vpop.permute.xlu2 %3534 }
0x16ab   :  { %3561 = vst.msk [vmem:[#allocation3 + $0x20] sm:$0xff] %vm501_vm9, %v3535_v61  ;;  %5007 = vmatmul.msk.f32.vlgmr.msrb.gmra.mxu2 %vm501_vm9, %v3535_v61  ;;  %5008 = vmatmul.msk.f32.vlgmr.msra.gmra.mxu3 %vm501_vm9, %v3535_v61 }
0x16ac   :  { %5009 = vmatmul.msk.f32.vlgmr.msra.gmra.mxu0 %vm501_vm9, %v3535_v61  ;;  %3862 = vmatpush.msrb.mxu2 %v8189_v2 }
0x16ad   :  { %4106 = vmatpush.msra.mxu3 %v7941_v28  ;;  %4146 = vmatpush.msra.mxu0 %v7943_v15  ;;  %v3544_v28 = vpop.permute.xlu1 %3543  ;;  %v9310_v15 = vld [vmem:[#allocation7_spill] sm:$0xff] }
0x16ae   :  { %3863 = vmatpush.msrb.mxu2 %v8194_v49  ;;  %vm3528_vm15 = vcmp.ge.s32.totalorder %v9310_v15, 32  ;;  %vm3941_vm0 = vcmp.ge.s32.totalorder %v9310_v15, 64  ;;  %vm4345_vm1 = vcmp.ge.s32.totalorder %v9310_v15, 96  ;;  %v4434_v15 = vld [vmem:[#allocation4 + $0x1d8] sm:$0xff] }
0x16af   :  { %4107 = vmatpush.msra.mxu3 %v7951_v33  ;;  %4147 = vmatpush.msra.mxu0 %v7955_v9 }
0x16b0   :  { %3864 = vmatpush.msrb.mxu2 %v8198_v14 }
0x16b1   :  { %4108 = vmatpush.msra.mxu3 %v7963_v22  ;;  %4148 = vmatpush.msra.mxu0 %v7965_v62  ;;  %v8220_v22 = vld [vmem:[#allocation4 + $0x278] sm:$0xff]  ;;  %v8226_v62 = vld [vmem:[#allocation4 + $0x250] sm:$0xff] }
0x16b2   :  { %3865 = vmatpush.msrb.mxu2 %v8203_v45 }
0x16b3   :  { %4109 = vmatpush.msra.mxu3 %v7973_v8  ;;  %4149 = vmatpush.msra.mxu0 %v7977_v57  ;;  %v8230_v8 = vpop.permute.xlu2 %3545 }
0x16b5   :  { %v3555_v57 = vpop.permute.xlu1 %3554 }
0x16c0   :  { %v3533_v49 = vpop.permute.xlu0 %3532 }
0x16c1   :  { %v3536_v33 = vsel %vm501_vm9, %v3533_v49, %v3535_v61 }
0x16c2   :  { %v8218_v9 = vsel %vm3528_vm15, %v3536_v33, %v7872_v42  ;;  %v8232_v42 = vld [vmem:[#allocation4 + $0x228] sm:$0xff]  ;;  %v8238_v33 = vld [vmem:[#allocation4 + $0x200] sm:$0xff] }
0x16c3   :  { %3686 = vmatmul.f32.vlgmr.msrb.gmra.mxu1 %v8218_v9  ;;  %3726 = vmatmul.f32.vlgmr.msra.gmra.mxu2 %v8218_v9 }
0x16c4   :  { %3766 = vmatmul.f32.vlgmr.msrb.gmra.mxu3 %v8218_v9  ;;  %3806 = vmatmul.f32.vlgmr.msrb.gmra.mxu0 %v8218_v9 }
0x16c5   :  { %3830 = vmatpush.msrb.mxu1 %v8220_v22  ;;  %4074 = vmatpush.msra.mxu2 %v7939_v23  ;;  %v3547_v23 = vsel %vm818_vm11, %v3544_v28, %v8230_v8  ;;  %v9336_v28 = vld [vmem:[#allocation73_spill] sm:$0xff] }
0x16c6   :  { %4114 = vmatpush.msrb.mxu3 %v7983_v60  ;;  %4154 = vmatpush.msrb.mxu0 %v7985_v18  ;;  %v8247_v18 = vld [vmem:[#allocation4 + $0x1d8] sm:$0xff] }
0x16c7   :  { %3831 = vmatpush.msrb.mxu1 %v8226_v62  ;;  %4075 = vmatpush.msra.mxu2 %v7949_v47 }
0x16c8   :  { %v3553_v49 = vpop.permute.xlu0 %3552  ;;  %4115 = vmatpush.msrb.mxu3 %v7995_v3  ;;  %4155 = vmatpush.msrb.mxu0 %v7997_v35  ;;  %v8264_v3 = vld [vmem:[#allocation4 + $0x188] sm:$0xff] }
0x16c9   :  { %3832 = vmatpush.msrb.mxu1 %v8232_v42  ;;  %v3556_v60 = vsel %vm818_vm11, %v3553_v49, %v3555_v57  ;;  %4076 = vmatpush.msra.mxu2 %v7959_v5  ;;  %v8260_v5 = vld [vmem:[#allocation4 + $0x1b0] sm:$0xff]  ;;  %v8288_v35 = vld [vmem:[#allocation4 + $0xe8] sm:$0xff] }
0x16ca   :  { %v8251_v47 = vsel %vm3528_vm15, %v3547_v23, %v3556_v60  ;;  %4116 = vmatpush.msrb.mxu3 %v8007_v25  ;;  %4156 = vmatpush.msrb.mxu0 %v8009_v55  ;;  %v8300_v25 = vld [vmem:[#allocation4 + $0x98] sm:$0xff]  ;;  %v8306_v55 = vld [vmem:[#allocation4 + $0x70] sm:$0xff] }
0x16cb   :  { %3833 = vmatpush.msrb.mxu1 %v8238_v33  ;;  %5011 = vmatmul.msk.f32.vlgmr.msrb.gmra.mxu2 %vm501_vm9, %v3535_v61 }
0x16cc   :  { %5010 = vmatmul.msk.f32.vlgmr.msra.gmra.mxu1 %vm501_vm9, %v3535_v61  ;;  %3897 = vrot.lane.b32.xlu1 %v8251_v47, %s5377_s24  ;;  %v8270_v61 = vld [vmem:[#allocation4 + $0x160] sm:$0xff] }
0x16cd   :  { %3834 = vmatpush.msrb.mxu1 %v8247_v18  ;;  %4077 = vmatpush.msra.mxu2 %v7971_v7  ;;  %v8276_v7 = vld [vmem:[#allocation4 + $0x138] sm:$0xff] }
0x16ce   :  { %4117 = vmatpush.msrb.mxu3 %v8020_v63  ;;  %4157 = vmatpush.msrb.mxu0 %v8022_v48  ;;  %v9327_v63 = vld [vmem:[#allocation10_spill] sm:$0xff]  ;;  %v9328_v48 = vld [vmem:[#allocation16_spill] sm:$0xff] }
0x16cf   :  { %3835 = vmatpush.msrb.mxu1 %v8260_v5  ;;  %4078 = vmatpush.msra.mxu2 %v7991_v32  ;;  %v8282_v32 = vld [vmem:[#allocation4 + $0x110] sm:$0xff] }
0x16d0   :  { %4118 = vmatpush.msrb.mxu3 %v8045_v39  ;;  %4158 = vmatpush.msrb.mxu0 %v8047_v29  ;;  %v9331_v39 = vld [vmem:[#allocation12_spill] sm:$0xff]  ;;  %v9332_v29 = vld [vmem:[#allocation31_spill] sm:$0xff] }
0x16d1   :  { %3836 = vmatpush.msrb.mxu1 %v8264_v3  ;;  %4079 = vmatpush.msra.mxu2 %v8003_v16  ;;  %v8294_v16 = vld [vmem:[#allocation4 + $0xc0] sm:$0xff] }
0x16d2   :  { %4119 = vmatpush.msrb.mxu3 %v8055_v11  ;;  %4159 = vmatpush.msrb.mxu0 %v8057_v31 }
0x16d3   :  { %3837 = vmatpush.msrb.mxu1 %v8270_v61  ;;  %4080 = vmatpush.msra.mxu2 %v8015_v40  ;;  %v9326_v40 = vld [vmem:[#allocation72_spill] sm:$0xff] }
0x16d4   :  { %4120 = vmatpush.msrb.mxu3 %v8065_v58  ;;  %4160 = vmatpush.msrb.mxu0 %v8069_v4  ;;  %v9333_v4 = vld [vmem:[#allocation65_spill] sm:$0xff] }
0x16d5   :  { %3838 = vmatpush.msrb.mxu1 %v8276_v7  ;;  %4081 = vmatpush.msra.mxu2 %v8042_v10  ;;  %v9330_v10 = vld [vmem:[#allocation41_spill] sm:$0xff] }
0x16d6   :  { %4121 = vmatpush.msrb.mxu3 %v8077_v19  ;;  %4161 = vmatpush.msrb.mxu0 %v8079_v12  ;;  %v9334_v19 = vld [vmem:[#allocation68_spill] sm:$0xff] }
0x16d7   :  { %3839 = vmatpush.msrb.mxu1 %v8282_v32  ;;  %4082 = vmatpush.msra.mxu2 %v8053_v27 }
0x16d8   :  { %4122 = vmatpush.msrb.mxu3 %v8091_v54  ;;  %4162 = vmatpush.msrb.mxu0 %v8093_v21  ;;  %v8312_v21 = vld [vmem:[#allocation4 + $0x48] sm:$0xff]  ;;  %v9323_v54 = vld [vmem:[#allocation79_spill] sm:$0xff] }
0x16d9   :  { %3840 = vmatpush.msrb.mxu1 %v8288_v35  ;;  %4083 = vmatpush.msra.mxu2 %v8063_v20 }
0x16da   :  { %4123 = vmatpush.msrb.mxu3 %v8101_v41  ;;  %4163 = vmatpush.msrb.mxu0 %v8105_v43  ;;  %v8318_v43 = vld [vmem:[#allocation4 + $0x20] sm:$0xff]  ;;  %v9320_v41 = vld [vmem:[#allocation24_spill] sm:$0xff] }
0x16db   :  { %3841 = vmatpush.msrb.mxu1 %v8294_v16  ;;  %4084 = vmatpush.msra.mxu2 %v8073_v51 }
0x16dc   :  { %4124 = vmatpush.msrb.mxu3 %v8113_v13  ;;  %4164 = vmatpush.msrb.mxu0 %v8115_v30  ;;  %v9315_v30 = vld [vmem:[#allocation29_spill] sm:$0xff] }
0x16dd   :  { %3842 = vmatpush.msrb.mxu1 %v8300_v25  ;;  %4085 = vmatpush.msra.mxu2 %v8089_v53  ;;  %v9316_v13 = vld [vmem:[#allocation13_spill] sm:$0xff] }
0x16de   :  { %4125 = vmatpush.msrb.mxu3 %v8125_v24  ;;  %4165 = vmatpush.msrb.mxu0 %v8127_v56  ;;  %v9311_v56 = vld [vmem:[#allocation81_spill] sm:$0xff]  ;;  %v9312_v24 = vld [vmem:[#allocation11_spill] sm:$0xff] }
0x16df   :  { %3843 = vmatpush.msrb.mxu1 %v8306_v55  ;;  %4086 = vmatpush.msra.mxu2 %v8099_v1  ;;  %v9321_v1 = vld [vmem:[#allocation20_spill] sm:$0xff] }
0x16e0   :  { %4126 = vmatpush.msrb.mxu3 %v8137_v26  ;;  %4166 = vmatpush.msrb.mxu0 %v8139_v50  ;;  %v9318_v50 = vld [vmem:[#allocation18_spill] sm:$0xff] }
0x16e1   :  { %3844 = vmatpush.msrb.mxu1 %v8312_v21  ;;  %4087 = vmatpush.msra.mxu2 %v8109_v59  ;;  %v9317_v59 = vld [vmem:[#allocation9_spill] sm:$0xff]  ;;  %v9335_v26 = vld [vmem:[#allocation66_spill] sm:$0xff] }
0x16e2   :  { %4127 = vmatpush.msrb.mxu3 %v8149_v46  ;;  %4167 = vmatpush.msrb.mxu0 %v8151_v6  ;;  %v9313_v6 = vld [vmem:[#allocation8_spill] sm:$0xff] }
0x16e3   :  { %3845 = vmatpush.msrb.mxu1 %v8318_v43  ;;  %4088 = vmatpush.msra.mxu2 %v8121_v36  ;;  %v9314_v36 = vld [vmem:[#allocation64_spill] sm:$0xff] }
0x16e4   :  { %3846 = vmatmul.f32.vlgmr.msrb.gmra.mxu1 %v8218_v9  ;;  %4128 = vmatpush.msrb.mxu3 %v8161_v17  ;;  %v9325_v17 = vld [vmem:[#allocation23_spill] sm:$0xff] }
0x16e5   :  { %4186 = vmatpush.msra.mxu1 %v7947_v38  ;;  %4089 = vmatpush.msra.mxu2 %v8133_v0  ;;  %v9322_v0 = vld [vmem:[#allocation21_spill] sm:$0xff]  ;;  %v9324_v38 = vld [vmem:[#allocation14_spill] sm:$0xff] }
0x16e6   :  { %4168 = vmatpush.msrb.mxu0 %v8163_v37  ;;  %4129 = vmatpush.msrb.mxu3 %v8177_v44  ;;  %v9319_v37 = vld [vmem:[#allocation52_spill] sm:$0xff] }
0x16e7   :  { %4226 = vmatpush.msrb.mxu2 %v8145_v34  ;;  %4187 = vmatpush.msra.mxu1 %v9311_v56  ;;  %v9337_v56 = vld [vmem:[#allocation70_spill] sm:$0xff] }
0x16e8   :  { %4169 = vmatpush.msrb.mxu0 %v9313_v6 }
0x16e9   :  { %4227 = vmatpush.msrb.mxu2 %v9312_v24  ;;  %4188 = vmatpush.msra.mxu1 %v9314_v36  ;;  %v9338_v36 = vld [vmem:[#allocation74_spill] sm:$0xff] }
0x16eb   :  { %4228 = vmatpush.msrb.mxu2 %v9315_v30  ;;  %4189 = vmatpush.msra.mxu1 %v9316_v13 }
0x16ed   :  { %4194 = vmatpush.msrb.mxu1 %v9317_v59  ;;  %4229 = vmatpush.msrb.mxu2 %v8185_v52  ;;  %v9329_v52 = vld [vmem:[#allocation27_spill] sm:$0xff] }
0x16ef   :  { %4195 = vmatpush.msrb.mxu1 %v9318_v50 }
0x16f1   :  { %4196 = vmatpush.msrb.mxu1 %v9319_v37 }
0x16f3   :  { %4197 = vmatpush.msrb.mxu1 %v9320_v41  ;;  %v9339_v41 = vld [vmem:[#allocation50_spill] sm:$0xff] }
0x16f5   :  { %4198 = vmatpush.msrb.mxu1 %v9321_v1 }
0x16f7   :  { %4199 = vmatpush.msrb.mxu1 %v9322_v0  ;;  %v9340_v0 = vld [vmem:[#allocation49_spill] sm:$0xff] }
0x16f9   :  { %4200 = vmatpush.msrb.mxu1 %v9323_v54 }
0x16fb   :  { %4201 = vmatpush.msrb.mxu1 %v9324_v38  ;;  %v9341_v38 = vld [vmem:[#allocation75_spill] sm:$0xff] }
0x16fd   :  { %4202 = vmatpush.msrb.mxu1 %v9325_v17 }
0x16ff   :  { %4203 = vmatpush.msrb.mxu1 %v9326_v40  ;;  %v9342_v40 = vld [vmem:[#allocation76_spill] sm:$0xff] }
0x1701   :  { %4204 = vmatpush.msrb.mxu1 %v9327_v63 }
0x1703   :  { %4205 = vmatpush.msrb.mxu1 %v9328_v48 }
0x1705   :  { %4206 = vmatpush.msrb.mxu1 %v9329_v52 }
0x1707   :  { %4207 = vmatpush.msrb.mxu1 %v9330_v10 }
0x1709   :  { %4208 = vmatpush.msrb.mxu1 %v9331_v39  ;;  %v9343_v39 = vld [vmem:[#allocation77_spill] sm:$0xff] }
0x170b   :  { %4209 = vmatpush.msrb.mxu1 %v9332_v29 }
0x1729   :  { %v3787_v11 = vpop.f32.mrf.mxu0 }
0x172e   :  { %v3747_v46 = vpop.f32.mrf.mxu3  ;;  %v3707_v13 = vpop.f32.mrf.mxu2 }
0x1740   :  { %v3687_v27 = vpop.f32.mrf.mxu1 }
0x1741   :  { %v3807_v20 = vpop.f32.mrf.mxu0  ;;  %v3708_v37 = vadd.f32 %v3707_v13, %v3687_v27 }
0x1743   :  { %v3870_v54 = vadd.f32 %v3708_v37, %v9340_v0 }
0x1745   :  { %v3875_v63 = vmul.f32 %v3870_v54, %v9342_v40 }
0x1746   :  { %v3727_v59 = vpop.f32.mrf.mxu2 }
0x1747   :  { %v3767_v31 = vpop.f32.mrf.mxu3  ;;  %v3748_v50 = vadd.f32 %v3747_v46, %v3727_v59 }
0x1748   :  { %v3788_v34 = vadd.f32 %v3787_v11, %v3767_v31  ;;  %v9344_v11 = vld [vmem:[#allocation78_spill] sm:$0xff] }
0x1749   :  { %v3827_v58 = vpop.f32.mrf.mxu1  ;;  %v3871_v1 = vadd.f32 %v3748_v50, %v9339_v41 }
0x174a   :  { %v3872_v44 = vadd.f32 %v3788_v34, %v9333_v4  ;;  %v3828_v51 = vadd.f32 %v3827_v58, %v3807_v20 }
0x174b   :  { %v3876_v17 = vmul.f32 %v3871_v1, %v9341_v38 }
0x174c   :  { %v3877_v12 = vmul.f32 %v3872_v44, %v9334_v19  ;;  %v3873_v53 = vadd.f32 %v3828_v51, %v9335_v26  ;;  %v3898_v44 = vpop.permute.xlu1 %3897 }
0x174e   :  { %5202 = vtanh.f32 %v3877_v12  ;;  %v3878_v57 = vmul.f32 %v3873_v53, %v9336_v28  ;;  %v3867_v1 = vpop.f32.mrf.mxu2 }
0x1750   :  { %5204 = vtanh.f32 %v3878_v57 }
0x1751   :  { %5206 = vtanh.f32 %v3876_v17 }
0x1752   :  { %5208 = vtanh.f32 %v3875_v63  ;;  %v9345_v63 = vld [vmem:[#allocation71_spill] sm:$0xff] }
0x1754   :  { %v5203_v49 = vpop.eup %5202 }
0x1755   :  { %v3887_v23 = vmul.f32 %v5203_v49, %v9334_v19 }
0x1756   :  { %v5205_v60 = vpop.eup %5204 }
0x1757   :  { %v3892_v24 = vadd.f32 %v3887_v23, %v9337_v56  ;;  %v3888_v6 = vmul.f32 %v5205_v60, %v9336_v28  ;;  %v5207_v48 = vpop.eup %5206 }
0x1758   :  { %v5209_v52 = vpop.eup %5208  ;;  %v3886_v10 = vmul.f32 %v5207_v48, %v9341_v38 }
0x1759   :  { %3908 = vrot.lane.b32.xlu2 %v3892_v24, %s5378_s5  ;;  %v3893_v30 = vadd.f32 %v3888_v6, %v9338_v36 }
0x175a   :  { %v3891_v29 = vadd.f32 %v3886_v10, %v9343_v39 }
0x175b   :  { %3910 = vrot.lane.b32.xlu0 %v3893_v30, %s5378_s5 }
0x175c   :  { %v3904_v57 = vmul.f32 %v3898_v44, %v3891_v29 }
0x1761   :  { %3899 = vrot.lane.b32.xlu2 %v8230_v8, %s5377_s24  ;;  %v3885_v8 = vmul.f32 %v5209_v52, %v9342_v40  ;;  %v3847_v37 = vpop.f32.mrf.mxu1  ;;  %v9346_v52 = vld [vmem:[#allocation84_spill] sm:$0xff] }
0x1762   :  { %v3868_v54 = vadd.f32 %v3867_v1, %v3847_v37 }
0x1763   :  { %v3890_v31 = vadd.f32 %v3885_v8, %v9344_v11 }
0x1764   :  { %v3874_v48 = vadd.f32 %v3868_v54, %v9345_v63 }
0x1766   :  { %v3879_v10 = vmul.f32 %v3874_v48, %v9346_v52 }
0x17b3   :  { %v3909_v46 = vpop.permute.xlu2 %3908 }
0x17bb   :  { %v3900_v51 = vpop.permute.xlu2 %3899 }
0x17bc   :  { %v3901_v12 = vsel %vm501_vm9, %v3898_v44, %v3900_v51 }
0x17bd   :  { %v3905_v49 = vmul.f32 %v3901_v12, %v3892_v24  ;;  %v9348_v12 = vld [vmem:[#allocation15_spill] sm:$0xff] }
0x17cd   :  { %v3911_v27 = vpop.permute.xlu0 %3910 }
0x17ce   :  { %v3912_v34 = vsel %vm769_vm10, %v3909_v46, %v3911_v27  ;;  %v3916_v20 = vmul.f32 %v3911_v27, %v3891_v29  ;;  %v9347_v46 = vld [vmem:[#allocation85_spill] sm:$0xff] }
0x17cf   :  { %v3915_v58 = vmul.f32 %v3912_v34, %v3890_v31 }
0x17d0   :  { %3921 = vrot.lane.b32.xlu1 %v3916_v20, %s5377_s24 }
0x17d1   :  { %3919 = vrot.lane.b32.xlu0 %v3915_v58, %s5377_s24 }
0x1842   :  { %v3922_v53 = vpop.permute.xlu1 %3921 }
0x1843   :  { %v3920_v23 = vpop.permute.xlu0 %3919 }
0x1844   :  { %v3923_v60 = vsel %vm501_vm9, %v3920_v23, %v3922_v53  ;;  %v3926_v6 = vadd.f32 %v3920_v23, %v3904_v57 }
0x1845   :  { %v3927_v13 = vadd.f32 %v3923_v60, %v3905_v49 }
0x1846   :  { %5210 = vtanh.f32 %v3926_v6 }
0x1847   :  { %5212 = vtanh.f32 %v3927_v13 }
0x1848   :  { %5214 = vtanh.f32 %v3879_v10 }
0x184c   :  { %v5211_v59 = vpop.eup %5210 }
0x184d   :  { %v5213_v50 = vpop.eup %5212  ;;  %3932 = vrot.lane.b32.xlu2 %v5211_v59, %s5378_s5 }
0x184e   :  { %3934 = vrot.lane.b32.xlu0 %v5213_v50, %s5378_s5  ;;  %v5215_v8 = vpop.eup %5214 }
0x184f   :  { %v3889_v29 = vmul.f32 %v5215_v8, %v9346_v52 }
0x1851   :  { %v3894_v27 = vadd.f32 %v3889_v29, %v9347_v46 }
0x1856   :  { %3956 = vrot.lane.b32.xlu0 %v3926_v6, %s5379_s6 }
0x18a7   :  { %v3933_v17 = vpop.permute.xlu2 %3932 }
0x18a8   :  { %v3939_v24 = vmul.f32 %v3933_v17, %v3893_v30 }
0x18aa   :  { %3945 = vrot.lane.b32.xlu1 %v3939_v24, %s5377_s24 }
0x18b2   :  { %3958 = vrot.lane.b32.xlu1 %v3927_v13, %s5379_s6 }
0x18c0   :  { %v3935_v31 = vpop.permute.xlu0 %3934 }
0x18c1   :  { %v3936_v34 = vsel %vm769_vm10, %v3933_v17, %v3935_v31 }
0x18c2   :  { %v3940_v20 = vmul.f32 %v3936_v34, %v3894_v27 }
0x18c4   :  { %3947 = vrot.lane.b32.xlu2 %v3940_v20, %s5377_s24 }
0x18c8   :  { %v3957_v53 = vpop.permute.xlu0 %3956 }
0x191c   :  { %v3946_v30 = vpop.permute.xlu1 %3945 }
0x191e   :  { %v3948_v58 = vpop.permute.xlu2 %3947 }
0x191f   :  { %3965 = vst.msk [vmem:[#allocation3 + $0x28] sm:$0xff] %vm501_vm9, %v3948_v58  ;;  %5012 = vmatmul.msk.f32.vlgmr.msra.gmra.mxu3 %vm501_vm9, %v3948_v58  ;;  %5013 = vmatmul.msk.f32.vlgmr.msra.gmra.mxu0 %vm501_vm9, %v3948_v58  ;;  %v3949_v44 = vsel %vm501_vm9, %v3946_v30, %v3948_v58 }
0x1920   :  { %5014 = vmatmul.msk.f32.vlgmr.msra.gmra.mxu1 %vm501_vm9, %v3948_v58  ;;  %v8403_v51 = vsel %vm3941_vm0, %v3949_v44, %v8218_v9  ;;  %4266 = vmatpush.msra.mxu3 %v8189_v2 }
0x1921   :  { %4090 = vmatmul.f32.vlgmr.msra.gmra.mxu2 %v8403_v51 }
0x1922   :  { %4234 = vmatpush.msra.mxu2 %v8220_v22  ;;  %4267 = vmatpush.msra.mxu3 %v9348_v12 }
0x1924   :  { %4235 = vmatpush.msra.mxu2 %v8226_v62  ;;  %v3959_v57 = vpop.permute.xlu1 %3958  ;;  %4268 = vmatpush.msra.mxu3 %v8198_v14 }
0x1925   :  { %v3960_v49 = vsel %vm818_vm11, %v3957_v53, %v3959_v57 }
0x1926   :  { %4236 = vmatpush.msra.mxu2 %v8232_v42  ;;  %v8416_v2 = vsel %vm3941_vm0, %v3960_v49, %v8251_v47  ;;  %4269 = vmatpush.msra.mxu3 %v8203_v45 }
0x1927   :  { %4130 = vmatmul.f32.vlgmr.msrb.gmra.mxu3 %v8403_v51  ;;  %4170 = vmatmul.f32.vlgmr.msrb.gmra.mxu0 %v8403_v51 }
0x1928   :  { %4210 = vmatmul.f32.vlgmr.msrb.gmra.mxu1 %v8403_v51  ;;  %4237 = vmatpush.msra.mxu2 %v8238_v33 }
0x1929   :  { %4301 = vrot.lane.b32.xlu1 %v8416_v2, %s5377_s24  ;;  %5015 = vmatmul.msk.f32.vlgmr.msrb.gmra.mxu2 %vm501_vm9, %v3948_v58 }
0x192a   :  { %4238 = vmatpush.msra.mxu2 %v8247_v18 }
0x192c   :  { %4239 = vmatpush.msra.mxu2 %v8260_v5 }
0x192e   :  { %4240 = vmatpush.msra.mxu2 %v8264_v3 }
0x192f   :  { %5016 = vmatmul.msk.f32.vlgmr.msra.gmra.mxu3 %vm501_vm9, %v3948_v58 }
0x1930   :  { %4241 = vmatpush.msra.mxu2 %v8270_v61 }
0x1932   :  { %4242 = vmatpush.msra.mxu2 %v8276_v7 }
0x1934   :  { %4243 = vmatpush.msra.mxu2 %v8282_v32 }
0x1936   :  { %4244 = vmatpush.msra.mxu2 %v8288_v35 }
0x1938   :  { %4245 = vmatpush.msra.mxu2 %v8294_v16 }
0x193a   :  { %4246 = vmatpush.msra.mxu2 %v8300_v25 }
0x193c   :  { %4247 = vmatpush.msra.mxu2 %v8306_v55 }
0x193e   :  { %4248 = vmatpush.msra.mxu2 %v8312_v21 }
0x1940   :  { %4249 = vmatpush.msra.mxu2 %v8318_v43 }
0x1941   :  { %4250 = vmatmul.f32.vlgmr.msra.gmra.mxu2 %v8403_v51 }
0x199b   :  { %v4302_v34 = vpop.permute.xlu1 %4301 }
0x199c   :  { %v4151_v45 = vpop.f32.mrf.mxu0 }
0x199d   :  { %v4191_v14 = vpop.f32.mrf.mxu1 }
0x19a2   :  { %v4111_v21 = vpop.f32.mrf.mxu3 }
0x19a4   :  { %v4091_v9 = vpop.f32.mrf.mxu2  ;;  %v4171_v22 = vpop.f32.mrf.mxu0 }
0x19a5   :  { %v4192_v62 = vadd.f32 %v4191_v14, %v4171_v22  ;;  %v4211_v18 = vpop.f32.mrf.mxu1  ;;  %v4112_v60 = vadd.f32 %v4111_v21, %v4091_v9  ;;  %v4467_v21 = vld [vmem:[#allocation4 + $0x2e0] sm:$0xff] }
0x19a7   :  { %v4276_v42 = vadd.f32 %v4192_v62, %v9333_v4  ;;  %v4274_v13 = vadd.f32 %v4112_v60, %v9340_v0  ;;  %v4462_v60 = vld [vmem:[#allocation4 + $0x2b8] sm:$0xff] }
0x19a9   :  { %v4281_v33 = vmul.f32 %v4276_v42, %v9334_v19  ;;  %v4279_v50 = vmul.f32 %v4274_v13, %v9342_v40  ;;  %v4430_v13 = vld [vmem:[#allocation4 + $0x1b8] sm:$0xff] }
0x19aa   :  { %v4131_v43 = vpop.f32.mrf.mxu3 }
0x19ab   :  { %5216 = vtanh.f32 %v4281_v33  ;;  %v4152_v23 = vadd.f32 %v4151_v45, %v4131_v43  ;;  %v4435_v43 = vld [vmem:[#allocation4 + $0x1e0] sm:$0xff] }
0x19ac   :  { %v4231_v47 = vpop.f32.mrf.mxu2 }
0x19ad   :  { %v4232_v5 = vadd.f32 %v4231_v47, %v4211_v18  ;;  %v4275_v6 = vadd.f32 %v4152_v23, %v9339_v41  ;;  %v4450_v47 = vld [vmem:[#allocation4 + $0x258] sm:$0xff]  ;;  %v4461_v23 = vld [vmem:[#allocation4 + $0x2b0] sm:$0xff] }
0x19ae   :  { %4478 = vmatpush.msrb.mxu3 %v4450_v47  ;;  %v4395_v47 = vld [vmem:[#allocation4 + $0xa0] sm:$0xff] }
0x19af   :  { %v4277_v3 = vadd.f32 %v4232_v5, %v9335_v26  ;;  %v4280_v59 = vmul.f32 %v4275_v6, %v9341_v38  ;;  %v4445_v5 = vld [vmem:[#allocation4 + $0x230] sm:$0xff]  ;;  %v4455_v6 = vld [vmem:[#allocation4 + $0x280] sm:$0xff] }
0x19b0   :  { %4479 = vmatpush.msrb.mxu3 %v4445_v5  ;;  %v4421_v5 = vld [vmem:[#allocation4 + $0x170] sm:$0xff] }
0x19b1   :  { %v4282_v61 = vmul.f32 %v4277_v3, %v9336_v28  ;;  %v5217_v7 = vpop.eup %5216  ;;  %v4470_v3 = vld [vmem:[#allocation4 + $0x2f8] sm:$0xff] }
0x19b2   :  { %v4291_v32 = vmul.f32 %v5217_v7, %v9334_v19  ;;  %v4271_v62 = vpop.f32.mrf.mxu3  ;;  %v4440_v7 = vld [vmem:[#allocation4 + $0x208] sm:$0xff]  ;;  %4510 = vmatpush.msra.mxu0 %v4470_v3  ;;  %v4422_v3 = vld [vmem:[#allocation4 + $0x178] sm:$0xff] }
0x19b3   :  { %5218 = vtanh.f32 %v4282_v61  ;;  %v4471_v61 = vld [vmem:[#allocation4 + $0x300] sm:$0xff]  ;;  %4480 = vmatpush.msrb.mxu3 %v4440_v7  ;;  %v4390_v7 = vld [vmem:[#allocation4 + $0x78] sm:$0xff] }
0x19b4   :  { %v4296_v35 = vadd.f32 %v4291_v32, %v9337_v56  ;;  %5220 = vtanh.f32 %v4280_v59  ;;  %v4472_v32 = vld [vmem:[#allocation4 + $0x308] sm:$0xff]  ;;  %4550 = vmatpush.msra.mxu1 %v4471_v61  ;;  %v4423_v61 = vld [vmem:[#allocation4 + $0x180] sm:$0xff] }
0x19b5   :  { %5222 = vtanh.f32 %v4279_v50  ;;  %4590 = vmatpush.msrb.mxu2 %v4472_v32  ;;  %v4456_v59 = vld [vmem:[#allocation4 + $0x288] sm:$0xff]  ;;  %4481 = vmatpush.msrb.mxu3 %v4435_v43  ;;  %v4385_v43 = vld [vmem:[#allocation4 + $0x50] sm:$0xff] }
0x19b6   :  { %4312 = vrot.lane.b32.xlu2 %v4296_v35, %s5378_s5  ;;  %v4416_v32 = vld [vmem:[#allocation4 + $0x148] sm:$0xff] }
0x19b7   :  { %4591 = vmatpush.msrb.mxu2 %v4467_v21  ;;  %4482 = vmatpush.msrb.mxu3 %v4430_v13  ;;  %v4380_v13 = vld [vmem:[#allocation4 + $0x28] sm:$0xff] }
0x19b9   :  { %v5219_v16 = vpop.eup %5218  ;;  %4592 = vmatpush.msrb.mxu2 %v4462_v60  ;;  %v4412_v60 = vld [vmem:[#allocation4 + $0x128] sm:$0xff] }
0x19ba   :  { %v4292_v25 = vmul.f32 %v5219_v16, %v9336_v28  ;;  %v5221_v37 = vpop.eup %5220 }
0x19bb   :  { %v5223_v1 = vpop.eup %5222  ;;  %v4290_v54 = vmul.f32 %v5221_v37, %v9341_v38  ;;  %v4457_v37 = vld [vmem:[#allocation4 + $0x290] sm:$0xff] }
0x19bc   :  { %v4297_v55 = vadd.f32 %v4292_v25, %v9338_v36  ;;  %v4289_v17 = vmul.f32 %v5223_v1, %v9342_v40  ;;  %v4466_v25 = vld [vmem:[#allocation4 + $0x2d8] sm:$0xff]  ;;  %v4425_v1 = vld [vmem:[#allocation4 + $0x190] sm:$0xff]  ;;  %4593 = vmatpush.msrb.mxu2 %v4457_v37  ;;  %v4407_v37 = vld [vmem:[#allocation4 + $0x100] sm:$0xff] }
0x19bd   :  { %v4295_v24 = vadd.f32 %v4290_v54, %v9343_v39  ;;  %4551 = vmatpush.msra.mxu1 %v4466_v25  ;;  %v4451_v54 = vld [vmem:[#allocation4 + $0x260] sm:$0xff]  ;;  %4483 = vmatpush.msrb.mxu3 %v4425_v1 }
0x19be   :  { %4314 = vrot.lane.b32.xlu0 %v4297_v55, %s5378_s5  ;;  %4303 = vrot.lane.b32.xlu2 %v3959_v57, %s5377_s24  ;;  %v4294_v8 = vadd.f32 %v4289_v17, %v9344_v11  ;;  %v4452_v17 = vld [vmem:[#allocation4 + $0x268] sm:$0xff]  ;;  %v4375_v1 = vld [vmem:[#allocation4] sm:$0xff] }
0x19bf   :  { %v4308_v44 = vmul.f32 %v4302_v34, %v4295_v24  ;;  %4552 = vmatpush.msra.mxu1 %v4461_v23 }
0x19c1   :  { %4553 = vmatpush.msra.mxu1 %v4456_v59  ;;  %v4413_v59 = vld [vmem:[#allocation4 + $0x130] sm:$0xff] }
0x19c3   :  { %4558 = vmatpush.msrb.mxu1 %v4452_v17  ;;  %v4401_v17 = vld [vmem:[#allocation4 + $0xd0] sm:$0xff] }
0x19c4   :  { %v4251_v22 = vpop.f32.mrf.mxu2 }
0x19c5   :  { %v4272_v42 = vadd.f32 %v4271_v62, %v4251_v22  ;;  %v4426_v22 = vld [vmem:[#allocation4 + $0x198] sm:$0xff]  ;;  %v4427_v62 = vld [vmem:[#allocation4 + $0x1a0] sm:$0xff] }
0x19c7   :  { %v4278_v16 = vadd.f32 %v4272_v42, %v9345_v63  ;;  %v4428_v42 = vld [vmem:[#allocation4 + $0x1a8] sm:$0xff] }
0x19c9   :  { %v4283_v50 = vmul.f32 %v4278_v16, %v9346_v52  ;;  %v4418_v16 = vld [vmem:[#allocation4 + $0x158] sm:$0xff] }
0x1a10   :  { %v4313_v48 = vpop.permute.xlu2 %4312 }
0x1a18   :  { %v4304_v20 = vpop.permute.xlu2 %4303 }
0x1a19   :  { %v4305_v30 = vsel %vm501_vm9, %v4302_v34, %v4304_v20  ;;  %v4442_v34 = vld [vmem:[#allocation4 + $0x218] sm:$0xff]  ;;  %v4443_v20 = vld [vmem:[#allocation4 + $0x220] sm:$0xff] }
0x1a1a   :  { %v4309_v12 = vmul.f32 %v4305_v30, %v4296_v35  ;;  %v4465_v35 = vld [vmem:[#allocation4 + $0x2d0] sm:$0xff]  ;;  %v4410_v30 = vld [vmem:[#allocation4 + $0x118] sm:$0xff] }
0x1a1b   :  { %4511 = vmatpush.msra.mxu0 %v4465_v35  ;;  %v4417_v35 = vld [vmem:[#allocation4 + $0x150] sm:$0xff] }
0x1a30   :  { %v4315_v10 = vpop.permute.xlu0 %4314 }
0x1a31   :  { %v4316_v29 = vsel %vm769_vm10, %v4313_v48, %v4315_v10  ;;  %v4320_v27 = vmul.f32 %v4315_v10, %v4295_v24  ;;  %v4453_v24 = vld [vmem:[#allocation4 + $0x270] sm:$0xff]  ;;  %v4420_v48 = vld [vmem:[#allocation4 + $0x168] sm:$0xff]  ;;  %v4446_v10 = vld [vmem:[#allocation4 + $0x238] sm:$0xff] }
0x1a32   :  { %v4319_v31 = vmul.f32 %v4316_v29, %v4294_v8  ;;  %v4447_v8 = vld [vmem:[#allocation4 + $0x240] sm:$0xff]  ;;  %v4448_v29 = vld [vmem:[#allocation4 + $0x248] sm:$0xff]  ;;  %4598 = vmatpush.msra.mxu2 %v4453_v24  ;;  %4484 = vmatpush.msrb.mxu3 %v4420_v48  ;;  %v4402_v24 = vld [vmem:[#allocation4 + $0xd8] sm:$0xff] }
0x1a33   :  { %4325 = vrot.lane.b32.xlu1 %v4320_v27, %s5377_s24  ;;  %v4415_v27 = vld [vmem:[#allocation4 + $0x140] sm:$0xff]  ;;  %4559 = vmatpush.msrb.mxu1 %v4447_v8  ;;  %v4396_v8 = vld [vmem:[#allocation4 + $0xa8] sm:$0xff] }
0x1a34   :  { %4323 = vrot.lane.b32.xlu0 %v4319_v31, %s5377_s24  ;;  %v4441_v31 = vld [vmem:[#allocation4 + $0x210] sm:$0xff]  ;;  %4599 = vmatpush.msra.mxu2 %v4448_v29  ;;  %v4403_v48 = vld [vmem:[#allocation4 + $0xe0] sm:$0xff] }
0x1a35   :  { %4485 = vmatpush.msrb.mxu3 %v4415_v27  ;;  %4560 = vmatpush.msrb.mxu1 %v4442_v34  ;;  %v4397_v29 = vld [vmem:[#allocation4 + $0xb0] sm:$0xff]  ;;  %v4398_v27 = vld [vmem:[#allocation4 + $0xb8] sm:$0xff]  ;;  %v4391_v34 = vld [vmem:[#allocation4 + $0x80] sm:$0xff] }
0x1a36   :  { %4600 = vmatpush.msra.mxu2 %v4443_v20  ;;  %v4392_v20 = vld [vmem:[#allocation4 + $0x88] sm:$0xff] }
0x1a37   :  { %4486 = vmatpush.msrb.mxu3 %v4410_v30  ;;  %v4393_v30 = vld [vmem:[#allocation4 + $0x90] sm:$0xff] }
0x1aa5   :  { %v4326_v58 = vpop.permute.xlu1 %4325 }
0x1aa6   :  { %v4324_v53 = vpop.permute.xlu0 %4323 }
0x1aa7   :  { %v4327_v57 = vsel %vm501_vm9, %v4324_v53, %v4326_v58  ;;  %v4330_v49 = vadd.f32 %v4324_v53, %v4308_v44  ;;  %v4436_v58 = vld [vmem:[#allocation4 + $0x1e8] sm:$0xff]  ;;  %v4437_v44 = vld [vmem:[#allocation4 + $0x1f0] sm:$0xff] }
0x1aa8   :  { %v4331_v45 = vadd.f32 %v4327_v57, %v4309_v12  ;;  %v4438_v12 = vld [vmem:[#allocation4 + $0x1f8] sm:$0xff]  ;;  %v4405_v53 = vld [vmem:[#allocation4 + $0xf0] sm:$0xff]  ;;  %v4431_v57 = vld [vmem:[#allocation4 + $0x1c0] sm:$0xff]  ;;  %4561 = vmatpush.msrb.mxu1 %v4437_v44 }
0x1aa9   :  { %5224 = vtanh.f32 %v4330_v49  ;;  %4601 = vmatpush.msra.mxu2 %v4438_v12  ;;  %4487 = vmatpush.msrb.mxu3 %v4405_v53  ;;  %v4386_v44 = vld [vmem:[#allocation4 + $0x58] sm:$0xff]  ;;  %v4387_v12 = vld [vmem:[#allocation4 + $0x60] sm:$0xff]  ;;  %v4388_v53 = vld [vmem:[#allocation4 + $0x68] sm:$0xff] }
0x1aaa   :  { %5226 = vtanh.f32 %v4331_v45 }
0x1aab   :  { %5228 = vtanh.f32 %v4283_v50  ;;  %v4406_v50 = vld [vmem:[#allocation4 + $0xf8] sm:$0xff] }
0x1aaf   :  { %v5225_v14 = vpop.eup %5224 }
0x1ab0   :  { %v5227_v9 = vpop.eup %5226  ;;  %4336 = vrot.lane.b32.xlu2 %v5225_v14, %s5378_s5  ;;  %v4433_v14 = vld [vmem:[#allocation4 + $0x1d0] sm:$0xff] }
0x1ab1   :  { %4338 = vrot.lane.b32.xlu0 %v5227_v9, %s5378_s5  ;;  %v4400_v9 = vld [vmem:[#allocation4 + $0xc8] sm:$0xff]  ;;  %4602 = vmatpush.msra.mxu2 %v4433_v14 }
0x1ab2   :  { %4488 = vmatpush.msrb.mxu3 %v4400_v9  ;;  %v4376_v14 = vld [vmem:[#allocation4 + $0x8] sm:$0xff]  ;;  %v4377_v9 = vld [vmem:[#allocation4 + $0x10] sm:$0xff] }
0x1ab3   :  { %4603 = vmatpush.msra.mxu2 %v4428_v42  ;;  %v4474_v42 = vld [vmem:[#allocation4 + $0x318] sm:$0xff] }
0x1ab4   :  { %4489 = vmatpush.msrb.mxu3 %v4395_v47 }
0x1ab5   :  { %4604 = vmatpush.msra.mxu2 %v4423_v61 }
0x1ab6   :  { %4490 = vmatpush.msrb.mxu3 %v4390_v7  ;;  %v4449_v7 = vld [vmem:[#allocation4 + $0x250] sm:$0xff] }
0x1ab7   :  { %4605 = vmatpush.msra.mxu2 %v4418_v16  ;;  %v4459_v16 = vld [vmem:[#allocation4 + $0x2a0] sm:$0xff] }
0x1ab8   :  { %4491 = vmatpush.msrb.mxu3 %v4385_v43 }
0x1ab9   :  { %4360 = vrot.lane.b32.xlu0 %v4330_v49, %s5379_s6  ;;  %v5229_v49 = vpop.eup %5228  ;;  %4606 = vmatpush.msra.mxu2 %v4413_v59  ;;  %v4782_v59 = vld [vmem:[%s8664_s7] sm:$0xff] }
0x1aba   :  { %4492 = vmatpush.msrb.mxu3 %v4380_v13  ;;  %v4424_v13 = vld [vmem:[#allocation4 + $0x188] sm:$0xff] }
0x1abc   :  { %4493 = vmatpush.msrb.mxu3 %v4375_v1  ;;  %v4409_v1 = vld [vmem:[#allocation4 + $0x110] sm:$0xff] }
0x1b0a   :  { %v8467_v33 = vpop.permute.xlu2 %4336 }
0x1b0b   :  { %v4343_v18 = vmul.f32 %v8467_v33, %v4297_v55  ;;  %v4460_v55 = vld [vmem:[#allocation4 + $0x2a8] sm:$0xff] }
0x1b0c   :  { %4512 = vmatpush.msra.mxu0 %v4460_v55  ;;  %v4411_v55 = vld [vmem:[#allocation4 + $0x120] sm:$0xff] }
0x1b0d   :  { %4349 = vrot.lane.b32.xlu1 %v4343_v18, %s5377_s24  ;;  %v4293_v18 = vmul.f32 %v5229_v49, %v9346_v52  ;;  %v4382_v49 = vld [vmem:[#allocation4 + $0x38] sm:$0xff] }
0x1b0e   :  { %4513 = vmatpush.msra.mxu0 %v4455_v6 }
0x1b0f   :  { %v4298_v25 = vadd.f32 %v4293_v18, %v9347_v46 }
0x1b10   :  { %4518 = vmatpush.msrb.mxu0 %v4451_v54  ;;  %v4408_v54 = vld [vmem:[#allocation4 + $0x108] sm:$0xff] }
0x1b11   :  { %4607 = vmatpush.msra.mxu2 %v4408_v54  ;;  %v4404_v54 = vld [vmem:[#allocation4 + $0xe8] sm:$0xff] }
0x1b12   :  { %4519 = vmatpush.msrb.mxu0 %v4446_v10  ;;  %v4468_v10 = vld [vmem:[#allocation4 + $0x2e8] sm:$0xff] }
0x1b13   :  { %4608 = vmatpush.msra.mxu2 %v4403_v48  ;;  %v4389_v48 = vld [vmem:[#allocation4 + $0x70] sm:$0xff] }
0x1b14   :  { %4520 = vmatpush.msrb.mxu0 %v4441_v31  ;;  %v4463_v31 = vld [vmem:[#allocation4 + $0x2c0] sm:$0xff] }
0x1b15   :  { %4362 = vrot.lane.b32.xlu1 %v4331_v45, %s5379_s6  ;;  %v4432_v45 = vld [vmem:[#allocation4 + $0x1c8] sm:$0xff]  ;;  %4609 = vmatpush.msra.mxu2 %v4398_v27  ;;  %v4776_v27 = vld [vmem:[#allocation3 + $0x10] sm:$0xff] }
0x1b16   :  { %4521 = vmatpush.msrb.mxu0 %v4436_v58  ;;  %4562 = vmatpush.msrb.mxu1 %v4432_v45  ;;  %v4458_v58 = vld [vmem:[#allocation4 + $0x298] sm:$0xff]  ;;  %v4383_v45 = vld [vmem:[#allocation4 + $0x40] sm:$0xff] }
0x1b17   :  { %4610 = vmatpush.msra.mxu2 %v4393_v30 }
0x1b18   :  { %4522 = vmatpush.msrb.mxu0 %v4431_v57  ;;  %4563 = vmatpush.msrb.mxu1 %v4427_v62  ;;  %v4381_v57 = vld [vmem:[#allocation4 + $0x30] sm:$0xff] }
0x1b19   :  { %4611 = vmatpush.msra.mxu2 %v4388_v53 }
0x1b1a   :  { %4523 = vmatpush.msrb.mxu0 %v4426_v22  ;;  %4564 = vmatpush.msrb.mxu1 %v4422_v3  ;;  %v4378_v22 = vld [vmem:[#allocation4 + $0x18] sm:$0xff]  ;;  %v4469_v3 = vld [vmem:[#allocation4 + $0x2f0] sm:$0xff] }
0x1b1b   :  { %4612 = vmatpush.msra.mxu2 %v4383_v45 }
0x1b1c   :  { %4524 = vmatpush.msrb.mxu0 %v4421_v5  ;;  %4565 = vmatpush.msrb.mxu1 %v4417_v35  ;;  %v4454_v5 = vld [vmem:[#allocation4 + $0x278] sm:$0xff]  ;;  %v4444_v35 = vld [vmem:[#allocation4 + $0x228] sm:$0xff] }
0x1b1d   :  { %4613 = vmatpush.msra.mxu2 %v4378_v22 }
0x1b1e   :  { %4525 = vmatpush.msrb.mxu0 %v4416_v32  ;;  %4566 = vmatpush.msrb.mxu1 %v4412_v60  ;;  %v4464_v32 = vld [vmem:[#allocation4 + $0x2c8] sm:$0xff]  ;;  %v4429_v60 = vld [vmem:[#allocation4 + $0x1b0] sm:$0xff] }
0x1b20   :  { %4526 = vmatpush.msrb.mxu0 %v4411_v55  ;;  %4567 = vmatpush.msrb.mxu1 %v4407_v37  ;;  %v4439_v55 = vld [vmem:[#allocation4 + $0x200] sm:$0xff]  ;;  %v4414_v37 = vld [vmem:[#allocation4 + $0x138] sm:$0xff] }
0x1b22   :  { %4527 = vmatpush.msrb.mxu0 %v4406_v50  ;;  %4568 = vmatpush.msrb.mxu1 %v4402_v24  ;;  %v4419_v50 = vld [vmem:[#allocation4 + $0x160] sm:$0xff]  ;;  %v4394_v24 = vld [vmem:[#allocation4 + $0x98] sm:$0xff] }
0x1b23   :  { %v4339_v21 = vpop.permute.xlu0 %4338 }
0x1b24   :  { %v4340_v23 = vsel %vm769_vm10, %v8467_v33, %v4339_v21  ;;  %v4473_v33 = vld [vmem:[#allocation4 + $0x310] sm:$0xff]  ;;  %4528 = vmatpush.msrb.mxu0 %v4401_v17  ;;  %4569 = vmatpush.msrb.mxu1 %v4397_v29  ;;  %v4774_v17 = vld [vmem:[#allocation3] sm:$0xff]  ;;  %v4775_v29 = vld [vmem:[#allocation3 + $0x8] sm:$0xff] }
0x1b25   :  { %v4344_v6 = vmul.f32 %v4340_v23, %v4298_v25  ;;  %4630 = vmatpush.msra.mxu3 %v4473_v33  ;;  %v4785_v23 = vld [vmem:[%s8664_s7 + $0x18] sm:$0xff]  ;;  %v4399_v33 = vld [vmem:[#allocation4 + $0xc0] sm:$0xff] }
0x1b26   :  { %4529 = vmatpush.msrb.mxu0 %v4396_v8  ;;  %4570 = vmatpush.msrb.mxu1 %v4392_v20  ;;  %v4379_v8 = vld [vmem:[#allocation4 + $0x20] sm:$0xff]  ;;  %v4779_v20 = vld [vmem:[#allocation3 + $0x28] sm:$0xff] }
0x1b27   :  { %4351 = vrot.lane.b32.xlu2 %v4344_v6, %s5377_s24  ;;  %4631 = vmatpush.msra.mxu3 %v4468_v10  ;;  %v4783_v6 = vld [vmem:[%s8664_s7 + $0x8] sm:$0xff] }
0x1b28   :  { %4530 = vmatpush.msrb.mxu0 %v4391_v34  ;;  %4571 = vmatpush.msrb.mxu1 %v4387_v12  ;;  %v4384_v10 = vld [vmem:[#allocation4 + $0x48] sm:$0xff]  ;;  %v4778_v34 = vld [vmem:[#allocation3 + $0x20] sm:$0xff] }
0x1b29   :  { %4632 = vmatpush.msra.mxu3 %v4463_v31  ;;  %v4777_v31 = vld [vmem:[#allocation3 + $0x18] sm:$0xff] }
0x1b2a   :  { %4531 = vmatpush.msrb.mxu0 %v4386_v44  ;;  %4572 = vmatpush.msrb.mxu1 %v4382_v49 }
0x1b2b   :  { %4633 = vmatpush.msra.mxu3 %v4458_v58  ;;  %v4361_v25 = vpop.permute.xlu0 %4360 }
0x1b2c   :  { %4532 = vmatpush.msrb.mxu0 %v4381_v57  ;;  %4573 = vmatpush.msrb.mxu1 %v4377_v9 }
0x1b2e   :  { %4533 = vmatpush.msrb.mxu0 %v4376_v14 }
0x1b7f   :  { %v4350_v62 = vpop.permute.xlu1 %4349 }
0x1b81   :  { %v4352_v18 = vpop.permute.xlu2 %4351 }
0x1b82   :  { %v4353_v47 = vsel %vm501_vm9, %v4350_v62, %v4352_v18  ;;  %4369 = vst.msk [vmem:[#allocation3 + $0x30] sm:$0xff] %vm501_vm9, %v4352_v18  ;;  %5017 = vmatmul.msk.f32.vlgmr.msra.gmra.mxu0 %vm501_vm9, %v4352_v18  ;;  %5018 = vmatmul.msk.f32.vlgmr.msra.gmra.mxu1 %vm501_vm9, %v4352_v18 }
0x1b83   :  { %v8487_v61 = vsel %vm4345_vm1, %v4353_v47, %v8403_v51  ;;  %5019 = vmatmul.msk.f32.vlgmr.msrb.gmra.mxu2 %vm501_vm9, %v4352_v18  ;;  %4670 = vmatpush.msra.mxu0 %v4474_v42 }
0x1b84   :  { %4863 = vst.msk [vmem:[%s8667_s10] sm:$0xff] %vm501_vm9, %v8487_v61  ;;  %4494 = vmatmul.f32.vlgmr.msrb.gmra.mxu3 %v8487_v61 }
0x1b85   :  { %4638 = vmatpush.msrb.mxu3 %v4454_v5  ;;  %4671 = vmatpush.msra.mxu0 %v4469_v3 }
0x1b87   :  { %4639 = vmatpush.msrb.mxu3 %v4449_v7  ;;  %v8496_v51 = vpop.permute.xlu1 %4362  ;;  %4672 = vmatpush.msra.mxu0 %v4464_v32  ;;  %v8545_v7 = vld [vmem:[%s8665_s8] ss:$0 sm:$0xff] }
0x1b88   :  { %v4364_v21 = vsel %vm818_vm11, %v4361_v25, %v8496_v51 }
0x1b89   :  { %v8503_v43 = vsel %vm4345_vm1, %v4364_v21, %v8416_v2  ;;  %4640 = vmatpush.msrb.mxu3 %v4444_v35  ;;  %4673 = vmatpush.msra.mxu0 %v4459_v16  ;;  %v4784_v2 = vld [vmem:[%s8664_s7 + $0x10] sm:$0xff] }
0x1b8a   :  { %4864 = vst.msk [vmem:[%s8668_s11] sm:$0xff] %vm501_vm9, %v8503_v43  ;;  %4705 = vrot.lane.b32.xlu1 %v8503_v43, %s5377_s24  ;;  %4534 = vmatmul.f32.vlgmr.msrb.gmra.mxu0 %v8487_v61  ;;  %v4780_v30 = vld [vmem:[#allocation3 + $0x30] sm:$0xff] }
0x1b8b   :  { %4574 = vmatmul.f32.vlgmr.msrb.gmra.mxu1 %v8487_v61  ;;  %4614 = vmatmul.f32.vlgmr.msra.gmra.mxu2 %v8487_v61 }
0x1b8c   :  { %4641 = vmatpush.msrb.mxu3 %v4439_v55  ;;  %4826 = vmatpush.msrb.mxu0 %v4785_v23 }
0x1b8d   :  { %5020 = vmatmul.msk.f32.vlgmr.msra.gmra.mxu3 %vm501_vm9, %v4352_v18 }
0x1b8e   :  { %4642 = vmatpush.msrb.mxu3 %v4434_v15  ;;  %4827 = vmatpush.msrb.mxu0 %v4784_v2 }
0x1b90   :  { %4643 = vmatpush.msrb.mxu3 %v4429_v60  ;;  %4828 = vmatpush.msrb.mxu0 %v4783_v6 }
0x1b92   :  { %4644 = vmatpush.msrb.mxu3 %v4424_v13  ;;  %5021 = vmatmul.msk.f32.vlgmr.msra.gmra.mxu0 %vm501_vm9, %v4352_v18 }
0x1b93   :  { %4829 = vmatpush.msrb.mxu0 %v4782_v59 }
0x1b94   :  { %4645 = vmatpush.msrb.mxu3 %v4419_v50 }
0x1b96   :  { %4646 = vmatpush.msrb.mxu3 %v4414_v37 }
0x1b98   :  { %4647 = vmatpush.msrb.mxu3 %v4409_v1 }
0x1b9a   :  { %4648 = vmatpush.msrb.mxu3 %v4404_v54  ;;  %5022 = vmatmul.msk.f32.vlgmr.msrb.gmra.mxu0 %vm501_vm9, %v4774_v17 }
0x1b9c   :  { %4649 = vmatpush.msrb.mxu3 %v4399_v33 }
0x1b9e   :  { %4650 = vmatpush.msrb.mxu3 %v4394_v24 }
0x1ba0   :  { %4651 = vmatpush.msrb.mxu3 %v4389_v48 }
0x1ba2   :  { %4652 = vmatpush.msrb.mxu3 %v4384_v10  ;;  %5023 = vmatmul.msk.f32.gmra.mxu0 %vm501_vm9, %v4775_v29 }
0x1ba4   :  { %4653 = vmatpush.msrb.mxu3 %v4379_v8 }
0x1ba5   :  { %4654 = vmatmul.f32.vlgmr.msrb.gmra.mxu3 %v8487_v61 }
0x1baa   :  { %5024 = vmatmul.msk.f32.gmra.mxu0 %vm501_vm9, %v4776_v27 }
0x1bb2   :  { %5025 = vmatmul.msk.f32.gmra.mxu0 %vm501_vm9, %v4777_v31 }
0x1bba   :  { %5026 = vmatmul.msk.f32.gmra.mxu0 %vm501_vm9, %v4778_v34 }
0x1bc2   :  { %5027 = vmatmul.msk.f32.gmra.mxu0 %vm501_vm9, %v4779_v20 }
0x1bca   :  { %5028 = vmatmul.msk.f32.gmra.mxu0 %vm501_vm9, %v4780_v30 }
0x1bfc   :  { %v4706_v20 = vpop.permute.xlu1 %4705 }
0x1bff   :  { %v4515_v58 = vpop.f32.mrf.mxu0  ;;  %v4555_v44 = vpop.f32.mrf.mxu1 }
0x1c06   :  { %v4595_v12 = vpop.f32.mrf.mxu2 }
0x1c07   :  { %v4495_v53 = vpop.f32.mrf.mxu3  ;;  %v4535_v57 = vpop.f32.mrf.mxu0 }
0x1c08   :  { %v4516_v49 = vadd.f32 %v4515_v58, %v4495_v53  ;;  %v4556_v45 = vadd.f32 %v4555_v44, %v4535_v57  ;;  %v4575_v14 = vpop.f32.mrf.mxu1 }
0x1c09   :  { %v4596_v9 = vadd.f32 %v4595_v12, %v4575_v14 }
0x1c0a   :  { %v4679_v37 = vadd.f32 %v4556_v45, %v9339_v41  ;;  %v4678_v1 = vadd.f32 %v4516_v49, %v9340_v0 }
0x1c0b   :  { %v4680_v22 = vadd.f32 %v4596_v9, %v9333_v4 }
0x1c0c   :  { %v4684_v54 = vmul.f32 %v4679_v37, %v9341_v38  ;;  %v4683_v33 = vmul.f32 %v4678_v1, %v9342_v40 }
0x1c0d   :  { %v4685_v62 = vmul.f32 %v4680_v22, %v9334_v19 }
0x1c0e   :  { %v4615_v18 = vpop.f32.mrf.mxu2 }
0x1c0f   :  { %v8539_v42 = vpop.f32.mrf.mxu0  ;;  %5230 = vtanh.f32 %v4685_v62 }
0x1c10   :  { %v4635_v47 = vpop.f32.mrf.mxu3 }
0x1c11   :  { %v4636_v5 = vadd.f32 %v4635_v47, %v4615_v18 }
0x1c13   :  { %v4681_v3 = vadd.f32 %v4636_v5, %v9335_v26 }
0x1c15   :  { %v4686_v32 = vmul.f32 %v4681_v3, %v9336_v28  ;;  %v5231_v35 = vpop.eup %5230 }
0x1c16   :  { %v4695_v16 = vmul.f32 %v5231_v35, %v9334_v19 }
0x1c17   :  { %5232 = vtanh.f32 %v4686_v32  ;;  %v4831_v4 = vpop.f32.mrf.mxu0 }
0x1c18   :  { %v4832_v25 = vadd.f32 %v8545_v7, %v4831_v4  ;;  %v4700_v21 = vadd.f32 %v4695_v16, %v9337_v56  ;;  %5234 = vtanh.f32 %v4684_v54 }
0x1c19   :  { %5236 = vtanh.f32 %v4683_v33 }
0x1c1a   :  { %4855 = vst [vmem:[%s8666_s9] sm:$0xff] %v4832_v25  ;;  %4716 = vrot.lane.b32.xlu2 %v4700_v21, %s5378_s5 }
0x1c1d   :  { %v5233_v26 = vpop.eup %5232 }
0x1c1e   :  { %v4696_v55 = vmul.f32 %v5233_v26, %v9336_v28  ;;  %v5235_v17 = vpop.eup %5234 }
0x1c1f   :  { %v4834_v23 = vpop.f32.mrf.mxu0  ;;  %v5237_v24 = vpop.eup %5236  ;;  %v4694_v48 = vmul.f32 %v5235_v17, %v9341_v38 }
0x1c20   :  { %v4835_v15 = vadd.f32 %v8545_v7, %v4834_v23  ;;  %v4701_v2 = vadd.f32 %v4696_v55, %v9338_v36  ;;  %v4693_v10 = vmul.f32 %v5237_v24, %v9342_v40 }
0x1c21   :  { %v4699_v8 = vadd.f32 %v4694_v48, %v9343_v39 }
0x1c22   :  { %4856 = vst [vmem:[%s8666_s9 + $0x8] sm:$0xff] %v4835_v15  ;;  %4718 = vrot.lane.b32.xlu0 %v4701_v2, %s5378_s5  ;;  %4707 = vrot.lane.b32.xlu2 %v8496_v51, %s5377_s24  ;;  %v4698_v41 = vadd.f32 %v4693_v10, %v9344_v11 }
0x1c23   :  { %v4712_v40 = vmul.f32 %v4706_v20, %v4699_v8 }
0x1c27   :  { %v4837_v19 = vpop.f32.mrf.mxu0 }
0x1c28   :  { %v4838_v56 = vadd.f32 %v8545_v7, %v4837_v19  ;;  %v4655_v45 = vpop.f32.mrf.mxu3 }
0x1c29   :  { %v4676_v14 = vadd.f32 %v8539_v42, %v4655_v45 }
0x1c2a   :  { %4857 = vst [vmem:[%s8666_s9 + $0x10] sm:$0xff] %v4838_v56 }
0x1c2b   :  { %v4682_v22 = vadd.f32 %v4676_v14, %v9345_v63 }
0x1c2d   :  { %v4687_v62 = vmul.f32 %v4682_v22, %v9346_v52 }
0x1c2f   :  { %v4840_v28 = vpop.f32.mrf.mxu0 }
0x1c30   :  { %v4841_v60 = vadd.f32 %v8545_v7, %v4840_v28 }
0x1c32   :  { %4858 = vst [vmem:[%s8666_s9 + $0x18] sm:$0xff] %v4841_v60 }
0x1c37   :  { %v4843_v36 = vpop.f32.mrf.mxu0 }
0x1c38   :  { %v4844_v6 = vadd.f32 %v8545_v7, %v4843_v36 }
0x1c3a   :  { %4859 = vst [vmem:[%s8666_s9 + $0x20] sm:$0xff] %v4844_v6 }
0x1c3f   :  { %v4846_v51 = vpop.f32.mrf.mxu0 }
0x1c40   :  { %v4847_v13 = vadd.f32 %v8545_v7, %v4846_v51 }
0x1c42   :  { %4860 = vst [vmem:[%s8666_s9 + $0x28] sm:$0xff] %v4847_v13 }
0x1c47   :  { %v4849_v59 = vpop.f32.mrf.mxu0 }
0x1c48   :  { %v4850_v50 = vadd.f32 %v8545_v7, %v4849_v59 }
0x1c4a   :  { %4861 = vst [vmem:[%s8666_s9 + $0x30] sm:$0xff] %v4850_v50 }
0x1c74   :  { %v4717_v29 = vpop.permute.xlu2 %4716 }
0x1c7c   :  { %v4708_v30 = vpop.permute.xlu2 %4707 }
0x1c7d   :  { %v4709_v38 = vsel %vm501_vm9, %v4706_v20, %v4708_v30 }
0x1c7e   :  { %v4713_v44 = vmul.f32 %v4709_v38, %v4700_v21 }
0x1c94   :  { %v4719_v27 = vpop.permute.xlu0 %4718 }
0x1c95   :  { %v4720_v0 = vsel %vm769_vm10, %v4717_v29, %v4719_v27  ;;  %v4724_v31 = vmul.f32 %v4719_v27, %v4699_v8 }
0x1c96   :  { %v4723_v34 = vmul.f32 %v4720_v0, %v4698_v41 }
0x1c97   :  { %4729 = vrot.lane.b32.xlu1 %v4724_v31, %s5377_s24 }
0x1c98   :  { %4727 = vrot.lane.b32.xlu0 %v4723_v34, %s5377_s24 }
0x1d09   :  { %v4730_v58 = vpop.permute.xlu1 %4729 }
0x1d0a   :  { %v4728_v39 = vpop.permute.xlu0 %4727 }
0x1d0b   :  { %v4731_v12 = vsel %vm501_vm9, %v4728_v39, %v4730_v58  ;;  %v4734_v53 = vadd.f32 %v4728_v39, %v4712_v40 }
0x1d0c   :  { %v4735_v11 = vadd.f32 %v4731_v12, %v4713_v44 }
0x1d0d   :  { %5238 = vtanh.f32 %v4734_v53 }
0x1d0e   :  { %5240 = vtanh.f32 %v4735_v11 }
0x1d0f   :  { %5242 = vtanh.f32 %v4687_v62 }
0x1d13   :  { %v5239_v57 = vpop.eup %5238 }
0x1d14   :  { %v5241_v49 = vpop.eup %5240  ;;  %4740 = vrot.lane.b32.xlu2 %v5239_v57, %s5378_s5 }
0x1d15   :  { %4742 = vrot.lane.b32.xlu0 %v5241_v49, %s5378_s5  ;;  %v5243_v5 = vpop.eup %5242 }
0x1d16   :  { %v4697_v42 = vmul.f32 %v5243_v5, %v9346_v52 }
0x1d18   :  { %v4702_v63 = vadd.f32 %v4697_v42, %v9347_v46 }
0x1d1c   :  { %4766 = vrot.lane.b32.xlu2 %v4735_v11, %s5379_s6 }
0x1d1d   :  { %4866 = vrot.lane.b32.xlu0 %v8487_v61, %s5379_s6 }
0x1d24   :  { %4877 = vrot.lane.b32.xlu2 %v8487_v61, %s5378_s5 }
0x1d25   :  { %4882 = vrot.lane.b32.xlu0 %v8503_v43, %s5378_s5 }
0x1d2c   :  { %4892 = vrot.lane.b32.xlu2 %v8503_v43, %s5377_s24 }
0x1d6e   :  { %v4741_v9 = vpop.permute.xlu2 %4740 }
0x1d76   :  { %v4767_v18 = vpop.permute.xlu2 %4766 }
0x1d77   :  { %5037 = vst.msk [vmem:[%s8668_s11 + $0x20] sm:$0xff] %vm501_vm9, %v4767_v18 }
0x1d7e   :  { %v4878_v47 = vpop.permute.xlu2 %4877 }
0x1d7f   :  { %5032 = vst.msk [vmem:[%s8667_s10 + $0x10] sm:$0xff] %vm501_vm9, %v4878_v47 }
0x1d86   :  { %v4893_v3 = vpop.permute.xlu2 %4892 }
0x1d87   :  { %5035 = vst.msk [vmem:[%s8668_s11 + $0x18] sm:$0xff] %vm501_vm9, %v4893_v3  ;;  %v4743_v32 = vpop.permute.xlu0 %4742 }
0x1d88   :  { %v4744_v35 = vsel %vm769_vm10, %v4741_v9, %v4743_v32 }
0x1d89   :  { %v4748_v4 = vmul.f32 %v4744_v35, %v4702_v63 }
0x1d8b   :  { %4755 = vrot.lane.b32.xlu1 %v4748_v4, %s5377_s24 }
0x1d8f   :  { %v4867_v16 = vpop.permute.xlu0 %4866 }
0x1d90   :  { %5030 = vst.msk [vmem:[%s8667_s10 + $0x8] sm:$0xff] %vm501_vm9, %v4867_v16 }
0x1d93   :  { %4872 = vrot.lane.b32.xlu1 %v8503_v43, %s5379_s6 }
0x1d97   :  { %v4883_v52 = vpop.permute.xlu0 %4882 }
0x1d98   :  { %5033 = vst.msk [vmem:[%s8668_s11 + $0x10] sm:$0xff] %vm501_vm9, %v4883_v52 }
0x1d9b   :  { %4887 = vrot.lane.b32.xlu1 %v8487_v61, %s5377_s24 }
0x1dfd   :  { %v4756_v46 = vpop.permute.xlu1 %4755 }
0x1dfe   :  { %4773 = vst.msk [vmem:[#allocation3 + $0x38] sm:$0xff] %vm501_vm9, %v4756_v46 }
0x1dff   :  { %5036 = vst.msk [vmem:[%s8667_s10 + $0x20] sm:$0xff] %vm501_vm9, %v4756_v46 }
0x1e05   :  { %v4873_v25 = vpop.permute.xlu1 %4872  ;;  %v4781_v21 = vld [vmem:[#allocation3 + $0x38] sm:$0xff] }
0x1e06   :  { %5031 = vst.msk [vmem:[%s8668_s11 + $0x8] sm:$0xff] %vm501_vm9, %v4873_v25  ;;  %5029 = vmatmul.msk.f32.gmra.mxu0 %vm501_vm9, %v4781_v21 }
0x1e0d   :  { %v4888_v43 = vpop.permute.xlu1 %4887 }
0x1e0e   :  { %5034 = vst.msk [vmem:[%s8667_s10 + $0x18] sm:$0xff] %vm501_vm9, %v4888_v43 }
0x1e83   :  { %v4852_v61 = vpop.f32.mrf.mxu0 }
0x1e84   :  { %v4853_v26 = vadd.f32 %v8545_v7, %v4852_v61 }
0x1e86   :  { %4862 = vst [vmem:[%s8666_s9 + $0x38] sm:$0xff] %v4853_v26 }
0x1e87   :  { %4913 = vsyncpa [#allocation5], 1 }

</bundles_post_ra>
